<compile_context>
chip_gen: v5e
topology: v5e:2x2
jax: 0.10.0
libtpu: 0.0.40
codegen_flags: <defaults>
</compile_context>

<pallas_src>
import jax
import jax.numpy as jnp
from jax.experimental import pallas as pl
from jax.experimental.pallas import tpu as pltpu

HIDDEN = 512


def _round_up(v, m):
    return ((v + m - 1) // m) * m


def pg_mlp_kernel(x_ref, w1_ref, b1_ref, w2_ref, b2_ref, w3_ref, b3_ref, o_ref):
    # Layer 1: (bt, d_in)bf16 @ (d_in, 512)bf16 -> f32 accumulate on the MXU.
    h = jnp.dot(x_ref[...], w1_ref[...], preferred_element_type=jnp.float32)
    h = h + b1_ref[...]
    h = h * jax.nn.sigmoid(h)          # SiLU in f32 (v5e VPU/EUP have no bf16 path)
    h = h.astype(jnp.bfloat16)         # halve vld/vst traffic feeding the next matmul

    # Layer 2: Linear + SiLU
    h = jnp.dot(h, w2_ref[...], preferred_element_type=jnp.float32)
    h = h + b2_ref[...]
    h = h * jax.nn.sigmoid(h)
    h = h.astype(jnp.bfloat16)

    # Layer 3: Linear (logits; N already padded to a 128 multiple -> lane-dense store)
    out = jnp.dot(h, w3_ref[...], preferred_element_type=jnp.float32)
    out = out + b3_ref[...]
    o_ref[...] = out.astype(o_ref.dtype)


def pg_network_forward(x, params, *, batch_tile=256):
    """x: (B, input_size) float32. params: weights pre-transposed (in, out), bf16;
    biases (1, out), f32. Returns (B, output_size) float32 logits.

    batch_tile: sweep 128-1024; keep it a multiple of 256 on v6e/v7x, 128 on v5e.
    """
    w1, b1, w2, b2, w3, b3 = (params["w1"], params["b1"], params["w2"],
                              params["b2"], params["w3"], params["b3"])
    B, d_in = x.shape
    d_out = w3.shape[1]

    # Lane-dense output: pad feature dim up to a multiple of 128.
    d_out_p = _round_up(d_out, 128)
    # Pad batch up to a tile multiple (zero rows are independent -> harmless).
    B_p = _round_up(B, batch_tile)

    x_p = jnp.pad(x, ((0, B_p - B), (0, 0))).astype(jnp.bfloat16)
    w3_p = jnp.pad(w3, ((0, 0), (0, d_out_p - d_out)))
    b3_p = jnp.pad(b3, ((0, 0), (0, d_out_p - d_out)))

    grid = (B_p // batch_tile,)

    # Advisory cost estimate for the XLA scheduler.
    flops = 2 * B_p * (d_in * HIDDEN + HIDDEN * HIDDEN + HIDDEN * d_out_p)
    bytes_accessed = (x_p.size * 2
                      + (w1.size + w2.size + w3_p.size) * 2
                      + (b1.size + b2.size + b3_p.size) * 4
                      + B_p * d_out_p * 4)
    cost = pl.CostEstimate(flops=flops,
                           transcendentals=2 * B_p * HIDDEN,
                           bytes_accessed=bytes_accessed)

    # VMEM budget: double-buffered x/out tiles + resident weights/biases + f32 hidden
    # intermediates. Cap below v7x's 64 MiB physical per TensorCore.
    est = (2 * batch_tile * d_in * 2                                   # x tiles (bf16)
           + 2 * batch_tile * d_out_p * 4                              # out tiles (f32)
           + 2 * (d_in * HIDDEN + HIDDEN * HIDDEN + HIDDEN * d_out_p) * 2  # weights (bf16)
           + 2 * (2 * HIDDEN + d_out_p) * 4                            # biases (f32)
           + 2 * batch_tile * HIDDEN * 4)                              # hidden acts (f32)
    vmem_limit = int(min(60 * 1024 * 1024, max(32 * 1024 * 1024, 2 * est)))

    out_p = pl.pallas_call(
        pg_mlp_kernel,
        out_shape=jax.ShapeDtypeStruct((B_p, d_out_p), jnp.float32),
        grid_spec=pltpu.PrefetchScalarGridSpec(
            num_scalar_prefetch=0,
            grid=grid,
            in_specs=[
                # x: tiled over batch
                pl.BlockSpec((batch_tile, d_in), lambda i: (i, 0)),
                # weights / biases: full arrays, resident in VMEM across grid steps
                pl.BlockSpec((d_in, HIDDEN), lambda i: (0, 0)),
                pl.BlockSpec((1, HIDDEN), lambda i: (0, 0)),
                pl.BlockSpec((HIDDEN, HIDDEN), lambda i: (0, 0)),
                pl.BlockSpec((1, HIDDEN), lambda i: (0, 0)),
                pl.BlockSpec((HIDDEN, d_out_p), lambda i: (0, 0)),
                pl.BlockSpec((1, d_out_p), lambda i: (0, 0)),
            ],
            out_specs=pl.BlockSpec((batch_tile, d_out_p), lambda i: (i, 0)),
        ),
        compiler_params=pltpu.CompilerParams(
            dimension_semantics=("parallel",),
            vmem_limit_bytes=vmem_limit,
        ),
        cost_estimate=cost,
    )(x_p, w1, b1, w2, b2, w3_p, b3_p)

    # Strip batch / feature padding outside the kernel.
    return out_p[:B, :d_out]


def init_params(key, input_size, output_size):
    """PyTorch-Linear-like uniform fan-in init. Weights stored pre-transposed
    (in_features, out_features) in bf16; biases (1, out_features) in f32."""
    ks = jax.random.split(key, 6)

    def lin(kw, kb, fan_in, fan_out):
        bound = 1.0 / jnp.sqrt(fan_in)
        w = jax.random.uniform(kw, (fan_in, fan_out), jnp.float32, -bound, bound)
        b = jax.random.uniform(kb, (1, fan_out), jnp.float32, -bound, bound)
        return w.astype(jnp.bfloat16), b

    w1, b1 = lin(ks[0], ks[1], input_size, HIDDEN)
    w2, b2 = lin(ks[2], ks[3], HIDDEN, HIDDEN)
    w3, b3 = lin(ks[4], ks[5], HIDDEN, output_size)
    return dict(w1=w1, b1=b1, w2=w2, b2=b2, w3=w3, b3=b3)


def reference_forward(x, p):
    """Pure-JAX f32 reference using the same (bf16-stored) parameters."""
    def silu(v):
        return v * jax.nn.sigmoid(v)
    w1 = p["w1"].astype(jnp.float32)
    w2 = p["w2"].astype(jnp.float32)
    w3 = p["w3"].astype(jnp.float32)
    h = silu(x @ w1 + p["b1"])
    h = silu(h @ w2 + p["b2"])
    return h @ w3 + p["b3"]


if __name__ == "__main__":
    key = jax.random.PRNGKey(0)
    k_x, k_p = jax.random.split(key)

    batch, input_size, output_size = 16, 16, 8
    x = jax.random.normal(k_x, (batch, input_size), jnp.float32)
    params = init_params(k_p, input_size, output_size)

    out = pg_network_forward(x, params)
    out = jax.block_until_ready(out)

    ref = reference_forward(x, params)
    assert out.shape == (batch, output_size)
    # bf16 dot inputs with f32 accumulation -> loosened tolerance vs. the f32 reference.
    assert jnp.allclose(out, ref, atol=2e-2, rtol=2e-2), "mismatch vs JAX reference"

    print("KERNEL_OK")
</pallas_src>

<mosaic_0001>
module attributes {stable_mosaic.version = 11 : i64} {
  func.func @pg_mlp_kernel(%arg0: i32, %arg1: memref<256x16xbf16, #tpu.memory_space<vmem>>, %arg2: memref<16x512xbf16, #tpu.memory_space<vmem>>, %arg3: memref<1x512xf32, #tpu.memory_space<vmem>>, %arg4: memref<512x512xbf16, #tpu.memory_space<vmem>>, %arg5: memref<1x512xf32, #tpu.memory_space<vmem>>, %arg6: memref<512x128xbf16, #tpu.memory_space<vmem>>, %arg7: memref<1x128xf32, #tpu.memory_space<vmem>>, %arg8: memref<256x128xf32, #tpu.memory_space<vmem>>) attributes {dimension_semantics = [#tpu.dimension_semantics<parallel>], iteration_bounds = array<i64: 1>, scalar_prefetch = 0 : i64, scratch_operands = 0 : i64, tpu.core_type = #tpu.core_type<tc>, window_params = [{transform_indices = @transform_0, window_bounds = array<i64: 256, 16>}, {pipeline_mode = #tpu.pipeline_mode<synchronous>, transform_indices = @transform_1, window_bounds = array<i64: 16, 512>}, {pipeline_mode = #tpu.pipeline_mode<synchronous>, transform_indices = @transform_2, window_bounds = array<i64: 1, 512>}, {pipeline_mode = #tpu.pipeline_mode<synchronous>, transform_indices = @transform_3, window_bounds = array<i64: 512, 512>}, {pipeline_mode = #tpu.pipeline_mode<synchronous>, transform_indices = @transform_4, window_bounds = array<i64: 1, 512>}, {pipeline_mode = #tpu.pipeline_mode<synchronous>, transform_indices = @transform_5, window_bounds = array<i64: 512, 128>}, {pipeline_mode = #tpu.pipeline_mode<synchronous>, transform_indices = @transform_6, window_bounds = array<i64: 1, 128>}, {transform_indices = @transform_7, window_bounds = array<i64: 256, 128>}]} {
    %c0 = arith.constant 0 : index
    %c0_0 = arith.constant 0 : index
    %0 = vector.load %arg1[%c0, %c0_0] : memref<256x16xbf16, #tpu.memory_space<vmem>>, vector<256x16xbf16>
    %c0_1 = arith.constant 0 : index
    %c0_2 = arith.constant 0 : index
    %1 = vector.load %arg2[%c0_1, %c0_2] : memref<16x512xbf16, #tpu.memory_space<vmem>>, vector<16x512xbf16>
    %cst = arith.constant dense<0.000000e+00> : vector<256x512xf32>
    %2 = tpu.matmul %0, %1, %cst {dimension_numbers = #tpu.dot_dimension_numbers<[1], [0], [0], [1], [0, 0, 1, 1], [], []>} : vector<256x16xbf16>, vector<16x512xbf16>, vector<256x512xf32> -> vector<256x512xf32>
    %c0_3 = arith.constant 0 : index
    %c0_4 = arith.constant 0 : index
    %3 = vector.load %arg3[%c0_3, %c0_4] : memref<1x512xf32, #tpu.memory_space<vmem>>, vector<1x512xf32>
    %4 = vector.broadcast %3 : vector<1x512xf32> to vector<256x512xf32>
    %5 = arith.addf %2, %4 : vector<256x512xf32>
    %6 = arith.negf %5 : vector<256x512xf32>
    %7 = math.exp %6 : vector<256x512xf32>
    %cst_5 = arith.constant 1.000000e+00 : f32
    %8 = vector.broadcast %cst_5 : f32 to vector<256x512xf32>
    %9 = arith.addf %8, %7 : vector<256x512xf32>
    %10 = arith.divf %8, %9 : vector<256x512xf32>
    %11 = arith.mulf %5, %10 : vector<256x512xf32>
    %12 = arith.truncf %11 : vector<256x512xf32> to vector<256x512xbf16>
    %c0_6 = arith.constant 0 : index
    %c0_7 = arith.constant 0 : index
    %13 = vector.load %arg4[%c0_6, %c0_7] : memref<512x512xbf16, #tpu.memory_space<vmem>>, vector<512x512xbf16>
    %cst_8 = arith.constant dense<0.000000e+00> : vector<256x512xf32>
    %14 = tpu.matmul %12, %13, %cst_8 {dimension_numbers = #tpu.dot_dimension_numbers<[1], [0], [0], [1], [0, 0, 1, 1], [], []>} : vector<256x512xbf16>, vector<512x512xbf16>, vector<256x512xf32> -> vector<256x512xf32>
    %c0_9 = arith.constant 0 : index
    %c0_10 = arith.constant 0 : index
    %15 = vector.load %arg5[%c0_9, %c0_10] : memref<1x512xf32, #tpu.memory_space<vmem>>, vector<1x512xf32>
    %16 = vector.broadcast %15 : vector<1x512xf32> to vector<256x512xf32>
    %17 = arith.addf %14, %16 : vector<256x512xf32>
    %18 = arith.negf %17 : vector<256x512xf32>
    %19 = math.exp %18 : vector<256x512xf32>
    %cst_11 = arith.constant 1.000000e+00 : f32
    %20 = vector.broadcast %cst_11 : f32 to vector<256x512xf32>
    %21 = arith.addf %20, %19 : vector<256x512xf32>
    %22 = arith.divf %20, %21 : vector<256x512xf32>
    %23 = arith.mulf %17, %22 : vector<256x512xf32>
    %24 = arith.truncf %23 : vector<256x512xf32> to vector<256x512xbf16>
    %c0_12 = arith.constant 0 : index
    %c0_13 = arith.constant 0 : index
    %25 = vector.load %arg6[%c0_12, %c0_13] : memref<512x128xbf16, #tpu.memory_space<vmem>>, vector<512x128xbf16>
    %cst_14 = arith.constant dense<0.000000e+00> : vector<256x128xf32>
    %26 = tpu.matmul %24, %25, %cst_14 {dimension_numbers = #tpu.dot_dimension_numbers<[1], [0], [0], [1], [0, 0, 1, 1], [], []>} : vector<256x512xbf16>, vector<512x128xbf16>, vector<256x128xf32> -> vector<256x128xf32>
    %c0_15 = arith.constant 0 : index
    %c0_16 = arith.constant 0 : index
    %27 = vector.load %arg7[%c0_15, %c0_16] : memref<1x128xf32, #tpu.memory_space<vmem>>, vector<1x128xf32>
    %28 = vector.broadcast %27 : vector<1x128xf32> to vector<256x128xf32>
    %29 = arith.addf %26, %28 : vector<256x128xf32>
    %c0_17 = arith.constant 0 : index
    %c0_18 = arith.constant 0 : index
    %30 = vector.load %arg8[%c0_17, %c0_18] : memref<256x128xf32, #tpu.memory_space<vmem>>, vector<256x128xf32>
    tpu.vector_store %arg8[%c0_17, %c0_18], %29 {strides = array<i32>} : memref<256x128xf32, #tpu.memory_space<vmem>>, vector<256x128xf32>,
    return
  }
  func.func @transform_0(%arg0: i32) -> (i32, i32) {
    %c0_i32 = arith.constant 0 : i32
    %c0_i32_0 = arith.constant 0 : i32
    return %arg0, %c0_i32 : i32, i32
  }
  func.func @transform_1(%arg0: i32) -> (i32, i32) {
    %c0_i32 = arith.constant 0 : i32
    %c0_i32_0 = arith.constant 0 : i32
    %c0_i32_1 = arith.constant 0 : i32
    return %c0_i32, %c0_i32_0 : i32, i32
  }
  func.func @transform_2(%arg0: i32) -> (i32, i32) {
    %c0_i32 = arith.constant 0 : i32
    %c0_i32_0 = arith.constant 0 : i32
    %c0_i32_1 = arith.constant 0 : i32
    return %c0_i32, %c0_i32_0 : i32, i32
  }
  func.func @transform_3(%arg0: i32) -> (i32, i32) {
    %c0_i32 = arith.constant 0 : i32
    %c0_i32_0 = arith.constant 0 : i32
    %c0_i32_1 = arith.constant 0 : i32
    return %c0_i32, %c0_i32_0 : i32, i32
  }
  func.func @transform_4(%arg0: i32) -> (i32, i32) {
    %c0_i32 = arith.constant 0 : i32
    %c0_i32_0 = arith.constant 0 : i32
    %c0_i32_1 = arith.constant 0 : i32
    return %c0_i32, %c0_i32_0 : i32, i32
  }
  func.func @transform_5(%arg0: i32) -> (i32, i32) {
    %c0_i32 = arith.constant 0 : i32
    %c0_i32_0 = arith.constant 0 : i32
    %c0_i32_1 = arith.constant 0 : i32
    return %c0_i32, %c0_i32_0 : i32, i32
  }
  func.func @transform_6(%arg0: i32) -> (i32, i32) {
    %c0_i32 = arith.constant 0 : i32
    %c0_i32_0 = arith.constant 0 : i32
    %c0_i32_1 = arith.constant 0 : i32
    return %c0_i32, %c0_i32_0 : i32, i32
  }
  func.func @transform_7(%arg0: i32) -> (i32, i32) {
    %c0_i32 = arith.constant 0 : i32
    %c0_i32_0 = arith.constant 0 : i32
    return %arg0, %c0_i32 : i32, i32
  }
}

</mosaic_0001>

<bundles_post_ra>
// kernel: tpu_custom_call.1
= control target key start
LH: loop header
LB: loop body
LE: loop exit
PB: predicated region body
PF: predicated region fallthrough
CT: control target
= control target key end

     0   :  { %12 = vsyncpa [#allocation3], 0  ;;  %s19268_s0 = inlined_call_operand.vmem [shape: bf16[256,16], index: 0, kind: input, shape index: {}]   ;;  %s19269_s1 = inlined_call_operand.vmem [shape: bf16[16,512], index: 1, kind: input, shape index: {}]   ;;  %s19270_s2 = inlined_call_operand.vmem [shape: f32[1,512], index: 2, kind: input, shape index: {}]   ;;  %s19271_s3 = inlined_call_operand.hbm [shape: bf16[512,512], index: 3, kind: input, shape index: {}]   ;;  %s19272_s4 = inlined_call_operand.vmem [shape: f32[1,512], index: 4, kind: input, shape index: {}]   ;;  %s19273_s5 = inlined_call_operand.hbm [shape: bf16[512,128], index: 5, kind: input, shape index: {}]   ;;  %s19274_s6 = inlined_call_operand.vmem [shape: f32[1,128], index: 6, kind: input, shape index: {}]   ;;  %s19275_s7 = inlined_call_operand.hbm [shape: f32[256,128], index: 7, kind: output, shape index: {}]  }
   0x1   :  { %13 = vsyncpa [#allocation6], 0 }
   0x2   :  { %14 = vsyncpa [#allocation4], 0  ;;  %s25_s26 = sshll.u32 %s19271_s3, 4  ;;  %s11065_s27 = smov [#allocation2]   ;;  %s26_s26 = int_to_ptr.hbm [resolvable:$true] %s25_s26 }
   0x3   :  { %s27_s28 = sshll.u32 %s11065_s27, 4  ;;  %s40_s8 = sshll.u32 %s19273_s5, 4  ;;  %s28_s28 = int_to_ptr.vmem [resolvable:$true] %s27_s28  ;;  %s41_s8 = int_to_ptr.hbm [resolvable:$true] %s40_s8 }
   0x4   :  { %s11066_s9 = smov 256   ;;  %s11067_s10 = smov 16  }
   0x5   :  { %33 = dma.hbm_to_vmem [thread:$0]  %s26_s26, 16384, %s28_s28, [#allocation3], %s11066_s9, %s11066_s9, %s11067_s10  }
   0x6   :  { %s11068_s11 = smov [#allocation5]   ;;  %s11069_s13 = smov 64  }
   0x7   :  { %s42_s12 = sshll.u32 %s11068_s11, 4  ;;  %s11070_s14 = smov 4   ;;  %s43_s12 = int_to_ptr.vmem [resolvable:$true] %s42_s12 }
   0x8   :  { %48 = dma.hbm_to_vmem [thread:$0]  %s41_s8, 4096, %s43_s12, [#allocation6], %s11069_s13, %s11069_s13, %s11070_s14  }
   0x9   :  { %11059 = dma.done.wait [#allocation3], 16384  }
   0xa   :  { %11060 = vsyncadd [#allocation3], 4294950912 }
   0xb   :  { %11061 = dma.done.wait [#allocation6], 4096  }
   0xc   :  { %11062 = vsyncadd [#allocation6], 4294963200  ;;  %v8795_v0 = vld [vmem:[%s19269_s1] sm:$0xf]  ;;  %v9787_v1 = vld [vmem:[%s19269_s1 + $0xc] sm:$0xf0] }
   0xd   :  { %v9785_v2 = vld [vmem:[%s19269_s1 + $0x4] sm:$0xf]  ;;  %v8796_v3 = vor.u32 %v9787_v1, %v8795_v0  ;;  %v8797_v4 = vld [vmem:[%s19269_s1 + $0x10] sm:$0xf0]  ;;  %v8803_v5 = vld [vmem:[%s19269_s1 + $0x8] sm:$0xf] }
   0xe   :  { %v9788_v6 = vld [vmem:[%s19269_s1 + $0x14] sm:$0xf0]  ;;  %v8800_v7 = vor.u32 %v9785_v2, %v8797_v4  ;;  %v9786_v9 = vld [vmem:[%s19269_s1 + $0xc] sm:$0xf]  ;;  %v8805_v10 = vld [vmem:[%s19269_s1 + $0x18] sm:$0xf0] }
   0xf   :  { %v8804_v8 = vor.u32 %v9788_v6, %v8803_v5  ;;  %v9769_v11 = vld [vmem:[%s19268_s0] sm:$0xff]  ;;  %vm206_vm0 = vcmask 130048   ;;  %262 = vmatpush.bf16.msra.mxu0 %v8796_v3  ;;  %v8808_v12 = vor.u32 %v9786_v9, %v8805_v10  ;;  %v9883_v14 = vld [vmem:[#allocation2 + $0x2ec] sm:$0xf0]  ;;  %v9770_v37 = vld [vmem:[%s19268_s0 + $0x8] sm:$0xff]  ;;  %s11071_s20 = smov [#allocation7]  }
  0x10   :  { %v9371_v13 = vld [vmem:[#allocation2 + $0x2e0] sm:$0xf]  ;;  %351 = vmatpush.bf16.msra.mxu1 %v8800_v7  ;;  %v9819_v17 = vld [vmem:[#allocation2 + $0xec] sm:$0xf0]  ;;  %v9772_v51 = vld [vmem:[%s19268_s0 + $0x18] sm:$0xff]  ;;  %s8713_s21 = sshll.u32 %s11071_s20, 4  ;;  %s8714_s21 = int_to_ptr.vmem [resolvable:$true] %s8713_s21 }
  0x11   :  { %v9115_v15 = vld [vmem:[#allocation2 + $0xe0] sm:$0xf]  ;;  %440 = vmatpush.bf16.msra.mxu2 %v8804_v8  ;;  %v9372_v16 = vor.u32 %v9883_v14, %v9371_v13  ;;  %v9915_v19 = vld [vmem:[#allocation2 + $0x3ec] sm:$0xf0]  ;;  %529 = vmatpush.bf16.msra.mxu3 %v8808_v12  ;;  %v9774_v1 = vld [vmem:[%s19268_s0 + $0x28] sm:$0xff]  ;;  %s8715_s23 = sshll.u32 %s19275_s7, 4  ;;  %s8716_s23 = int_to_ptr.hbm [resolvable:$true] %s8715_s23 }
  0x12   :  { %v9499_v18 = vld [vmem:[#allocation2 + $0x3e0] sm:$0xf]  ;;  %v9116_v20 = vor.u32 %v9819_v17, %v9115_v15  ;;  %v9851_v23 = vld [vmem:[#allocation2 + $0x1ec] sm:$0xf0]  ;;  %8809 = vmatmul.msk.bf16.vlgmr.msra.gmra.mxu0 %vm206_vm0, %v9769_v11  ;;  %v9776_v3 = vld [vmem:[%s19268_s0 + $0x38] sm:$0xff]  ;;  %s11072_s24 = smov 128  }
  0x13   :  { %v9500_v21 = vor.u32 %v9915_v19, %v9499_v18  ;;  %v9243_v22 = vld [vmem:[#allocation2 + $0x1e0] sm:$0xf]  ;;  %8825 = vmatmul.msk.bf16.vlgmr.msra.gmra.mxu1 %vm206_vm0, %v9769_v11  ;;  %v9879_v26 = vld [vmem:[#allocation2 + $0x2cc] sm:$0xf0]  ;;  %s11073_s25 = smov 8  }
  0x14   :  { %v9244_v24 = vor.u32 %v9851_v23, %v9243_v22  ;;  %8841 = vmatmul.msk.bf16.vlgmr.msra.gmra.mxu2 %vm206_vm0, %v9769_v11  ;;  %8857 = vmatmul.msk.bf16.vlgmr.msra.gmra.mxu3 %vm206_vm0, %v9769_v11  ;;  %v9355_v25 = vld [vmem:[#allocation2 + $0x2c0] sm:$0xf]  ;;  %v9815_v29 = vld [vmem:[#allocation2 + $0xcc] sm:$0xf0] }
  0x15   :  { %4191 = vmatpush.bf16.msrb.mxu2 %v9372_v16  ;;  %4013 = vmatpush.bf16.msrb.mxu0 %v9116_v20  ;;  %v9099_v27 = vld [vmem:[#allocation2 + $0xc0] sm:$0xf]  ;;  %v9356_v28 = vor.u32 %v9879_v26, %v9355_v25  ;;  %v9911_v31 = vld [vmem:[#allocation2 + $0x3cc] sm:$0xf0] }
  0x16   :  { %4280 = vmatpush.bf16.msrb.mxu3 %v9500_v21  ;;  %4102 = vmatpush.bf16.msrb.mxu1 %v9244_v24  ;;  %v9483_v30 = vld [vmem:[#allocation2 + $0x3c0] sm:$0xf]  ;;  %v9100_v32 = vor.u32 %v9815_v29, %v9099_v27  ;;  %v9847_v35 = vld [vmem:[#allocation2 + $0x1cc] sm:$0xf0] }
  0x17   :  { %v9484_v33 = vor.u32 %v9911_v31, %v9483_v30  ;;  %v9227_v34 = vld [vmem:[#allocation2 + $0x1c0] sm:$0xf]  ;;  %v9771_v38 = vld [vmem:[%s19268_s0 + $0x10] sm:$0xff] }
  0x18   :  { %v9228_v36 = vor.u32 %v9847_v35, %v9227_v34  ;;  %v9339_v39 = vld [vmem:[#allocation2 + $0x2a0] sm:$0xf]  ;;  %v9875_v40 = vld [vmem:[#allocation2 + $0x2ac] sm:$0xf0] }
  0x19   :  { %4192 = vmatpush.bf16.msrb.mxu2 %v9356_v28  ;;  %4014 = vmatpush.bf16.msrb.mxu0 %v9100_v32  ;;  %v9083_v41 = vld [vmem:[#allocation2 + $0xa0] sm:$0xf]  ;;  %v9340_v42 = vor.u32 %v9875_v40, %v9339_v39  ;;  %v9811_v43 = vld [vmem:[#allocation2 + $0xac] sm:$0xf0] }
  0x1a   :  { %4281 = vmatpush.bf16.msrb.mxu3 %v9484_v33  ;;  %4103 = vmatpush.bf16.msrb.mxu1 %v9228_v36  ;;  %v9467_v44 = vld [vmem:[#allocation2 + $0x3a0] sm:$0xf]  ;;  %v9907_v45 = vld [vmem:[#allocation2 + $0x3ac] sm:$0xf0]  ;;  %v9084_v46 = vor.u32 %v9811_v43, %v9083_v41 }
  0x1b   :  { %v9468_v47 = vor.u32 %v9907_v45, %v9467_v44  ;;  %v9211_v48 = vld [vmem:[#allocation2 + $0x1a0] sm:$0xf]  ;;  %v9843_v49 = vld [vmem:[#allocation2 + $0x1ac] sm:$0xf0] }
  0x1c   :  { %v9212_v50 = vor.u32 %v9843_v49, %v9211_v48  ;;  %v9773_v52 = vld [vmem:[%s19268_s0 + $0x20] sm:$0xff]  ;;  %v9871_v54 = vld [vmem:[#allocation2 + $0x28c] sm:$0xf0] }
  0x1d   :  { %4193 = vmatpush.bf16.msrb.mxu2 %v9340_v42  ;;  %4015 = vmatpush.bf16.msrb.mxu0 %v9084_v46  ;;  %v9323_v53 = vld [vmem:[#allocation2 + $0x280] sm:$0xf]  ;;  %v9807_v57 = vld [vmem:[#allocation2 + $0x8c] sm:$0xf0] }
  0x1e   :  { %4282 = vmatpush.bf16.msrb.mxu3 %v9468_v47  ;;  %4104 = vmatpush.bf16.msrb.mxu1 %v9212_v50  ;;  %v9067_v55 = vld [vmem:[#allocation2 + $0x80] sm:$0xf]  ;;  %v9324_v56 = vor.u32 %v9871_v54, %v9323_v53  ;;  %v9903_v59 = vld [vmem:[#allocation2 + $0x38c] sm:$0xf0] }
  0x1f   :  { %v9451_v58 = vld [vmem:[#allocation2 + $0x380] sm:$0xf]  ;;  %v9068_v60 = vor.u32 %v9807_v57, %v9067_v55  ;;  %v9839_v63 = vld [vmem:[#allocation2 + $0x18c] sm:$0xf0] }
  0x20   :  { %v9452_v61 = vor.u32 %v9903_v59, %v9451_v58  ;;  %v9195_v62 = vld [vmem:[#allocation2 + $0x180] sm:$0xf]  ;;  %v9775_v2 = vld [vmem:[%s19268_s0 + $0x30] sm:$0xff] }
  0x21   :  { %4194 = vmatpush.bf16.msrb.mxu2 %v9324_v56  ;;  %v9196_v0 = vor.u32 %v9839_v63, %v9195_v62  ;;  %4016 = vmatpush.bf16.msrb.mxu0 %v9068_v60  ;;  %v96_v4 = vld [vmem:[%s19270_s2] sm:$0xf]  ;;  %v9867_v10 = vld [vmem:[#allocation2 + $0x26c] sm:$0xf0] }
  0x22   :  { %8810 = vmatmul.msk.bf16.gmra.mxu0 %vm206_vm0, %v9770_v37  ;;  %4283 = vmatpush.bf16.msrb.mxu3 %v9452_v61  ;;  %v11203_v5 = vperm.slane %v96_v4, 0  ;;  %v11205_v6 = vperm.slane %v96_v4, 1  ;;  %v9777_v7 = vld [vmem:[%s19268_s0 + $0x40] sm:$0xff]  ;;  %v9803_v15 = vld [vmem:[#allocation2 + $0x6c] sm:$0xf0]  ;;  %v11220_v22 = vperm.slane %v96_v4, 2 }
  0x23   :  { %8826 = vmatmul.msk.bf16.gmra.mxu1 %vm206_vm0, %v9770_v37  ;;  %v9307_v9 = vld [vmem:[#allocation2 + $0x260] sm:$0xf]  ;;  %v9899_v17 = vld [vmem:[#allocation2 + $0x36c] sm:$0xf0]  ;;  %v11223_v23 = vperm.slane %v96_v4, 3 }
  0x24   :  { %8842 = vmatmul.msk.bf16.gmra.mxu2 %vm206_vm0, %v9770_v37  ;;  %8858 = vmatmul.msk.bf16.gmra.mxu3 %vm206_vm0, %v9770_v37  ;;  %v9051_v11 = vld [vmem:[#allocation2 + $0x60] sm:$0xf]  ;;  %v9308_v14 = vor.u32 %v9867_v10, %v9307_v9  ;;  %v9835_v29 = vld [vmem:[#allocation2 + $0x16c] sm:$0xf0]  ;;  %v9778_v37 = vld [vmem:[%s19268_s0 + $0x48] sm:$0xff] }
  0x25   :  { %4105 = vmatpush.bf16.msrb.mxu1 %v9196_v0  ;;  %v9435_v16 = vld [vmem:[#allocation2 + $0x360] sm:$0xf]  ;;  %v9052_v18 = vor.u32 %v9803_v15, %v9051_v11 }
  0x26   :  { %v9436_v19 = vor.u32 %v9899_v17, %v9435_v16  ;;  %4195 = vmatpush.bf16.msrb.mxu2 %v9308_v14  ;;  %v9179_v28 = vld [vmem:[#allocation2 + $0x160] sm:$0xf] }
  0x27   :  { %4017 = vmatpush.bf16.msrb.mxu0 %v9052_v18  ;;  %v9180_v30 = vor.u32 %v9835_v29, %v9179_v28 }
  0x28   :  { %4284 = vmatpush.bf16.msrb.mxu3 %v9436_v19 }
  0x29   :  { %4106 = vmatpush.bf16.msrb.mxu1 %v9180_v30 }
  0x32   :  { %8811 = vmatmul.msk.bf16.gmra.mxu0 %vm206_vm0, %v9771_v38 }
  0x33   :  { %8827 = vmatmul.msk.bf16.gmra.mxu1 %vm206_vm0, %v9771_v38 }
  0x34   :  { %8843 = vmatmul.msk.bf16.gmra.mxu2 %vm206_vm0, %v9771_v38  ;;  %8859 = vmatmul.msk.bf16.gmra.mxu3 %vm206_vm0, %v9771_v38 }
  0x42   :  { %8812 = vmatmul.msk.bf16.gmra.mxu0 %vm206_vm0, %v9772_v51 }
  0x43   :  { %8828 = vmatmul.msk.bf16.gmra.mxu1 %vm206_vm0, %v9772_v51 }
  0x44   :  { %8844 = vmatmul.msk.bf16.gmra.mxu2 %vm206_vm0, %v9772_v51  ;;  %8860 = vmatmul.msk.bf16.gmra.mxu3 %vm206_vm0, %v9772_v51 }
  0x52   :  { %8813 = vmatmul.msk.bf16.gmra.mxu0 %vm206_vm0, %v9773_v52 }
  0x53   :  { %8829 = vmatmul.msk.bf16.gmra.mxu1 %vm206_vm0, %v9773_v52 }
  0x54   :  { %8845 = vmatmul.msk.bf16.gmra.mxu2 %vm206_vm0, %v9773_v52  ;;  %8861 = vmatmul.msk.bf16.gmra.mxu3 %vm206_vm0, %v9773_v52 }
  0x62   :  { %8814 = vmatmul.msk.bf16.gmra.mxu0 %vm206_vm0, %v9774_v1 }
  0x63   :  { %8830 = vmatmul.msk.bf16.gmra.mxu1 %vm206_vm0, %v9774_v1 }
  0x64   :  { %8846 = vmatmul.msk.bf16.gmra.mxu2 %vm206_vm0, %v9774_v1  ;;  %8862 = vmatmul.msk.bf16.gmra.mxu3 %vm206_vm0, %v9774_v1 }
  0x72   :  { %8815 = vmatmul.msk.bf16.gmra.mxu0 %vm206_vm0, %v9775_v2 }
  0x73   :  { %8831 = vmatmul.msk.bf16.gmra.mxu1 %vm206_vm0, %v9775_v2 }
  0x74   :  { %8847 = vmatmul.msk.bf16.gmra.mxu2 %vm206_vm0, %v9775_v2  ;;  %8863 = vmatmul.msk.bf16.gmra.mxu3 %vm206_vm0, %v9775_v2 }
  0x82   :  { %8816 = vmatmul.msk.bf16.gmra.mxu0 %vm206_vm0, %v9776_v3 }
  0x83   :  { %8832 = vmatmul.msk.bf16.gmra.mxu1 %vm206_vm0, %v9776_v3 }
  0x84   :  { %8848 = vmatmul.msk.bf16.gmra.mxu2 %vm206_vm0, %v9776_v3  ;;  %8864 = vmatmul.msk.bf16.gmra.mxu3 %vm206_vm0, %v9776_v3 }
  0x8f   :  { %v264_v8 = vpop.f32.mrf.mxu0 }
  0x90   :  { %v11211_v12 = vadd.f32 %v264_v8, %v11203_v5  ;;  %v353_v13 = vpop.f32.mrf.mxu1 }
  0x91   :  { %v11214_v20 = vadd.f32 %v353_v13, %v11205_v6 }
  0x92   :  { %8817 = vmatmul.msk.bf16.gmra.mxu0 %vm206_vm0, %v9777_v7  ;;  %v8873_v21 = vmul.f32 -1.442695, %v11211_v12 }
  0x93   :  { %8833 = vmatmul.msk.bf16.gmra.mxu1 %vm206_vm0, %v9777_v7  ;;  %v8874_v24 = vmul.f32 -1.442695, %v11214_v20 }
  0x94   :  { %8849 = vmatmul.msk.bf16.gmra.mxu2 %vm206_vm0, %v9777_v7  ;;  %8865 = vmatmul.msk.bf16.gmra.mxu3 %vm206_vm0, %v9777_v7  ;;  %9959 = vpow2.f32 %v8873_v21 }
  0x95   :  { %9961 = vpow2.f32 %v8874_v24 }
  0x97   :  { %v442_v25 = vpop.f32.mrf.mxu2  ;;  %v531_v27 = vpop.f32.mrf.mxu3 }
  0x98   :  { %v11227_v26 = vadd.f32 %v442_v25, %v11220_v22  ;;  %v266_v31 = vpop.f32.mrf.mxu0  ;;  %v11230_v32 = vadd.f32 %v531_v27, %v11223_v23  ;;  %v355_v39 = vpop.f32.mrf.mxu1 }
  0x99   :  { %v11234_v34 = vadd.f32 %v266_v31, %v11203_v5  ;;  %v11244_v42 = vadd.f32 %v355_v39, %v11205_v6 }
  0x9a   :  { %v8875_v33 = vmul.f32 -1.442695, %v11227_v26  ;;  %v9960_v35 = vpop.eup %9959  ;;  %v8876_v36 = vmul.f32 -1.442695, %v11230_v32 }
  0x9b   :  { %v8877_v38 = vmul.f32 -1.442695, %v11234_v34  ;;  %v9962_v40 = vpop.eup %9961  ;;  %v11241_v41 = vadd.f32 1.0, %v9960_v35  ;;  %v8878_v48 = vmul.f32 -1.442695, %v11244_v42 }
  0x9c   :  { %9963 = vpow2.f32 %v8875_v33  ;;  %v11247_v44 = vadd.f32 1.0, %v9962_v40 }
  0x9d   :  { %9965 = vpow2.f32 %v8876_v36  ;;  %v1132_v7 = vand.u32 2147483647, %v11241_v41  ;;  %vm1128_vm1 = vweird.f32 %v11241_v41  ;;  %v1134_v17 = vand.u32 2147483648, %v11241_v41 }
  0x9e   :  { %9967 = vpow2.f32 %v8877_v38  ;;  %v1147_v18 = vand.u32 2147483647, %v11247_v44  ;;  %v1149_v19 = vand.u32 2147483648, %v11247_v44  ;;  %vm1143_vm4 = vweird.f32 %v11247_v44 }
  0x9f   :  { %v444_v43 = vpop.f32.mrf.mxu2  ;;  %9969 = vrcp.f32 %v11241_v41  ;;  %v533_v46 = vpop.f32.mrf.mxu3  ;;  %vm11306_vm3 = vcmp.eq.f32.partialorder %v1132_v7, 8.507059e+37  ;;  %v1135_v38 = vor.u32 1.1754944e-38, %v1134_v17 }
  0xa0   :  { %v11254_v47 = vadd.f32 %v444_v43, %v11220_v22  ;;  %9971 = vrcp.f32 %v11247_v44  ;;  %v11261_v51 = vadd.f32 %v533_v46, %v11223_v23  ;;  %v269_v52 = vpop.f32.mrf.mxu0  ;;  %v358_v1 = vpop.f32.mrf.mxu1  ;;  %vm11324_vm5 = vcmp.eq.f32.partialorder %v1147_v18, 8.507059e+37  ;;  %v9779_v46 = vld [vmem:[%s19268_s0 + $0x50] sm:$0xff] }
  0xa1   :  { %9973 = vpow2.f32 %v8878_v48  ;;  %v11271_v58 = vadd.f32 %v269_v52, %v11203_v5  ;;  %v11288_v8 = vadd.f32 %v358_v1, %v11205_v6  ;;  %v1150_v40 = vor.u32 1.1754944e-38, %v1149_v19 }
  0xa2   :  { %8818 = vmatmul.msk.bf16.gmra.mxu0 %vm206_vm0, %v9778_v37  ;;  %v9964_v45 = vpop.eup %9963  ;;  %v8879_v54 = vmul.f32 -1.442695, %v11254_v47  ;;  %v8880_v57 = vmul.f32 -1.442695, %v11261_v51 }
  0xa3   :  { %8834 = vmatmul.msk.bf16.gmra.mxu1 %vm206_vm0, %v9778_v37  ;;  %v9966_v49 = vpop.eup %9965  ;;  %v11258_v50 = vadd.f32 1.0, %v9964_v45  ;;  %v8881_v62 = vmul.f32 -1.442695, %v11271_v58  ;;  %v8882_v27 = vmul.f32 -1.442695, %v11288_v8 }
  0xa4   :  { %8850 = vmatmul.msk.bf16.gmra.mxu2 %vm206_vm0, %v9778_v37  ;;  %8866 = vmatmul.msk.bf16.gmra.mxu3 %vm206_vm0, %v9778_v37  ;;  %v9968_v53 = vpop.eup %9967  ;;  %v11266_v56 = vadd.f32 1.0, %v9966_v49 }
  0xa5   :  { %v11264_v55 = vpop.eup %9969  ;;  %9975 = vrcp.f32 %v11258_v50  ;;  %v11273_v59 = vadd.f32 1.0, %v9968_v53  ;;  %v1162_v43 = vand.u32 2147483647, %v11258_v50  ;;  %v1164_v45 = vand.u32 2147483648, %v11258_v50 }
  0xa6   :  { %v11275_v60 = vpop.eup %9971  ;;  %v1124_v61 = vmul.f32 %v11264_v55, %v11241_v41  ;;  %9977 = vpow2.f32 %v8879_v54  ;;  %vm1129_vm2 = vweird.f32 %v11264_v55  ;;  %vm1158_vm8 = vweird.f32 %v11258_v50 }
  0xa7   :  { %9979 = vrcp.f32 %v11266_v56  ;;  %v9974_v63 = vpop.eup %9973  ;;  %v1139_v0 = vmul.f32 %v11275_v60, %v11247_v44  ;;  %v447_v24 = vpop.f32.mrf.mxu2  ;;  %vm1144_vm6 = vweird.f32 %v11275_v60  ;;  %vm11339_vm7 = vmor %vm1128_vm1, %vm1129_vm2  ;;  %vm1173_vm9 = vweird.f32 %v11266_v56 }
  0xa8   :  { %9981 = vpow2.f32 %v8880_v57  ;;  %v1125_v3 = vsub.f32 1.0, %v1124_v61  ;;  %v11294_v13 = vadd.f32 1.0, %v9974_v63  ;;  %v11322_v37 = vadd.f32 %v447_v24, %v11220_v22  ;;  %vm11365_vm10 = vmor %vm1143_vm4, %vm1144_vm6 }
  0xa9   :  { %9983 = vrcp.f32 %v11273_v59  ;;  %v1140_v10 = vsub.f32 1.0, %v1139_v0  ;;  %v1177_v0 = vand.u32 2147483647, %v11266_v56  ;;  %v1179_v1 = vand.u32 2147483648, %v11266_v56 }
  0xaa   :  { %9985 = vpow2.f32 %v8881_v62  ;;  %v1126_v15 = vmul.f32 %v11264_v55, %v1125_v3  ;;  %v8883_v41 = vmul.f32 -1.442695, %v11322_v37  ;;  %v536_v62 = vpop.f32.mrf.mxu3  ;;  %vm11370_vm12 = vcmp.eq.f32.partialorder %v1162_v43, 8.507059e+37 }
  0xab   :  { %v11284_v2 = vpop.eup %9975  ;;  %v1141_v28 = vmul.f32 %v11275_v60, %v1140_v10  ;;  %9987 = vrcp.f32 %v11294_v13  ;;  %v1192_v7 = vand.u32 2147483647, %v11273_v59  ;;  %vm1188_vm13 = vweird.f32 %v11273_v59 }
  0xac   :  { %v9978_v4 = vpop.eup %9977  ;;  %v1154_v11 = vmul.f32 %v11284_v2, %v11258_v50  ;;  %v1127_v33 = vadd.f32 %v11264_v55, %v1126_v15  ;;  %vm1159_vm11 = vweird.f32 %v11284_v2  ;;  %v271_v15 = vpop.f32.mrf.mxu0  ;;  %vm11416_vm1 = vcmp.eq.f32.partialorder %v1177_v0, 8.507059e+37 }
  0xad   :  { %v11290_v9 = vpop.eup %9979  ;;  %v11303_v21 = vadd.f32 1.0, %v9978_v4  ;;  %v1142_v49 = vadd.f32 %v11275_v60, %v1141_v28  ;;  %v1165_v4 = vor.u32 1.1754944e-38, %v1164_v45  ;;  %v11394_v28 = vadd.f32 %v536_v62, %v11223_v23  ;;  %vm11405_vm14 = vmor %vm1158_vm8, %vm1159_vm11 }
  0xae   :  { %v9982_v14 = vpop.eup %9981  ;;  %v1155_v29 = vsub.f32 1.0, %v1154_v11  ;;  %v1169_v35 = vmul.f32 %v11290_v9, %v11266_v56  ;;  %v1131_v54 = vsel %vm11339_vm7, %v11264_v55, %v1127_v33  ;;  %vm1174_vm15 = vweird.f32 %v11290_v9 }
  0xaf   :  { %v11298_v16 = vpop.eup %9983  ;;  %v11314_v30 = vadd.f32 1.0, %v9982_v14  ;;  %9989 = vrcp.f32 %v11303_v21  ;;  %v1136_v44 = vsel %vm11306_vm3, %v1135_v38, %v1131_v54  ;;  %v1146_v11 = vsel %vm11365_vm10, %v11275_v60, %v1142_v49  ;;  %v449_v48 = vpop.f32.mrf.mxu2  ;;  %vm11446_vm4 = vmor %vm1173_vm9, %vm1174_vm15 }
  0xb0   :  { %v9986_v31 = vpop.eup %9985  ;;  %v1184_v36 = vmul.f32 %v11298_v16, %v11273_v59  ;;  %9991 = vpow2.f32 %v8882_v27  ;;  %v1156_v52 = vmul.f32 %v11284_v2, %v1155_v29  ;;  %v1170_v57 = vsub.f32 1.0, %v1169_v35 }
  0xb1   :  { %9993 = vrcp.f32 %v11314_v30  ;;  %v11346_v53 = vadd.f32 1.0, %v9986_v31  ;;  %v11353_v63 = vpop.eup %9987  ;;  %v1180_v27 = vor.u32 1.1754944e-38, %v1179_v1  ;;  %v1194_v60 = vand.u32 2147483648, %v11273_v59 }
  0xb2   :  { %v1185_v61 = vsub.f32 1.0, %v1184_v36  ;;  %8819 = vmatmul.msk.bf16.gmra.mxu0 %vm206_vm0, %v9779_v46  ;;  %v1157_v14 = vadd.f32 %v11284_v2, %v1156_v52  ;;  %v1171_v18 = vmul.f32 %v11290_v9, %v1170_v57  ;;  %v1199_v24 = vmul.f32 %v11353_v63, %v11294_v13 }
  0xb3   :  { %8835 = vmatmul.msk.bf16.gmra.mxu1 %vm206_vm0, %v9779_v46  ;;  %9995 = vrcp.f32 %v11346_v53  ;;  %v11397_v29 = vmul.f32 %v1136_v44, %v11211_v12  ;;  %v1151_v31 = vsel %vm11324_vm5, %v1150_v40, %v1146_v11  ;;  %v11411_v35 = vadd.f32 %v271_v15, %v11203_v5  ;;  %v360_v40 = vpop.f32.mrf.mxu1 }
  0xb4   :  { %8851 = vmatmul.msk.bf16.gmra.mxu2 %vm206_vm0, %v9779_v46  ;;  %8867 = vmatmul.msk.bf16.gmra.mxu3 %vm206_vm0, %v9779_v46  ;;  %v1186_v19 = vmul.f32 %v11298_v16, %v1185_v61  ;;  %9997 = vpow2.f32 %v8883_v41  ;;  %v1161_v12 = vsel %vm11405_vm14, %v11284_v2, %v1157_v14  ;;  %vm1189_vm2 = vweird.f32 %v11298_v16 }
  0xb5   :  { %v11376_v10 = vpop.eup %9989  ;;  %vm11421_vm3 = vcmp.eq.f32.partialorder %v1192_v7, 8.507059e+37  ;;  %v1172_v43 = vadd.f32 %v11290_v9, %v1171_v18  ;;  %v1200_v45 = vsub.f32 1.0, %v1199_v24  ;;  %v11436_v52 = vmul.f32 %v1151_v31, %v11214_v20  ;;  %v538_v7 = vpop.f32.mrf.mxu3  ;;  %vm11460_vm6 = vmor %vm1188_vm13, %vm1189_vm2 }
  0xb6   :  { %v9992_v17 = vpop.eup %9991  ;;  %v1214_v38 = vmul.f32 %v11376_v10, %v11303_v21  ;;  %v1187_v2 = vadd.f32 %v11298_v16, %v1186_v19  ;;  %v1195_v54 = vor.u32 1.1754944e-38, %v1194_v60  ;;  %v1207_v57 = vand.u32 2147483647, %v11294_v13 }
  0xb7   :  { %v11389_v25 = vpop.eup %9993  ;;  %v11427_v39 = vadd.f32 1.0, %v9992_v17  ;;  %v8884_v61 = vmul.f32 -1.442695, %v11394_v28  ;;  %v1166_v62 = vsel %vm11370_vm12, %v1165_v4, %v1161_v12  ;;  %vm1203_vm5 = vweird.f32 %v11294_v13 }
  0xb8   :  { %v1229_v46 = vmul.f32 %v11389_v25, %v11314_v30  ;;  %v1209_v20 = vand.u32 2147483648, %v11294_v13  ;;  %v8885_v1 = vmul.f32 -1.442695, %v11411_v35  ;;  %v11454_v55 = vadd.f32 %v360_v40, %v11205_v6 }
  0xb9   :  { %v11433_v49 = vpop.eup %9995  ;;  %v1215_v3 = vsub.f32 1.0, %v1214_v38  ;;  %v1222_v4 = vand.u32 2147483647, %v11303_v21  ;;  %9999 = vrcp.f32 %v11427_v39  ;;  %v11467_v44 = vadd.f32 %v449_v48, %v11220_v22 }
  0xba   :  { %v9998_v41 = vpop.eup %9997  ;;  %v1176_v11 = vsel %vm11446_vm4, %v11290_v9, %v1172_v43  ;;  %v1191_v59 = vsel %vm11460_vm6, %v11298_v16, %v1187_v2  ;;  %v1201_v14 = vmul.f32 %v11353_v63, %v1200_v45  ;;  %v1230_v15 = vsub.f32 1.0, %v1229_v46 }
  0xbb   :  { %v1244_v17 = vmul.f32 %v11433_v49, %v11346_v53  ;;  %v11478_v18 = vadd.f32 1.0, %v9998_v41  ;;  %10001 = vpow2.f32 %v8884_v61  ;;  %v11481_v19 = vadd.f32 %v538_v7, %v11223_v23 }
  0xbc   :  { %vm11483_vm7 = vcmp.eq.f32.partialorder %v1207_v57, 8.507059e+37  ;;  %v1210_v9 = vor.u32 1.1754944e-38, %v1209_v20  ;;  %v1224_v60 = vand.u32 2147483648, %v11303_v21  ;;  %10003 = vpow2.f32 %v8885_v1 }
  0xbd   :  { %v8886_v16 = vmul.f32 -1.442695, %v11454_v55  ;;  %vm1204_vm8 = vweird.f32 %v11353_v63  ;;  %v1216_v31 = vmul.f32 %v11376_v10, %v1215_v3  ;;  %vm1218_vm9 = vweird.f32 %v11303_v21 }
  0xbe   :  { %v8887_v33 = vmul.f32 -1.442695, %v11467_v44  ;;  %v11494_v12 = vmul.f32 %v1166_v62, %v11227_v26  ;;  %v1181_v38 = vsel %vm11416_vm1, %v1180_v27, %v1176_v11  ;;  %v1196_v40 = vsel %vm11421_vm3, %v1195_v54, %v1191_v59  ;;  %v274_v54 = vpop.f32.mrf.mxu0  ;;  %vm11519_vm11 = vmor %vm1203_vm5, %vm1204_vm8 }
  0xbf   :  { %v1202_v43 = vadd.f32 %v11353_v63, %v1201_v14  ;;  %v11501_v2 = vpop.eup %9999  ;;  %vm11503_vm10 = vcmp.eq.f32.partialorder %v1222_v4, 8.507059e+37  ;;  %v1231_v46 = vmul.f32 %v11389_v25, %v1230_v15  ;;  %v1245_v48 = vsub.f32 1.0, %v1244_v17 }
  0xc0   :  { %10005 = vrcp.f32 %v11478_v18  ;;  %v8888_v26 = vmul.f32 -1.442695, %v11481_v19  ;;  %v1225_v36 = vor.u32 1.1754944e-38, %v1224_v60  ;;  %v1237_v27 = vand.u32 2147483647, %v11314_v30 }
  0xc1   :  { %v1239_v50 = vand.u32 2147483648, %v11314_v30  ;;  %10007 = vpow2.f32 %v8886_v16  ;;  %v10002_v57 = vpop.eup %10001  ;;  %v11513_v61 = vmul.f32 %v1181_v38, %v11230_v32  ;;  %v1217_v62 = vadd.f32 %v11376_v10, %v1216_v31 }
  0xc2   :  { %vm1219_vm12 = vweird.f32 %v11376_v10  ;;  %10009 = vpow2.f32 %v8887_v33  ;;  %v10004_v0 = vpop.eup %10003  ;;  %v3047_v20 = vmul.f32 %v1196_v40, %v11234_v34  ;;  %v1206_v32 = vsel %vm11519_vm11, %v11353_v63, %v1202_v43 }
  0xc3   :  { %vm1234_vm13 = vweird.f32 %v11389_v25  ;;  %v1259_v13 = vmul.f32 %v11501_v2, %v11427_v39  ;;  %v1232_v1 = vadd.f32 %v11389_v25, %v1231_v46  ;;  %v1246_v7 = vmul.f32 %v11433_v49, %v1245_v48  ;;  %vm11539_vm14 = vmor %vm1218_vm9, %vm1219_vm12  ;;  %v9419_v48 = vld [vmem:[#allocation2 + $0x340] sm:$0xf] }
  0xc4   :  { %10011 = vpow2.f32 %v8888_v26  ;;  %v11535_v56 = vadd.f32 %v274_v54, %v11203_v5  ;;  %vm1233_vm15 = vweird.f32 %v11314_v30  ;;  %vm11544_vm1 = vcmp.eq.f32.partialorder %v1237_v27, 8.507059e+37  ;;  %v363_v30 = vpop.f32.mrf.mxu1 }
  0xc5   :  { %v1240_v3 = vor.u32 1.1754944e-38, %v1239_v50  ;;  %v11548_v4 = vadd.f32 1.0, %v10002_v57  ;;  %v1211_v59 = vsel %vm11483_vm7, %v1210_v9, %v1206_v32  ;;  %v1221_v21 = vsel %vm11539_vm14, %v11376_v10, %v1217_v62  ;;  %vm11565_vm2 = vmor %vm1233_vm15, %vm1234_vm13 }
  0xc6   :  { %v11550_v11 = vpop.eup %10005  ;;  %v1252_v14 = vand.u32 2147483647, %v11346_v53  ;;  %v11558_v15 = vadd.f32 1.0, %v10004_v0  ;;  %v11561_v60 = vpack.c.bf16 %v3047_v20, %v11397_v29  ;;  %vm1248_vm3 = vweird.f32 %v11346_v53  ;;  %v276_v16 = vpop.f32.mrf.mxu0 }
  0xc7   :  { %v10008_v17 = vpop.eup %10007  ;;  %v1254_v24 = vand.u32 2147483648, %v11346_v53  ;;  %v1260_v10 = vsub.f32 1.0, %v1259_v13  ;;  %v1236_v31 = vsel %vm11565_vm2, %v11389_v25, %v1232_v1  ;;  %v1247_v33 = vadd.f32 %v11433_v49, %v1246_v7  ;;  %v9863_v1 = vld [vmem:[#allocation2 + $0x24c] sm:$0xf0] }
  0xc8   :  { %19493 = vst [vmem:[#allocation11_spill] sm:$0xff] %v11561_v60  ;;  %v10010_v9 = vpop.eup %10009  ;;  %vm1249_vm4 = vweird.f32 %v11433_v49  ;;  %v8889_v29 = vmul.f32 -1.442695, %v11535_v56  ;;  %v3048_v38 = vmul.f32 %v1211_v59, %v11244_v42  ;;  %v1226_v40 = vsel %vm11503_vm10, %v1225_v36, %v1221_v21  ;;  %v452_v21 = vpop.f32.mrf.mxu2 }
  0xc9   :  { %10013 = vrcp.f32 %v11548_v4  ;;  %v11582_v43 = vadd.f32 %v363_v30, %v11205_v6  ;;  %vm11584_vm5 = vcmp.eq.f32.partialorder %v1252_v14, 8.507059e+37  ;;  %v1274_v25 = vmul.f32 %v11550_v11, %v11478_v18  ;;  %vm11597_vm6 = vmor %vm1248_vm3, %vm1249_vm4  ;;  %v9780_v14 = vld [vmem:[%s19268_s0 + $0x58] sm:$0xff] }
  0xca   :  { %v10012_v46 = vpop.eup %10011  ;;  %10015 = vrcp.f32 %v11558_v15  ;;  %v11591_v26 = vadd.f32 1.0, %v10008_v17  ;;  %v1241_v42 = vsel %vm11544_vm1, %v1240_v3, %v1236_v31  ;;  %v1255_v36 = vor.u32 1.1754944e-38, %v1254_v24  ;;  %v541_v17 = vpop.f32.mrf.mxu3  ;;  %8820 = vmatmul.msk.bf16.gmra.mxu0 %vm206_vm0, %v9780_v14  ;;  %8836 = vmatmul.msk.bf16.gmra.mxu1 %vm206_vm0, %v9780_v14 }
  0xcb   :  { %v1261_v27 = vmul.f32 %v11501_v2, %v1260_v10  ;;  %v11602_v50 = vadd.f32 1.0, %v10010_v9  ;;  %v3049_v54 = vmul.f32 %v1226_v40, %v11254_v47  ;;  %v1251_v57 = vsel %vm11597_vm6, %v11433_v49, %v1247_v33  ;;  %v9291_v49 = vld [vmem:[#allocation2 + $0x240] sm:$0xf]  ;;  %8868 = vmatmul.msk.bf16.gmra.mxu3 %vm206_vm0, %v9780_v14  ;;  %8852 = vmatmul.msk.bf16.gmra.mxu2 %vm206_vm0, %v9780_v14 }
  0xcc   :  { %v1267_v41 = vand.u32 2147483647, %v11427_v39  ;;  %10017 = vpow2.f32 %v8889_v29  ;;  %v11610_v53 = vpack.c.bf16 %v3048_v38, %v11436_v52  ;;  %v1269_v62 = vand.u32 2147483648, %v11427_v39  ;;  %v9035_v33 = vld [vmem:[#allocation2 + $0x40] sm:$0xf]  ;;  %v365_v38 = vpop.f32.mrf.mxu1 }
  0xcd   :  { %v11613_v0 = vadd.f32 1.0, %v10012_v46  ;;  %v8890_v20 = vmul.f32 -1.442695, %v11582_v43  ;;  %v3050_v32 = vmul.f32 %v1241_v42, %v11261_v51  ;;  %v1275_v13 = vsub.f32 1.0, %v1274_v25  ;;  %v9799_v29 = vld [vmem:[#allocation2 + $0x4c] sm:$0xf0] }
  0xce   :  { %19500 = vst [vmem:[#allocation12_spill] sm:$0xff] %v11610_v53  ;;  %v1284_v47 = vand.u32 2147483648, %v11478_v18  ;;  %10019 = vrcp.f32 %v11591_v26  ;;  %v1256_v52 = vsel %vm11584_vm5, %v1255_v36, %v1251_v57  ;;  %v1262_v34 = vadd.f32 %v11501_v2, %v1261_v27  ;;  %v9895_v25 = vld [vmem:[#allocation2 + $0x34c] sm:$0xf0] }
  0xcf   :  { %v11619_v7 = vpop.eup %10013  ;;  %vm1264_vm7 = vweird.f32 %v11501_v2  ;;  %10021 = vrcp.f32 %v11602_v50  ;;  %v11629_v51 = vpack.c.bf16 %v3049_v54, %v11494_v12  ;;  %vm1263_vm8 = vweird.f32 %v11427_v39 }
  0xd0   :  { %v11626_v63 = vpop.eup %10015  ;;  %vm11632_vm9 = vcmp.eq.f32.partialorder %v1267_v41, 8.507059e+37  ;;  %v1282_v59 = vand.u32 2147483647, %v11478_v18  ;;  %v1270_v30 = vor.u32 1.1754944e-38, %v1269_v62  ;;  %vm1278_vm10 = vweird.f32 %v11478_v18  ;;  %vm11650_vm11 = vmor %vm1263_vm8, %vm1264_vm7 }
  0xd1   :  { %19501 = vst [vmem:[#allocation13_spill] sm:$0xff] %v11629_v51  ;;  %10023 = vrcp.f32 %v11613_v0  ;;  %v9292_v12 = vor.u32 %v9863_v1, %v9291_v49  ;;  %v11643_v24 = vpack.c.bf16 %v3050_v32, %v11513_v61  ;;  %v11646_v10 = vmul.f32 %v1256_v52, %v11271_v58 }
  0xd2   :  { %v10018_v39 = vpop.eup %10017  ;;  %v1276_v31 = vmul.f32 %v11550_v11, %v1275_v13  ;;  %10025 = vpow2.f32 %v8890_v20  ;;  %v1266_v58 = vsel %vm11650_vm11, %v11501_v2, %v1262_v34  ;;  %v1285_v61 = vor.u32 1.1754944e-38, %v1284_v47 }
  0xd3   :  { %19504 = vst [vmem:[#allocation14_spill] sm:$0xff] %v11643_v24  ;;  %v1289_v40 = vmul.f32 %v11619_v7, %v11548_v4  ;;  %v1304_v46 = vmul.f32 %v11626_v63, %v11558_v15  ;;  %4196 = vmatpush.bf16.msrb.mxu2 %v9292_v12  ;;  %vm11667_vm12 = vcmp.eq.f32.partialorder %v1282_v59, 8.507059e+37  ;;  %v1299_v2 = vand.u32 2147483648, %v11548_v4 }
  0xd4   :  { %v11665_v42 = vpop.eup %10019  ;;  %v11673_v36 = vadd.f32 %v452_v21, %v11220_v22  ;;  %v11676_v27 = vadd.f32 %v541_v17, %v11223_v23  ;;  %v11679_v54 = vadd.f32 %v276_v16, %v11203_v5  ;;  %vm1279_vm13 = vweird.f32 %v11550_v11 }
  0xd5   :  { %v11682_v57 = vpop.eup %10021  ;;  %v11685_v41 = vadd.f32 1.0, %v10018_v39  ;;  %v9036_v62 = vor.u32 %v9799_v29, %v9035_v33  ;;  %v11688_v20 = vadd.f32 %v365_v38, %v11205_v6  ;;  %v1271_v32 = vsel %vm11632_vm9, %v1270_v30, %v1266_v58  ;;  %vm11712_vm14 = vmor %vm1278_vm10, %vm1279_vm13  ;;  %v9831_v33 = vld [vmem:[#allocation2 + $0x14c] sm:$0xf0] }
  0xd6   :  { %v1277_v13 = vadd.f32 %v11550_v11, %v1276_v31  ;;  %v1314_v47 = vand.u32 2147483648, %v11558_v15  ;;  %v9420_v49 = vor.u32 %v9895_v25, %v9419_v48  ;;  %v1290_v52 = vsub.f32 1.0, %v1289_v40  ;;  %v9163_v31 = vld [vmem:[#allocation2 + $0x140] sm:$0xf] }
  0xd7   :  { %v11694_v1 = vpop.eup %10023  ;;  %v1297_v34 = vand.u32 2147483647, %v11548_v4  ;;  %v1305_v59 = vsub.f32 1.0, %v1304_v46  ;;  %v1312_v21 = vand.u32 2147483647, %v11558_v15  ;;  %4018 = vmatpush.bf16.msrb.mxu0 %v9036_v62  ;;  %v11698_v12 = vor.u32 1.1754944e-38, %v1299_v2  ;;  %v454_v62 = vpop.f32.mrf.mxu2 }
  0xd8   :  { %v10026_v14 = vpop.eup %10025  ;;  %v1319_v3 = vmul.f32 %v11665_v42, %v11591_v26  ;;  %v1334_v30 = vmul.f32 %v11682_v57, %v11602_v50  ;;  %4285 = vmatpush.bf16.msrb.mxu3 %v9420_v49  ;;  %v8891_v17 = vmul.f32 -1.442695, %v11673_v36  ;;  %v11706_v16 = vmul.f32 %v1271_v32, %v11288_v8 }
  0xd9   :  { %vm1293_vm15 = vweird.f32 %v11548_v4  ;;  %10027 = vrcp.f32 %v11685_v41  ;;  %v8892_v9 = vmul.f32 -1.442695, %v11676_v27  ;;  %v1281_v8 = vsel %vm11712_vm14, %v11550_v11, %v1277_v13 }
  0xda   :  { %vm1308_vm1 = vweird.f32 %v11558_v15  ;;  %v11723_v29 = vor.u32 1.1754944e-38, %v1314_v47  ;;  %v1329_v18 = vand.u32 2147483648, %v11591_v26  ;;  %v1349_v38 = vmul.f32 %v11694_v1, %v11613_v0 }
  0xdb   :  { %v1291_v58 = vmul.f32 %v11619_v7, %v1290_v52  ;;  %v1306_v40 = vmul.f32 %v11626_v63, %v1305_v59  ;;  %v1327_v46 = vand.u32 2147483647, %v11591_v26  ;;  %v11731_v48 = vadd.f32 1.0, %v10026_v14 }
  0xdc   :  { %v1320_v25 = vsub.f32 1.0, %v1319_v3  ;;  %v1335_v2 = vsub.f32 1.0, %v1334_v30  ;;  %10029 = vpow2.f32 %v8891_v17  ;;  %v9164_v11 = vor.u32 %v9831_v33, %v9163_v31 }
  0xdd   :  { %v1286_v32 = vsel %vm11667_vm12, %v1285_v61, %v1281_v8  ;;  %vm1294_vm2 = vweird.f32 %v11619_v7  ;;  %vm1309_vm3 = vweird.f32 %v11626_v63  ;;  %vm1323_vm4 = vweird.f32 %v11591_v26 }
  0xde   :  { %10031 = vpow2.f32 %v8892_v9  ;;  %vm11738_vm5 = vcmp.eq.f32.partialorder %v1297_v34, 8.507059e+37  ;;  %vm11742_vm6 = vcmp.eq.f32.partialorder %v1312_v21, 8.507059e+37  ;;  %v11746_v49 = vor.u32 1.1754944e-38, %v1329_v18  ;;  %4107 = vmatpush.bf16.msrb.mxu1 %v9164_v11  ;;  %vm11771_vm9 = vmor %vm1293_vm15, %vm1294_vm2 }
  0xdf   :  { %v1350_v52 = vsub.f32 1.0, %v1349_v38  ;;  %v8893_v61 = vmul.f32 -1.442695, %v11679_v54  ;;  %v8894_v45 = vmul.f32 -1.442695, %v11688_v20  ;;  %v11750_v59 = vpop.eup %10027  ;;  %v1292_v14 = vadd.f32 %v11619_v7, %v1291_v58  ;;  %v543_v58 = vpop.f32.mrf.mxu3  ;;  %vm11790_vm11 = vmor %vm1308_vm1, %vm1309_vm3 }
  0xe0   :  { %v1342_v34 = vand.u32 2147483647, %v11602_v50  ;;  %10033 = vrcp.f32 %v11731_v48  ;;  %v11756_v21 = vadd.f32 %v454_v62, %v11220_v22  ;;  %v1307_v3 = vadd.f32 %v11626_v63, %v1306_v40 }
  0xe1   :  { %v1321_v30 = vmul.f32 %v11665_v42, %v1320_v25  ;;  %v1336_v17 = vmul.f32 %v11682_v57, %v1335_v2  ;;  %10035 = vpow2.f32 %v8893_v61  ;;  %v11762_v39 = vmul.f32 %v1286_v32, %v11322_v37 }
  0xe2   :  { %vm1338_vm7 = vweird.f32 %v11602_v50  ;;  %v1344_v9 = vand.u32 2147483648, %v11602_v50  ;;  %vm1353_vm8 = vweird.f32 %v11613_v0  ;;  %v10030_v31 = vpop.eup %10029  ;;  %vm11775_vm10 = vcmp.eq.f32.partialorder %v1327_v46, 8.507059e+37 }
  0xe3   :  { %v1351_v37 = vmul.f32 %v11694_v1, %v1350_v52  ;;  %v1357_v18 = vand.u32 2147483647, %v11613_v0  ;;  %v1364_v38 = vmul.f32 %v11750_v59, %v11685_v41  ;;  %10037 = vpow2.f32 %v8894_v45 }
  0xe4   :  { %v10032_v40 = vpop.eup %10031  ;;  %v1296_v4 = vsel %vm11771_vm9, %v11619_v7, %v1292_v14  ;;  %vm1324_vm12 = vweird.f32 %v11665_v42  ;;  %vm1339_vm13 = vweird.f32 %v11682_v57  ;;  %vm11796_vm14 = vcmp.eq.f32.partialorder %v1342_v34, 8.507059e+37  ;;  %v279_v34 = vpop.f32.mrf.mxu0 }
  0xe5   :  { %v8895_v2 = vmul.f32 -1.442695, %v11756_v21  ;;  %v1311_v7 = vsel %vm11790_vm11, %v11626_v63, %v1307_v3  ;;  %v1322_v15 = vadd.f32 %v11665_v42, %v1321_v30  ;;  %v1337_v11 = vadd.f32 %v11682_v57, %v1336_v17  ;;  %vm11820_vm15 = vmor %vm1323_vm4, %vm1324_vm12 }
  0xe6   :  { %v11806_v62 = vadd.f32 1.0, %v10030_v31  ;;  %v11808_v32 = vpop.eup %10033  ;;  %v1345_v52 = vor.u32 1.1754944e-38, %v1344_v9  ;;  %v1359_v61 = vand.u32 2147483648, %v11613_v0  ;;  %v11811_v45 = vadd.f32 1.0, %v10032_v40  ;;  %v368_v9 = vpop.f32.mrf.mxu1  ;;  %vm11840_vm3 = vmor %vm1338_vm7, %vm1339_vm13 }
  0xe7   :  { %v11814_v14 = vadd.f32 %v543_v58, %v11223_v23  ;;  %v10036_v33 = vpop.eup %10035  ;;  %v1352_v3 = vadd.f32 %v11694_v1, %v1351_v37  ;;  %vm1354_vm1 = vweird.f32 %v11694_v1  ;;  %vm11826_vm2 = vcmp.eq.f32.partialorder %v1357_v18, 8.507059e+37  ;;  %v546_v13 = vpop.f32.mrf.mxu3 }
  0xe8   :  { %v1365_v17 = vsub.f32 1.0, %v1364_v38  ;;  %v1301_v31 = vsel %vm11738_vm5, %v11698_v12, %v1296_v4  ;;  %v1316_v26 = vsel %vm11742_vm6, %v11723_v29, %v1311_v7  ;;  %v11844_v18 = vadd.f32 1.0, %v10036_v33  ;;  %vm11858_vm4 = vmor %vm1353_vm8, %vm1354_vm1 }
  0xe9   :  { %10039 = vpow2.f32 %v8895_v2  ;;  %v10038_v38 = vpop.eup %10037  ;;  %v1326_v12 = vsel %vm11820_vm15, %v11665_v42, %v1322_v15  ;;  %v1341_v29 = vsel %vm11840_vm3, %v11682_v57, %v1337_v11  ;;  %v11854_v50 = vadd.f32 %v279_v34, %v11203_v5  ;;  %v457_v15 = vpop.f32.mrf.mxu2 }
  0xea   :  { %10041 = vrcp.f32 %v11806_v62  ;;  %v1379_v47 = vmul.f32 %v11808_v32, %v11731_v48  ;;  %v8896_v42 = vmul.f32 -1.442695, %v11814_v14  ;;  %v11867_v57 = vadd.f32 %v368_v9, %v11205_v6 }
  0xeb   :  { %10043 = vrcp.f32 %v11811_v45  ;;  %v1356_v58 = vsel %vm11858_vm4, %v11694_v1, %v1352_v3  ;;  %v1360_v40 = vor.u32 1.1754944e-38, %v1359_v61  ;;  %v1366_v0 = vmul.f32 %v11750_v59, %v1365_v17 }
  0xec   :  { %10045 = vrcp.f32 %v11844_v18  ;;  %v3054_v4 = vmul.f32 %v1301_v31, %v11394_v28  ;;  %v3055_v46 = vmul.f32 %v1316_v26, %v11411_v35  ;;  %v1331_v2 = vsel %vm11775_vm10, %v11746_v49, %v1326_v12 }
  0xed   :  { %v11879_v7 = vadd.f32 1.0, %v10038_v38  ;;  %v1346_v11 = vsel %vm11796_vm14, %v1345_v52, %v1341_v29  ;;  %v1372_v1 = vand.u32 2147483647, %v11685_v41  ;;  %v1374_v61 = vand.u32 2147483648, %v11685_v41 }
  0xee   :  { %v8897_v34 = vmul.f32 -1.442695, %v11854_v50  ;;  %v1361_v28 = vsel %vm11826_vm2, %v1360_v40, %v1356_v58  ;;  %v1380_v35 = vsub.f32 1.0, %v1379_v47  ;;  %10047 = vpow2.f32 %v8896_v42 }
  0xef   :  { %v10040_v33 = vpop.eup %10039  ;;  %v8898_v49 = vmul.f32 -1.442695, %v11867_v57  ;;  %v3056_v63 = vmul.f32 %v1331_v2, %v11454_v55  ;;  %v1367_v25 = vadd.f32 %v11750_v59, %v1366_v0  ;;  %vm1369_vm5 = vweird.f32 %v11750_v59  ;;  %v9781_v2 = vld [vmem:[%s19268_s0 + $0x60] sm:$0xff] }
  0xf0   :  { %v11889_v8 = vpop.eup %10041  ;;  %v11895_v52 = vadd.f32 %v457_v15, %v11220_v22  ;;  %v11900_v30 = vpack.c.bf16 %v3055_v46, %v11646_v10  ;;  %v3057_v17 = vmul.f32 %v1346_v11, %v11467_v44  ;;  %vm1368_vm6 = vweird.f32 %v11685_v41  ;;  %8821 = vmatmul.msk.bf16.gmra.mxu0 %vm206_vm0, %v9781_v2  ;;  %8837 = vmatmul.msk.bf16.gmra.mxu1 %vm206_vm0, %v9781_v2 }
  0xf1   :  { %v11897_v3 = vpop.eup %10043  ;;  %10049 = vrcp.f32 %v11879_v7  ;;  %v3058_v55 = vmul.f32 %v1361_v28, %v11481_v19  ;;  %v1387_v31 = vand.u32 2147483647, %v11731_v48  ;;  %v1389_v26 = vand.u32 2147483648, %v11731_v48  ;;  %vm11910_vm7 = vmor %vm1368_vm6, %vm1369_vm5  ;;  %8853 = vmatmul.msk.bf16.gmra.mxu2 %vm206_vm0, %v9781_v2  ;;  %8869 = vmatmul.msk.bf16.gmra.mxu3 %vm206_vm0, %v9781_v2 }
  0xf2   :  { %19531 = vst [vmem:[#allocation15_spill] sm:$0xff] %v11900_v30  ;;  %v11905_v9 = vpop.eup %10045  ;;  %10051 = vpow2.f32 %v8897_v34  ;;  %vm11914_vm8 = vcmp.eq.f32.partialorder %v1372_v1, 8.507059e+37  ;;  %v1375_v44 = vor.u32 1.1754944e-38, %v1374_v61  ;;  %v1381_v41 = vmul.f32 %v11808_v32, %v1380_v35 }
  0xf3   :  { %10053 = vpow2.f32 %v8898_v49  ;;  %v11920_v38 = vpack.c.bf16 %v3056_v63, %v11706_v16  ;;  %v1371_v19 = vsel %vm11910_vm7, %v11750_v59, %v1367_v25  ;;  %v1394_v12 = vmul.f32 %v11889_v8, %v11806_v62 }
  0xf4   :  { %v8899_v29 = vmul.f32 -1.442695, %v11895_v52  ;;  %v10048_v47 = vpop.eup %10047  ;;  %vm1383_vm9 = vweird.f32 %v11731_v48  ;;  %v1409_v42 = vmul.f32 %v11897_v3, %v11811_v45  ;;  %v1424_v16 = vmul.f32 %v11905_v9, %v11844_v18 }
  0xf5   :  { %19536 = vst [vmem:[#allocation16_spill] sm:$0xff] %v11920_v38  ;;  %v11933_v58 = vadd.f32 1.0, %v10040_v33  ;;  %v11936_v40 = vpack.c.bf16 %v3057_v17, %v11762_v39  ;;  %v11938_v59 = vpack.c.bf16 %v3058_v55, %v3054_v4  ;;  %vm11940_vm10 = vcmp.eq.f32.partialorder %v1387_v31, 8.507059e+37 }
  0xf6   :  { %v1390_v46 = vor.u32 1.1754944e-38, %v1389_v26  ;;  %v1376_v11 = vsel %vm11914_vm8, %v1375_v44, %v1371_v19  ;;  %v1382_v1 = vadd.f32 %v11808_v32, %v1381_v41  ;;  %vm1384_vm11 = vweird.f32 %v11808_v32 }
  0xf7   :  { %19537 = vst [vmem:[#allocation17_spill] sm:$0xff] %v11936_v40  ;;  %v11947_v15 = vpop.eup %10049  ;;  %v11954_v39 = vadd.f32 %v546_v13, %v11223_v23  ;;  %v1395_v61 = vsub.f32 1.0, %v1394_v12  ;;  %v1404_v34 = vand.u32 2147483648, %v11806_v62  ;;  %v11957_v33 = vadd.f32 1.0, %v10048_v47  ;;  %vm11972_vm12 = vmor %vm1383_vm9, %vm1384_vm11 }
  0xf8   :  { %19538 = vst [vmem:[#allocation18_spill] sm:$0xff] %v11938_v59  ;;  %v10052_v4 = vpop.eup %10051  ;;  %10055 = vpow2.f32 %v8899_v29  ;;  %v1410_v35 = vsub.f32 1.0, %v1409_v42  ;;  %v1419_v49 = vand.u32 2147483648, %v11811_v45  ;;  %v1425_v63 = vsub.f32 1.0, %v1424_v16 }
  0xf9   :  { %v10054_v28 = vpop.eup %10053  ;;  %10057 = vrcp.f32 %v11933_v58  ;;  %v11966_v25 = vmul.f32 %v1376_v11, %v11535_v56  ;;  %vm1398_vm13 = vweird.f32 %v11806_v62  ;;  %v1402_v55 = vand.u32 2147483647, %v11806_v62 }
  0xfa   :  { %v1439_v31 = vmul.f32 %v11947_v15, %v11879_v7  ;;  %v1386_v56 = vsel %vm11972_vm12, %v11808_v32, %v1382_v1  ;;  %vm1413_vm14 = vweird.f32 %v11811_v45  ;;  %v1417_v26 = vand.u32 2147483647, %v11811_v45 }
  0xfb   :  { %v11985_v48 = vadd.f32 1.0, %v10052_v4  ;;  %v1396_v37 = vmul.f32 %v11889_v8, %v1395_v61  ;;  %v1405_v10 = vor.u32 1.1754944e-38, %v1404_v34  ;;  %10059 = vrcp.f32 %v11957_v33 }
  0xfc   :  { %v11989_v44 = vadd.f32 1.0, %v10054_v28  ;;  %v1411_v41 = vmul.f32 %v11897_v3, %v1410_v35  ;;  %v1420_v19 = vor.u32 1.1754944e-38, %v1419_v49  ;;  %v1426_v12 = vmul.f32 %v11905_v9, %v1425_v63  ;;  %v281_v28 = vpop.f32.mrf.mxu0 }
  0xfd   :  { %v8900_v32 = vmul.f32 -1.442695, %v11954_v39  ;;  %v1391_v13 = vsel %vm11940_vm10, %v1390_v46, %v1386_v56  ;;  %vm11996_vm15 = vcmp.eq.f32.partialorder %v1402_v55, 8.507059e+37  ;;  %vm1428_vm1 = vweird.f32 %v11844_v18 }
  0xfe   :  { %v10056_v29 = vpop.eup %10055  ;;  %v1432_v42 = vand.u32 2147483647, %v11844_v18  ;;  %v1440_v16 = vsub.f32 1.0, %v1439_v31  ;;  %vm1399_vm2 = vweird.f32 %v11889_v8  ;;  %vm12005_vm3 = vcmp.eq.f32.partialorder %v1417_v26, 8.507059e+37 }
  0xff   :  { %v12002_v2 = vpop.eup %10057  ;;  %v1434_v0 = vand.u32 2147483648, %v11844_v18  ;;  %v1447_v46 = vand.u32 2147483647, %v11879_v7  ;;  %10061 = vrcp.f32 %v11985_v48  ;;  %v1397_v1 = vadd.f32 %v11889_v8, %v1396_v37  ;;  %vm12028_vm6 = vmor %vm1398_vm13, %vm1399_vm2  ;;  %v370_v37 = vpop.f32.mrf.mxu1 }
 0x100   :  { %vm1414_vm4 = vweird.f32 %v11897_v3  ;;  %v1449_v4 = vand.u32 2147483648, %v11879_v7  ;;  %10063 = vrcp.f32 %v11989_v44  ;;  %v1412_v61 = vadd.f32 %v11897_v3, %v1411_v41 }
 0x101   :  { %v1427_v34 = vadd.f32 %v11905_v9, %v1426_v12  ;;  %vm1429_vm5 = vweird.f32 %v11905_v9  ;;  %10065 = vpow2.f32 %v8900_v32  ;;  %v12019_v35 = vpop.eup %10059  ;;  %v12022_v49 = vmul.f32 %v1391_v13, %v11582_v43  ;;  %vm12039_vm7 = vmor %vm1413_vm14, %vm1414_vm4 }
 0x102   :  { %v1441_v17 = vmul.f32 %v11947_v15, %v1440_v16  ;;  %v1454_v55 = vmul.f32 %v12002_v2, %v11933_v58  ;;  %v12035_v31 = vadd.f32 1.0, %v10056_v29  ;;  %vm12043_vm8 = vcmp.eq.f32.partialorder %v1432_v42, 8.507059e+37  ;;  %vm12056_vm10 = vmor %vm1428_vm1, %vm1429_vm5  ;;  %v459_v16 = vpop.f32.mrf.mxu2 }
 0x103   :  { %v1435_v62 = vor.u32 1.1754944e-38, %v1434_v0  ;;  %vm1443_vm9 = vweird.f32 %v11879_v7  ;;  %v1464_v26 = vand.u32 2147483648, %v11933_v58  ;;  %v1401_v41 = vsel %vm12028_vm6, %v11889_v8, %v1397_v1 }
 0x104   :  { %vm12060_vm11 = vcmp.eq.f32.partialorder %v1447_v46, 8.507059e+37  ;;  %v1450_v32 = vor.u32 1.1754944e-38, %v1449_v4  ;;  %v12065_v29 = vadd.f32 %v281_v28, %v11203_v5  ;;  %v1416_v8 = vsel %vm12039_vm7, %v11897_v3, %v1412_v61  ;;  %v548_v3 = vpop.f32.mrf.mxu3 }
 0x105   :  { %v12067_v13 = vpop.eup %10061  ;;  %v1431_v18 = vsel %vm12056_vm10, %v11905_v9, %v1427_v34  ;;  %vm1444_vm12 = vweird.f32 %v11947_v15  ;;  %v1469_v42 = vmul.f32 %v12019_v35, %v11957_v33  ;;  %v1442_v46 = vadd.f32 %v11947_v15, %v1441_v17 }
 0x106   :  { %v12078_v0 = vpop.eup %10063  ;;  %v1455_v1 = vsub.f32 1.0, %v1454_v55  ;;  %v1462_v4 = vand.u32 2147483647, %v11933_v58  ;;  %10067 = vrcp.f32 %v12035_v31  ;;  %v1406_v9 = vsel %vm11996_vm15, %v1405_v10, %v1401_v41  ;;  %vm12105_vm14 = vmor %vm1443_vm9, %vm1444_vm12 }
 0x107   :  { %v10066_v61 = vpop.eup %10065  ;;  %v12085_v34 = vor.u32 1.1754944e-38, %v1464_v26  ;;  %v8901_v28 = vmul.f32 -1.442695, %v12065_v29  ;;  %v12089_v63 = vadd.f32 %v370_v37, %v11205_v6  ;;  %v1421_v17 = vsel %vm12005_vm3, %v1420_v19, %v1416_v8 }
 0x108   :  { %v1436_v55 = vsel %vm12043_vm8, %v1435_v62, %v1431_v18  ;;  %vm1458_vm13 = vweird.f32 %v11933_v58  ;;  %v12096_v43 = vadd.f32 1.0, %v10066_v61  ;;  %v12099_v47 = vadd.f32 %v459_v16, %v11220_v22  ;;  %v373_v61 = vpop.f32.mrf.mxu1 }
 0x109   :  { %v1470_v11 = vsub.f32 1.0, %v1469_v42  ;;  %10069 = vpow2.f32 %v8901_v28  ;;  %v8902_v19 = vmul.f32 -1.442695, %v12089_v63  ;;  %v12111_v56 = vadd.f32 %v548_v3, %v11223_v23 }
 0x10a   :  { %v1446_v62 = vsel %vm12105_vm14, %v11947_v15, %v1442_v46  ;;  %v1456_v26 = vmul.f32 %v12002_v2, %v1455_v1  ;;  %v1484_v7 = vmul.f32 %v12067_v13, %v11985_v48  ;;  %v1499_v37 = vmul.f32 %v12078_v0, %v11989_v44  ;;  %v284_v46 = vpop.f32.mrf.mxu0 }
 0x10b   :  { %v12122_v41 = vmul.f32 %v1406_v9, %v11673_v36  ;;  %vm1473_vm15 = vweird.f32 %v11957_v33  ;;  %v1477_v45 = vand.u32 2147483647, %v11957_v33  ;;  %v1479_v8 = vand.u32 2147483648, %v11957_v33 }
 0x10c   :  { %10071 = vrcp.f32 %v12096_v43  ;;  %v12128_v15 = vpop.eup %10067  ;;  %v12131_v18 = vmul.f32 %v1421_v17, %v11676_v27  ;;  %v3063_v42 = vmul.f32 %v1436_v55, %v11679_v54  ;;  %vm1459_vm1 = vweird.f32 %v12002_v2 }
 0x10d   :  { %vm12135_vm2 = vcmp.eq.f32.partialorder %v1462_v4, 8.507059e+37  ;;  %v8903_v16 = vmul.f32 -1.442695, %v12099_v47  ;;  %v1451_v1 = vsel %vm12060_vm11, %v1450_v32, %v1446_v62  ;;  %v1471_v3 = vmul.f32 %v12019_v35, %v1470_v11  ;;  %vm12169_vm4 = vmor %vm1458_vm13, %vm1459_vm1 }
 0x10e   :  { %10073 = vpow2.f32 %v8902_v19  ;;  %v8904_v27 = vmul.f32 -1.442695, %v12111_v56  ;;  %v1457_v54 = vadd.f32 %v12002_v2, %v1456_v26  ;;  %v1485_v9 = vsub.f32 1.0, %v1484_v7 }
 0x10f   :  { %v1500_v28 = vsub.f32 1.0, %v1499_v37  ;;  %10075 = vpow2.f32 %v8903_v16  ;;  %v10070_v4 = vpop.eup %10069  ;;  %v12145_v17 = vor.u32 1.1754944e-38, %v1479_v8  ;;  %v1514_v55 = vmul.f32 %v12128_v15, %v12035_v31 }
 0x110   :  { %10077 = vpow2.f32 %v8904_v27  ;;  %v12150_v12 = vadd.f32 %v284_v46, %v11203_v5  ;;  %v3064_v32 = vmul.f32 %v1451_v1, %v11688_v20  ;;  %vm1488_vm3 = vweird.f32 %v11985_v48  ;;  %v462_v27 = vpop.f32.mrf.mxu2  ;;  %v9019_v20 = vld [vmem:[#allocation2 + $0x20] sm:$0xf] }
 0x111   :  { %v1492_v10 = vand.u32 2147483647, %v11985_v48  ;;  %v12155_v11 = vadd.f32 1.0, %v10070_v4  ;;  %v12158_v19 = vadd.f32 %v373_v61, %v11205_v6  ;;  %v12163_v26 = vpack.c.bf16 %v3063_v42, %v11966_v25 }
 0x112   :  { %v12160_v62 = vpop.eup %10071  ;;  %v1472_v7 = vadd.f32 %v12019_v35, %v1471_v3  ;;  %vm1474_vm5 = vweird.f32 %v12019_v35  ;;  %vm12175_vm6 = vcmp.eq.f32.partialorder %v1477_v45, 8.507059e+37  ;;  %v1494_v8 = vand.u32 2147483648, %v11985_v48 }
 0x113   :  { %19561 = vst [vmem:[#allocation19_spill] sm:$0xff] %v12163_v26  ;;  %v1461_v25 = vsel %vm12169_vm4, %v12002_v2, %v1457_v54  ;;  %v1486_v58 = vmul.f32 %v12067_v13, %v1485_v9  ;;  %v1501_v42 = vmul.f32 %v12078_v0, %v1500_v28  ;;  %vm1503_vm7 = vweird.f32 %v11989_v44  ;;  %vm12196_vm8 = vmor %vm1473_vm15, %vm1474_vm5  ;;  %v9275_v28 = vld [vmem:[#allocation2 + $0x220] sm:$0xf] }
 0x114   :  { %v10074_v16 = vpop.eup %10073  ;;  %v1507_v46 = vand.u32 2147483647, %v11989_v44  ;;  %v1509_v45 = vand.u32 2147483648, %v11989_v44  ;;  %v1515_v1 = vsub.f32 1.0, %v1514_v55  ;;  %v8905_v3 = vmul.f32 -1.442695, %v12150_v12 }
 0x115   :  { %v10076_v61 = vpop.eup %10075  ;;  %v12190_v4 = vpack.c.bf16 %v3064_v32, %v12022_v49  ;;  %vm12200_vm9 = vcmp.eq.f32.partialorder %v1492_v10, 8.507059e+37  ;;  %v1529_v9 = vmul.f32 %v12160_v62, %v12096_v43  ;;  %10079 = vrcp.f32 %v12155_v11  ;;  %v9859_v55 = vld [vmem:[#allocation2 + $0x22c] sm:$0xf0] }
 0x116   :  { %v8906_v49 = vmul.f32 -1.442695, %v12158_v19  ;;  %v10078_v32 = vpop.eup %10077  ;;  %v1466_v33 = vsel %vm12135_vm2, %v12085_v34, %v1461_v25  ;;  %v1476_v10 = vsel %vm12196_vm8, %v12019_v35, %v1472_v7  ;;  %vm1489_vm10 = vweird.f32 %v12067_v13 }
 0x117   :  { %19566 = vst [vmem:[#allocation20_spill] sm:$0xff] %v12190_v4  ;;  %vm1504_vm11 = vweird.f32 %v12078_v0  ;;  %v9795_v4 = vld [vmem:[#allocation2 + $0x2c] sm:$0xf0]  ;;  %v1487_v26 = vadd.f32 %v12067_v13, %v1486_v58  ;;  %v1502_v59 = vadd.f32 %v12078_v0, %v1501_v42  ;;  %v12218_v40 = vadd.f32 1.0, %v10074_v16  ;;  %vm12232_vm12 = vmor %vm1488_vm3, %vm1489_vm10 }
 0x118   :  { %v12221_v38 = vadd.f32 %v462_v27, %v11220_v22  ;;  %v12223_v34 = vadd.f32 1.0, %v10076_v61  ;;  %10081 = vpow2.f32 %v8905_v3  ;;  %v9276_v36 = vor.u32 %v9859_v55, %v9275_v28  ;;  %vm12256_vm14 = vmor %vm1503_vm7, %vm1504_vm11 }
 0x119   :  { %v9020_v35 = vor.u32 %v9795_v4, %v9019_v20  ;;  %v1516_v7 = vmul.f32 %v12128_v15, %v1515_v1  ;;  %v1530_v25 = vsub.f32 1.0, %v1529_v9  ;;  %v12226_v2 = vadd.f32 1.0, %v10078_v32 }
 0x11a   :  { %10083 = vpow2.f32 %v8906_v49  ;;  %v1495_v42 = vor.u32 1.1754944e-38, %v1494_v8  ;;  %vm12236_vm13 = vcmp.eq.f32.partialorder %v1507_v46, 8.507059e+37  ;;  %v1510_v3 = vor.u32 1.1754944e-38, %v1509_v45  ;;  %4197 = vmatpush.bf16.msrb.mxu2 %v9276_v36 }
 0x11b   :  { %v1522_v1 = vand.u32 2147483647, %v12035_v31  ;;  %4019 = vmatpush.bf16.msrb.mxu0 %v9020_v35  ;;  %v12241_v27 = vpop.eup %10079  ;;  %v1481_v48 = vsel %vm12175_vm6, %v12145_v17, %v1476_v10  ;;  %v1491_v61 = vsel %vm12232_vm12, %v12067_v13, %v1487_v26  ;;  %10085 = vrcp.f32 %v12218_v40  ;;  %v9403_v13 = vld [vmem:[#allocation2 + $0x320] sm:$0xf]  ;;  %v9891_v26 = vld [vmem:[#allocation2 + $0x32c] sm:$0xf0] }
 0x11c   :  { %v8907_v8 = vmul.f32 -1.442695, %v12221_v38  ;;  %v3065_v46 = vmul.f32 %v1466_v33, %v11756_v21  ;;  %vm1519_vm15 = vweird.f32 %v12128_v15  ;;  %v1524_v17 = vand.u32 2147483648, %v12035_v31 }
 0x11d   :  { %10087 = vrcp.f32 %v12223_v34  ;;  %v1506_v21 = vsel %vm12256_vm14, %v12078_v0, %v1502_v59  ;;  %v1517_v37 = vadd.f32 %v12128_v15, %v1516_v7  ;;  %v1531_v44 = vmul.f32 %v12160_v62, %v1530_v25  ;;  %v9782_v59 = vld [vmem:[%s19268_s0 + $0x68] sm:$0xff]  ;;  %v551_v25 = vpop.f32.mrf.mxu3 }
 0x11e   :  { %10089 = vrcp.f32 %v12226_v2  ;;  %v10082_v4 = vpop.eup %10081  ;;  %v3066_v9 = vmul.f32 %v1481_v48, %v11814_v14  ;;  %v1496_v49 = vsel %vm12200_vm9, %v1495_v42, %v1491_v61  ;;  %vm1518_vm1 = vweird.f32 %v12035_v31  ;;  %8822 = vmatmul.msk.bf16.gmra.mxu0 %vm206_vm0, %v9782_v59  ;;  %8838 = vmatmul.msk.bf16.gmra.mxu1 %vm206_vm0, %v9782_v59 }
 0x11f   :  { %v1544_v28 = vmul.f32 %v12241_v27, %v12155_v11  ;;  %v1537_v55 = vand.u32 2147483647, %v12096_v43  ;;  %v1539_v32 = vand.u32 2147483648, %v12096_v43  ;;  %v9404_v33 = vor.u32 %v9891_v26, %v9403_v13  ;;  %vm12287_vm2 = vmor %vm1518_vm1, %vm1519_vm15  ;;  %8854 = vmatmul.msk.bf16.gmra.mxu2 %vm206_vm0, %v9782_v59  ;;  %8870 = vmatmul.msk.bf16.gmra.mxu3 %vm206_vm0, %v9782_v59 }
 0x120   :  { %v10084_v0 = vpop.eup %10083  ;;  %10091 = vpow2.f32 %v8907_v8  ;;  %v12281_v14 = vpack.c.bf16 %v3065_v46, %v12122_v41  ;;  %v1511_v31 = vsel %vm12236_vm13, %v1510_v3, %v1506_v21  ;;  %vm12291_vm3 = vcmp.eq.f32.partialorder %v1522_v1, 8.507059e+37 }
 0x121   :  { %v1525_v20 = vor.u32 1.1754944e-38, %v1524_v17  ;;  %v12297_v41 = vpop.eup %10085  ;;  %v1521_v36 = vsel %vm12287_vm2, %v12128_v15, %v1517_v37  ;;  %v1532_v35 = vadd.f32 %v12160_v62, %v1531_v44  ;;  %vm1534_vm4 = vweird.f32 %v12160_v62  ;;  %4286 = vmatpush.bf16.msrb.mxu3 %v9404_v33  ;;  %v286_v17 = vpop.f32.mrf.mxu0 }
 0x122   :  { %19577 = vst [vmem:[#allocation21_spill] sm:$0xff] %v12281_v14  ;;  %v12304_v7 = vadd.f32 1.0, %v10082_v4  ;;  %v12310_v42 = vpack.c.bf16 %v3066_v9, %v12131_v18  ;;  %v12313_v16 = vmul.f32 %v1496_v49, %v11854_v50  ;;  %v1545_v3 = vsub.f32 1.0, %v1544_v28  ;;  %v375_v28 = vpop.f32.mrf.mxu1 }
 0x123   :  { %v12307_v58 = vpop.eup %10087  ;;  %v12315_v15 = vadd.f32 1.0, %v10084_v0  ;;  %vm1533_vm5 = vweird.f32 %v12096_v43  ;;  %vm12321_vm6 = vcmp.eq.f32.partialorder %v1537_v55, 8.507059e+37  ;;  %v1540_v61 = vor.u32 1.1754944e-38, %v1539_v32 }
 0x124   :  { %19582 = vst [vmem:[#allocation22_spill] sm:$0xff] %v12310_v42  ;;  %v12318_v1 = vpop.eup %10089  ;;  %v1554_v18 = vand.u32 2147483648, %v12155_v11  ;;  %v12327_v8 = vmul.f32 %v1511_v31, %v11867_v57  ;;  %v1526_v50 = vsel %vm12291_vm3, %v1525_v20, %v1521_v36  ;;  %vm12333_vm7 = vmor %vm1533_vm5, %vm1534_vm4  ;;  %v1552_v43 = vand.u32 2147483647, %v12155_v11 }
 0x125   :  { %v12339_v45 = vadd.f32 %v551_v25, %v11223_v23  ;;  %v1536_v57 = vsel %vm12333_vm7, %v12160_v62, %v1532_v35  ;;  %v1559_v26 = vmul.f32 %v12297_v41, %v12218_v40  ;;  %v1574_v21 = vmul.f32 %v12307_v58, %v12223_v34  ;;  %v9147_v25 = vld [vmem:[#allocation2 + $0x120] sm:$0xf] }
 0x126   :  { %v10092_v13 = vpop.eup %10091  ;;  %10093 = vrcp.f32 %v12304_v7  ;;  %v1546_v37 = vmul.f32 %v12241_v27, %v1545_v3  ;;  %v1569_v44 = vand.u32 2147483648, %v12218_v40  ;;  %v1589_v4 = vmul.f32 %v12318_v1, %v12226_v2  ;;  %v9827_v3 = vld [vmem:[#allocation2 + $0x12c] sm:$0xf0] }
 0x127   :  { %10095 = vrcp.f32 %v12315_v15  ;;  %v12355_v9 = vmul.f32 %v1526_v50, %v11895_v52  ;;  %vm1548_vm8 = vweird.f32 %v12155_v11  ;;  %v1555_v62 = vor.u32 1.1754944e-38, %v1554_v18 }
 0x128   :  { %v12359_v49 = vadd.f32 %v286_v17, %v11203_v5  ;;  %v1541_v59 = vsel %vm12321_vm6, %v1540_v61, %v1536_v57  ;;  %vm12363_vm9 = vcmp.eq.f32.partialorder %v1552_v43, 8.507059e+37  ;;  %v1584_v55 = vand.u32 2147483648, %v12223_v34 }
 0x129   :  { %v1599_v32 = vand.u32 2147483648, %v12226_v2  ;;  %v12369_v52 = vadd.f32 1.0, %v10092_v13  ;;  %v1560_v33 = vsub.f32 1.0, %v1559_v26  ;;  %v1567_v31 = vand.u32 2147483647, %v12218_v40 }
 0x12a   :  { %v1575_v54 = vsub.f32 1.0, %v1574_v21  ;;  %v8908_v10 = vmul.f32 -1.442695, %v12339_v45  ;;  %v1547_v20 = vadd.f32 %v12241_v27, %v1546_v37  ;;  %vm1549_vm10 = vweird.f32 %v12241_v27  ;;  %v553_v37 = vpop.f32.mrf.mxu3 }
 0x12b   :  { %vm1563_vm11 = vweird.f32 %v12218_v40  ;;  %v12376_v36 = vor.u32 1.1754944e-38, %v1569_v44  ;;  %v1590_v35 = vsub.f32 1.0, %v1589_v4  ;;  %v12381_v61 = vmul.f32 %v1541_v59, %v11954_v39  ;;  %v464_v39 = vpop.f32.mrf.mxu2  ;;  %vm12399_vm15 = vmor %vm1548_vm8, %vm1549_vm10 }
 0x12c   :  { %v12378_v48 = vpop.eup %10093  ;;  %vm1578_vm12 = vweird.f32 %v12223_v34  ;;  %v1582_v18 = vand.u32 2147483647, %v12223_v34  ;;  %10097 = vrcp.f32 %v12369_v52  ;;  %vm1564_vm13 = vweird.f32 %v12297_v41 }
 0x12d   :  { %v12386_v50 = vpop.eup %10095  ;;  %v12389_v46 = vor.u32 1.1754944e-38, %v1584_v55  ;;  %vm1593_vm14 = vweird.f32 %v12226_v2  ;;  %v1597_v43 = vand.u32 2147483647, %v12226_v2  ;;  %v12393_v17 = vor.u32 1.1754944e-38, %v1599_v32  ;;  %vm12452_vm6 = vmor %vm1563_vm11, %vm1564_vm13 }
 0x12e   :  { %v1561_v57 = vmul.f32 %v12297_v41, %v1560_v33  ;;  %v1576_v26 = vmul.f32 %v12307_v58, %v1575_v54  ;;  %10099 = vpow2.f32 %v8908_v10  ;;  %v9148_v21 = vor.u32 %v9827_v3, %v9147_v25 }
 0x12f   :  { %v1551_v44 = vsel %vm12399_vm15, %v12241_v27, %v1547_v20  ;;  %v1591_v4 = vmul.f32 %v12318_v1, %v1590_v35  ;;  %v1604_v11 = vmul.f32 %v12378_v48, %v12304_v7  ;;  %v8909_v59 = vmul.f32 -1.442695, %v12359_v49  ;;  %v289_v35 = vpop.f32.mrf.mxu0 }
 0x130   :  { %v1614_v55 = vand.u32 2147483648, %v12304_v7  ;;  %v1619_v32 = vmul.f32 %v12386_v50, %v12315_v15  ;;  %4108 = vmatpush.bf16.msrb.mxu1 %v9148_v21  ;;  %v12416_v33 = vadd.f32 %v375_v28, %v11205_v6  ;;  %v12419_v54 = vadd.f32 %v464_v39, %v11220_v22  ;;  %v378_v21 = vpop.f32.mrf.mxu1 }
 0x131   :  { %vm12421_vm1 = vcmp.eq.f32.partialorder %v1567_v31, 8.507059e+37  ;;  %vm1579_vm2 = vweird.f32 %v12307_v58  ;;  %v1612_v10 = vand.u32 2147483647, %v12304_v7  ;;  %10101 = vpow2.f32 %v8909_v59 }
 0x132   :  { %v12428_v20 = vadd.f32 %v553_v37, %v11223_v23  ;;  %v12430_v25 = vpop.eup %10097  ;;  %v1556_v28 = vsel %vm12363_vm9, %v1555_v62, %v1551_v44  ;;  %v1562_v3 = vadd.f32 %v12297_v41, %v1561_v57  ;;  %v1577_v31 = vadd.f32 %v12307_v58, %v1576_v26  ;;  %vm12466_vm7 = vmor %vm1578_vm12, %vm1579_vm2 }
 0x133   :  { %vm12436_vm3 = vcmp.eq.f32.partialorder %v1582_v18, 8.507059e+37  ;;  %vm1594_vm4 = vweird.f32 %v12318_v1  ;;  %vm12441_vm5 = vcmp.eq.f32.partialorder %v1597_v43, 8.507059e+37  ;;  %v1592_v37 = vadd.f32 %v12318_v1, %v1591_v4 }
 0x134   :  { %v1605_v59 = vsub.f32 1.0, %v1604_v11  ;;  %v8910_v62 = vmul.f32 -1.442695, %v12416_v33  ;;  %v8911_v0 = vmul.f32 -1.442695, %v12419_v54  ;;  %v10100_v57 = vpop.eup %10099  ;;  %v12456_v43 = vor.u32 1.1754944e-38, %v1614_v55  ;;  %vm12486_vm9 = vmor %vm1593_vm14, %vm1594_vm4 }
 0x135   :  { %v1620_v26 = vsub.f32 1.0, %v1619_v32  ;;  %v8912_v44 = vmul.f32 -1.442695, %v12428_v20  ;;  %v12460_v4 = vadd.f32 %v289_v35, %v11203_v5  ;;  %vm1608_vm8 = vweird.f32 %v12304_v7 }
 0x136   :  { %v1634_v40 = vmul.f32 %v12430_v25, %v12369_v52  ;;  %v12473_v55 = vadd.f32 1.0, %v10100_v57  ;;  %10103 = vpow2.f32 %v8910_v62  ;;  %v12476_v32 = vadd.f32 %v378_v21, %v11205_v6 }
 0x137   :  { %v3071_v35 = vmul.f32 %v1556_v28, %v12065_v29  ;;  %v1566_v34 = vsel %vm12452_vm6, %v12297_v41, %v1562_v3  ;;  %vm1623_vm10 = vweird.f32 %v12315_v15  ;;  %10105 = vpow2.f32 %v8911_v0  ;;  %v10102_v62 = vpop.eup %10101  ;;  %v467_v0 = vpop.f32.mrf.mxu2 }
 0x138   :  { %v1581_v29 = vsel %vm12466_vm7, %v12307_v58, %v1577_v31  ;;  %v1596_v41 = vsel %vm12486_vm9, %v12318_v1, %v1592_v37  ;;  %v1606_v28 = vmul.f32 %v12378_v48, %v1605_v59  ;;  %10107 = vrcp.f32 %v12473_v55 }
 0x139   :  { %v1621_v2 = vmul.f32 %v12386_v50, %v1620_v26  ;;  %v12500_v3 = vadd.f32 1.0, %v10102_v62  ;;  %10109 = vpow2.f32 %v8912_v44  ;;  %v8913_v21 = vmul.f32 -1.442695, %v12460_v4 }
 0x13a   :  { %vm12503_vm11 = vcmp.eq.f32.partialorder %v1612_v10, 8.507059e+37  ;;  %v1627_v58 = vand.u32 2147483647, %v12315_v15  ;;  %v1629_v42 = vand.u32 2147483648, %v12315_v15  ;;  %v1635_v1 = vsub.f32 1.0, %v1634_v40 }
 0x13b   :  { %v8914_v31 = vmul.f32 -1.442695, %v12476_v32  ;;  %v12511_v37 = vpack.c.bf16 %v3071_v35, %v12313_v16  ;;  %v1571_v59 = vsel %vm12421_vm1, %v12376_v36, %v1566_v34  ;;  %vm1609_vm12 = vweird.f32 %v12378_v48 }
 0x13c   :  { %10111 = vrcp.f32 %v12500_v3  ;;  %v10104_v10 = vpop.eup %10103  ;;  %v1586_v18 = vsel %vm12436_vm3, %v12389_v46, %v1581_v29  ;;  %v1601_v26 = vsel %vm12441_vm5, %v12393_v17, %v1596_v41  ;;  %v1607_v16 = vadd.f32 %v12378_v48, %v1606_v28  ;;  %vm12543_vm14 = vmor %vm1608_vm8, %vm1609_vm12  ;;  %v556_v28 = vpop.f32.mrf.mxu3 }
 0x13d   :  { %19605 = vst [vmem:[#allocation23_spill] sm:$0xff] %v12511_v37  ;;  %v12526_v44 = vadd.f32 %v467_v0, %v11220_v22  ;;  %v10106_v27 = vpop.eup %10105  ;;  %v1622_v36 = vadd.f32 %v12386_v50, %v1621_v2  ;;  %vm1624_vm13 = vweird.f32 %v12386_v50  ;;  %v12530_v11 = vadd.f32 1.0, %v10104_v10 }
 0x13e   :  { %10113 = vpow2.f32 %v8913_v21  ;;  %v12532_v40 = vpop.eup %10107  ;;  %v3072_v46 = vmul.f32 %v1571_v59, %v12089_v63  ;;  %v1636_v39 = vmul.f32 %v12430_v25, %v1635_v1  ;;  %v12536_v17 = vadd.f32 1.0, %v10106_v27  ;;  %vm12560_vm1 = vmor %vm1623_vm10, %vm1624_vm13 }
 0x13f   :  { %10115 = vpow2.f32 %v8914_v31  ;;  %v10110_v13 = vpop.eup %10109  ;;  %v3073_v35 = vmul.f32 %v1586_v18, %v12099_v47  ;;  %vm12547_vm15 = vcmp.eq.f32.partialorder %v1627_v58, 8.507059e+37  ;;  %v1630_v63 = vor.u32 1.1754944e-38, %v1629_v42 }
 0x140   :  { %10117 = vrcp.f32 %v12530_v11  ;;  %v3074_v29 = vmul.f32 %v1601_v26, %v12111_v56  ;;  %v1611_v47 = vsel %vm12543_vm14, %v12378_v48, %v1607_v16  ;;  %v8915_v41 = vmul.f32 -1.442695, %v12526_v44 }
 0x141   :  { %10119 = vrcp.f32 %v12536_v17  ;;  %v1626_v56 = vsel %vm12560_vm1, %v12386_v50, %v1622_v36  ;;  %v1642_v48 = vand.u32 2147483647, %v12369_v52  ;;  %v1649_v15 = vmul.f32 %v12532_v40, %v12473_v55  ;;  %v9783_v50 = vld [vmem:[%s19268_s0 + $0x70] sm:$0xff] }
 0x142   :  { %v12566_v2 = vpop.eup %10111  ;;  %v12574_v21 = vadd.f32 1.0, %v10110_v13  ;;  %v1637_v0 = vadd.f32 %v12430_v25, %v1636_v39  ;;  %vm1639_vm2 = vweird.f32 %v12430_v25  ;;  %v1644_v58 = vand.u32 2147483648, %v12369_v52  ;;  %8823 = vmatmul.msk.bf16.gmra.mxu0 %vm206_vm0, %v9783_v50  ;;  %8839 = vmatmul.msk.bf16.gmra.mxu1 %vm206_vm0, %v9783_v50 }
 0x143   :  { %v1664_v42 = vmul.f32 %v12566_v2, %v12500_v3  ;;  %v1616_v31 = vsel %vm12503_vm11, %v12456_v43, %v1611_v47  ;;  %vm1638_vm3 = vweird.f32 %v12369_v52  ;;  %v12590_v59 = vadd.f32 %v556_v28, %v11223_v23  ;;  %8855 = vmatmul.msk.bf16.gmra.mxu2 %vm206_vm0, %v9783_v50  ;;  %8871 = vmatmul.msk.bf16.gmra.mxu3 %vm206_vm0, %v9783_v50 }
 0x144   :  { %v10114_v1 = vpop.eup %10113  ;;  %10121 = vrcp.f32 %v12574_v21  ;;  %v1631_v18 = vsel %vm12547_vm15, %v1630_v63, %v1626_v56  ;;  %v1659_v26 = vand.u32 2147483648, %v12473_v55  ;;  %v12600_v52 = vpack.c.bf16 %v3072_v46, %v12327_v8  ;;  %vm12610_vm4 = vmor %vm1638_vm3, %vm1639_vm2  ;;  %v291_v63 = vpop.f32.mrf.mxu0 }
 0x145   :  { %v10116_v10 = vpop.eup %10115  ;;  %v1665_v16 = vsub.f32 1.0, %v1664_v42  ;;  %10123 = vpow2.f32 %v8915_v41  ;;  %v12603_v57 = vpack.c.bf16 %v3073_v35, %v12355_v9  ;;  %v12606_v27 = vpack.c.bf16 %v3074_v29, %v12381_v61 }
 0x146   :  { %v12597_v43 = vpop.eup %10117  ;;  %19612 = vst [vmem:[#allocation24_spill] sm:$0xff] %v12600_v52  ;;  %v1650_v39 = vsub.f32 1.0, %v1649_v15  ;;  %v1641_v8 = vsel %vm12610_vm4, %v12430_v25, %v1637_v0  ;;  %vm1643_vm5 = vcmp.eq.f32.partialorder %v1642_v48, 8.507059e+37  ;;  %v1645_v9 = vor.u32 1.1754944e-38, %v1644_v58 }
 0x147   :  { %19613 = vst [vmem:[#allocation25_spill] sm:$0xff] %v12603_v57  ;;  %v12616_v13 = vpop.eup %10119  ;;  %v1666_v61 = vmul.f32 %v12566_v2, %v1665_v16  ;;  %v12623_v46 = vmul.f32 %v1616_v31, %v12150_v12  ;;  %v12626_v35 = vmul.f32 %v1631_v18, %v12158_v19  ;;  %v1657_v34 = vand.u32 2147483647, %v12473_v55  ;;  %v469_v18 = vpop.f32.mrf.mxu2 }
 0x148   :  { %19614 = vst [vmem:[#allocation26_spill] sm:$0xff] %v12606_v27  ;;  %v8916_v62 = vmul.f32 -1.442695, %v12590_v59  ;;  %vm1653_vm6 = vweird.f32 %v12473_v55  ;;  %v1660_v29 = vor.u32 1.1754944e-38, %v1659_v26  ;;  %v1679_v25 = vmul.f32 %v12597_v43, %v12530_v11 }
 0x149   :  { %v12633_v47 = vadd.f32 1.0, %v10114_v1  ;;  %v1646_v12 = vsel %vm1643_vm5, %v1645_v9, %v1641_v8  ;;  %v1651_v41 = vmul.f32 %v12532_v40, %v1650_v39  ;;  %v1694_v19 = vmul.f32 %v12616_v13, %v12536_v17 }
 0x14a   :  { %v12635_v7 = vpop.eup %10121  ;;  %v12640_v28 = vadd.f32 1.0, %v10116_v10  ;;  %v1667_v48 = vadd.f32 %v12566_v2, %v1666_v61  ;;  %vm1669_vm7 = vweird.f32 %v12566_v2  ;;  %v1672_v15 = vand.u32 2147483647, %v12500_v3 }
 0x14b   :  { %v10124_v56 = vpop.eup %10123  ;;  %v12646_v0 = vadd.f32 %v291_v63, %v11203_v5  ;;  %vm12648_vm8 = vcmp.eq.f32.partialorder %v1657_v34, 8.507059e+37  ;;  %vm1668_vm9 = vweird.f32 %v12500_v3  ;;  %v1674_v42 = vand.u32 2147483648, %v12500_v3 }
 0x14c   :  { %v1709_v50 = vmul.f32 %v12635_v7, %v12574_v21  ;;  %10125 = vpow2.f32 %v8916_v62  ;;  %v12657_v1 = vmul.f32 %v1646_v12, %v12221_v38  ;;  %vm1654_vm10 = vweird.f32 %v12532_v40  ;;  %vm12662_vm11 = vmor %vm1668_vm9, %vm1669_vm7 }
 0x14d   :  { %v1680_v31 = vsub.f32 1.0, %v1679_v25  ;;  %10127 = vrcp.f32 %v12633_v47  ;;  %v1652_v10 = vadd.f32 %v12532_v40, %v1651_v41  ;;  %v1695_v26 = vsub.f32 1.0, %v1694_v19  ;;  %vm12680_vm13 = vmor %vm1653_vm6, %vm1654_vm10  ;;  %v380_v25 = vpop.f32.mrf.mxu1 }
 0x14e   :  { %10129 = vrcp.f32 %v12640_v28  ;;  %v12667_v3 = vadd.f32 1.0, %v10124_v56  ;;  %v1671_v38 = vsel %vm12662_vm11, %v12566_v2, %v1667_v48  ;;  %vm1673_vm12 = vcmp.eq.f32.partialorder %v1672_v15, 8.507059e+37 }
 0x14f   :  { %v1689_v16 = vand.u32 2147483648, %v12530_v11  ;;  %v1704_v36 = vand.u32 2147483648, %v12536_v17  ;;  %v1675_v39 = vor.u32 1.1754944e-38, %v1674_v42  ;;  %v1687_v8 = vand.u32 2147483647, %v12530_v11 }
 0x150   :  { %v1702_v9 = vand.u32 2147483647, %v12536_v17  ;;  %v1710_v61 = vsub.f32 1.0, %v1709_v50  ;;  %v1681_v2 = vmul.f32 %v12597_v43, %v1680_v31  ;;  %vm1683_vm14 = vweird.f32 %v12530_v11 }
 0x151   :  { %v1717_v62 = vand.u32 2147483647, %v12574_v21  ;;  %v8917_v63 = vmul.f32 -1.442695, %v12646_v0  ;;  %v1656_v41 = vsel %vm12680_vm13, %v12532_v40, %v1652_v10  ;;  %v1676_v19 = vsel %vm1673_vm12, %v1675_v39, %v1671_v38  ;;  %v9259_v40 = vld [vmem:[#allocation2 + $0x200] sm:$0xf] }
 0x152   :  { %v10126_v12 = vpop.eup %10125  ;;  %v1696_v55 = vmul.f32 %v12616_v13, %v1695_v26  ;;  %10131 = vrcp.f32 %v12667_v3  ;;  %v1690_v48 = vor.u32 1.1754944e-38, %v1689_v16  ;;  %vm1698_vm15 = vweird.f32 %v12536_v17 }
 0x153   :  { %v12693_v56 = vpop.eup %10127  ;;  %v1705_v15 = vor.u32 1.1754944e-38, %v1704_v36  ;;  %v1719_v42 = vand.u32 2147483648, %v12574_v21  ;;  %vm1684_vm1 = vweird.f32 %v12597_v43  ;;  %vm12700_vm2 = vcmp.eq.f32.partialorder %v1687_v8, 8.507059e+37 }
 0x154   :  { %v12697_v50 = vpop.eup %10129  ;;  %vm1699_vm3 = vweird.f32 %v12616_v13  ;;  %vm12705_vm4 = vcmp.eq.f32.partialorder %v1702_v9, 8.507059e+37  ;;  %v1711_v10 = vmul.f32 %v12635_v7, %v1710_v61  ;;  %vm1713_vm5 = vweird.f32 %v12574_v21  ;;  %vm12742_vm7 = vmor %vm1683_vm14, %vm1684_vm1 }
 0x155   :  { %v1661_v26 = vsel %vm12648_vm8, %v1660_v29, %v1656_v41  ;;  %v3079_v38 = vmul.f32 %v1676_v19, %v12359_v49  ;;  %v1682_v16 = vadd.f32 %v12597_v43, %v1681_v2  ;;  %v1734_v36 = vand.u32 2147483648, %v12633_v47  ;;  %vm12756_vm9 = vmor %vm1698_vm15, %vm1699_vm3 }
 0x156   :  { %v1697_v39 = vadd.f32 %v12616_v13, %v1696_v55  ;;  %vm12717_vm6 = vcmp.eq.f32.partialorder %v1717_v62, 8.507059e+37  ;;  %v1724_v9 = vmul.f32 %v12693_v56, %v12633_v47  ;;  %v12723_v61 = vadd.f32 1.0, %v10126_v12 }
 0x157   :  { %10133 = vpow2.f32 %v8917_v63  ;;  %v1720_v58 = vor.u32 1.1754944e-38, %v1719_v42  ;;  %v1739_v49 = vmul.f32 %v12697_v50, %v12640_v28  ;;  %v12728_v29 = vadd.f32 %v380_v25, %v11205_v6  ;;  %v558_v25 = vpop.f32.mrf.mxu3  ;;  %v294_v42 = vpop.f32.mrf.mxu0 }
 0x158   :  { %v12731_v34 = vadd.f32 %v469_v18, %v11220_v22  ;;  %v12733_v2 = vpop.eup %10131  ;;  %v12736_v62 = vmul.f32 %v1661_v26, %v12339_v45  ;;  %v1712_v12 = vadd.f32 %v12635_v7, %v1711_v10  ;;  %vm1714_vm8 = vweird.f32 %v12635_v7 }
 0x159   :  { %10135 = vrcp.f32 %v12723_v61  ;;  %v12750_v41 = vpack.c.bf16 %v3079_v38, %v12623_v46  ;;  %v1732_v11 = vand.u32 2147483647, %v12633_v47  ;;  %v12761_v19 = vor.u32 1.1754944e-38, %v1734_v36  ;;  %vm12773_vm10 = vmor %vm1713_vm5, %vm1714_vm8 }
 0x15a   :  { %v1686_v46 = vsel %vm12742_vm7, %v12597_v43, %v1682_v16  ;;  %v1701_v10 = vsel %vm12756_vm9, %v12616_v13, %v1697_v39  ;;  %v1725_v17 = vsub.f32 1.0, %v1724_v9  ;;  %v8918_v18 = vmul.f32 -1.442695, %v12728_v29  ;;  %v383_v16 = vpop.f32.mrf.mxu1 }
 0x15b   :  { %19631 = vst [vmem:[#allocation27_spill] sm:$0xff] %v12750_v41  ;;  %v1740_v38 = vsub.f32 1.0, %v1739_v49  ;;  %v1754_v36 = vmul.f32 %v12733_v2, %v12667_v3  ;;  %v8919_v63 = vmul.f32 -1.442695, %v12731_v34  ;;  %v12781_v43 = vadd.f32 %v558_v25, %v11223_v23 }
 0x15c   :  { %v1716_v39 = vsel %vm12773_vm10, %v12635_v7, %v1712_v12  ;;  %vm1728_vm11 = vweird.f32 %v12633_v47  ;;  %v1749_v21 = vand.u32 2147483648, %v12640_v28  ;;  %10137 = vpow2.f32 %v8918_v18 }
 0x15d   :  { %v10134_v13 = vpop.eup %10133  ;;  %v12789_v9 = vadd.f32 %v294_v42, %v11203_v5  ;;  %v1691_v49 = vsel %vm12700_vm2, %v1690_v48, %v1686_v46  ;;  %v1706_v25 = vsel %vm12705_vm4, %v1705_v15, %v1701_v10  ;;  %vm1743_vm12 = vweird.f32 %v12640_v28  ;;  %v9855_v46 = vld [vmem:[#allocation2 + $0x20c] sm:$0xf0] }
 0x15e   :  { %v12796_v45 = vadd.f32 1.0, %v10134_v13  ;;  %10139 = vpow2.f32 %v8919_v63  ;;  %v1726_v12 = vmul.f32 %v12693_v56, %v1725_v17  ;;  %v8920_v18 = vmul.f32 -1.442695, %v12781_v43  ;;  %v9003_v63 = vld [vmem:[#allocation2] sm:$0xf] }
 0x15f   :  { %v12798_v7 = vpop.eup %10135  ;;  %v8921_v42 = vmul.f32 -1.442695, %v12789_v9  ;;  %v12804_v26 = vadd.f32 %v383_v16, %v11205_v6  ;;  %v1721_v48 = vsel %vm12717_vm6, %v1720_v58, %v1716_v39  ;;  %v1741_v15 = vmul.f32 %v12697_v50, %v1740_v38  ;;  %v9387_v13 = vld [vmem:[#allocation2 + $0x300] sm:$0xf] }
 0x160   :  { %v1755_v31 = vsub.f32 1.0, %v1754_v36  ;;  %10141 = vrcp.f32 %v12796_v45  ;;  %vm1729_vm13 = vweird.f32 %v12693_v56  ;;  %v1762_v10 = vand.u32 2147483647, %v12667_v3  ;;  %v9791_v36 = vld [vmem:[#allocation2 + $0xc] sm:$0xf0] }
 0x161   :  { %v1769_v17 = vmul.f32 %v12798_v7, %v12723_v61  ;;  %10143 = vpow2.f32 %v8920_v18  ;;  %v3080_v16 = vmul.f32 %v1691_v49, %v12416_v33  ;;  %v3081_v8 = vmul.f32 %v1706_v25, %v12419_v54  ;;  %v9887_v33 = vld [vmem:[#allocation2 + $0x30c] sm:$0xf0]  ;;  %vm12836_vm1 = vmor %vm1728_vm11, %vm1729_vm13 }
 0x162   :  { %vm12816_vm14 = vcmp.eq.f32.partialorder %v1732_v11, 8.507059e+37  ;;  %10145 = vpow2.f32 %v8921_v42  ;;  %v8922_v38 = vmul.f32 -1.442695, %v12804_v26  ;;  %v10138_v39 = vpop.eup %10137  ;;  %v3082_v55 = vmul.f32 %v1721_v48, %v12428_v20 }
 0x163   :  { %v1727_v41 = vadd.f32 %v12693_v56, %v1726_v12  ;;  %vm1744_vm15 = vweird.f32 %v12697_v50  ;;  %v9260_v18 = vor.u32 %v9855_v46, %v9259_v40  ;;  %v1742_v54 = vadd.f32 %v12697_v50, %v1741_v15 }
 0x164   :  { %v10140_v49 = vpop.eup %10139  ;;  %v1756_v11 = vmul.f32 %v12733_v2, %v1755_v31  ;;  %v12826_v25 = vadd.f32 1.0, %v10138_v39  ;;  %10147 = vpow2.f32 %v8922_v38  ;;  %v1770_v42 = vsub.f32 1.0, %v1769_v17  ;;  %vm12855_vm3 = vmor %vm1743_vm12, %vm1744_vm15 }
 0x165   :  { %v12828_v27 = vadd.f32 1.0, %v10140_v49  ;;  %4198 = vmatpush.bf16.msrb.mxu2 %v9260_v18  ;;  %v9004_v57 = vor.u32 %v9791_v36, %v9003_v63  ;;  %v9388_v20 = vor.u32 %v9887_v33, %v9387_v13  ;;  %v19640_v15 = vand.u32 2147483647, %v12640_v28  ;;  %v9784_v49 = vld [vmem:[%s19268_s0 + $0x78] sm:$0xff] }
 0x166   :  { %v12830_v48 = vpop.eup %10141  ;;  %v1750_v40 = vor.u32 1.1754944e-38, %v1749_v21  ;;  %v1764_v46 = vand.u32 2147483648, %v12667_v3  ;;  %10149 = vrcp.f32 %v12826_v25  ;;  %v12849_v63 = vpack.c.bf16 %v3080_v16, %v12626_v35  ;;  %8824 = vmatmul.msk.bf16.gmra.mxu0 %vm206_vm0, %v9784_v49  ;;  %8840 = vmatmul.msk.bf16.gmra.mxu1 %vm206_vm0, %v9784_v49 }
 0x167   :  { %vm12842_vm2 = vcmp.eq.f32.partialorder %v19640_v15, 8.507059e+37  ;;  %v10144_v17 = vpop.eup %10143  ;;  %vm1758_vm4 = vweird.f32 %v12667_v3  ;;  %v1784_v21 = vmul.f32 %v12830_v48, %v12796_v45  ;;  %10151 = vrcp.f32 %v12828_v27  ;;  %4020 = vmatpush.bf16.msrb.mxu0 %v9004_v57  ;;  %4287 = vmatpush.bf16.msrb.mxu3 %v9388_v20 }
 0x168   :  { %19643 = vst [vmem:[#allocation28_spill] sm:$0xff] %v12849_v63  ;;  %v10146_v38 = vpop.eup %10145  ;;  %v12864_v35 = vpack.c.bf16 %v3081_v8, %v12657_v1  ;;  %v1731_v28 = vsel %vm12836_vm1, %v12693_v56, %v1727_v41  ;;  %v1746_v16 = vsel %vm12855_vm3, %v12697_v50, %v1742_v54  ;;  %vm12872_vm5 = vcmp.eq.f32.partialorder %v1762_v10, 8.507059e+37  ;;  %v472_v50 = vpop.f32.mrf.mxu2  ;;  %8856 = vmatmul.msk.bf16.gmra.mxu2 %vm206_vm0, %v9784_v49 }
 0x169   :  { %v12877_v13 = vpack.c.bf16 %v3082_v55, %v12736_v62  ;;  %v1757_v57 = vadd.f32 %v12733_v2, %v1756_v11  ;;  %vm1759_vm6 = vweird.f32 %v12733_v2  ;;  %v1771_v1 = vmul.f32 %v12798_v7, %v1770_v42  ;;  %8872 = vmatmul.msk.bf16.gmra.mxu3 %vm206_vm0, %v9784_v49 }
 0x16a   :  { %19646 = vst [vmem:[#allocation29_spill] sm:$0xff] %v12864_v35  ;;  %v10148_v8 = vpop.eup %10147  ;;  %v1765_v39 = vor.u32 1.1754944e-38, %v1764_v46  ;;  %v1785_v56 = vsub.f32 1.0, %v1784_v21  ;;  %v12882_v41 = vadd.f32 1.0, %v10144_v17  ;;  %v12884_v18 = vadd.f32 1.0, %v10146_v38  ;;  %vm12900_vm7 = vmor %vm1758_vm4, %vm1759_vm6 }
 0x16b   :  { %19649 = vst [vmem:[#allocation30_spill] sm:$0xff] %v12877_v13  ;;  %v1736_v10 = vsel %vm12816_vm14, %v12761_v19, %v1731_v28  ;;  %v1751_v62 = vsel %vm12842_vm2, %v1750_v40, %v1746_v16  ;;  %v1777_v55 = vand.u32 2147483647, %v12723_v61  ;;  %v1779_v33 = vand.u32 2147483648, %v12723_v61 }
 0x16c   :  { %v12896_v54 = vpop.eup %10149  ;;  %vm1774_vm8 = vweird.f32 %v12798_v7  ;;  %v1792_v19 = vand.u32 2147483647, %v12796_v45  ;;  %10153 = vrcp.f32 %v12882_v41  ;;  %v12907_v58 = vadd.f32 1.0, %v10148_v8 }
 0x16d   :  { %v12909_v42 = vpop.eup %10151  ;;  %v1761_v20 = vsel %vm12900_vm7, %v12733_v2, %v1757_v57  ;;  %v1772_v3 = vadd.f32 %v12798_v7, %v1771_v1  ;;  %10155 = vrcp.f32 %v12884_v18  ;;  %v12917_v12 = vadd.f32 %v472_v50, %v11220_v22 }
 0x16e   :  { %vm1773_vm9 = vweird.f32 %v12723_v61  ;;  %v1786_v15 = vmul.f32 %v12830_v48, %v1785_v56  ;;  %v1794_v31 = vand.u32 2147483648, %v12796_v45  ;;  %v1799_v2 = vmul.f32 %v12896_v54, %v12826_v25 }
 0x16f   :  { %v12929_v40 = vmul.f32 %v1736_v10, %v12460_v4  ;;  %vm12931_vm10 = vcmp.eq.f32.partialorder %v1777_v55, 8.507059e+37  ;;  %v1780_v17 = vor.u32 1.1754944e-38, %v1779_v33  ;;  %v1814_v61 = vmul.f32 %v12909_v42, %v12828_v27  ;;  %vm12944_vm0 = vmor %vm1773_vm9, %vm1774_vm8 }
 0x170   :  { %v12938_v47 = vmul.f32 %v1751_v62, %v12476_v32  ;;  %v1766_v21 = vsel %vm12872_vm5, %v1765_v39, %v1761_v20  ;;  %vm1788_vm11 = vweird.f32 %v12796_v45  ;;  %10157 = vrcp.f32 %v12907_v58  ;;  %v561_v62 = vpop.f32.mrf.mxu3 }
 0x171   :  { %v1776_v4 = vsel %vm12944_vm0, %v12798_v7, %v1772_v3  ;;  %vm12953_vm12 = vcmp.eq.f32.partialorder %v1792_v19, 8.507059e+37  ;;  %v1809_v28 = vand.u32 2147483648, %v12826_v25  ;;  %v8923_v16 = vmul.f32 -1.442695, %v12917_v12  ;;  %v296_v3 = vpop.f32.mrf.mxu0 }
 0x172   :  { %v12959_v36 = vpop.eup %10153  ;;  %v1787_v57 = vadd.f32 %v12830_v48, %v1786_v15  ;;  %vm1789_vm13 = vweird.f32 %v12830_v48  ;;  %v1795_v1 = vor.u32 1.1754944e-38, %v1794_v31  ;;  %v1800_v8 = vsub.f32 1.0, %v1799_v2 }
 0x173   :  { %v12963_v39 = vpop.eup %10155  ;;  %v12966_v7 = vmul.f32 %v1766_v21, %v12526_v44  ;;  %v1815_v56 = vsub.f32 1.0, %v1814_v61  ;;  %v1824_v50 = vand.u32 2147483648, %v12828_v27  ;;  %v1829_v10 = vmul.f32 %v12959_v36, %v12882_v41  ;;  %vm12978_vm15 = vmor %vm1788_vm11, %vm1789_vm13  ;;  %v9823_v61 = vld [vmem:[#allocation2 + $0x10c] sm:$0xf0] }
 0x174   :  { %v1781_v55 = vsel %vm12931_vm10, %v1780_v17, %v1776_v4  ;;  %vm1803_vm14 = vweird.f32 %v12826_v25  ;;  %v1807_v33 = vand.u32 2147483647, %v12826_v25  ;;  %v1822_v49 = vand.u32 2147483647, %v12828_v27  ;;  %v9131_v17 = vld [vmem:[#allocation2 + $0x100] sm:$0xf] }
 0x175   :  { %v12982_v11 = vor.u32 1.1754944e-38, %v1809_v28  ;;  %vm1818_vm1 = vweird.f32 %v12828_v27  ;;  %v1839_v19 = vand.u32 2147483648, %v12882_v41  ;;  %v1844_v20 = vmul.f32 %v12963_v39, %v12884_v18 }
 0x176   :  { %10159 = vpow2.f32 %v8923_v16  ;;  %v12988_v15 = vpop.eup %10157  ;;  %v1791_v45 = vsel %vm12978_vm15, %v12830_v48, %v1787_v57  ;;  %v1801_v31 = vmul.f32 %v12896_v54, %v1800_v8  ;;  %v1830_v2 = vsub.f32 1.0, %v1829_v10  ;;  %v385_v16 = vpop.f32.mrf.mxu1  ;;  %4021 = vmatmul.bf16.vlgmr.msrb.gmra.mxu0 %v11561_v60  ;;  %v9373_v60 = vld [vmem:[#allocation2 + $0x2f0] sm:$0xf0] }
 0x177   :  { %v12995_v46 = vadd.f32 %v561_v62, %v11223_v23  ;;  %v12998_v21 = vmul.f32 %v1781_v55, %v12590_v59  ;;  %v1816_v38 = vmul.f32 %v12909_v42, %v1815_v56  ;;  %v1825_v4 = vor.u32 1.1754944e-38, %v1824_v50  ;;  %v474_v55 = vpop.f32.mrf.mxu2 }
 0x178   :  { %v1837_v28 = vand.u32 2147483647, %v12882_v41  ;;  %vm1804_vm2 = vweird.f32 %v12896_v54  ;;  %vm13003_vm3 = vcmp.eq.f32.partialorder %v1807_v33, 8.507059e+37  ;;  %vm1819_vm4 = vweird.f32 %v12909_v42  ;;  %4199 = vmatmul.bf16.vlgmr.msrb.gmra.mxu2 %v11629_v51 }
 0x179   :  { %vm1833_vm5 = vweird.f32 %v12882_v41  ;;  %v1859_v59 = vmul.f32 %v12988_v15, %v12907_v58  ;;  %v8924_v57 = vmul.f32 -1.442695, %v12995_v46  ;;  %v1796_v8 = vsel %vm12953_vm12, %v1795_v1, %v1791_v45  ;;  %vm13046_vm9 = vmor %vm1803_vm14, %vm1804_vm2  ;;  %4288 = vmatmul.bf16.vlgmr.msrb.gmra.mxu3 %v11643_v24 }
 0x17a   :  { %vm13014_vm6 = vcmp.eq.f32.partialorder %v1822_v49, 8.507059e+37  ;;  %v13018_v50 = vor.u32 1.1754944e-38, %v1839_v19  ;;  %v1845_v10 = vsub.f32 1.0, %v1844_v20  ;;  %v9132_v62 = vor.u32 %v9823_v61, %v9131_v17  ;;  %vm13061_vm10 = vmor %vm1818_vm1, %vm1819_vm4 }
 0x17b   :  { %v1802_v33 = vadd.f32 %v12896_v54, %v1801_v31  ;;  %v1831_v44 = vmul.f32 %v12959_v36, %v1830_v2  ;;  %10161 = vpow2.f32 %v8924_v57  ;;  %v13023_v13 = vadd.f32 %v296_v3, %v11203_v5 }
 0x17c   :  { %v10160_v35 = vpop.eup %10159  ;;  %v1817_v32 = vadd.f32 %v12909_v42, %v1816_v38  ;;  %vm1848_vm7 = vweird.f32 %v12884_v18  ;;  %v1852_v1 = vand.u32 2147483647, %v12884_v18  ;;  %4109 = vmatpush.bf16.msrb.mxu1 %v9132_v62  ;;  %v13029_v49 = vadd.f32 %v385_v16, %v11205_v6  ;;  %v563_v16 = vpop.f32.mrf.mxu3 }
 0x17d   :  { %vm13031_vm8 = vcmp.eq.f32.partialorder %v1837_v28, 8.507059e+37  ;;  %v1860_v20 = vsub.f32 1.0, %v1859_v59  ;;  %v13035_v45 = vadd.f32 1.0, %v10160_v35  ;;  %v8925_v3 = vmul.f32 -1.442695, %v13023_v13  ;;  %v299_v59 = vpop.f32.mrf.mxu0 }
 0x17e   :  { %v13039_v31 = vadd.f32 %v474_v55, %v11220_v22  ;;  %v3087_v2 = vmul.f32 %v1796_v8, %v12646_v0  ;;  %v1846_v61 = vmul.f32 %v12963_v39, %v1845_v10  ;;  %v1854_v35 = vand.u32 2147483648, %v12884_v18 }
 0x17f   :  { %v8926_v38 = vmul.f32 -1.442695, %v13029_v49  ;;  %v1806_v0 = vsel %vm13046_vm9, %v12896_v54, %v1802_v33  ;;  %v1832_v28 = vadd.f32 %v12959_v36, %v1831_v44  ;;  %vm1834_vm0 = vweird.f32 %v12959_v36  ;;  %4110 = vmatmul.bf16.vlgmr.msrb.gmra.mxu1 %v11610_v53  ;;  %v477_v27 = vpop.f32.mrf.mxu2 }
 0x180   :  { %10163 = vrcp.f32 %v13035_v45  ;;  %v1821_v54 = vsel %vm13061_vm10, %v12909_v42, %v1817_v32  ;;  %vm13073_vm11 = vcmp.eq.f32.partialorder %v1852_v1, 8.507059e+37  ;;  %vm1863_vm12 = vweird.f32 %v12907_v58  ;;  %vm13089_vm14 = vmor %vm1833_vm5, %vm1834_vm0  ;;  %v388_v32 = vpop.f32.mrf.mxu1 }
 0x181   :  { %10165 = vpow2.f32 %v8925_v3  ;;  %v10162_v57 = vpop.eup %10161  ;;  %vm1849_vm13 = vweird.f32 %v12963_v39  ;;  %v1861_v8 = vmul.f32 %v12988_v15, %v1860_v20  ;;  %v8927_v10 = vmul.f32 -1.442695, %v13039_v31 }
 0x182   :  { %10167 = vpow2.f32 %v8926_v38  ;;  %v1811_v42 = vsel %vm13003_vm3, %v12982_v11, %v1806_v0  ;;  %v1847_v55 = vadd.f32 %v12963_v39, %v1846_v61  ;;  %v13094_v33 = vadd.f32 1.0, %v10162_v57  ;;  %vm13116_vm15 = vmor %vm1848_vm7, %vm1849_vm13 }
 0x183   :  { %v13097_v44 = vadd.f32 %v563_v16, %v11223_v23  ;;  %v1826_v48 = vsel %vm13014_vm6, %v1825_v4, %v1821_v54  ;;  %v1836_v11 = vsel %vm13089_vm14, %v12959_v36, %v1832_v28  ;;  %10169 = vpow2.f32 %v8927_v10 }
 0x184   :  { %v13105_v41 = vadd.f32 %v299_v59, %v11203_v5  ;;  %v1855_v1 = vor.u32 1.1754944e-38, %v1854_v35  ;;  %v1867_v20 = vand.u32 2147483647, %v12907_v58  ;;  %v1869_v3 = vand.u32 2147483648, %v12907_v58 }
 0x185   :  { %10171 = vrcp.f32 %v13094_v33  ;;  %v1862_v36 = vadd.f32 %v12988_v15, %v1861_v8  ;;  %vm1864_vm1 = vweird.f32 %v12988_v15  ;;  %v8928_v56 = vmul.f32 -1.442695, %v13097_v44 }
 0x186   :  { %19674 = vst [vmem:[#allocation31_spill] sm:$0xff] %v13105_v41  ;;  %v13110_v17 = vpop.eup %10163  ;;  %v13124_v61 = vadd.f32 %v388_v32, %v11205_v6  ;;  %v3088_v38 = vmul.f32 %v1811_v42, %v12728_v29  ;;  %v3089_v0 = vmul.f32 %v1826_v48, %v12731_v34  ;;  %v1841_v18 = vsel %vm13031_vm8, %v13018_v50, %v1836_v11  ;;  %vm13144_vm2 = vmor %vm1863_vm12, %vm1864_vm1  ;;  %v19687_v34 = vld [vmem:[#allocation18_spill] sm:$0xff] }
 0x187   :  { %v10166_v35 = vpop.eup %10165  ;;  %v1851_v25 = vsel %vm13116_vm15, %v12963_v39, %v1847_v55  ;;  %v1874_v16 = vmul.f32 %v13110_v17, %v13035_v45  ;;  %10173 = vpow2.f32 %v8928_v56  ;;  %v8929_v59 = vmul.f32 -1.442695, %v13105_v41  ;;  %4026 = vmatmul.bf16.gmra.mxu0 %v11900_v30 }
 0x188   :  { %v10168_v28 = vpop.eup %10167  ;;  %v13136_v54 = vadd.f32 1.0, %v10166_v35  ;;  %v13140_v29 = vpack.c.bf16 %v3087_v2, %v12929_v40  ;;  %vm13148_vm3 = vcmp.eq.f32.partialorder %v1867_v20, 8.507059e+37  ;;  %v1870_v50 = vor.u32 1.1754944e-38, %v1869_v3 }
 0x189   :  { %v13152_v19 = vadd.f32 1.0, %v10168_v28  ;;  %v10170_v57 = vpop.eup %10169  ;;  %v1856_v8 = vsel %vm13073_vm11, %v1855_v1, %v1851_v25  ;;  %v1866_v40 = vsel %vm13144_vm2, %v12988_v15, %v1862_v36  ;;  %v8930_v58 = vmul.f32 -1.442695, %v13124_v61  ;;  %v19686_v25 = vld [vmem:[#allocation17_spill] sm:$0xff]  ;;  %4293 = vmatmul.bf16.gmra.mxu3 %v19687_v34 }
 0x18a   :  { %19677 = vst [vmem:[#allocation32_spill] sm:$0xff] %v13140_v29  ;;  %10175 = vrcp.f32 %v13136_v54  ;;  %v13164_v10 = vpack.c.bf16 %v3088_v38, %v12938_v47  ;;  %v13167_v42 = vpack.c.bf16 %v3089_v0, %v12966_v7  ;;  %v3090_v62 = vmul.f32 %v1841_v18, %v12781_v43  ;;  %v566_v43 = vpop.f32.mrf.mxu3  ;;  %4204 = vmatmul.bf16.gmra.mxu2 %v19686_v25 }
 0x18b   :  { %v13161_v2 = vpop.eup %10171  ;;  %10177 = vrcp.f32 %v13152_v19  ;;  %v1875_v55 = vsub.f32 1.0, %v1874_v16  ;;  %v1884_v15 = vand.u32 2147483648, %v13035_v45  ;;  %v13175_v48 = vmul.f32 %v1856_v8, %v12789_v9 }
 0x18c   :  { %19682 = vst [vmem:[#allocation33_spill] sm:$0xff] %v13164_v10  ;;  %v1889_v32 = vmul.f32 %v13161_v2, %v13094_v33  ;;  %10179 = vpow2.f32 %v8929_v59  ;;  %v1871_v47 = vsel %vm13148_vm3, %v1870_v50, %v1866_v40  ;;  %v1882_v7 = vand.u32 2147483647, %v13035_v45 }
 0x18d   :  { %19683 = vst [vmem:[#allocation34_spill] sm:$0xff] %v13167_v42  ;;  %v13180_v11 = vadd.f32 1.0, %v10170_v57  ;;  %v10174_v1 = vpop.eup %10173  ;;  %v1899_v3 = vand.u32 2147483648, %v13094_v33  ;;  %10181 = vpow2.f32 %v8930_v58  ;;  %v13184_v4 = vadd.f32 %v477_v27, %v11220_v22 }
 0x18e   :  { %v1890_v20 = vsub.f32 1.0, %v1889_v32  ;;  %v13187_v36 = vpack.c.bf16 %v3090_v62, %v12998_v21  ;;  %vm1878_vm4 = vweird.f32 %v13035_v45  ;;  %v1897_v9 = vand.u32 2147483647, %v13094_v33  ;;  %v19685_v21 = vld [vmem:[#allocation16_spill] sm:$0xff] }
 0x18f   :  { %10183 = vrcp.f32 %v13180_v11  ;;  %v13196_v35 = vmul.f32 %v1871_v47, %v12804_v26  ;;  %v1876_v38 = vmul.f32 %v13110_v17, %v1875_v55  ;;  %v1885_v0 = vor.u32 1.1754944e-38, %v1884_v15  ;;  %4115 = vmatmul.bf16.gmra.mxu1 %v19685_v21  ;;  %v301_v15 = vpop.f32.mrf.mxu0 }
 0x190   :  { %19684 = vst [vmem:[#allocation35_spill] sm:$0xff] %v13187_v36  ;;  %v13193_v56 = vpop.eup %10175  ;;  %v13200_v18 = vadd.f32 %v566_v43, %v11223_v23  ;;  %v1891_v16 = vmul.f32 %v13161_v2, %v1890_v20  ;;  %vm1893_vm5 = vweird.f32 %v13094_v33  ;;  %v13210_v59 = vadd.f32 1.0, %v10174_v1 }
 0x191   :  { %v13204_v28 = vpop.eup %10177  ;;  %v1904_v26 = vmul.f32 %v13193_v56, %v13136_v54  ;;  %vm1879_vm6 = vweird.f32 %v13110_v17  ;;  %vm13214_vm7 = vcmp.eq.f32.partialorder %v1882_v7, 8.507059e+37  ;;  %v1900_v57 = vor.u32 1.1754944e-38, %v1899_v3 }
 0x192   :  { %v10180_v39 = vpop.eup %10179  ;;  %v1919_v8 = vmul.f32 %v13204_v28, %v13152_v19  ;;  %v8931_v40 = vmul.f32 -1.442695, %v13184_v4  ;;  %vm13221_vm8 = vcmp.eq.f32.partialorder %v1897_v9, 8.507059e+37  ;;  %v1912_v27 = vand.u32 2147483647, %v13136_v54  ;;  %vm13252_vm0 = vmor %vm1878_vm4, %vm1879_vm6 }
 0x193   :  { %v1905_v62 = vsub.f32 1.0, %v1904_v26  ;;  %v1914_v55 = vand.u32 2147483648, %v13136_v54  ;;  %10185 = vrcp.f32 %v13210_v59  ;;  %v10182_v32 = vpop.eup %10181  ;;  %v1877_v47 = vadd.f32 %v13110_v17, %v1876_v38 }
 0x194   :  { %vm1894_vm9 = vweird.f32 %v13161_v2  ;;  %v1920_v7 = vsub.f32 1.0, %v1919_v8  ;;  %v13231_v43 = vmul.f32 -1.442695, %v13200_v18  ;;  %v1892_v20 = vadd.f32 %v13161_v2, %v1891_v16 }
 0x195   :  { %v13233_v1 = vpop.eup %10183  ;;  %v1906_v3 = vmul.f32 %v13193_v56, %v1905_v62  ;;  %v13237_v9 = vadd.f32 1.0, %v10180_v39  ;;  %v13239_v26 = vadd.f32 1.0, %v10182_v32  ;;  %vm1908_vm10 = vweird.f32 %v13136_v54  ;;  %vm13269_vm13 = vmor %vm1893_vm5, %vm1894_vm9  ;;  %v390_v32 = vpop.f32.mrf.mxu1 }
 0x196   :  { %v1927_v38 = vand.u32 2147483647, %v13152_v19  ;;  %v1934_v8 = vmul.f32 %v13233_v1, %v13180_v11  ;;  %v13246_v21 = vadd.f32 %v301_v15, %v11203_v5  ;;  %vm13256_vm11 = vcmp.eq.f32.partialorder %v1912_v27, 8.507059e+37 }
 0x197   :  { %v1915_v62 = vor.u32 1.1754944e-38, %v1914_v55  ;;  %vm1923_vm12 = vweird.f32 %v13152_v19  ;;  %10187 = vrcp.f32 %v13237_v9  ;;  %v1881_v15 = vsel %vm13252_vm0, %v13110_v17, %v1877_v47 }
 0x198   :  { %19692 = vst [vmem:[#allocation36_spill] sm:$0xff] %v13246_v21  ;;  %v1907_v27 = vadd.f32 %v13193_v56, %v1906_v3  ;;  %vm1909_vm14 = vweird.f32 %v13193_v56  ;;  %v1921_v55 = vmul.f32 %v13204_v28, %v1920_v7  ;;  %v1896_v17 = vsel %vm13269_vm13, %v13161_v2, %v1892_v20 }
 0x199   :  { %v13276_v34 = vpop.eup %10185  ;;  %v1929_v47 = vand.u32 2147483648, %v13152_v19  ;;  %v1935_v33 = vsub.f32 1.0, %v1934_v8  ;;  %10189 = vrcp.f32 %v13239_v26  ;;  %vm13283_vm15 = vcmp.eq.f32.partialorder %v1927_v38, 8.507059e+37  ;;  %vm13295_vm1 = vmor %vm1908_vm10, %vm1909_vm14 }
 0x19a   :  { %v1944_v3 = vand.u32 2147483648, %v13180_v11  ;;  %v1949_v7 = vmul.f32 %v13276_v34, %v13210_v59  ;;  %v8933_v25 = vmul.f32 -1.442695, %v13246_v21  ;;  %v1886_v45 = vsel %vm13214_vm7, %v1885_v0, %v1881_v15  ;;  %4209 = vmatmul.bf16.gmra.mxu2 %v12281_v14 }
 0x19b   :  { %vm1924_vm2 = vweird.f32 %v13204_v28  ;;  %v1942_v20 = vand.u32 2147483647, %v13180_v11  ;;  %v13302_v38 = vadd.f32 %v390_v32, %v11205_v6  ;;  %v1901_v8 = vsel %vm13221_vm8, %v1900_v57, %v1896_v17 }
 0x19c   :  { %v1911_v0 = vsel %vm13295_vm1, %v13193_v56, %v1907_v27  ;;  %v1922_v54 = vadd.f32 %v13204_v28, %v1921_v55  ;;  %v1959_v50 = vand.u32 2147483648, %v13210_v59  ;;  %v1930_v30 = vor.u32 1.1754944e-38, %v1929_v47  ;;  %v479_v27 = vpop.f32.mrf.mxu2  ;;  %vm13331_vm4 = vmor %vm1923_vm12, %vm1924_vm2 }
 0x19d   :  { %v13311_v15 = vpop.eup %10187  ;;  %v1936_v53 = vmul.f32 %v13233_v1, %v1935_v33  ;;  %vm1938_vm3 = vweird.f32 %v13180_v11  ;;  %10191 = vpow2.f32 %v8931_v40  ;;  %v13316_v32 = vmul.f32 %v1886_v45, %v12917_v12  ;;  %v19707_v33 = vld [vmem:[#allocation19_spill] sm:$0xff]  ;;  %v19710_v45 = vld [vmem:[#allocation20_spill] sm:$0xff] }
 0x19e   :  { %v1945_v57 = vor.u32 1.1754944e-38, %v1944_v3  ;;  %v1950_v58 = vsub.f32 1.0, %v1949_v7  ;;  %v1964_v56 = vmul.f32 %v13311_v15, %v13237_v9  ;;  %v13323_v17 = vmul.f32 %v1901_v8, %v12995_v46  ;;  %4031 = vmatmul.bf16.gmra.mxu0 %v19707_v33  ;;  %v568_v7 = vpop.f32.mrf.mxu3  ;;  %v19711_v8 = vld [vmem:[#allocation22_spill] sm:$0xff] }
 0x19f   :  { %19703 = vst [vmem:[#allocation37_spill] sm:$0xff] %v13316_v32  ;;  %v13320_v55 = vpop.eup %10189  ;;  %v1916_v47 = vsel %vm13256_vm11, %v1915_v62, %v1911_v0  ;;  %vm1939_vm5 = vweird.f32 %v13233_v1  ;;  %v1957_v40 = vand.u32 2147483647, %v13210_v59  ;;  %v1926_v46 = vsel %vm13331_vm4, %v13204_v28, %v1922_v54  ;;  %4120 = vmatmul.bf16.gmra.mxu1 %v19710_v45  ;;  %4298 = vmatmul.bf16.gmra.mxu3 %v19711_v8 }
 0x1a0   :  { %19704 = vst [vmem:[#allocation38_spill] sm:$0xff] %v13323_v17  ;;  %vm13341_vm6 = vcmp.eq.f32.partialorder %v1942_v20, 8.507059e+37  ;;  %vm1953_vm7 = vweird.f32 %v13210_v59  ;;  %v13346_v19 = vor.u32 1.1754944e-38, %v1959_v50  ;;  %v1974_v62 = vand.u32 2147483648, %v13237_v9  ;;  %vm13372_vm9 = vmor %vm1938_vm3, %vm1939_vm5  ;;  %v304_v59 = vpop.f32.mrf.mxu0 }
 0x1a1   :  { %v1979_v3 = vmul.f32 %v13320_v55, %v13239_v26  ;;  %v1937_v28 = vadd.f32 %v13233_v1, %v1936_v53  ;;  %10193 = vpow2.f32 %v13231_v43  ;;  %v8934_v2 = vmul.f32 -1.442695, %v13302_v38 }
 0x1a2   :  { %v13357_v20 = vadd.f32 %v479_v27, %v11220_v22  ;;  %v3095_v0 = vmul.f32 %v1916_v47, %v13023_v13  ;;  %v1951_v54 = vmul.f32 %v13276_v34, %v1950_v58  ;;  %v1965_v50 = vsub.f32 1.0, %v1964_v56 }
 0x1a3   :  { %v1980_v12 = vsub.f32 1.0, %v1979_v3  ;;  %v10192_v45 = vpop.eup %10191  ;;  %v1931_v14 = vsel %vm13283_vm15, %v1930_v30, %v1926_v46  ;;  %vm1954_vm8 = vweird.f32 %v13276_v34  ;;  %10195 = vpow2.f32 %v8933_v25 }
 0x1a4   :  { %v13366_v53 = vadd.f32 %v568_v7, %v11223_v23  ;;  %vm13376_vm10 = vcmp.eq.f32.partialorder %v1957_v40, 8.507059e+37  ;;  %vm1968_vm0 = vweird.f32 %v13237_v9  ;;  %v1989_v25 = vand.u32 2147483648, %v13239_v26  ;;  %vm13416_vm14 = vmor %vm1953_vm7, %vm1954_vm8 }
 0x1a5   :  { %v1981_v30 = vmul.f32 %v13320_v55, %v1980_v12  ;;  %v13383_v16 = vadd.f32 1.0, %v10192_v45  ;;  %v8935_v58 = vmul.f32 -1.442695, %v13357_v20  ;;  %v1941_v11 = vsel %vm13372_vm9, %v13233_v1, %v1937_v28 }
 0x1a6   :  { %vm1984_vm11 = vweird.f32 %v13320_v55  ;;  %10197 = vpow2.f32 %v8934_v2  ;;  %v8936_v56 = vmul.f32 -1.442695, %v13366_v53  ;;  %v1952_v27 = vadd.f32 %v13276_v34, %v1951_v54 }
 0x1a7   :  { %v1966_v47 = vmul.f32 %v13311_v15, %v1965_v50  ;;  %v1982_v40 = vadd.f32 %v13320_v55, %v1981_v30  ;;  %10199 = vrcp.f32 %v13383_v16  ;;  %v10194_v46 = vpop.eup %10193  ;;  %v3096_v3 = vmul.f32 %v1931_v14, %v13029_v49 }
 0x1a8   :  { %vm1983_vm12 = vweird.f32 %v13239_v26  ;;  %v1987_v1 = vand.u32 2147483647, %v13239_v26  ;;  %v13400_v45 = vpack.c.bf16 %v3095_v0, %v13175_v48  ;;  %v13402_v28 = vor.u32 1.1754944e-38, %v1974_v62 }
 0x1a9   :  { %vm13404_vm13 = vmor %vm1983_vm12, %vm1984_vm11  ;;  %v13408_v54 = vadd.f32 1.0, %v10194_v46  ;;  %10201 = vpow2.f32 %v8935_v58  ;;  %v10196_v50 = vpop.eup %10195  ;;  %v1946_v14 = vsel %vm13341_vm6, %v1945_v57, %v1941_v11  ;;  %vm1969_vm15 = vweird.f32 %v13311_v15 }
 0x1aa   :  { %19716 = vst [vmem:[#allocation39_spill] sm:$0xff] %v13400_v45  ;;  %v1986_v48 = vsel %vm13404_vm13, %v13320_v55, %v1982_v40  ;;  %10203 = vpow2.f32 %v8936_v56  ;;  %v1956_v26 = vsel %vm13416_vm14, %v13276_v34, %v1952_v27  ;;  %v13428_v57 = vadd.f32 %v13311_v15, %v1966_v47  ;;  %v393_v55 = vpop.f32.mrf.mxu1  ;;  %vm13452_vm2 = vmor %vm1968_vm0, %vm1969_vm15 }
 0x1ab   :  { %v1990_v39 = vor.u32 1.1754944e-38, %v1989_v25  ;;  %10205 = vrcp.f32 %v13408_v54  ;;  %vm1988_vm1 = vcmp.eq.f32.partialorder %v1987_v1, 8.507059e+37  ;;  %v2002_v0 = vand.u32 2147483647, %v13383_v16 }
 0x1ac   :  { %v10198_v62 = vpop.eup %10197  ;;  %v2004_v12 = vand.u32 2147483648, %v13383_v16  ;;  %v13433_v13 = vadd.f32 1.0, %v10196_v50  ;;  %v13436_v58 = vpack.c.bf16 %v3096_v3, %v13196_v35  ;;  %v13439_v34 = vmul.f32 %v1946_v14, %v13039_v31  ;;  %v482_v50 = vpop.f32.mrf.mxu2 }
 0x1ad   :  { %v10200_v30 = vpop.eup %10199  ;;  %v1991_v25 = vsel %vm1988_vm1, %v1990_v39, %v1986_v48  ;;  %v13441_v11 = vadd.f32 1.0, %v10198_v62  ;;  %v13446_v56 = vsel %vm13376_vm10, %v13346_v19, %v1956_v26  ;;  %v13459_v31 = vadd.f32 %v304_v59, %v11203_v5 }
 0x1ae   :  { %19721 = vst [vmem:[#allocation40_spill] sm:$0xff] %v13436_v58  ;;  %v1994_v35 = vmul.f32 %v10200_v30, %v13383_v16  ;;  %10207 = vrcp.f32 %v13433_v13  ;;  %vm1998_vm3 = vweird.f32 %v13383_v16  ;;  %v13468_v43 = vadd.f32 %v393_v55, %v11205_v6  ;;  %4036 = vmatmul.bf16.gmra.mxu0 %v12511_v37  ;;  %v19728_v55 = vld [vmem:[#allocation26_spill] sm:$0xff]  ;;  %v306_v58 = vpop.f32.mrf.mxu0 }
 0x1af   :  { %19722 = vst [vmem:[#allocation41_spill] sm:$0xff] %v13439_v34  ;;  %v10202_v47 = vpop.eup %10201  ;;  %10209 = vrcp.f32 %v13441_v11  ;;  %v13471_v46 = vmul.f32 %v1991_v25, %v13124_v61  ;;  %vm13473_vm4 = vcmp.eq.f32.partialorder %v2002_v0, 8.507059e+37  ;;  %v2005_v2 = vor.u32 1.1754944e-38, %v2004_v12  ;;  %4125 = vmatmul.bf16.gmra.mxu1 %v12600_v52  ;;  %v19727_v61 = vld [vmem:[#allocation25_spill] sm:$0xff]  ;;  %v571_v12 = vpop.f32.mrf.mxu3  ;;  %4303 = vmatmul.bf16.gmra.mxu3 %v19728_v55 }
 0x1b0   :  { %v10204_v40 = vpop.eup %10203  ;;  %v1995_v3 = vsub.f32 1.0, %v1994_v35  ;;  %v2017_v49 = vand.u32 2147483647, %v13408_v54  ;;  %v2019_v48 = vand.u32 2147483648, %v13408_v54  ;;  %v13482_v26 = vadd.f32 1.0, %v10202_v47  ;;  %4214 = vmatmul.bf16.gmra.mxu2 %v19727_v61 }
 0x1b1   :  { %v13478_v14 = vpop.eup %10205  ;;  %v13484_v39 = vadd.f32 1.0, %v10204_v40  ;;  %vm1999_vm5 = vweird.f32 %v10200_v30  ;;  %v8937_v0 = vmul.f32 -1.442695, %v13459_v31  ;;  %vm2013_vm6 = vweird.f32 %v13408_v54 }
 0x1b2   :  { %v1996_v59 = vmul.f32 %v10200_v30, %v1995_v3  ;;  %v2009_v62 = vmul.f32 %v13478_v14, %v13408_v54  ;;  %v2047_v25 = vand.u32 2147483647, %v13441_v11  ;;  %10211 = vrcp.f32 %v13482_v26  ;;  %vm2000_vm7 = vmor %vm1998_vm3, %vm1999_vm5 }
 0x1b3   :  { %v8938_v35 = vmul.f32 -1.442695, %v13468_v43  ;;  %v13497_v47 = vadd.f32 %v482_v50, %v11220_v22  ;;  %v2049_v7 = vand.u32 2147483648, %v13441_v11  ;;  %10213 = vrcp.f32 %v13484_v39 }
 0x1b4   :  { %v13499_v40 = vpop.eup %10207  ;;  %v1997_v3 = vadd.f32 %v10200_v30, %v1996_v59  ;;  %v2010_v19 = vsub.f32 1.0, %v2009_v62  ;;  %v13508_v55 = vor.u32 1.1754944e-38, %v2019_v48  ;;  %v2062_v61 = vand.u32 2147483647, %v13482_v26  ;;  %v19740_v48 = vld [vmem:[#allocation27_spill] sm:$0xff] }
 0x1b5   :  { %v13503_v52 = vpop.eup %10209  ;;  %v2024_v50 = vmul.f32 %v13499_v40, %v13433_v13  ;;  %v13514_v59 = vadd.f32 %v571_v12, %v11223_v23  ;;  %v2064_v33 = vand.u32 2147483648, %v13482_v26  ;;  %vm2014_vm8 = vweird.f32 %v13478_v14  ;;  %v9881_v12 = vld [vmem:[#allocation2 + $0x2e4] sm:$0xf] }
 0x1b6   :  { %v2001_v62 = vsel %vm2000_vm7, %v10200_v30, %v1997_v3  ;;  %v2011_v37 = vmul.f32 %v13478_v14, %v2010_v19  ;;  %v2039_v8 = vmul.f32 %v13503_v52, %v13441_v11  ;;  %vm2043_vm9 = vweird.f32 %v13441_v11  ;;  %vm13559_vm1 = vmor %vm2013_vm6, %vm2014_vm8 }
 0x1b7   :  { %vm13523_vm10 = vcmp.eq.f32.partialorder %v2047_v25, 8.507059e+37  ;;  %v2006_v30 = vsel %vm13473_vm4, %v2005_v2, %v2001_v62  ;;  %vm13529_vm0 = vcmp.eq.f32.partialorder %v2017_v49, 8.507059e+37  ;;  %v2025_v3 = vsub.f32 1.0, %v2024_v50  ;;  %v9817_v49 = vld [vmem:[#allocation2 + $0xe4] sm:$0xf] }
 0x1b8   :  { %v2040_v24 = vsub.f32 1.0, %v2039_v8  ;;  %v2050_v51 = vor.u32 1.1754944e-38, %v2049_v7  ;;  %v13533_v17 = vpop.eup %10211  ;;  %v2012_v16 = vadd.f32 %v13478_v14, %v2011_v37  ;;  %vm2058_vm11 = vweird.f32 %v13482_v26  ;;  %v9117_v37 = vld [vmem:[#allocation2 + $0xf0] sm:$0xf0] }
 0x1b9   :  { %10215 = vpow2.f32 %v8937_v0  ;;  %v9376_v25 = vor.u32 %v9881_v12, %v9373_v60  ;;  %v13537_v41 = vpop.eup %10213  ;;  %vm2044_vm12 = vweird.f32 %v13503_v52  ;;  %v2054_v2 = vmul.f32 %v13533_v17, %v13482_v26  ;;  %v9501_v0 = vld [vmem:[#allocation2 + $0x3f0] sm:$0xf0] }
 0x1ba   :  { %v2041_v1 = vmul.f32 %v13503_v52, %v2040_v24  ;;  %vm13543_vm13 = vcmp.eq.f32.partialorder %v2062_v61, 8.507059e+37  ;;  %v2065_v7 = vor.u32 1.1754944e-38, %v2064_v33  ;;  %v13548_v50 = vmul.f32 %v2006_v30, %v13184_v4  ;;  %v9913_v61 = vld [vmem:[#allocation2 + $0x3e4] sm:$0xf]  ;;  %vm2045_vm5 = vmor %vm2043_vm9, %vm2044_vm12 }
 0x1bb   :  { %vm2029_vm14 = vweird.f32 %v13499_v40  ;;  %v2069_v60 = vmul.f32 %v13537_v41, %v13484_v39  ;;  %vm2073_vm15 = vweird.f32 %v13484_v39  ;;  %v2077_v24 = vand.u32 2147483647, %v13484_v39  ;;  %4547 = vmatpush.bf16.msra.mxu2 %v9376_v25  ;;  %v9849_v33 = vld [vmem:[#allocation2 + $0x1e4] sm:$0xf] }
 0x1bc   :  { %v2026_v4 = vmul.f32 %v13499_v40, %v2025_v3  ;;  %v2042_v62 = vadd.f32 %v13503_v52, %v2041_v1  ;;  %v2055_v12 = vsub.f32 1.0, %v2054_v2  ;;  %v2079_v30 = vand.u32 2147483648, %v13484_v39  ;;  %v395_v2 = vpop.f32.mrf.mxu1 }
 0x1bd   :  { %v19737_v25 = vand.u32 2147483647, %v13237_v9  ;;  %v2016_v54 = vsel %vm13559_vm1, %v13478_v14, %v2012_v16  ;;  %vm2028_vm4 = vweird.f32 %v13433_v13  ;;  %v2070_v3 = vsub.f32 1.0, %v2069_v60  ;;  %v9245_v14 = vld [vmem:[#allocation2 + $0x1f0] sm:$0xf0] }
 0x1be   :  { %10217 = vpow2.f32 %v8938_v35  ;;  %v9120_v1 = vor.u32 %v9817_v49, %v9117_v37  ;;  %v2046_v9 = vsel %vm2045_vm5, %v13503_v52, %v2042_v62  ;;  %vm2059_vm6 = vweird.f32 %v13533_v17  ;;  %v484_v49 = vpop.f32.mrf.mxu2  ;;  %v573_v52 = vpop.f32.mrf.mxu3  ;;  %4041 = vmatmul.bf16.gmra.mxu0 %v19740_v48 }
 0x1bf   :  { %vm13568_vm3 = vcmp.eq.f32.partialorder %v19737_v25, 8.507059e+37  ;;  %v2056_v25 = vmul.f32 %v13533_v17, %v2055_v12  ;;  %v9504_v34 = vor.u32 %v9913_v61, %v9501_v0  ;;  %v10216_v16 = vpop.eup %10215  ;;  %v2051_v32 = vsel %vm13523_vm10, %v2050_v51, %v2046_v9  ;;  %vm2060_vm8 = vmor %vm2058_vm11, %vm2059_vm6  ;;  %4130 = vmatmul.bf16.gmra.mxu1 %v12849_v63 }
 0x1c0   :  { %v2071_v11 = vmul.f32 %v13537_v41, %v2070_v3  ;;  %vm2074_vm7 = vweird.f32 %v13537_v41  ;;  %4369 = vmatpush.bf16.msra.mxu0 %v9120_v1  ;;  %v8939_v35 = vmul.f32 -1.442695, %v13497_v47  ;;  %v3104_v37 = vmul.f32 %v2051_v32, %v13302_v38 }
 0x1c1   :  { %v2057_v60 = vadd.f32 %v13533_v17, %v2056_v25  ;;  %v13590_v61 = vadd.f32 1.0, %v10216_v16  ;;  %4636 = vmatpush.bf16.msra.mxu3 %v9504_v34  ;;  %v8940_v0 = vmul.f32 -1.442695, %v13514_v59  ;;  %v2021_v51 = vsel %vm13529_vm0, %v13508_v55, %v2016_v54  ;;  %v19741_v34 = vld [vmem:[#allocation29_spill] sm:$0xff]  ;;  %vm2075_vm9 = vmor %vm2073_vm15, %vm2074_vm7  ;;  %v19743_v55 = vld [vmem:[#allocation30_spill] sm:$0xff] }
 0x1c2   :  { %v2072_v38 = vadd.f32 %v13537_v41, %v2071_v11  ;;  %10219 = vpow2.f32 %v8939_v35  ;;  %v9248_v32 = vor.u32 %v9849_v33, %v9245_v14  ;;  %4219 = vmatmul.bf16.gmra.mxu2 %v19741_v34  ;;  %v13605_v62 = vpack.c.bf16 %v3104_v37, %v13471_v46  ;;  %4308 = vmatmul.bf16.gmra.mxu3 %v19743_v55  ;;  %vm13645_vm0 = vmor %vm2028_vm4, %vm2029_vm14 }
 0x1c3   :  { %v2061_v12 = vsel %vm2060_vm8, %v13533_v17, %v2057_v60  ;;  %v2080_v26 = vor.u32 1.1754944e-38, %v2079_v30  ;;  %10221 = vrcp.f32 %v13590_v61  ;;  %v2027_v54 = vadd.f32 %v13499_v40, %v2026_v4 }
 0x1c4   :  { %19742 = vst [vmem:[#allocation42_spill] sm:$0xff] %v13605_v62  ;;  %v10218_v19 = vpop.eup %10217  ;;  %v2066_v3 = vsel %vm13543_vm13, %v2065_v7, %v2061_v12  ;;  %v2076_v46 = vsel %vm2075_vm9, %v13537_v41, %v2072_v38  ;;  %vm2078_vm10 = vcmp.eq.f32.partialorder %v2077_v24, 8.507059e+37  ;;  %4458 = vmatpush.bf16.msra.mxu1 %v9248_v32  ;;  %10223 = vpow2.f32 %v8940_v0  ;;  %v13662_v27 = vpop.f32.mrf.mxu1 }
 0x1c5   :  { %v3105_v17 = vmul.f32 %v2066_v3, %v13357_v20  ;;  %v2081_v1 = vsel %vm2078_vm10, %v2080_v26, %v2076_v46  ;;  %v13619_v39 = vadd.f32 1.0, %v10218_v19  ;;  %v3102_v30 = vmul.f32 %v2021_v51, %v13200_v18 }
 0x1c6   :  { %v2032_v9 = vand.u32 2147483647, %v13433_v13  ;;  %v3106_v25 = vmul.f32 %v2081_v1, %v13366_v53  ;;  %v13625_v4 = vadd.f32 %v306_v58, %v11203_v5  ;;  %v13629_v41 = vmul.f32 %v13446_v56, %v13097_v44  ;;  %v309_v58 = vpop.f32.mrf.mxu0  ;;  %v13677_v16 = vpop.f32.mrf.mxu2 }
 0x1c7   :  { %v19744_v20 = vsel %vm13452_vm2, %v13311_v15, %v13428_v57  ;;  %v13650_v44 = vpack.c.bf16 %v3105_v17, %v13548_v50  ;;  %10225 = vrcp.f32 %v13619_v39  ;;  %v2031_v21 = vsel %vm13645_vm0, %v13499_v40, %v2027_v54  ;;  %v13679_v11 = vpop.f32.mrf.mxu3 }
 0x1c8   :  { %v13639_v18 = vsel %vm13568_vm3, %v13402_v28, %v19744_v20  ;;  %v10220_v15 = vpop.eup %10219  ;;  %v13656_v28 = vpack.c.bf16 %v3106_v25, %v3102_v30  ;;  %v8941_v57 = vmul.f32 -1.442695, %v13625_v4  ;;  %v13660_v56 = vadd.f32 %v395_v2, %v11205_v6 }
 0x1c9   :  { %19747 = vst [vmem:[#allocation43_spill] sm:$0xff] %v13650_v44  ;;  %v13664_v8 = vpop.eup %10221  ;;  %v19749_v7 = vand.u32 2147483648, %v13433_v13  ;;  %v2094_v24 = vand.u32 2147483648, %v13590_v61  ;;  %v13669_v33 = vadd.f32 1.0, %v10220_v15  ;;  %v13672_v40 = vadd.f32 %v484_v49, %v11220_v22 }
 0x1ca   :  { %19748 = vst [vmem:[#allocation44_spill] sm:$0xff] %v13656_v28  ;;  %vm2033_vm2 = vcmp.eq.f32.partialorder %v2032_v9, 8.507059e+37  ;;  %v2084_v14 = vmul.f32 %v13664_v8, %v13590_v61  ;;  %v2092_v2 = vand.u32 2147483647, %v13590_v61  ;;  %10227 = vpow2.f32 %v8941_v57  ;;  %v10224_v13 = vpop.eup %10223 }
 0x1cb   :  { %v2035_v50 = vor.u32 1.1754944e-38, %v19749_v7  ;;  %v2107_v37 = vand.u32 2147483647, %v13619_v39  ;;  %10229 = vrcp.f32 %v13669_v33  ;;  %v13686_v49 = vadd.f32 %v573_v52, %v11223_v23 }
 0x1cc   :  { %v2085_v60 = vsub.f32 1.0, %v2084_v14  ;;  %v13688_v0 = vadd.f32 1.0, %v10224_v13  ;;  %v8942_v51 = vmul.f32 -1.442695, %v13660_v56  ;;  %v8943_v38 = vmul.f32 -1.442695, %v13672_v40  ;;  %v13731_v14 = vpop.f32.mrf.mxu1 }
 0x1cd   :  { %v13681_v35 = vsel %vm2033_vm2, %v2035_v50, %v2031_v21  ;;  %v13692_v32 = vpop.eup %10225  ;;  %vm2088_vm11 = vweird.f32 %v13590_v61  ;;  %v2095_v12 = vor.u32 1.1754944e-38, %v2094_v24  ;;  %v2109_v26 = vand.u32 2147483648, %v13619_v39 }
 0x1ce   :  { %v13697_v19 = vadd.f32 %v309_v58, %v11203_v5  ;;  %v2086_v52 = vmul.f32 %v13664_v8, %v2085_v60  ;;  %vm13700_vm12 = vcmp.eq.f32.partialorder %v2092_v2, 8.507059e+37  ;;  %v2099_v3 = vmul.f32 %v13692_v32, %v13619_v39  ;;  %v13723_v57 = vpop.f32.mrf.mxu0  ;;  %4046 = vmatmul.bf16.gmra.mxu0 %v13140_v29 }
 0x1cf   :  { %vm2103_vm13 = vweird.f32 %v13619_v39  ;;  %10231 = vrcp.f32 %v13688_v0  ;;  %vm2089_vm14 = vweird.f32 %v13664_v8  ;;  %v2122_v46 = vand.u32 2147483647, %v13669_v33  ;;  %4135 = vmatmul.bf16.gmra.mxu1 %v13164_v10 }
 0x1d0   :  { %v2124_v17 = vand.u32 2147483648, %v13669_v33  ;;  %10233 = vpow2.f32 %v8942_v51  ;;  %v10228_v1 = vpop.eup %10227  ;;  %v2087_v30 = vadd.f32 %v13664_v8, %v2086_v52  ;;  %v2100_v9 = vsub.f32 1.0, %v2099_v3  ;;  %vm13738_vm4 = vmor %vm2088_vm11, %vm2089_vm14  ;;  %v13754_v52 = vpop.f32.mrf.mxu2 }
 0x1d1   :  { %vm13712_vm15 = vcmp.eq.f32.partialorder %v2107_v37, 8.507059e+37  ;;  %10235 = vpow2.f32 %v8943_v38  ;;  %v8944_v20 = vmul.f32 -1.442695, %v13686_v49  ;;  %v13717_v53 = vpop.eup %10229  ;;  %v2110_v58 = vor.u32 1.1754944e-38, %v2109_v26  ;;  %v13756_v3 = vpop.f32.mrf.mxu3 }
 0x1d2   :  { %vm2118_vm1 = vweird.f32 %v13669_v33  ;;  %v13720_v15 = vadd.f32 1.0, %v10228_v1  ;;  %v8945_v21 = vmul.f32 -1.442695, %v13697_v19  ;;  %v2101_v7 = vmul.f32 %v13692_v32, %v2100_v9  ;;  %4224 = vmatmul.bf16.gmra.mxu2 %v13167_v42  ;;  %4313 = vmatmul.bf16.gmra.mxu3 %v13187_v36 }
 0x1d3   :  { %vm2104_vm3 = vweird.f32 %v13692_v32  ;;  %v2114_v50 = vmul.f32 %v13717_v53, %v13669_v33  ;;  %v2137_v24 = vand.u32 2147483647, %v13688_v0  ;;  %vm13742_vm5 = vcmp.eq.f32.partialorder %v2122_v46, 8.507059e+37 }
 0x1d4   :  { %v2125_v37 = vor.u32 1.1754944e-38, %v2124_v17  ;;  %v2139_v60 = vand.u32 2147483648, %v13688_v0  ;;  %10237 = vrcp.f32 %v13720_v15  ;;  %v2091_v38 = vsel %vm13738_vm4, %v13664_v8, %v2087_v30  ;;  %vm13764_vm6 = vmor %vm2103_vm13, %vm2104_vm3 }
 0x1d5   :  { %v13748_v51 = vpop.eup %10231  ;;  %v2102_v61 = vadd.f32 %v13692_v32, %v2101_v7  ;;  %v2115_v26 = vsub.f32 1.0, %v2114_v50  ;;  %10239 = vpow2.f32 %v8944_v20  ;;  %vm2119_vm7 = vweird.f32 %v13717_v53 }
 0x1d6   :  { %v10234_v46 = vpop.eup %10233  ;;  %v2129_v8 = vmul.f32 %v13748_v51, %v13688_v0  ;;  %vm2133_vm8 = vweird.f32 %v13688_v0  ;;  %10241 = vpow2.f32 %v8945_v21  ;;  %vm13776_vm9 = vcmp.eq.f32.partialorder %v2137_v24, 8.507059e+37  ;;  %vm13797_vm0 = vmor %vm2118_vm1, %vm2119_vm7 }
 0x1d7   :  { %v10236_v1 = vpop.eup %10235  ;;  %v2106_v30 = vsel %vm13764_vm6, %v13692_v32, %v2102_v61  ;;  %v2116_v9 = vmul.f32 %v13717_v53, %v2115_v26  ;;  %v2152_v20 = vand.u32 2147483647, %v13720_v15  ;;  %v13781_v7 = vadd.f32 1.0, %v10234_v46 }
 0x1d8   :  { %v2096_v50 = vsel %vm13700_vm12, %v2095_v12, %v2091_v38  ;;  %v2130_v2 = vsub.f32 1.0, %v2129_v8  ;;  %v2154_v21 = vand.u32 2147483648, %v13720_v15  ;;  %v13786_v10 = vadd.f32 1.0, %v10236_v1 }
 0x1d9   :  { %v2117_v32 = vadd.f32 %v13717_v53, %v2116_v9  ;;  %v2140_v61 = vor.u32 1.1754944e-38, %v2139_v60  ;;  %vm2148_vm10 = vweird.f32 %v13720_v15  ;;  %10243 = vrcp.f32 %v13781_v7 }
 0x1da   :  { %v10238_v24 = vpop.eup %10237  ;;  %v2111_v26 = vsel %vm13712_vm15, %v2110_v58, %v2106_v30  ;;  %v2131_v54 = vmul.f32 %v13748_v51, %v2130_v2  ;;  %vm2134_vm2 = vweird.f32 %v13748_v51  ;;  %10245 = vrcp.f32 %v13786_v10 }
 0x1db   :  { %v10240_v60 = vpop.eup %10239  ;;  %v3107_v38 = vmul.f32 %v2096_v50, %v13459_v31  ;;  %v2121_v25 = vsel %vm13797_vm0, %v13717_v53, %v2117_v32  ;;  %v2144_v58 = vmul.f32 %v10238_v24, %v13720_v15  ;;  %vm13809_vm11 = vcmp.eq.f32.partialorder %v2152_v20, 8.507059e+37  ;;  %vm2135_vm12 = vmor %vm2133_vm8, %vm2134_vm2 }
 0x1dc   :  { %v10242_v46 = vpop.eup %10241  ;;  %v2132_v17 = vadd.f32 %v13748_v51, %v2131_v54  ;;  %v2155_v8 = vor.u32 1.1754944e-38, %v2154_v21  ;;  %v2167_v1 = vand.u32 2147483647, %v13781_v7  ;;  %v13817_v30 = vadd.f32 %v13662_v27, %v11205_v6 }
 0x1dd   :  { %v13820_v31 = vmul.f32 %v2111_v26, %v13468_v43  ;;  %v2126_v53 = vsel %vm13742_vm5, %v2125_v37, %v2121_v25  ;;  %v2145_v9 = vsub.f32 1.0, %v2144_v58  ;;  %v2169_v20 = vand.u32 2147483648, %v13781_v7 }
 0x1de   :  { %v2136_v50 = vsel %vm2135_vm12, %v13748_v51, %v2132_v17  ;;  %vm2163_vm13 = vweird.f32 %v13781_v7  ;;  %v2182_v2 = vand.u32 2147483647, %v13786_v10  ;;  %v13830_v27 = vadd.f32 1.0, %v10240_v60 }
 0x1df   :  { %v13832_v21 = vadd.f32 1.0, %v10242_v46  ;;  %v10244_v43 = vpop.eup %10243  ;;  %v2146_v32 = vmul.f32 %v10238_v24, %v2145_v9  ;;  %vm2149_vm14 = vweird.f32 %v10238_v24  ;;  %vm2178_vm15 = vweird.f32 %v13786_v10 }
 0x1e0   :  { %v2184_v0 = vand.u32 2147483648, %v13786_v10  ;;  %v10246_v13 = vpop.eup %10245  ;;  %v2141_v37 = vsel %vm13776_vm9, %v2140_v61, %v2136_v50  ;;  %v2159_v51 = vmul.f32 %v10244_v43, %v13781_v7  ;;  %vm13839_vm1 = vcmp.eq.f32.partialorder %v2167_v1, 8.507059e+37  ;;  %vm2150_vm3 = vmor %vm2148_vm10, %vm2149_vm14 }
 0x1e1   :  { %10247 = vrcp.f32 %v13830_v27  ;;  %v3109_v12 = vmul.f32 %v2126_v53, %v13497_v47  ;;  %v2147_v54 = vadd.f32 %v10238_v24, %v2146_v32  ;;  %v2170_v60 = vor.u32 1.1754944e-38, %v2169_v20 }
 0x1e2   :  { %v2174_v25 = vmul.f32 %v10246_v13, %v13786_v10  ;;  %v2160_v58 = vsub.f32 1.0, %v2159_v51  ;;  %vm13848_vm4 = vcmp.eq.f32.partialorder %v2182_v2, 8.507059e+37  ;;  %10249 = vrcp.f32 %v13832_v21  ;;  %v13862_v2 = vpop.f32.mrf.mxu0 }
 0x1e3   :  { %v8946_v61 = vmul.f32 -1.442695, %v13817_v30  ;;  %v13855_v46 = vmul.f32 %v2141_v37, %v13514_v59  ;;  %v2151_v47 = vsel %vm2150_vm3, %v10238_v24, %v2147_v54  ;;  %v2185_v1 = vor.u32 1.1754944e-38, %v2184_v0 }
 0x1e4   :  { %v2175_v17 = vsub.f32 1.0, %v2174_v25  ;;  %v2156_v53 = vsel %vm13809_vm11, %v2155_v8, %v2151_v47  ;;  %v2161_v15 = vmul.f32 %v10244_v43, %v2160_v58  ;;  %vm2164_vm5 = vweird.f32 %v10244_v43 }
 0x1e5   :  { %v2197_v9 = vand.u32 2147483647, %v13830_v27  ;;  %v3111_v20 = vmul.f32 %v2156_v53, %v13625_v4  ;;  %vm2179_vm6 = vweird.f32 %v10246_v13  ;;  %vm2193_vm7 = vweird.f32 %v13830_v27  ;;  %vm2165_vm8 = vmor %vm2163_vm13, %vm2164_vm5 }
 0x1e6   :  { %v2176_v50 = vmul.f32 %v10246_v13, %v2175_v17  ;;  %v2162_v32 = vadd.f32 %v10244_v43, %v2161_v15  ;;  %10251 = vpow2.f32 %v8946_v61  ;;  %v13866_v24 = vadd.f32 %v13677_v16, %v11220_v22  ;;  %vm2180_vm9 = vmor %vm2178_vm15, %vm2179_vm6 }
 0x1e7   :  { %v10248_v59 = vpop.eup %10247  ;;  %v13870_v33 = vadd.f32 %v13679_v11, %v11223_v23  ;;  %v13872_v8 = vpack.c.bf16 %v3111_v20, %v3107_v38  ;;  %v2199_v37 = vand.u32 2147483648, %v13830_v27  ;;  %vm13883_vm10 = vcmp.eq.f32.partialorder %v2197_v9, 8.507059e+37  ;;  %v13890_v38 = vpop.f32.mrf.mxu1 }
 0x1e8   :  { %v2177_v4 = vadd.f32 %v10246_v13, %v2176_v50  ;;  %v2189_v0 = vmul.f32 %v10248_v59, %v13830_v27  ;;  %v13878_v51 = vpop.eup %10249  ;;  %v2166_v54 = vsel %vm2165_vm8, %v10244_v43, %v2162_v32  ;;  %vm2208_vm0 = vweird.f32 %v13832_v21 }
 0x1e9   :  { %19770 = vst [vmem:[#allocation45_spill] sm:$0xff] %v13872_v8  ;;  %v8947_v11 = vmul.f32 -1.442695, %v13866_v24  ;;  %v8948_v7 = vmul.f32 -1.442695, %v13870_v33  ;;  %v2171_v25 = vsel %vm13839_vm1, %v2170_v60, %v2166_v54  ;;  %v2204_v10 = vmul.f32 %v13878_v51, %v13832_v21 }
 0x1ea   :  { %v2181_v43 = vsel %vm2180_vm9, %v10246_v13, %v2177_v4  ;;  %v2190_v58 = vsub.f32 1.0, %v2189_v0  ;;  %v3112_v61 = vmul.f32 %v2171_v25, %v13660_v56  ;;  %vm2194_vm2 = vweird.f32 %v10248_v59  ;;  %v13929_v32 = vpop.f32.mrf.mxu0  ;;  %4051 = vmatmul.bf16.gmra.mxu0 %v13400_v45  ;;  %v13951_v25 = vpop.f32.mrf.mxu2 }
 0x1eb   :  { %v2186_v47 = vsel %vm13848_vm4, %v2185_v1, %v2181_v43  ;;  %10253 = vpow2.f32 %v8947_v11  ;;  %v2205_v15 = vsub.f32 1.0, %v2204_v10  ;;  %v13905_v13 = vadd.f32 %v13723_v57, %v11203_v5  ;;  %vm2195_vm11 = vmor %vm2193_vm7, %vm2194_vm2  ;;  %v19777_v43 = vld [vmem:[#allocation37_spill] sm:$0xff]  ;;  %v19780_v10 = vld [vmem:[#allocation36_spill] sm:$0xff] }
 0x1ec   :  { %v3113_v17 = vmul.f32 %v2186_v47, %v13672_v40  ;;  %v2191_v53 = vmul.f32 %v10248_v59, %v2190_v58  ;;  %10255 = vpow2.f32 %v8948_v7  ;;  %v10252_v9 = vpop.eup %10251  ;;  %v13901_v26 = vpack.c.bf16 %v3112_v61, %v13820_v31  ;;  %v19778_v58 = vld [vmem:[#allocation41_spill] sm:$0xff] }
 0x1ed   :  { %v13909_v56 = vadd.f32 %v13731_v14, %v11205_v6  ;;  %v13913_v60 = vadd.f32 %v13754_v52, %v11220_v22  ;;  %v2206_v1 = vmul.f32 %v13878_v51, %v2205_v15  ;;  %v13918_v20 = vadd.f32 1.0, %v10252_v9  ;;  %v19782_v15 = vld [vmem:[#allocation31_spill] sm:$0xff] }
 0x1ee   :  { %19773 = vst [vmem:[#allocation46_spill] sm:$0xff] %v13901_v26  ;;  %v13915_v40 = vpack.c.bf16 %v3113_v17, %v3109_v12  ;;  %v2192_v39 = vadd.f32 %v10248_v59, %v2191_v53  ;;  %v2200_v57 = vor.u32 1.1754944e-38, %v2199_v37  ;;  %vm2209_vm12 = vweird.f32 %v13878_v51  ;;  %v13964_v17 = vpop.f32.mrf.mxu3 }
 0x1ef   :  { %v8949_v14 = vmul.f32 -1.442695, %v13905_v13  ;;  %v8950_v31 = vmul.f32 -1.442695, %v13909_v56  ;;  %v2207_v12 = vadd.f32 %v13878_v51, %v2206_v1  ;;  %v2214_v50 = vand.u32 2147483648, %v13832_v21  ;;  %vm13941_vm13 = vmor %vm2208_vm0, %vm2209_vm12  ;;  %v13966_v53 = vpop.f32.mrf.mxu1 }
 0x1f0   :  { %19774 = vst [vmem:[#allocation47_spill] sm:$0xff] %v13915_v40  ;;  %v2196_v52 = vsel %vm2195_vm11, %v10248_v59, %v2192_v39  ;;  %10257 = vrcp.f32 %v13918_v20  ;;  %v2212_v0 = vand.u32 2147483647, %v13832_v21  ;;  %v8951_v37 = vmul.f32 -1.442695, %v13913_v60 }
 0x1f1   :  { %v10254_v27 = vpop.eup %10253  ;;  %v2201_v4 = vsel %vm13883_vm10, %v2200_v57, %v2196_v52  ;;  %10259 = vpow2.f32 %v8949_v14  ;;  %v13949_v16 = vadd.f32 %v13756_v3, %v11223_v23  ;;  %v3103_v21 = vmul.f32 %v13681_v35, %v19780_v10  ;;  %v19781_v3 = vld [vmem:[#allocation40_spill] sm:$0xff]  ;;  %v19784_v14 = vld [vmem:[#allocation38_spill] sm:$0xff] }
 0x1f2   :  { %v10256_v59 = vpop.eup %10255  ;;  %v3114_v54 = vmul.f32 %v2201_v4, %v13686_v49  ;;  %v13945_v7 = vadd.f32 1.0, %v10254_v27  ;;  %10261 = vpow2.f32 %v8950_v31  ;;  %v13955_v49 = vpack.c.bf16 %v19778_v58, %v19777_v43  ;;  %4140 = vmatmul.bf16.gmra.mxu1 %v19781_v3 }
 0x1f3   :  { %v2211_v61 = vsel %vm13941_vm13, %v13878_v51, %v2207_v12  ;;  %v13962_v47 = vadd.f32 1.0, %v10256_v59  ;;  %v3099_v9 = vmul.f32 %v13639_v18, %v19782_v15  ;;  %v2215_v1 = vor.u32 1.1754944e-38, %v2214_v50 }
 0x1f4   :  { %19779 = vst [vmem:[#allocation37_spill] sm:$0xff] %v13955_v49  ;;  %v13972_v39 = vpack.c.bf16 %v3114_v54, %v13855_v46  ;;  %10263 = vrcp.f32 %v13945_v7  ;;  %vm2213_vm14 = vcmp.eq.f32.partialorder %v2212_v0, 8.507059e+37  ;;  %v2227_v35 = vand.u32 2147483647, %v13918_v20 }
 0x1f5   :  { %v2229_v51 = vand.u32 2147483648, %v13918_v20  ;;  %10265 = vrcp.f32 %v13962_v47  ;;  %v13982_v31 = vpack.c.bf16 %v13629_v41, %v19784_v14  ;;  %v2216_v18 = vsel %vm2213_vm14, %v2215_v1, %v2211_v61 }
 0x1f6   :  { %19783 = vst [vmem:[#allocation41_spill] sm:$0xff] %v13972_v39  ;;  %v13978_v57 = vpop.eup %10257  ;;  %10267 = vpow2.f32 %v8951_v37  ;;  %v8952_v46 = vmul.f32 -1.442695, %v13949_v16  ;;  %v13985_v12 = vpack.c.bf16 %v3103_v21, %v3099_v9  ;;  %vm2223_vm15 = vweird.f32 %v13918_v20 }
 0x1f7   :  { %19785 = vst [vmem:[#allocation36_spill] sm:$0xff] %v13982_v31  ;;  %v10260_v52 = vpop.eup %10259  ;;  %v2219_v50 = vmul.f32 %v13978_v57, %v13918_v20  ;;  %v2242_v27 = vand.u32 2147483647, %v13945_v7  ;;  %v2244_v0 = vand.u32 2147483648, %v13945_v7  ;;  %v2259_v41 = vand.u32 2147483648, %v13962_v47 }
 0x1f8   :  { %19786 = vst [vmem:[#allocation31_spill] sm:$0xff] %v13985_v12  ;;  %v10262_v4 = vpop.eup %10261  ;;  %v13993_v59 = vadd.f32 1.0, %v10260_v52  ;;  %10269 = vpow2.f32 %v8952_v46  ;;  %v13996_v37 = vmul.f32 %v2216_v18, %v13697_v19  ;;  %vm13998_vm1 = vcmp.eq.f32.partialorder %v2227_v35, 8.507059e+37 }
 0x1f9   :  { %v2220_v54 = vsub.f32 1.0, %v2219_v50  ;;  %v2230_v43 = vor.u32 1.1754944e-38, %v2229_v51  ;;  %v14002_v58 = vadd.f32 1.0, %v10262_v4  ;;  %vm2224_vm3 = vweird.f32 %v13978_v57 }
 0x1fa   :  { %v10264_v10 = vpop.eup %10263  ;;  %vm2238_vm4 = vweird.f32 %v13945_v7  ;;  %v2257_v21 = vand.u32 2147483647, %v13962_v47  ;;  %10271 = vrcp.f32 %v13993_v59  ;;  %vm14012_vm5 = vcmp.eq.f32.partialorder %v2242_v27, 8.507059e+37  ;;  %vm14043_vm7 = vmor %vm2223_vm15, %vm2224_vm3 }
 0x1fb   :  { %v14008_v61 = vpop.eup %10265  ;;  %v2221_v19 = vmul.f32 %v13978_v57, %v2220_v54  ;;  %v2234_v15 = vmul.f32 %v10264_v10, %v13945_v7  ;;  %vm2253_vm6 = vweird.f32 %v13962_v47  ;;  %v2274_v1 = vand.u32 2147483648, %v13993_v59  ;;  %v14033_v54 = vpop.f32.mrf.mxu2  ;;  %4229 = vmatmul.bf16.gmra.mxu2 %v13955_v49 }
 0x1fc   :  { %10273 = vrcp.f32 %v14002_v58  ;;  %v10268_v35 = vpop.eup %10267  ;;  %v2245_v51 = vor.u32 1.1754944e-38, %v2244_v0  ;;  %v2249_v14 = vmul.f32 %v14008_v61, %v13962_v47  ;;  %v14021_v18 = vor.u32 1.1754944e-38, %v2259_v41  ;;  %v14035_v0 = vpop.f32.mrf.mxu3  ;;  %4318 = vmatmul.bf16.gmra.mxu3 %v13982_v31 }
 0x1fd   :  { %v14025_v46 = vadd.f32 %v13862_v2, %v11203_v5  ;;  %v2222_v52 = vadd.f32 %v13978_v57, %v2221_v19  ;;  %v2235_v50 = vsub.f32 1.0, %v2234_v15  ;;  %v2272_v27 = vand.u32 2147483647, %v13993_v59  ;;  %v14125_v7 = vpop.f32.mrf.mxu0 }
 0x1fe   :  { %v14031_v4 = vadd.f32 %v13890_v38, %v11205_v6  ;;  %v10270_v41 = vpop.eup %10269  ;;  %vm2239_vm8 = vweird.f32 %v10264_v10  ;;  %v2250_v38 = vsub.f32 1.0, %v2249_v14  ;;  %v2287_v19 = vand.u32 2147483647, %v14002_v58 }
 0x1ff   :  { %v14048_v15 = vadd.f32 1.0, %v10268_v35  ;;  %v2226_v3 = vsel %vm14043_vm7, %v13978_v57, %v2222_v52  ;;  %v2236_v31 = vmul.f32 %v10264_v10, %v2235_v50  ;;  %vm2254_vm9 = vweird.f32 %v14008_v61  ;;  %vm2240_vm12 = vmor %vm2238_vm4, %vm2239_vm8 }
 0x200   :  { %vm14054_vm10 = vcmp.eq.f32.partialorder %v2257_v21, 8.507059e+37  ;;  %vm2268_vm0 = vweird.f32 %v13993_v59  ;;  %v2275_v20 = vor.u32 1.1754944e-38, %v2274_v1  ;;  %v10272_v45 = vpop.eup %10271  ;;  %v2251_v14 = vmul.f32 %v14008_v61, %v2250_v38  ;;  %vm14090_vm14 = vmor %vm2253_vm6, %vm2254_vm9 }
 0x201   :  { %v2289_v35 = vand.u32 2147483648, %v14002_v58  ;;  %10275 = vrcp.f32 %v14048_v15  ;;  %v14062_v36 = vadd.f32 1.0, %v10270_v41  ;;  %v2237_v52 = vadd.f32 %v10264_v10, %v2236_v31 }
 0x202   :  { %v10274_v57 = vpop.eup %10273  ;;  %v2264_v50 = vmul.f32 %v10272_v45, %v13993_v59  ;;  %vm14065_vm2 = vcmp.eq.f32.partialorder %v2272_v27, 8.507059e+37  ;;  %vm2283_vm11 = vweird.f32 %v14002_v58  ;;  %v8953_v1 = vmul.f32 -1.442695, %v14025_v46  ;;  %v9845_v27 = vld [vmem:[#allocation2 + $0x1c4] sm:$0xf] }
 0x203   :  { %v2231_v2 = vsel %vm13998_vm1, %v2230_v43, %v2226_v3  ;;  %v2252_v41 = vadd.f32 %v14008_v61, %v2251_v14  ;;  %v2279_v31 = vmul.f32 %v10274_v57, %v14002_v58  ;;  %vm14078_vm13 = vcmp.eq.f32.partialorder %v2287_v19, 8.507059e+37 }
 0x204   :  { %v2241_v38 = vsel %vm2240_vm12, %v10264_v10, %v2237_v52  ;;  %v2265_v42 = vsub.f32 1.0, %v2264_v50  ;;  %v2302_v29 = vand.u32 2147483647, %v14048_v15  ;;  %v2304_v63 = vand.u32 2147483648, %v14048_v15  ;;  %v9877_v52 = vld [vmem:[#allocation2 + $0x2c4] sm:$0xf] }
 0x205   :  { %v2246_v3 = vsel %vm14012_vm5, %v2245_v51, %v2241_v38  ;;  %v2280_v11 = vsub.f32 1.0, %v2279_v31  ;;  %v2290_v43 = vor.u32 1.1754944e-38, %v2289_v35  ;;  %10277 = vrcp.f32 %v14062_v36  ;;  %v9357_v35 = vld [vmem:[#allocation2 + $0x2d0] sm:$0xf0] }
 0x206   :  { %v3116_v10 = vmul.f32 %v2231_v2, %v13817_v30  ;;  %v2256_v19 = vsel %vm14090_vm14, %v14008_v61, %v2252_v41  ;;  %v2266_v9 = vmul.f32 %v10272_v45, %v2265_v42  ;;  %vm2269_vm15 = vweird.f32 %v10272_v45  ;;  %v9101_v38 = vld [vmem:[#allocation2 + $0xd0] sm:$0xf0] }
 0x207   :  { %v10276_v51 = vpop.eup %10275  ;;  %v14100_v14 = vmul.f32 %v2246_v3, %v13866_v24  ;;  %v2281_v47 = vmul.f32 %v10274_v57, %v2280_v11  ;;  %vm2284_vm1 = vweird.f32 %v10274_v57  ;;  %vm2298_vm3 = vweird.f32 %v14048_v15  ;;  %vm14115_vm5 = vmor %vm2268_vm0, %vm2269_vm15  ;;  %v9485_v3 = vld [vmem:[#allocation2 + $0x3d0] sm:$0xf0] }
 0x208   :  { %v2267_v50 = vadd.f32 %v10272_v45, %v2266_v9  ;;  %v2294_v31 = vmul.f32 %v10276_v51, %v14048_v15  ;;  %vm14104_vm4 = vcmp.eq.f32.partialorder %v2302_v29, 8.507059e+37  ;;  %v2305_v61 = vor.u32 1.1754944e-38, %v2304_v63  ;;  %v9813_v29 = vld [vmem:[#allocation2 + $0xc4] sm:$0xf]  ;;  %vm2285_vm6 = vmor %vm2283_vm11, %vm2284_vm1 }
 0x209   :  { %v14111_v42 = vsel %vm14054_vm10, %v14021_v18, %v2256_v19  ;;  %v2282_v2 = vadd.f32 %v10274_v57, %v2281_v47  ;;  %10279 = vpow2.f32 %v8953_v1  ;;  %v8954_v41 = vmul.f32 -1.442695, %v14031_v4  ;;  %v9909_v18 = vld [vmem:[#allocation2 + $0x3c4] sm:$0xf] }
 0x20a   :  { %v2271_v63 = vsel %vm14115_vm5, %v10272_v45, %v2267_v50  ;;  %v2295_v49 = vsub.f32 1.0, %v2294_v31  ;;  %vm2299_vm7 = vweird.f32 %v10276_v51  ;;  %v9360_v59 = vor.u32 %v9877_v52, %v9357_v35 }
 0x20b   :  { %v10278_v11 = vpop.eup %10277  ;;  %v2276_v1 = vsel %vm14065_vm2, %v2275_v20, %v2271_v63  ;;  %v2286_v19 = vsel %vm2285_vm6, %v10274_v57, %v2282_v2  ;;  %v2317_v9 = vand.u32 2147483647, %v14062_v36  ;;  %10281 = vpow2.f32 %v8954_v41  ;;  %v14143_v2 = vpop.f32.mrf.mxu1  ;;  %vm2300_vm8 = vmor %vm2298_vm3, %vm2299_vm7 }
 0x20c   :  { %v3119_v45 = vmul.f32 %v2276_v1, %v13905_v13  ;;  %v2291_v58 = vsel %vm14078_vm13, %v2290_v43, %v2286_v19  ;;  %v2296_v47 = vmul.f32 %v10276_v51, %v2295_v49  ;;  %v2309_v52 = vmul.f32 %v10278_v11, %v14062_v36  ;;  %4548 = vmatpush.bf16.msra.mxu2 %v9360_v59  ;;  %v9229_v43 = vld [vmem:[#allocation2 + $0x1d0] sm:$0xf0]  ;;  %v14178_v1 = vpop.f32.mrf.mxu0 }
 0x20d   :  { %v3120_v35 = vmul.f32 %v2291_v58, %v13909_v56  ;;  %v2319_v50 = vand.u32 2147483648, %v14062_v36  ;;  %v9104_v31 = vor.u32 %v9813_v29, %v9101_v38  ;;  %v9488_v21 = vor.u32 %v9909_v18, %v9485_v3  ;;  %4056 = vmatmul.bf16.gmra.mxu0 %v13985_v12 }
 0x20e   :  { %v14137_v20 = vpack.c.bf16 %v3119_v45, %v13996_v37  ;;  %v2297_v57 = vadd.f32 %v10276_v51, %v2296_v47  ;;  %v2310_v24 = vsub.f32 1.0, %v2309_v52  ;;  %v14141_v13 = vadd.f32 %v13951_v25, %v11220_v22 }
 0x20f   :  { %v10280_v41 = vpop.eup %10279  ;;  %v14145_v63 = vpack.c.bf16 %v3120_v35, %v3116_v10  ;;  %vm2314_vm9 = vweird.f32 %v10278_v11  ;;  %4370 = vmatpush.bf16.msra.mxu0 %v9104_v31  ;;  %4637 = vmatpush.bf16.msra.mxu3 %v9488_v21  ;;  %v14152_v56 = vadd.f32 %v13964_v17, %v11223_v23  ;;  %v9232_v25 = vor.u32 %v9845_v27, %v9229_v43  ;;  %v497_v21 = vpop.f32.mrf.mxu2 }
 0x210   :  { %19805 = vst [vmem:[#allocation38_spill] sm:$0xff] %v14137_v20  ;;  %v2301_v37 = vsel %vm2300_vm8, %v10276_v51, %v2297_v57  ;;  %v2311_v29 = vmul.f32 %v10278_v11, %v2310_v24  ;;  %v14154_v38 = vadd.f32 1.0, %v10280_v41  ;;  %v8955_v49 = vmul.f32 -1.442695, %v14141_v13  ;;  %v14203_v57 = vpop.f32.mrf.mxu3 }
 0x211   :  { %19806 = vst [vmem:[#allocation48_spill] sm:$0xff] %v14145_v63  ;;  %v10282_v10 = vpop.eup %10281  ;;  %v2306_v59 = vsel %vm14104_vm4, %v2305_v61, %v2301_v37  ;;  %vm2313_vm10 = vweird.f32 %v14062_v36  ;;  %v8956_v15 = vmul.f32 -1.442695, %v14152_v56  ;;  %4459 = vmatpush.bf16.msra.mxu1 %v9232_v25  ;;  %v14163_v17 = vadd.f32 %v13929_v32, %v11203_v5 }
 0x212   :  { %v3121_v51 = vmul.f32 %v2306_v59, %v13913_v60  ;;  %v2312_v18 = vadd.f32 %v10278_v11, %v2311_v29  ;;  %vm2318_vm0 = vcmp.eq.f32.partialorder %v2317_v9, 8.507059e+37  ;;  %10283 = vrcp.f32 %v14154_v38  ;;  %vm2315_vm2 = vmor %vm2313_vm10, %vm2314_vm9 }
 0x213   :  { %v2320_v3 = vor.u32 1.1754944e-38, %v2319_v50  ;;  %v14168_v30 = vadd.f32 1.0, %v10282_v10  ;;  %10285 = vpow2.f32 %v8955_v49  ;;  %v14172_v36 = vadd.f32 %v13966_v53, %v11205_v6  ;;  %v14192_v47 = vpop.f32.mrf.mxu1  ;;  %4145 = vmatmul.bf16.gmra.mxu1 %v13605_v62 }
 0x214   :  { %v14175_v61 = vpack.c.bf16 %v3121_v51, %v14100_v14  ;;  %v2316_v32 = vsel %vm2315_vm2, %v10278_v11, %v2312_v18  ;;  %10287 = vpow2.f32 %v8956_v15  ;;  %v8957_v60 = vmul.f32 -1.442695, %v14163_v17 }
 0x215   :  { %v2321_v19 = vsel %vm2318_vm0, %v2320_v3, %v2316_v32  ;;  %10289 = vrcp.f32 %v14168_v30  ;;  %v3118_v9 = vmul.f32 %v14111_v42, %v13870_v33  ;;  %v8958_v14 = vmul.f32 -1.442695, %v14172_v36 }
 0x216   :  { %19807 = vst [vmem:[#allocation49_spill] sm:$0xff] %v14175_v61  ;;  %v3122_v53 = vmul.f32 %v2321_v19, %v13949_v16  ;;  %10291 = vpow2.f32 %v8957_v60  ;;  %v14188_v11 = vadd.f32 %v14033_v54, %v11220_v22  ;;  %v2332_v24 = vand.u32 2147483647, %v14154_v38 }
 0x217   :  { %10293 = vpow2.f32 %v8958_v14  ;;  %v2334_v25 = vand.u32 2147483648, %v14154_v38  ;;  %v2347_v37 = vand.u32 2147483647, %v14168_v30  ;;  %v2349_v49 = vand.u32 2147483648, %v14168_v30 }
 0x218   :  { %v10284_v45 = vpop.eup %10283  ;;  %v14190_v58 = vpack.c.bf16 %v3122_v53, %v3118_v9  ;;  %v8959_v33 = vmul.f32 -1.442695, %v14188_v11  ;;  %vm2328_vm12 = vweird.f32 %v14154_v38  ;;  %v14218_v51 = vadd.f32 %v14035_v0, %v11223_v23 }
 0x219   :  { %v10286_v52 = vpop.eup %10285  ;;  %v2324_v35 = vmul.f32 %v10284_v45, %v14154_v38  ;;  %vm2329_vm11 = vweird.f32 %v10284_v45  ;;  %vm14220_vm13 = vcmp.eq.f32.partialorder %v2332_v24, 8.507059e+37  ;;  %v14229_v60 = vadd.f32 %v14125_v7, %v11203_v5 }
 0x21a   :  { %19808 = vst [vmem:[#allocation50_spill] sm:$0xff] %v14190_v58  ;;  %v10288_v16 = vpop.eup %10287  ;;  %v14197_v42 = vadd.f32 1.0, %v10286_v52  ;;  %10295 = vpow2.f32 %v8959_v33  ;;  %vm14231_vm14 = vmor %vm2328_vm12, %vm2329_vm11  ;;  %v2335_v9 = vor.u32 1.1754944e-38, %v2334_v25  ;;  %vm2343_vm15 = vweird.f32 %v14168_v30 }
 0x21b   :  { %v14199_v50 = vpop.eup %10289  ;;  %v2325_v54 = vsub.f32 1.0, %v2324_v35  ;;  %v14201_v31 = vadd.f32 1.0, %v10288_v16  ;;  %vm14236_vm1 = vcmp.eq.f32.partialorder %v2347_v37, 8.507059e+37  ;;  %v2350_v14 = vor.u32 1.1754944e-38, %v2349_v49  ;;  %v14269_v49 = vpop.f32.mrf.mxu2  ;;  %4234 = vmatmul.bf16.gmra.mxu2 %v13650_v44 }
 0x21c   :  { %v2339_v27 = vmul.f32 %v14199_v50, %v14168_v30  ;;  %10297 = vrcp.f32 %v14197_v42  ;;  %v10292_v43 = vpop.eup %10291  ;;  %v2364_v52 = vand.u32 2147483648, %v14197_v42  ;;  %vm2344_vm3 = vweird.f32 %v14199_v50 }
 0x21d   :  { %v2326_v41 = vmul.f32 %v10284_v45, %v2325_v54  ;;  %10299 = vrcp.f32 %v14201_v31  ;;  %v10294_v10 = vpop.eup %10293  ;;  %v14214_v15 = vadd.f32 1.0, %v10292_v43  ;;  %v8960_v54 = vmul.f32 -1.442695, %v14218_v51  ;;  %vm14279_vm5 = vmor %vm2343_vm15, %vm2344_vm3 }
 0x21e   :  { %v2340_v29 = vsub.f32 1.0, %v2339_v27  ;;  %v14225_v32 = vadd.f32 1.0, %v10294_v10  ;;  %v14259_v27 = vadd.f32 %v14143_v2, %v11205_v6  ;;  %v14262_v43 = vadd.f32 %v497_v21, %v11220_v22  ;;  %v14271_v10 = vpop.f32.mrf.mxu3  ;;  %4323 = vmatmul.bf16.gmra.mxu3 %v13656_v28 }
 0x21f   :  { %v2327_v59 = vadd.f32 %v10284_v45, %v2326_v41  ;;  %10301 = vrcp.f32 %v14214_v15  ;;  %vm2358_vm4 = vweird.f32 %v14197_v42  ;;  %v14283_v21 = vor.u32 1.1754944e-38, %v2364_v52 }
 0x220   :  { %v2341_v3 = vmul.f32 %v14199_v50, %v2340_v29  ;;  %v10296_v19 = vpop.eup %10295  ;;  %10303 = vrcp.f32 %v14225_v32  ;;  %v2392_v29 = vand.u32 2147483647, %v14214_v15  ;;  %vm2388_vm6 = vweird.f32 %v14214_v15 }
 0x221   :  { %v2331_v7 = vsel %vm14231_vm14, %v10284_v45, %v2327_v59  ;;  %v8961_v45 = vmul.f32 -1.442695, %v14229_v60  ;;  %10305 = vpow2.f32 %v8960_v54  ;;  %v2394_v59 = vand.u32 2147483648, %v14214_v15 }
 0x222   :  { %v14241_v53 = vpop.eup %10297  ;;  %v2342_v33 = vadd.f32 %v14199_v50, %v2341_v3  ;;  %v2336_v41 = vsel %vm14220_vm13, %v2335_v9, %v2331_v7  ;;  %v14287_v3 = vadd.f32 1.0, %v10296_v19  ;;  %vm14298_vm8 = vcmp.eq.f32.partialorder %v2392_v29, 8.507059e+37 }
 0x223   :  { %v14247_v35 = vpop.eup %10299  ;;  %v2354_v16 = vmul.f32 %v14241_v53, %v14197_v42  ;;  %vm2359_vm7 = vweird.f32 %v14241_v53  ;;  %v2407_v54 = vand.u32 2147483647, %v14225_v32  ;;  %v2409_v29 = vand.u32 2147483648, %v14225_v32 }
 0x224   :  { %v2369_v24 = vmul.f32 %v14247_v35, %v14201_v31  ;;  %v2346_v9 = vsel %vm14279_vm5, %v14199_v50, %v2342_v33  ;;  %10307 = vrcp.f32 %v14287_v3  ;;  %vm2374_vm9 = vweird.f32 %v14247_v35  ;;  %vm14319_vm12 = vmor %vm2358_vm4, %vm2359_vm7 }
 0x225   :  { %v2355_v25 = vsub.f32 1.0, %v2354_v16  ;;  %v10302_v38 = vpop.eup %10301  ;;  %v3123_v16 = vmul.f32 %v2336_v41, %v14025_v46  ;;  %v2351_v33 = vsel %vm14236_vm1, %v2350_v14, %v2346_v9  ;;  %10309 = vpow2.f32 %v8961_v45 }
 0x226   :  { %v2370_v7 = vsub.f32 1.0, %v2369_v24  ;;  %v10304_v30 = vpop.eup %10303  ;;  %v2384_v52 = vmul.f32 %v10302_v38, %v14214_v15  ;;  %v8962_v24 = vmul.f32 -1.442695, %v14259_v27  ;;  %vm2389_vm10 = vweird.f32 %v10302_v38 }
 0x227   :  { %v2356_v19 = vmul.f32 %v14241_v53, %v2355_v25  ;;  %v2399_v50 = vmul.f32 %v10304_v30, %v14225_v32  ;;  %v2395_v37 = vor.u32 1.1754944e-38, %v2394_v59  ;;  %vm2403_vm0 = vweird.f32 %v14225_v32  ;;  %v10306_v0 = vpop.eup %10305  ;;  %vm2390_vm14 = vmor %vm2388_vm6, %vm2389_vm10 }
 0x228   :  { %v2385_v46 = vsub.f32 1.0, %v2384_v52  ;;  %v2371_v41 = vmul.f32 %v14247_v35, %v2370_v7  ;;  %v3124_v14 = vmul.f32 %v2351_v33, %v14031_v4  ;;  %vm2373_vm2 = vweird.f32 %v14201_v31 }
 0x229   :  { %v2400_v25 = vsub.f32 1.0, %v2399_v50  ;;  %v2357_v9 = vadd.f32 %v14241_v53, %v2356_v19  ;;  %vm2404_vm11 = vweird.f32 %v10304_v30  ;;  %vm14323_vm13 = vcmp.eq.f32.partialorder %v2407_v54, 8.507059e+37  ;;  %vm14377_vm5 = vmor %vm2373_vm2, %vm2374_vm9 }
 0x22a   :  { %v2386_v2 = vmul.f32 %v10302_v38, %v2385_v46  ;;  %v14327_v4 = vadd.f32 1.0, %v10306_v0  ;;  %10311 = vpow2.f32 %v8962_v24  ;;  %v10308_v19 = vpop.eup %10307  ;;  %v14330_v50 = vadd.f32 %v14247_v35, %v2371_v41  ;;  %vm2405_vm15 = vmor %vm2403_vm0, %vm2404_vm11 }
 0x22b   :  { %v2401_v52 = vmul.f32 %v10304_v30, %v2400_v25  ;;  %v2410_v46 = vor.u32 1.1754944e-38, %v2409_v29  ;;  %v8963_v25 = vmul.f32 -1.442695, %v14262_v43  ;;  %v2414_v24 = vmul.f32 %v10308_v19, %v14287_v3  ;;  %v10310_v15 = vpop.eup %10309 }
 0x22c   :  { %v2387_v59 = vadd.f32 %v10302_v38, %v2386_v2  ;;  %v14336_v2 = vpop.f32.mrf.mxu0  ;;  %10313 = vrcp.f32 %v14327_v4  ;;  %v14344_v41 = vadd.f32 %v14203_v57, %v11223_v23  ;;  %v2361_v29 = vsel %vm14319_vm12, %v14241_v53, %v2357_v9 }
 0x22d   :  { %v2402_v33 = vadd.f32 %v10304_v30, %v2401_v52  ;;  %v2422_v32 = vand.u32 2147483647, %v14287_v3  ;;  %v2415_v62 = vsub.f32 1.0, %v2414_v24  ;;  %v2424_v57 = vand.u32 2147483648, %v14287_v3 }
 0x22e   :  { %v2391_v54 = vsel %vm2390_vm14, %v10302_v38, %v2387_v59  ;;  %v14357_v44 = vadd.f32 1.0, %v10310_v15  ;;  %10315 = vpow2.f32 %v8963_v25  ;;  %v14361_v53 = vadd.f32 %v14178_v1, %v11203_v5 }
 0x22f   :  { %v2396_v0 = vsel %vm14298_vm8, %v2395_v37, %v2391_v54  ;;  %v2406_v38 = vsel %vm2405_vm15, %v10304_v30, %v2402_v33  ;;  %v2416_v30 = vmul.f32 %v10308_v19, %v2415_v62  ;;  %vm2419_vm1 = vweird.f32 %v10308_v19 }
 0x230   :  { %v3127_v52 = vmul.f32 %v2396_v0, %v14163_v17  ;;  %v2411_v59 = vsel %vm14323_vm13, %v2410_v46, %v2406_v38  ;;  %v10312_v37 = vpop.eup %10311  ;;  %v8964_v17 = vmul.f32 -1.442695, %v14344_v41  ;;  %v19824_v9 = vand.u32 2147483647, %v14197_v42 }
 0x231   :  { %v3128_v28 = vmul.f32 %v2411_v59, %v14172_v36  ;;  %vm2418_vm4 = vweird.f32 %v14287_v3  ;;  %10317 = vrcp.f32 %v14357_v44  ;;  %v14381_v42 = vadd.f32 1.0, %v10312_v37  ;;  %v14409_v59 = vpop.f32.mrf.mxu1 }
 0x232   :  { %v14363_v18 = vpack.c.bf16 %v3127_v52, %v3123_v16  ;;  %vm2363_vm3 = vcmp.eq.f32.partialorder %v19824_v9, 8.507059e+37  ;;  %v10314_v36 = vpop.eup %10313  ;;  %v2417_v16 = vadd.f32 %v10308_v19, %v2416_v30  ;;  %10319 = vpow2.f32 %v8964_v17  ;;  %vm2420_vm6 = vmor %vm2418_vm4, %vm2419_vm1 }
 0x233   :  { %v14368_v45 = vpack.c.bf16 %v3128_v28, %v3124_v14  ;;  %v2366_v1 = vsel %vm2363_vm3, %v14283_v21, %v2361_v29  ;;  %v19828_v28 = vand.u32 2147483648, %v14201_v31  ;;  %v2425_v14 = vor.u32 1.1754944e-38, %v2424_v57 }
 0x234   :  { %19823 = vst [vmem:[#allocation51_spill] sm:$0xff] %v14363_v18  ;;  %v2429_v7 = vmul.f32 %v10314_v36, %v14327_v4  ;;  %v8965_v21 = vmul.f32 -1.442695, %v14361_v53  ;;  %v2376_v33 = vsel %vm14377_vm5, %v14247_v35, %v14330_v50  ;;  %v2421_v46 = vsel %vm2420_vm6, %v10308_v19, %v2417_v16  ;;  %v10316_v25 = vpop.eup %10315  ;;  %v14394_v0 = vpop.f32.mrf.mxu0  ;;  %4061 = vmatmul.bf16.gmra.mxu0 %v13872_v8 }
 0x235   :  { %19825 = vst [vmem:[#allocation52_spill] sm:$0xff] %v14368_v45  ;;  %v2380_v3 = vor.u32 1.1754944e-38, %v19828_v28  ;;  %vm2423_vm7 = vcmp.eq.f32.partialorder %v2422_v32, 8.507059e+37  ;;  %10321 = vrcp.f32 %v14381_v42  ;;  %v3125_v54 = vmul.f32 %v2366_v1, %v14141_v13 }
 0x236   :  { %v2426_v24 = vsel %vm2423_vm7, %v2425_v14, %v2421_v46  ;;  %v2430_v15 = vsub.f32 1.0, %v2429_v7  ;;  %v2439_v29 = vand.u32 2147483648, %v14327_v4  ;;  %v14398_v52 = vadd.f32 1.0, %v10316_v25 }
 0x237   :  { %v3129_v38 = vmul.f32 %v2426_v24, %v14188_v11  ;;  %10323 = vpow2.f32 %v8965_v21  ;;  %v14402_v35 = vadd.f32 %v14192_v47, %v11205_v6  ;;  %v14404_v19 = vpop.eup %10317  ;;  %v19829_v13 = vand.u32 2147483647, %v14201_v31 }
 0x238   :  { %v2431_v50 = vmul.f32 %v10314_v36, %v2430_v15  ;;  %vm2434_vm9 = vweird.f32 %v10314_v36  ;;  %v2437_v32 = vand.u32 2147483647, %v14327_v4  ;;  %v10320_v57 = vpop.eup %10319  ;;  %v2444_v30 = vmul.f32 %v14404_v19, %v14357_v44  ;;  %v14441_v15 = vpop.f32.mrf.mxu2 }
 0x239   :  { %vm2378_vm8 = vcmp.eq.f32.partialorder %v19829_v13, 8.507059e+37  ;;  %v14411_v37 = vpack.c.bf16 %v3129_v38, %v3125_v54  ;;  %10325 = vrcp.f32 %v14398_v52  ;;  %vm2433_vm10 = vweird.f32 %v14327_v4 }
 0x23a   :  { %v2381_v11 = vsel %vm2378_vm8, %v2380_v3, %v2376_v33  ;;  %v2432_v47 = vadd.f32 %v10314_v36, %v2431_v50  ;;  %v2440_v31 = vor.u32 1.1754944e-38, %v2439_v29  ;;  %vm2435_vm0 = vmor %vm2433_vm10, %vm2434_vm9  ;;  %v2445_v9 = vsub.f32 1.0, %v2444_v30  ;;  %v14443_v29 = vpop.f32.mrf.mxu3 }
 0x23b   :  { %19830 = vst [vmem:[#allocation53_spill] sm:$0xff] %v14411_v37  ;;  %v14417_v17 = vpop.eup %10321  ;;  %v14419_v1 = vadd.f32 1.0, %v10320_v57  ;;  %v8966_v62 = vmul.f32 -1.442695, %v14402_v35  ;;  %v14424_v16 = vadd.f32 %v14269_v49, %v11220_v22  ;;  %v3126_v28 = vmul.f32 %v2381_v11, %v14152_v56 }
 0x23c   :  { %v2436_v3 = vsel %vm2435_vm0, %v10314_v36, %v2432_v47  ;;  %vm2438_vm2 = vcmp.eq.f32.partialorder %v2437_v32, 8.507059e+37  ;;  %v2459_v4 = vmul.f32 %v14417_v17, %v14381_v42  ;;  %v2446_v21 = vmul.f32 %v14404_v19, %v2445_v9 }
 0x23d   :  { %v10324_v14 = vpop.eup %10323  ;;  %v2441_v7 = vsel %vm2438_vm2, %v2440_v31, %v2436_v3  ;;  %v2452_v33 = vand.u32 2147483647, %v14357_v44  ;;  %10327 = vrcp.f32 %v14419_v1  ;;  %vm2449_vm11 = vweird.f32 %v14404_v19  ;;  %v14465_v31 = vpop.f32.mrf.mxu1  ;;  %4150 = vmatmul.bf16.gmra.mxu1 %v13901_v26 }
 0x23e   :  { %v3130_v46 = vmul.f32 %v2441_v7, %v14218_v51  ;;  %v2454_v49 = vand.u32 2147483648, %v14357_v44  ;;  %v2460_v56 = vsub.f32 1.0, %v2459_v4  ;;  %v2447_v25 = vadd.f32 %v14404_v19, %v2446_v21 }
 0x23f   :  { %v14435_v36 = vpop.eup %10325  ;;  %v14438_v54 = vadd.f32 1.0, %v10324_v14  ;;  %10329 = vpow2.f32 %v8966_v62  ;;  %v8967_v24 = vmul.f32 -1.442695, %v14424_v16  ;;  %v2467_v51 = vand.u32 2147483647, %v14381_v42 }
 0x240   :  { %v14445_v38 = vpack.c.bf16 %v3130_v46, %v3126_v28  ;;  %v2469_v13 = vand.u32 2147483648, %v14381_v42  ;;  %v2474_v50 = vmul.f32 %v14435_v36, %v14398_v52  ;;  %vm2448_vm12 = vweird.f32 %v14357_v44 }
 0x241   :  { %v2484_v32 = vand.u32 2147483648, %v14398_v52  ;;  %10331 = vrcp.f32 %v14438_v54  ;;  %vm14456_vm13 = vmor %vm2448_vm12, %vm2449_vm11  ;;  %vm14460_vm14 = vcmp.eq.f32.partialorder %v2452_v33, 8.507059e+37  ;;  %v2455_v30 = vor.u32 1.1754944e-38, %v2454_v49 }
 0x242   :  { %19831 = vst [vmem:[#allocation54_spill] sm:$0xff] %v14445_v38  ;;  %v2461_v47 = vmul.f32 %v14417_v17, %v2460_v56  ;;  %v2451_v9 = vsel %vm14456_vm13, %v14404_v19, %v2447_v25  ;;  %vm2463_vm15 = vweird.f32 %v14381_v42  ;;  %v2475_v62 = vsub.f32 1.0, %v2474_v50 }
 0x243   :  { %v14468_v44 = vpop.eup %10327  ;;  %10333 = vpow2.f32 %v8967_v24  ;;  %vm14474_vm1 = vcmp.eq.f32.partialorder %v2467_v51, 8.507059e+37  ;;  %v2470_v3 = vor.u32 1.1754944e-38, %v2469_v13  ;;  %v2499_v14 = vand.u32 2147483648, %v14419_v1 }
 0x244   :  { %v2489_v4 = vmul.f32 %v14468_v44, %v14419_v1  ;;  %vm2464_vm3 = vweird.f32 %v14417_v17  ;;  %vm2478_vm4 = vweird.f32 %v14398_v52  ;;  %v2482_v19 = vand.u32 2147483647, %v14398_v52 }
 0x245   :  { %v10330_v7 = vpop.eup %10329  ;;  %v14484_v21 = vor.u32 1.1754944e-38, %v2484_v32  ;;  %v14488_v33 = vadd.f32 %v14271_v10, %v11223_v23  ;;  %v2456_v46 = vsel %vm14460_vm14, %v2455_v30, %v2451_v9  ;;  %v2462_v49 = vadd.f32 %v14417_v17, %v2461_v47  ;;  %vm14521_vm7 = vmor %vm2463_vm15, %vm2464_vm3 }
 0x246   :  { %v2490_v56 = vsub.f32 1.0, %v2489_v4  ;;  %v14493_v25 = vadd.f32 1.0, %v10330_v7  ;;  %v2476_v51 = vmul.f32 %v14435_v36, %v2475_v62  ;;  %v2497_v13 = vand.u32 2147483647, %v14419_v1  ;;  %v14530_v62 = vpop.f32.mrf.mxu3  ;;  %4328 = vmatmul.bf16.gmra.mxu3 %v13972_v39 }
 0x247   :  { %v14495_v24 = vpop.eup %10331  ;;  %v8968_v50 = vmul.f32 -1.442695, %v14488_v33  ;;  %v14502_v10 = vadd.f32 %v14336_v2, %v11203_v5  ;;  %vm2479_vm5 = vweird.f32 %v14435_v36  ;;  %vm2493_vm6 = vweird.f32 %v14419_v1 }
 0x248   :  { %v14506_v32 = vor.u32 1.1754944e-38, %v2499_v14  ;;  %v2504_v57 = vmul.f32 %v14495_v24, %v14438_v54  ;;  %v14512_v11 = vadd.f32 %v14409_v59, %v11205_v6  ;;  %v14515_v47 = vmul.f32 %v2456_v46, %v14229_v60  ;;  %v14528_v59 = vpop.f32.mrf.mxu2  ;;  %4239 = vmatmul.bf16.gmra.mxu2 %v13915_v40  ;;  %v9873_v46 = vld [vmem:[#allocation2 + $0x2a4] sm:$0xf]  ;;  %v9341_v40 = vld [vmem:[#allocation2 + $0x2b0] sm:$0xf0]  ;;  %vm14572_vm12 = vmor %vm2478_vm4, %vm2479_vm5 }
 0x249   :  { %v10334_v30 = vpop.eup %10333  ;;  %vm2508_vm8 = vweird.f32 %v14438_v54  ;;  %v2512_v9 = vand.u32 2147483647, %v14438_v54  ;;  %10335 = vrcp.f32 %v14493_v25  ;;  %v2466_v60 = vsel %vm14521_vm7, %v14417_v17, %v2462_v49 }
 0x24a   :  { %vm14537_vm9 = vcmp.eq.f32.partialorder %v2482_v19, 8.507059e+37  ;;  %v2491_v4 = vmul.f32 %v14468_v44, %v2490_v56  ;;  %v2505_v14 = vsub.f32 1.0, %v2504_v57  ;;  %v2514_v7 = vand.u32 2147483648, %v14438_v54  ;;  %v9809_v56 = vld [vmem:[#allocation2 + $0xa4] sm:$0xf]  ;;  %v14615_v57 = vpop.f32.mrf.mxu0 }
 0x24b   :  { %v2477_v26 = vadd.f32 %v14435_v36, %v2476_v51  ;;  %v14544_v8 = vadd.f32 1.0, %v10334_v30  ;;  %10337 = vpow2.f32 %v8968_v50  ;;  %v8969_v39 = vmul.f32 -1.442695, %v14502_v10  ;;  %v9085_v51 = vld [vmem:[#allocation2 + $0xb0] sm:$0xf0] }
 0x24c   :  { %vm2494_vm10 = vweird.f32 %v14468_v44  ;;  %vm14548_vm0 = vcmp.eq.f32.partialorder %v2497_v13, 8.507059e+37  ;;  %v2506_v19 = vmul.f32 %v14495_v24, %v2505_v14  ;;  %vm2509_vm2 = vweird.f32 %v14495_v24 }
 0x24d   :  { %v8970_v49 = vmul.f32 -1.442695, %v14512_v11  ;;  %v14557_v50 = vsel %vm14474_vm1, %v2470_v3, %v2466_v60  ;;  %vm14559_vm11 = vcmp.eq.f32.partialorder %v2512_v9, 8.507059e+37  ;;  %10339 = vrcp.f32 %v14544_v8  ;;  %v9905_v9 = vld [vmem:[#allocation2 + $0x3a4] sm:$0xf]  ;;  %vm2510_vm13 = vmor %vm2508_vm8, %vm2509_vm2 }
 0x24e   :  { %v14566_v13 = vadd.f32 %v14441_v15, %v11220_v22  ;;  %v2492_v28 = vadd.f32 %v14468_v44, %v2491_v4  ;;  %v2507_v3 = vadd.f32 %v14495_v24, %v2506_v19  ;;  %v2515_v2 = vor.u32 1.1754944e-38, %v2514_v7  ;;  %v9469_v60 = vld [vmem:[#allocation2 + $0x3b0] sm:$0xf0]  ;;  %vm14593_vm14 = vmor %vm2493_vm6, %vm2494_vm10 }
 0x24f   :  { %10341 = vpow2.f32 %v8969_v39  ;;  %v10336_v14 = vpop.eup %10335  ;;  %v2481_v15 = vsel %vm14572_vm12, %v14435_v36, %v2477_v26  ;;  %v9344_v52 = vor.u32 %v9873_v46, %v9341_v40  ;;  %v9088_v12 = vor.u32 %v9809_v56, %v9085_v51 }
 0x250   :  { %10343 = vpow2.f32 %v8970_v49  ;;  %v2511_v4 = vsel %vm2510_vm13, %v14495_v24, %v2507_v3  ;;  %v2519_v7 = vmul.f32 %v10336_v14, %v14493_v25  ;;  %v2527_v39 = vand.u32 2147483647, %v14493_v25  ;;  %v9213_v3 = vld [vmem:[#allocation2 + $0x1b0] sm:$0xf0] }
 0x251   :  { %v2529_v19 = vand.u32 2147483648, %v14493_v25  ;;  %v10338_v55 = vpop.eup %10337  ;;  %v2516_v40 = vsel %vm14559_vm11, %v2515_v2, %v2511_v4  ;;  %4549 = vmatpush.bf16.msra.mxu2 %v9344_v52  ;;  %4371 = vmatpush.bf16.msra.mxu0 %v9088_v12  ;;  %v9472_v36 = vor.u32 %v9905_v9, %v9469_v60  ;;  %v8971_v54 = vmul.f32 -1.442695, %v14566_v13 }
 0x252   :  { %v14602_v24 = vadd.f32 %v14443_v29, %v11223_v23  ;;  %v2496_v1 = vsel %vm14593_vm14, %v14468_v44, %v2492_v28  ;;  %v3135_v46 = vmul.f32 %v2516_v40, %v14361_v53  ;;  %v2520_v49 = vsub.f32 1.0, %v2519_v7  ;;  %v9841_v28 = vld [vmem:[#allocation2 + $0x1a4] sm:$0xf] }
 0x253   :  { %v14608_v56 = vadd.f32 1.0, %v10338_v55  ;;  %v10340_v51 = vpop.eup %10339  ;;  %v2486_v12 = vsel %vm14537_vm9, %v14484_v21, %v2481_v15  ;;  %vm2523_vm15 = vweird.f32 %v14493_v25  ;;  %4638 = vmatpush.bf16.msra.mxu3 %v9472_v36  ;;  %10345 = vpow2.f32 %v8971_v54 }
 0x254   :  { %v8972_v29 = vmul.f32 -1.442695, %v14602_v24  ;;  %v14618_v44 = vpack.c.bf16 %v3135_v46, %v14515_v47  ;;  %v2521_v53 = vmul.f32 %v10336_v14, %v2520_v49  ;;  %vm2524_vm1 = vweird.f32 %v10336_v14  ;;  %v14629_v47 = vpop.f32.mrf.mxu1 }
 0x255   :  { %v10342_v30 = vpop.eup %10341  ;;  %v2534_v55 = vmul.f32 %v10340_v51, %v14544_v8  ;;  %v2501_v21 = vsel %vm14548_vm0, %v14506_v32, %v2496_v1  ;;  %vm14624_vm3 = vcmp.eq.f32.partialorder %v2527_v39, 8.507059e+37  ;;  %v2530_v9 = vor.u32 1.1754944e-38, %v2529_v19  ;;  %vm2525_vm4 = vmor %vm2523_vm15, %vm2524_vm1 }
 0x256   :  { %19850 = vst [vmem:[#allocation55_spill] sm:$0xff] %v14618_v44  ;;  %v10344_v42 = vpop.eup %10343  ;;  %10347 = vrcp.f32 %v14608_v56  ;;  %v2522_v60 = vadd.f32 %v10336_v14, %v2521_v53  ;;  %v14631_v52 = vadd.f32 1.0, %v10342_v30  ;;  %v2542_v32 = vand.u32 2147483647, %v14544_v8 }
 0x257   :  { %v2535_v15 = vsub.f32 1.0, %v2534_v55  ;;  %v14633_v4 = vadd.f32 1.0, %v10344_v42  ;;  %v2544_v17 = vand.u32 2147483648, %v14544_v8  ;;  %10349 = vpow2.f32 %v8972_v29  ;;  %v14667_v55 = vpop.f32.mrf.mxu2 }
 0x258   :  { %v9216_v7 = vor.u32 %v9841_v28, %v9213_v3  ;;  %v2526_v39 = vsel %vm2525_vm4, %v10336_v14, %v2522_v60  ;;  %vm2539_vm5 = vweird.f32 %v10340_v51  ;;  %10351 = vrcp.f32 %v14631_v52  ;;  %v14669_v28 = vpop.f32.mrf.mxu0  ;;  %4066 = vmatmul.bf16.gmra.mxu0 %v14137_v20 }
 0x259   :  { %v2536_v19 = vmul.f32 %v10340_v51, %v2535_v15  ;;  %v10346_v26 = vpop.eup %10345  ;;  %v3132_v40 = vmul.f32 %v14557_v50, %v14259_v27  ;;  %v3133_v36 = vmul.f32 %v2486_v12, %v14262_v43  ;;  %v2531_v25 = vsel %vm14624_vm3, %v2530_v9, %v2526_v39 }
 0x25a   :  { %10353 = vrcp.f32 %v14633_v4  ;;  %4460 = vmatpush.bf16.msra.mxu1 %v9216_v7  ;;  %v14647_v54 = vmul.f32 %v2501_v21, %v14344_v41  ;;  %v3136_v14 = vmul.f32 %v2531_v25, %v14402_v35  ;;  %vm2538_vm6 = vweird.f32 %v14544_v8 }
 0x25b   :  { %v2537_v1 = vadd.f32 %v10340_v51, %v2536_v19  ;;  %vm2540_vm7 = vmor %vm2538_vm6, %vm2539_vm5  ;;  %vm2543_vm8 = vcmp.eq.f32.partialorder %v2542_v32, 8.507059e+37  ;;  %v2545_v27 = vor.u32 1.1754944e-38, %v2544_v17  ;;  %v2557_v43 = vand.u32 2147483647, %v14608_v56 }
 0x25c   :  { %v10348_v46 = vpop.eup %10347  ;;  %v14652_v50 = vadd.f32 1.0, %v10346_v26  ;;  %v14654_v49 = vpack.c.bf16 %v3136_v14, %v3132_v40  ;;  %v14659_v41 = vadd.f32 %v14394_v0, %v11203_v5  ;;  %v2559_v8 = vand.u32 2147483648, %v14608_v56 }
 0x25d   :  { %v2541_v12 = vsel %vm2540_vm7, %v10340_v51, %v2537_v1  ;;  %v2549_v29 = vmul.f32 %v10348_v46, %v14608_v56  ;;  %v10350_v35 = vpop.eup %10349  ;;  %v14665_v53 = vadd.f32 %v14465_v31, %v11205_v6  ;;  %vm2553_vm9 = vweird.f32 %v14608_v56 }
 0x25e   :  { %19853 = vst [vmem:[#allocation56_spill] sm:$0xff] %v14654_v49  ;;  %v2546_v30 = vsel %vm2543_vm8, %v2545_v27, %v2541_v12  ;;  %10355 = vrcp.f32 %v14652_v50  ;;  %v14672_v51 = vpop.eup %10351  ;;  %v14678_v42 = vadd.f32 %v14528_v59, %v11220_v22  ;;  %vm14682_vm10 = vcmp.eq.f32.partialorder %v2557_v43, 8.507059e+37 }
 0x25f   :  { %v3137_v0 = vmul.f32 %v2546_v30, %v14424_v16  ;;  %v2550_v3 = vsub.f32 1.0, %v2549_v29  ;;  %v2564_v2 = vmul.f32 %v14672_v51, %v14631_v52  ;;  %v2572_v9 = vand.u32 2147483647, %v14631_v52  ;;  %v14691_v16 = vpop.f32.mrf.mxu1  ;;  %4155 = vmatmul.bf16.gmra.mxu1 %v14145_v63 }
 0x260   :  { %v14680_v21 = vpop.eup %10353  ;;  %v14689_v60 = vadd.f32 1.0, %v10350_v35  ;;  %vm2554_vm0 = vweird.f32 %v10348_v46  ;;  %v2560_v17 = vor.u32 1.1754944e-38, %v2559_v8  ;;  %vm2568_vm2 = vweird.f32 %v14631_v52 }
 0x261   :  { %v14694_v15 = vpack.c.bf16 %v3137_v0, %v3133_v36  ;;  %v2551_v59 = vmul.f32 %v10348_v46, %v2550_v3  ;;  %v2579_v32 = vmul.f32 %v14680_v21, %v14633_v4  ;;  %v2565_v7 = vsub.f32 1.0, %v2564_v2  ;;  %vm2555_vm12 = vmor %vm2553_vm9, %vm2554_vm0 }
 0x262   :  { %10357 = vrcp.f32 %v14689_v60  ;;  %v2574_v19 = vand.u32 2147483648, %v14631_v52  ;;  %vm2583_vm11 = vweird.f32 %v14633_v4  ;;  %v2587_v25 = vand.u32 2147483647, %v14633_v4 }
 0x263   :  { %19856 = vst [vmem:[#allocation57_spill] sm:$0xff] %v14694_v15  ;;  %v2552_v39 = vadd.f32 %v10348_v46, %v2551_v59  ;;  %v2580_v26 = vsub.f32 1.0, %v2579_v32  ;;  %v2566_v36 = vmul.f32 %v14672_v51, %v2565_v7  ;;  %v8973_v14 = vmul.f32 -1.442695, %v14659_v41  ;;  %v14732_v59 = vpop.f32.mrf.mxu2  ;;  %4244 = vmatmul.bf16.gmra.mxu2 %v14175_v61 }
 0x264   :  { %v14702_v40 = vpop.eup %10355  ;;  %v8974_v1 = vmul.f32 -1.442695, %v14665_v53  ;;  %vm14710_vm13 = vcmp.eq.f32.partialorder %v2572_v9, 8.507059e+37  ;;  %vm2569_vm14 = vweird.f32 %v14672_v51  ;;  %vm2584_vm15 = vweird.f32 %v14680_v21  ;;  %v596_v9 = vpop.f32.mrf.mxu3 }
 0x265   :  { %v2556_v27 = vsel %vm2555_vm12, %v10348_v46, %v2552_v39  ;;  %v2581_v12 = vmul.f32 %v14680_v21, %v2580_v26  ;;  %v2594_v29 = vmul.f32 %v14702_v40, %v14652_v50  ;;  %v2589_v35 = vand.u32 2147483648, %v14633_v4  ;;  %vm14744_vm1 = vmor %vm2568_vm2, %vm2569_vm14 }
 0x266   :  { %v2561_v56 = vsel %vm14682_vm10, %v2560_v17, %v2556_v27  ;;  %v2567_v30 = vadd.f32 %v14672_v51, %v2566_v36  ;;  %10359 = vpow2.f32 %v8973_v14  ;;  %v8975_v31 = vmul.f32 -1.442695, %v14678_v42  ;;  %vm14762_vm5 = vmor %vm2583_vm11, %vm2584_vm15 }
 0x267   :  { %v3138_v46 = vmul.f32 %v2561_v56, %v14488_v33  ;;  %v2595_v8 = vsub.f32 1.0, %v2594_v29  ;;  %v2582_v3 = vadd.f32 %v14680_v21, %v2581_v12  ;;  %10361 = vpow2.f32 %v8974_v1 }
 0x268   :  { %v14724_v0 = vpop.eup %10357  ;;  %v14730_v2 = vadd.f32 %v14530_v62, %v11223_v23  ;;  %v2575_v32 = vor.u32 1.1754944e-38, %v2574_v19  ;;  %v2602_v17 = vand.u32 2147483647, %v14652_v50  ;;  %v2604_v7 = vand.u32 2147483648, %v14652_v50 }
 0x269   :  { %v14736_v33 = vpack.c.bf16 %v3138_v46, %v14647_v54  ;;  %vm14748_vm3 = vcmp.eq.f32.partialorder %v2587_v25, 8.507059e+37  ;;  %v2590_v26 = vor.u32 1.1754944e-38, %v2589_v35  ;;  %vm2598_vm4 = vweird.f32 %v14652_v50 }
 0x26a   :  { %v2609_v54 = vmul.f32 %v14724_v0, %v14689_v60  ;;  %v2571_v19 = vsel %vm14744_vm1, %v14672_v51, %v2567_v30  ;;  %v2596_v36 = vmul.f32 %v14702_v40, %v2595_v8  ;;  %10363 = vpow2.f32 %v8975_v31 }
 0x26b   :  { %19859 = vst [vmem:[#allocation58_spill] sm:$0xff] %v14736_v33  ;;  %v8976_v25 = vmul.f32 -1.442695, %v14730_v2  ;;  %v2586_v14 = vsel %vm14762_vm5, %v14680_v21, %v2582_v3  ;;  %v2619_v51 = vand.u32 2147483648, %v14689_v60  ;;  %v14774_v27 = vadd.f32 %v14615_v57, %v11203_v5 }
 0x26c   :  { %v2610_v1 = vsub.f32 1.0, %v2609_v54  ;;  %v10360_v4 = vpop.eup %10359  ;;  %vm14776_vm6 = vcmp.eq.f32.partialorder %v2602_v17, 8.507059e+37  ;;  %v2605_v29 = vor.u32 1.1754944e-38, %v2604_v7  ;;  %v14782_v56 = vadd.f32 %v14629_v47, %v11205_v6 }
 0x26d   :  { %10365 = vpow2.f32 %v8976_v25  ;;  %v10362_v35 = vpop.eup %10361  ;;  %v2576_v21 = vsel %vm14710_vm13, %v2575_v32, %v2571_v19  ;;  %vm2599_vm7 = vweird.f32 %v14702_v40  ;;  %v14788_v46 = vadd.f32 1.0, %v10360_v4 }
 0x26e   :  { %v2611_v57 = vmul.f32 %v14724_v0, %v2610_v1  ;;  %v2591_v30 = vsel %vm14748_vm3, %v2590_v26, %v2586_v14  ;;  %v2597_v8 = vadd.f32 %v14702_v40, %v2596_v36  ;;  %v14793_v3 = vadd.f32 1.0, %v10362_v35  ;;  %vm14817_vm9 = vmor %vm2598_vm4, %vm2599_vm7 }
 0x26f   :  { %v8977_v47 = vmul.f32 -1.442695, %v14774_v27  ;;  %vm2613_vm8 = vweird.f32 %v14689_v60  ;;  %v2617_v43 = vand.u32 2147483647, %v14689_v60  ;;  %v14798_v31 = vor.u32 1.1754944e-38, %v2619_v51 }
 0x270   :  { %10367 = vrcp.f32 %v14788_v46  ;;  %v10364_v32 = vpop.eup %10363  ;;  %v14802_v17 = vmul.f32 %v2576_v21, %v14502_v10  ;;  %v8978_v7 = vmul.f32 -1.442695, %v14782_v56  ;;  %v14808_v62 = vadd.f32 %v14667_v55, %v11220_v22  ;;  %v14827_v55 = vpop.f32.mrf.mxu3  ;;  %4333 = vmatmul.bf16.gmra.mxu3 %v14190_v58 }
 0x271   :  { %10369 = vrcp.f32 %v14793_v3  ;;  %v14811_v39 = vmul.f32 %v2591_v30, %v14512_v11  ;;  %v14822_v10 = vadd.f32 %v14724_v0, %v2611_v57  ;;  %vm2614_vm10 = vweird.f32 %v14724_v0 }
 0x272   :  { %v14825_v54 = vadd.f32 1.0, %v10364_v32  ;;  %v2601_v50 = vsel %vm14817_vm9, %v14702_v40, %v2597_v8  ;;  %v2632_v19 = vand.u32 2147483647, %v14788_v46  ;;  %v2634_v52 = vand.u32 2147483648, %v14788_v46  ;;  %vm14843_vm0 = vmor %vm2613_vm8, %vm2614_vm10 }
 0x273   :  { %v10366_v11 = vpop.eup %10365  ;;  %10371 = vpow2.f32 %v8977_v47  ;;  %v2647_v36 = vand.u32 2147483647, %v14793_v3  ;;  %v2649_v25 = vand.u32 2147483648, %v14793_v3  ;;  %v14839_v14 = vadd.f32 %v596_v9, %v11223_v23 }
 0x274   :  { %10373 = vrcp.f32 %v14825_v54  ;;  %v14847_v40 = vadd.f32 1.0, %v10366_v11  ;;  %v8979_v51 = vmul.f32 -1.442695, %v14808_v62  ;;  %v14852_v4 = vadd.f32 %v14669_v28, %v11203_v5 }
 0x275   :  { %10375 = vpow2.f32 %v8978_v7  ;;  %v14856_v9 = vsel %vm14776_vm6, %v2605_v29, %v2601_v50  ;;  %vm2628_vm2 = vweird.f32 %v14788_v46  ;;  %vm2643_vm11 = vweird.f32 %v14793_v3 }
 0x276   :  { %v10368_v35 = vpop.eup %10367  ;;  %vm14865_vm12 = vcmp.eq.f32.partialorder %v2632_v19, 8.507059e+37  ;;  %v2635_v30 = vor.u32 1.1754944e-38, %v2634_v52  ;;  %v2662_v12 = vand.u32 2147483647, %v14825_v54  ;;  %vm14871_vm13 = vcmp.eq.f32.partialorder %v2647_v36, 8.507059e+37 }
 0x277   :  { %v10370_v21 = vpop.eup %10369  ;;  %v2624_v57 = vmul.f32 %v10368_v35, %v14788_v46  ;;  %v2650_v47 = vor.u32 1.1754944e-38, %v2649_v25  ;;  %10377 = vrcp.f32 %v14847_v40  ;;  %v14878_v32 = vadd.f32 %v14691_v16, %v11205_v6 }
 0x278   :  { %v2639_v29 = vmul.f32 %v10370_v21, %v14793_v3  ;;  %v2664_v11 = vand.u32 2147483648, %v14825_v54  ;;  %10379 = vpow2.f32 %v8979_v51  ;;  %v8980_v50 = vmul.f32 -1.442695, %v14839_v14 }
 0x279   :  { %v10372_v7 = vpop.eup %10371  ;;  %v2625_v26 = vsub.f32 1.0, %v2624_v57  ;;  %vm2658_vm14 = vweird.f32 %v14825_v54  ;;  %v8981_v25 = vmul.f32 -1.442695, %v14852_v4  ;;  %vm14886_vm15 = vcmp.eq.f32.partialorder %v2617_v43, 8.507059e+37 }
 0x27a   :  { %v10374_v19 = vpop.eup %10373  ;;  %v2640_v52 = vsub.f32 1.0, %v2639_v29  ;;  %v14883_v36 = vadd.f32 1.0, %v10372_v7  ;;  %vm2629_vm1 = vweird.f32 %v10368_v35  ;;  %vm14891_vm3 = vcmp.eq.f32.partialorder %v2662_v12, 8.507059e+37  ;;  %v14895_v29 = vpop.f32.mrf.mxu0 }
 0x27b   :  { %v10376_v60 = vpop.eup %10375  ;;  %v2626_v16 = vmul.f32 %v10368_v35, %v2625_v26  ;;  %v2654_v57 = vmul.f32 %v10374_v19, %v14825_v54  ;;  %vm2644_vm4 = vweird.f32 %v10370_v21  ;;  %v8982_v7 = vmul.f32 -1.442695, %v14878_v32  ;;  %vm2630_vm5 = vmor %vm2628_vm2, %vm2629_vm1 }
 0x27c   :  { %v2641_v58 = vmul.f32 %v10370_v21, %v2640_v52  ;;  %10381 = vrcp.f32 %v14883_v36  ;;  %v2665_v20 = vor.u32 1.1754944e-38, %v2664_v11  ;;  %v2677_v34 = vand.u32 2147483647, %v14847_v40  ;;  %vm2645_vm6 = vmor %vm2643_vm11, %vm2644_vm4 }
 0x27d   :  { %v2627_v43 = vadd.f32 %v10368_v35, %v2626_v16  ;;  %v2655_v61 = vsub.f32 1.0, %v2654_v57  ;;  %10383 = vpow2.f32 %v8980_v50  ;;  %v10378_v26 = vpop.eup %10377  ;;  %v14902_v48 = vadd.f32 1.0, %v10376_v60  ;;  %v14908_v50 = vpop.f32.mrf.mxu1 }
 0x27e   :  { %v2642_v12 = vadd.f32 %v10370_v21, %v2641_v58  ;;  %10385 = vpow2.f32 %v8981_v25  ;;  %v10380_v52 = vpop.eup %10379  ;;  %vm2659_vm7 = vweird.f32 %v10374_v19  ;;  %v2669_v11 = vmul.f32 %v10378_v26, %v14847_v40 }
 0x27f   :  { %v2631_v33 = vsel %vm2630_vm5, %v10368_v35, %v2627_v43  ;;  %v2656_v16 = vmul.f32 %v10374_v19, %v2655_v61  ;;  %v2679_v60 = vand.u32 2147483648, %v14847_v40  ;;  %10387 = vpow2.f32 %v8982_v7  ;;  %vm2660_vm8 = vmor %vm2658_vm14, %vm2659_vm7 }
 0x280   :  { %v2636_v58 = vsel %vm14865_vm12, %v2635_v30, %v2631_v33  ;;  %v2646_v46 = vsel %vm2645_vm6, %v10370_v21, %v2642_v12  ;;  %v2670_v57 = vsub.f32 1.0, %v2669_v11  ;;  %vm2674_vm9 = vweird.f32 %v10378_v26 }
 0x281   :  { %v3143_v25 = vmul.f32 %v2636_v58, %v14659_v41  ;;  %v2651_v35 = vsel %vm14871_vm13, %v2650_v47, %v2646_v46  ;;  %v2657_v3 = vadd.f32 %v10374_v19, %v2656_v16  ;;  %10389 = vrcp.f32 %v14902_v48 }
 0x282   :  { %v10382_v61 = vpop.eup %10381  ;;  %v3144_v43 = vmul.f32 %v2651_v35, %v14665_v53  ;;  %v14920_v33 = vadd.f32 1.0, %v10380_v52  ;;  %v2671_v30 = vmul.f32 %v10378_v26, %v2670_v57  ;;  %v3141_v53 = vmul.f32 %v14856_v9, %v14566_v13  ;;  %v14943_v1 = vpop.f32.mrf.mxu0  ;;  %4071 = vmatmul.bf16.gmra.mxu0 %v14363_v18 }
 0x283   :  { %v10384_v21 = vpop.eup %10383  ;;  %v14923_v28 = vpack.c.bf16 %v3143_v25, %v14802_v17  ;;  %v2661_v41 = vsel %vm2660_vm8, %v10374_v19, %v2657_v3  ;;  %v2684_v8 = vmul.f32 %v10382_v61, %v14883_v36  ;;  %v19881_v54 = vsel %vm14843_vm0, %v14724_v0, %v14822_v10 }
 0x284   :  { %v10386_v47 = vpop.eup %10385  ;;  %v2621_v7 = vsel %vm14886_vm15, %v14798_v31, %v19881_v54  ;;  %v14937_v17 = vpack.c.bf16 %v3144_v43, %v14811_v39  ;;  %v2666_v19 = vsel %vm14891_vm3, %v2665_v20, %v2661_v41  ;;  %v2672_v52 = vadd.f32 %v10378_v26, %v2671_v30 }
 0x285   :  { %19880 = vst [vmem:[#allocation59_spill] sm:$0xff] %v14923_v28  ;;  %v3145_v12 = vmul.f32 %v2666_v19, %v14678_v42  ;;  %vm2673_vm10 = vweird.f32 %v14847_v40  ;;  %v2685_v13 = vsub.f32 1.0, %v2684_v8  ;;  %v10388_v0 = vpop.eup %10387  ;;  %v2680_v63 = vor.u32 1.1754944e-38, %v2679_v60  ;;  %v14959_v46 = vpop.f32.mrf.mxu1  ;;  %4160 = vmatmul.bf16.gmra.mxu1 %v14368_v45 }
 0x286   :  { %19882 = vst [vmem:[#allocation60_spill] sm:$0xff] %v14937_v17  ;;  %vm2675_vm0 = vmor %vm2673_vm10, %vm2674_vm9  ;;  %10391 = vrcp.f32 %v14920_v33  ;;  %vm2678_vm2 = vcmp.eq.f32.partialorder %v2677_v34, 8.507059e+37  ;;  %v3142_v10 = vmul.f32 %v2621_v7, %v14602_v24  ;;  %vm2689_vm11 = vweird.f32 %v10382_v61  ;;  %v601_v8 = vpop.f32.mrf.mxu3 }
 0x287   :  { %v14948_v31 = vpack.c.bf16 %v3145_v12, %v3141_v53  ;;  %v2676_v39 = vsel %vm2675_vm0, %v10378_v26, %v2672_v52  ;;  %v2686_v20 = vmul.f32 %v10382_v61, %v2685_v13  ;;  %v14950_v42 = vpop.eup %10389  ;;  %v14953_v9 = vadd.f32 1.0, %v10384_v21  ;;  %v9805_v13 = vld [vmem:[#allocation2 + $0x84] sm:$0xf] }
 0x288   :  { %v2681_v40 = vsel %vm2678_vm2, %v2680_v63, %v2676_v39  ;;  %v2694_v11 = vand.u32 2147483648, %v14883_v36  ;;  %v2699_v58 = vmul.f32 %v14950_v42, %v14902_v48  ;;  %vm2688_vm12 = vweird.f32 %v14883_v36 }
 0x289   :  { %19883 = vst [vmem:[#allocation61_spill] sm:$0xff] %v14948_v31  ;;  %v3146_v51 = vmul.f32 %v2681_v40, %v14730_v2  ;;  %v2687_v16 = vadd.f32 %v10382_v61, %v2686_v20  ;;  %v2692_v34 = vand.u32 2147483647, %v14883_v36  ;;  %10393 = vrcp.f32 %v14953_v9  ;;  %vm2690_vm13 = vmor %vm2688_vm12, %vm2689_vm11 }
 0x28a   :  { %v2700_v2 = vsub.f32 1.0, %v2699_v58  ;;  %v14967_v26 = vadd.f32 1.0, %v10386_v47  ;;  %v2707_v35 = vand.u32 2147483647, %v14902_v48  ;;  %v14972_v3 = vadd.f32 1.0, %v10388_v0 }
 0x28b   :  { %v14965_v24 = vpack.c.bf16 %v3146_v51, %v3142_v10  ;;  %v2691_v25 = vsel %vm2690_vm13, %v10382_v61, %v2687_v16  ;;  %v2695_v57 = vor.u32 1.1754944e-38, %v2694_v11  ;;  %vm2693_vm14 = vcmp.eq.f32.partialorder %v2692_v34, 8.507059e+37  ;;  %v512_v61 = vpop.f32.mrf.mxu2 }
 0x28c   :  { %v14969_v60 = vpop.eup %10391  ;;  %v2701_v43 = vmul.f32 %v14950_v42, %v2700_v2  ;;  %v2709_v36 = vand.u32 2147483648, %v14902_v48  ;;  %10395 = vrcp.f32 %v14967_v26  ;;  %vm2704_vm15 = vweird.f32 %v14950_v42 }
 0x28d   :  { %19884 = vst [vmem:[#allocation62_spill] sm:$0xff] %v14965_v24  ;;  %v2714_v21 = vmul.f32 %v14969_v60, %v14920_v33  ;;  %v2696_v41 = vsel %vm2693_vm14, %v2695_v57, %v2691_v25  ;;  %10397 = vrcp.f32 %v14972_v3  ;;  %vm2703_vm1 = vweird.f32 %v14902_v48 }
 0x28e   :  { %v2702_v30 = vadd.f32 %v14950_v42, %v2701_v43  ;;  %vm14985_vm3 = vcmp.eq.f32.partialorder %v2707_v35, 8.507059e+37  ;;  %v2752_v19 = vand.u32 2147483647, %v14967_v26  ;;  %v2754_v12 = vand.u32 2147483648, %v14967_v26  ;;  %vm14996_vm4 = vmor %vm2703_vm1, %vm2704_vm15 }
 0x28f   :  { %v14982_v47 = vpop.eup %10393  ;;  %v14994_v52 = vmul.f32 %v2696_v41, %v14774_v27  ;;  %v2710_v48 = vor.u32 1.1754944e-38, %v2709_v36  ;;  %v2715_v0 = vsub.f32 1.0, %v2714_v21  ;;  %v15002_v63 = vadd.f32 %v14732_v59, %v11220_v22 }
 0x290   :  { %v2706_v39 = vsel %vm14996_vm4, %v14950_v42, %v2702_v30  ;;  %v15009_v20 = vmul.f32 %v14982_v47, %v14953_v9  ;;  %vm2748_vm5 = vweird.f32 %v14967_v26  ;;  %v2767_v27 = vand.u32 2147483647, %v14972_v3 }
 0x291   :  { %v15015_v10 = vadd.f32 %v14827_v55, %v11223_v23  ;;  %vm2763_vm6 = vweird.f32 %v14972_v3  ;;  %v8983_v59 = vmul.f32 -1.442695, %v15002_v63  ;;  %v15021_v42 = vadd.f32 %v14895_v29, %v11203_v5 }
 0x292   :  { %v10396_v40 = vpop.eup %10395  ;;  %v15025_v51 = vadd.f32 %v14908_v50, %v11205_v6  ;;  %vm15030_vm7 = vcmp.eq.f32.partialorder %v2752_v19, 8.507059e+37  ;;  %v2755_v58 = vor.u32 1.1754944e-38, %v2754_v12  ;;  %v2769_v34 = vand.u32 2147483648, %v14972_v3  ;;  %v9869_v19 = vld [vmem:[#allocation2 + $0x284] sm:$0xf] }
 0x293   :  { %v15027_v16 = vpop.eup %10397  ;;  %v2744_v11 = vmul.f32 %v10396_v40, %v14967_v26  ;;  %v15037_v2 = vsel %vm14985_vm3, %v2710_v48, %v2706_v39  ;;  %v2716_v29 = vmul.f32 %v14969_v60, %v2715_v0  ;;  %vm2719_vm8 = vweird.f32 %v14969_v60  ;;  %v9325_v12 = vld [vmem:[#allocation2 + $0x290] sm:$0xf0]  ;;  %v15058_v0 = vpop.f32.mrf.mxu2  ;;  %4249 = vmatmul.bf16.gmra.mxu2 %v14411_v37 }
 0x294   :  { %v2759_v50 = vmul.f32 %v15027_v16, %v14972_v3  ;;  %10399 = vpow2.f32 %v8983_v59  ;;  %v2730_v25 = vsub.f32 1.0, %v15009_v20  ;;  %vm15044_vm9 = vcmp.eq.f32.partialorder %v2767_v27, 8.507059e+37  ;;  %v15060_v39 = vpop.f32.mrf.mxu3  ;;  %4338 = vmatmul.bf16.gmra.mxu3 %v14445_v38  ;;  %v9069_v27 = vld [vmem:[#allocation2 + $0x90] sm:$0xf0]  ;;  %v9901_v59 = vld [vmem:[#allocation2 + $0x384] sm:$0xf] }
 0x295   :  { %v2745_v35 = vsub.f32 1.0, %v2744_v11  ;;  %v8984_v43 = vmul.f32 -1.442695, %v15015_v10  ;;  %vm2718_vm10 = vweird.f32 %v14920_v33  ;;  %v8985_v21 = vmul.f32 -1.442695, %v15021_v42 }
 0x296   :  { %v2760_v36 = vsub.f32 1.0, %v2759_v50  ;;  %v8986_v41 = vmul.f32 -1.442695, %v15025_v51  ;;  %v15053_v30 = vadd.f32 %v512_v61, %v11220_v22  ;;  %vm2749_vm0 = vweird.f32 %v10396_v40  ;;  %v9453_v11 = vld [vmem:[#allocation2 + $0x390] sm:$0xf0]  ;;  %vm15104_vm14 = vmor %vm2718_vm10, %vm2719_vm8 }
 0x297   :  { %v2746_v53 = vmul.f32 %v10396_v40, %v2745_v35  ;;  %10401 = vpow2.f32 %v8984_v43  ;;  %v15056_v48 = vadd.f32 %v601_v8, %v11223_v23  ;;  %vm2764_vm2 = vweird.f32 %v15027_v16  ;;  %vm2750_vm11 = vmor %vm2748_vm5, %vm2749_vm0 }
 0x298   :  { %v2761_v61 = vmul.f32 %v15027_v16, %v2760_v36  ;;  %10403 = vpow2.f32 %v8985_v21  ;;  %v9328_v20 = vor.u32 %v9869_v19, %v9325_v12  ;;  %v2770_v8 = vor.u32 1.1754944e-38, %v2769_v34  ;;  %vm2765_vm12 = vmor %vm2763_vm6, %vm2764_vm2 }
 0x299   :  { %v2747_v50 = vadd.f32 %v10396_v40, %v2746_v53  ;;  %10405 = vpow2.f32 %v8986_v41  ;;  %v9072_v35 = vor.u32 %v9805_v13, %v9069_v27  ;;  %v9456_v36 = vor.u32 %v9901_v59, %v9453_v11 }
 0x29a   :  { %v10400_v43 = vpop.eup %10399  ;;  %v2762_v54 = vadd.f32 %v15027_v16, %v2761_v61  ;;  %4550 = vmatpush.bf16.msra.mxu2 %v9328_v20  ;;  %v8987_v7 = vmul.f32 -1.442695, %v15053_v30  ;;  %v15073_v21 = vadd.f32 %v14943_v1, %v11203_v5  ;;  %v2717_v53 = vadd.f32 %v14969_v60, %v2716_v29  ;;  %v9197_v29 = vld [vmem:[#allocation2 + $0x190] sm:$0xf0] }
 0x29b   :  { %v2751_v34 = vsel %vm2750_vm11, %v10396_v40, %v2747_v50  ;;  %v15080_v26 = vadd.f32 1.0, %v10400_v43  ;;  %4372 = vmatpush.bf16.msra.mxu0 %v9072_v35  ;;  %v8988_v41 = vmul.f32 -1.442695, %v15056_v48  ;;  %v2731_v19 = vmul.f32 %v14982_v47, %v2730_v25  ;;  %4639 = vmatpush.bf16.msra.mxu3 %v9456_v36  ;;  %v9837_v40 = vld [vmem:[#allocation2 + $0x184] sm:$0xf]  ;;  %v15092_v25 = vpop.f32.mrf.mxu0 }
 0x29c   :  { %v2756_v12 = vsel %vm15030_vm7, %v2755_v58, %v2751_v34  ;;  %v2766_v1 = vsel %vm2765_vm12, %v15027_v16, %v2762_v54  ;;  %10407 = vpow2.f32 %v8987_v7  ;;  %vm2734_vm13 = vweird.f32 %v14982_v47 }
 0x29d   :  { %v10402_v13 = vpop.eup %10401  ;;  %v3151_v3 = vmul.f32 %v2756_v12, %v14852_v4  ;;  %v2771_v61 = vsel %vm15044_vm9, %v2770_v8, %v2766_v1  ;;  %10409 = vrcp.f32 %v15080_v26  ;;  %v3148_v54 = vmul.f32 %v15037_v2, %v14782_v56  ;;  %v15124_v8 = vpop.f32.mrf.mxu1 }
 0x29e   :  { %v10404_v55 = vpop.eup %10403  ;;  %v3152_v7 = vmul.f32 %v2771_v61, %v14878_v32  ;;  %v15097_v16 = vadd.f32 1.0, %v10402_v13  ;;  %v8989_v58 = vmul.f32 -1.442695, %v15073_v21  ;;  %10411 = vpow2.f32 %v8988_v41 }
 0x29f   :  { %v10406_v20 = vpop.eup %10405  ;;  %v15109_v57 = vpack.c.bf16 %v3151_v3, %v14994_v52  ;;  %v15111_v27 = vadd.f32 1.0, %v10404_v55  ;;  %v9200_v56 = vor.u32 %v9837_v40, %v9197_v29  ;;  %v2721_v32 = vsel %vm15104_vm14, %v14969_v60, %v2717_v53 }
 0x2a0   :  { %v2732_v2 = vadd.f32 %v14982_v47, %v2731_v19  ;;  %v15117_v59 = vpack.c.bf16 %v3152_v7, %v3148_v54  ;;  %10413 = vrcp.f32 %v15097_v16  ;;  %v19897_v11 = vand.u32 2147483648, %v14920_v33 }
 0x2a1   :  { %19895 = vst [vmem:[#allocation63_spill] sm:$0xff] %v15109_v57  ;;  %v2739_v52 = vand.u32 2147483648, %v14953_v9  ;;  %10415 = vrcp.f32 %v15111_v27  ;;  %4461 = vmatpush.bf16.msra.mxu1 %v9200_v56  ;;  %v19898_v43 = vand.u32 2147483647, %v14920_v33  ;;  %vm2733_vm1 = vweird.f32 %v14953_v9 }
 0x2a2   :  { %19896 = vst [vmem:[#allocation64_spill] sm:$0xff] %v15117_v59  ;;  %v2725_v50 = vor.u32 1.1754944e-38, %v19897_v11  ;;  %v10408_v35 = vpop.eup %10407  ;;  %v2737_v60 = vand.u32 2147483647, %v14953_v9  ;;  %v15130_v36 = vadd.f32 1.0, %v10406_v20  ;;  %vm15134_vm3 = vmor %vm2733_vm1, %vm2734_vm13  ;;  %10417 = vpow2.f32 %v8989_v58 }
 0x2a3   :  { %vm2723_vm15 = vcmp.eq.f32.partialorder %v19898_v43, 8.507059e+37  ;;  %v10410_v53 = vpop.eup %10409  ;;  %v15138_v19 = vadd.f32 1.0, %v10408_v35  ;;  %v2736_v33 = vsel %vm15134_vm3, %v14982_v47, %v2732_v2  ;;  %v2740_v1 = vor.u32 1.1754944e-38, %v2739_v52  ;;  %v15159_v58 = vpop.f32.mrf.mxu0  ;;  %4076 = vmatmul.bf16.gmra.mxu0 %v14618_v44 }
 0x2a4   :  { %v2726_v34 = vsel %vm2723_vm15, %v2725_v50, %v2721_v32  ;;  %v2774_v12 = vmul.f32 %v10410_v53, %v15080_v26  ;;  %v10412_v9 = vpop.eup %10411  ;;  %v2784_v40 = vand.u32 2147483648, %v15080_v26  ;;  %10419 = vrcp.f32 %v15130_v36  ;;  %v15170_v35 = vpop.f32.mrf.mxu2 }
 0x2a5   :  { %v3149_v13 = vmul.f32 %v2726_v34, %v14808_v62  ;;  %vm2738_vm4 = vcmp.eq.f32.partialorder %v2737_v60, 8.507059e+37  ;;  %10421 = vrcp.f32 %v15138_v19  ;;  %v15153_v54 = vadd.f32 %v14959_v46, %v11205_v6  ;;  %v15177_v34 = vpop.f32.mrf.mxu1  ;;  %4165 = vmatmul.bf16.gmra.mxu1 %v14654_v49 }
 0x2a6   :  { %v10414_v29 = vpop.eup %10413  ;;  %v2775_v3 = vsub.f32 1.0, %v2774_v12  ;;  %v2741_v55 = vsel %vm2738_vm4, %v2740_v1, %v2736_v33  ;;  %v15157_v7 = vadd.f32 %v15058_v0, %v11220_v22  ;;  %vm2779_vm5 = vweird.f32 %v10410_v53 }
 0x2a7   :  { %v15148_v61 = vpop.eup %10415  ;;  %v2789_v47 = vmul.f32 %v10414_v29, %v15097_v16  ;;  %v2782_v20 = vand.u32 2147483647, %v15080_v26  ;;  %vm2778_vm6 = vweird.f32 %v15080_v26  ;;  %v2785_v46 = vor.u32 1.1754944e-38, %v2784_v40 }
 0x2a8   :  { %v2776_v62 = vmul.f32 %v10410_v53, %v2775_v3  ;;  %v2804_v4 = vmul.f32 %v15148_v61, %v15111_v27  ;;  %v10418_v56 = vpop.eup %10417  ;;  %v15166_v2 = vadd.f32 1.0, %v10412_v9  ;;  %v2797_v11 = vand.u32 2147483647, %v15097_v16  ;;  %vm2780_vm7 = vmor %vm2778_vm6, %vm2779_vm5 }
 0x2a9   :  { %v2790_v32 = vsub.f32 1.0, %v2789_v47  ;;  %v2799_v50 = vand.u32 2147483648, %v15097_v16  ;;  %vm2794_vm8 = vweird.f32 %v10414_v29  ;;  %v15175_v26 = vadd.f32 1.0, %v10418_v56  ;;  %v15194_v56 = vpop.f32.mrf.mxu3 }
 0x2aa   :  { %v2777_v0 = vadd.f32 %v10410_v53, %v2776_v62  ;;  %v2805_v52 = vsub.f32 1.0, %v2804_v4  ;;  %v15172_v43 = vpop.eup %10419  ;;  %10423 = vrcp.f32 %v15166_v2  ;;  %vm2783_vm9 = vcmp.eq.f32.partialorder %v2782_v20, 8.507059e+37 }
 0x2ab   :  { %v2791_v60 = vmul.f32 %v10414_v29, %v2790_v32  ;;  %v15180_v41 = vpop.eup %10421  ;;  %v2819_v9 = vmul.f32 %v15172_v43, %v15130_v36  ;;  %vm2793_vm10 = vweird.f32 %v15097_v16  ;;  %v2812_v3 = vand.u32 2147483647, %v15111_v27 }
 0x2ac   :  { %v2781_v33 = vsel %vm2780_vm7, %v10410_v53, %v2777_v0  ;;  %v2806_v12 = vmul.f32 %v15148_v61, %v2805_v52  ;;  %vm2795_vm0 = vmor %vm2793_vm10, %vm2794_vm8  ;;  %vm2798_vm2 = vcmp.eq.f32.partialorder %v2797_v11, 8.507059e+37  ;;  %v2800_v62 = vor.u32 1.1754944e-38, %v2799_v50 }
 0x2ad   :  { %v2786_v1 = vsel %vm2783_vm9, %v2785_v46, %v2781_v33  ;;  %v2792_v40 = vadd.f32 %v10414_v29, %v2791_v60  ;;  %v2814_v53 = vand.u32 2147483648, %v15111_v27  ;;  %vm2809_vm11 = vweird.f32 %v15148_v61 }
 0x2ae   :  { %v3153_v47 = vmul.f32 %v2786_v1, %v15002_v63  ;;  %v2834_v4 = vmul.f32 %v15180_v41, %v15138_v19  ;;  %10425 = vrcp.f32 %v15175_v26  ;;  %v2807_v63 = vadd.f32 %v15148_v61, %v2806_v12 }
 0x2af   :  { %v2796_v20 = vsel %vm2795_vm0, %v10414_v29, %v2792_v40  ;;  %v2820_v32 = vsub.f32 1.0, %v2819_v9  ;;  %v3150_v11 = vmul.f32 %v2741_v55, %v14839_v14  ;;  %v8990_v50 = vmul.f32 -1.442695, %v15153_v54  ;;  %v15226_v40 = vpop.f32.mrf.mxu2  ;;  %4254 = vmatmul.bf16.gmra.mxu2 %v14694_v15 }
 0x2b0   :  { %v15196_v16 = vpack.c.bf16 %v3153_v47, %v3149_v13  ;;  %v2801_v46 = vsel %vm2798_vm2, %v2800_v62, %v2796_v20  ;;  %v15199_v0 = vpop.eup %10423  ;;  %vm2808_vm12 = vweird.f32 %v15111_v27  ;;  %v2829_v52 = vand.u32 2147483648, %v15130_v36 }
 0x2b1   :  { %v3154_v29 = vmul.f32 %v2801_v46, %v15015_v10  ;;  %v2849_v13 = vmul.f32 %v15199_v0, %v15166_v2  ;;  %vm15212_vm13 = vmor %vm2808_vm12, %vm2809_vm11  ;;  %vm15216_vm14 = vcmp.eq.f32.partialorder %v2812_v3, 8.507059e+37  ;;  %v2815_v10 = vor.u32 1.1754944e-38, %v2814_v53  ;;  %v15259_v14 = vpop.f32.mrf.mxu3 }
 0x2b2   :  { %19901 = vst [vmem:[#allocation65_spill] sm:$0xff] %v15196_v16  ;;  %v2835_v55 = vsub.f32 1.0, %v2834_v4  ;;  %v2811_v27 = vsel %vm15212_vm13, %v15148_v61, %v2807_v63  ;;  %v2821_v12 = vmul.f32 %v15172_v43, %v2820_v32  ;;  %v2827_v9 = vand.u32 2147483647, %v15130_v36 }
 0x2b3   :  { %v15208_v60 = vpack.c.bf16 %v3154_v29, %v3150_v11  ;;  %v8991_v1 = vmul.f32 -1.442695, %v15157_v7  ;;  %vm2823_vm15 = vweird.f32 %v15130_v36  ;;  %v2842_v47 = vand.u32 2147483647, %v15138_v19 }
 0x2b4   :  { %v10426_v3 = vpop.eup %10425  ;;  %v2850_v62 = vsub.f32 1.0, %v2849_v13  ;;  %10427 = vpow2.f32 %v8990_v50  ;;  %v15233_v61 = vadd.f32 %v15060_v39, %v11223_v23  ;;  %vm2824_vm1 = vweird.f32 %v15172_v43 }
 0x2b5   :  { %19902 = vst [vmem:[#allocation66_spill] sm:$0xff] %v15208_v60  ;;  %v15236_v53 = vor.u32 1.1754944e-38, %v2829_v52  ;;  %vm2838_vm3 = vweird.f32 %v15138_v19  ;;  %v2844_v20 = vand.u32 2147483648, %v15138_v19  ;;  %v2864_v4 = vmul.f32 %v10426_v3, %v15175_v26  ;;  %vm15291_vm2 = vmor %vm2823_vm15, %vm2824_vm1 }
 0x2b6   :  { %v2816_v46 = vsel %vm15216_vm14, %v2815_v10, %v2811_v27  ;;  %v2836_v63 = vmul.f32 %v15180_v41, %v2835_v55  ;;  %vm2839_vm4 = vweird.f32 %v15180_v41  ;;  %vm2853_vm5 = vweird.f32 %v15166_v2  ;;  %v19907_v10 = vld [vmem:[#allocation58_spill] sm:$0xff] }
 0x2b7   :  { %v2857_v39 = vand.u32 2147483647, %v15166_v2  ;;  %v2822_v32 = vadd.f32 %v15172_v43, %v2821_v12  ;;  %v2865_v11 = vsub.f32 1.0, %v2864_v4  ;;  %10429 = vpow2.f32 %v8991_v1  ;;  %4343 = vmatmul.bf16.gmra.mxu3 %v19907_v10  ;;  %vm15303_vm12 = vmor %vm2838_vm3, %vm2839_vm4 }
 0x2b8   :  { %v8992_v29 = vmul.f32 -1.442695, %v15233_v61  ;;  %v2851_v50 = vmul.f32 %v15199_v0, %v2850_v62  ;;  %v2874_v52 = vand.u32 2147483648, %v15175_v26  ;;  %v15253_v13 = vadd.f32 %v15092_v25, %v11203_v5 }
 0x2b9   :  { %v15257_v33 = vadd.f32 %v15124_v8, %v11205_v6  ;;  %vm15262_vm6 = vcmp.eq.f32.partialorder %v2827_v9, 8.507059e+37  ;;  %vm15266_vm7 = vcmp.eq.f32.partialorder %v2842_v47, 8.507059e+37  ;;  %v2866_v12 = vmul.f32 %v10426_v3, %v2865_v11 }
 0x2ba   :  { %vm2869_vm8 = vweird.f32 %v10426_v3  ;;  %v2872_v25 = vand.u32 2147483647, %v15175_v26  ;;  %10431 = vpow2.f32 %v8992_v29  ;;  %v10428_v1 = vpop.eup %10427  ;;  %vm2854_vm9 = vweird.f32 %v15199_v0 }
 0x2bb   :  { %v8993_v8 = vmul.f32 -1.442695, %v15253_v13  ;;  %v8994_v62 = vmul.f32 -1.442695, %v15257_v33  ;;  %v15276_v9 = vadd.f32 %v15170_v35, %v11220_v22  ;;  %v2837_v47 = vadd.f32 %v15180_v41, %v2836_v63  ;;  %vm15323_vm13 = vmor %vm2853_vm5, %vm2854_vm9  ;;  %v15361_v35 = vpop.f32.mrf.mxu3 }
 0x2bc   :  { %v2867_v4 = vadd.f32 %v10426_v3, %v2866_v12  ;;  %vm2868_vm10 = vweird.f32 %v15175_v26  ;;  %v15280_v11 = vadd.f32 1.0, %v10428_v1  ;;  %v2852_v29 = vadd.f32 %v15199_v0, %v2851_v50  ;;  %v15297_v50 = vpop.f32.mrf.mxu0 }
 0x2bd   :  { %vm2870_vm0 = vmor %vm2868_vm10, %vm2869_vm8  ;;  %v2875_v49 = vor.u32 1.1754944e-38, %v2874_v52  ;;  %10433 = vpow2.f32 %v8993_v8  ;;  %v15285_v10 = vadd.f32 %v15194_v56, %v11223_v23  ;;  %v10430_v15 = vpop.eup %10429  ;;  %v2859_v26 = vand.u32 2147483648, %v15166_v2 }
 0x2be   :  { %v2871_v63 = vsel %vm2870_vm0, %v10426_v3, %v2867_v4  ;;  %vm2873_vm11 = vcmp.eq.f32.partialorder %v2872_v25, 8.507059e+37  ;;  %10435 = vrcp.f32 %v15280_v11  ;;  %v15307_v52 = vadd.f32 1.0, %v10430_v15  ;;  %v15310_v3 = vpop.f32.mrf.mxu1 }
 0x2bf   :  { %v2876_v36 = vsel %vm2873_vm11, %v2875_v49, %v2871_v63  ;;  %10437 = vpow2.f32 %v8994_v62  ;;  %v8995_v12 = vmul.f32 -1.442695, %v15276_v9  ;;  %v3155_v1 = vmul.f32 %v2816_v46, %v15021_v42 }
 0x2c0   :  { %v10432_v25 = vpop.eup %10431  ;;  %v2826_v8 = vsel %vm15291_vm2, %v15172_v43, %v2822_v32  ;;  %v2841_v19 = vsel %vm15303_vm12, %v15180_v41, %v2837_v47  ;;  %v3159_v15 = vmul.f32 %v2876_v36, %v15073_v21  ;;  %v2845_v62 = vor.u32 1.1754944e-38, %v2844_v20 }
 0x2c1   :  { %v2856_v42 = vsel %vm15323_vm13, %v15199_v0, %v2852_v29  ;;  %10439 = vrcp.f32 %v15307_v52  ;;  %v8996_v43 = vmul.f32 -1.442695, %v15285_v10  ;;  %v2860_v41 = vor.u32 1.1754944e-38, %v2859_v26 }
 0x2c2   :  { %v15333_v46 = vpack.c.bf16 %v3159_v15, %v3155_v1  ;;  %v15335_v32 = vadd.f32 1.0, %v10432_v25  ;;  %v15339_v2 = vadd.f32 %v15159_v58, %v11203_v5  ;;  %v2831_v21 = vsel %vm15262_vm6, %v15236_v53, %v2826_v8 }
 0x2c3   :  { %v10434_v47 = vpop.eup %10433  ;;  %v2846_v0 = vsel %vm15266_vm7, %v2845_v62, %v2841_v19  ;;  %vm2858_vm14 = vcmp.eq.f32.partialorder %v2857_v39, 8.507059e+37  ;;  %10441 = vpow2.f32 %v8995_v12  ;;  %v2889_v29 = vand.u32 2147483648, %v15280_v11  ;;  %v15359_v39 = vpop.f32.mrf.mxu2 }
 0x2c4   :  { %v15346_v20 = vpop.eup %10435  ;;  %v2861_v4 = vsel %vm2858_vm14, %v2860_v41, %v2856_v42  ;;  %10443 = vrcp.f32 %v15335_v32  ;;  %v15352_v5 = vadd.f32 %v15177_v34, %v11205_v6  ;;  %v2887_v55 = vand.u32 2147483647, %v15280_v11  ;;  %v15386_v8 = vpop.f32.mrf.mxu0  ;;  %4081 = vmatmul.bf16.gmra.mxu0 %v14923_v28 }
 0x2c5   :  { %v10438_v58 = vpop.eup %10437  ;;  %v2879_v53 = vmul.f32 %v15346_v20, %v15280_v11  ;;  %v15357_v27 = vadd.f32 1.0, %v10434_v47  ;;  %10445 = vpow2.f32 %v8996_v43  ;;  %v15364_v26 = vmul.f32 %v2831_v21, %v15025_v51 }
 0x2c6   :  { %v15367_v63 = vmul.f32 %v2846_v0, %v15053_v30  ;;  %v15369_v6 = vadd.f32 1.0, %v10438_v58  ;;  %v8997_v34 = vmul.f32 -1.442695, %v15339_v2  ;;  %v15375_v36 = vmul.f32 %v2861_v4, %v15056_v48  ;;  %v15388_v19 = vpop.f32.mrf.mxu1  ;;  %4170 = vmatmul.bf16.gmra.mxu1 %v14937_v17 }
 0x2c7   :  { %v15372_v56 = vpop.eup %10439  ;;  %v2880_v12 = vsub.f32 1.0, %v2879_v53  ;;  %10447 = vrcp.f32 %v15357_v27  ;;  %v15380_v25 = vadd.f32 %v15226_v40, %v11220_v22  ;;  %vm2883_vm15 = vweird.f32 %v15280_v11  ;;  %v15446_v11 = vpop.f32.mrf.mxu3  ;;  %4348 = vmatmul.bf16.gmra.mxu3 %v14965_v24 }
 0x2c8   :  { %v2890_v51 = vor.u32 1.1754944e-38, %v2889_v29  ;;  %v2894_v30 = vmul.f32 %v15372_v56, %v15307_v52  ;;  %v8998_v1 = vmul.f32 -1.442695, %v15352_v5  ;;  %vm15393_vm1 = vcmp.eq.f32.partialorder %v2887_v55, 8.507059e+37 }
 0x2c9   :  { %v10442_v48 = vpop.eup %10441  ;;  %v2881_v22 = vmul.f32 %v15346_v20, %v2880_v12  ;;  %v2902_v49 = vand.u32 2147483647, %v15307_v52  ;;  %v2904_v15 = vand.u32 2147483648, %v15307_v52  ;;  %10449 = vrcp.f32 %v15369_v6 }
 0x2ca   :  { %v15400_v62 = vpop.eup %10443  ;;  %v2895_v42 = vsub.f32 1.0, %v2894_v30  ;;  %v2917_v43 = vand.u32 2147483647, %v15335_v32  ;;  %10451 = vpow2.f32 %v8997_v34  ;;  %v15405_v41 = vadd.f32 %v15259_v14, %v11223_v23 }
 0x2cb   :  { %v10446_v47 = vpop.eup %10445  ;;  %v2882_v21 = vadd.f32 %v15346_v20, %v2881_v22  ;;  %vm2884_vm3 = vweird.f32 %v15346_v20  ;;  %vm2898_vm4 = vweird.f32 %v15307_v52  ;;  %v2909_v0 = vmul.f32 %v15400_v62, %v15335_v32 }
 0x2cc   :  { %v2896_v4 = vmul.f32 %v15372_v56, %v2895_v42  ;;  %v2919_v29 = vand.u32 2147483648, %v15335_v32  ;;  %v15414_v58 = vadd.f32 1.0, %v10442_v48  ;;  %v15417_v53 = vmul.f32 -1.442695, %v15380_v25  ;;  %vm15428_vm7 = vmor %vm2883_vm15, %vm2884_vm3 }
 0x2cd   :  { %v15419_v23 = vpop.eup %10447  ;;  %vm15421_vm5 = vcmp.eq.f32.partialorder %v2902_v49, 8.507059e+37  ;;  %v2905_v55 = vor.u32 1.1754944e-38, %v2904_v15  ;;  %v2910_v34 = vsub.f32 1.0, %v2909_v0  ;;  %vm2913_vm6 = vweird.f32 %v15335_v32 }
 0x2ce   :  { %10453 = vpow2.f32 %v8998_v1  ;;  %vm2899_vm8 = vweird.f32 %v15372_v56  ;;  %vm15433_vm9 = vcmp.eq.f32.partialorder %v2917_v43, 8.507059e+37  ;;  %v2924_v48 = vmul.f32 %v15419_v23, %v15357_v27  ;;  %v15444_v1 = vpop.f32.mrf.mxu2  ;;  %4259 = vmatmul.bf16.gmra.mxu2 %v14948_v31  ;;  %v15461_v31 = vpop.f32.mrf.mxu0 }
 0x2cf   :  { %v15439_v22 = vadd.f32 1.0, %v10446_v47  ;;  %v15442_v49 = vmul.f32 -1.442695, %v15405_v41  ;;  %v15450_v15 = vpop.eup %10449  ;;  %v2886_v42 = vsel %vm15428_vm7, %v15346_v20, %v2882_v21  ;;  %v2897_v43 = vadd.f32 %v15372_v56, %v2896_v4  ;;  %v15463_v44 = vpop.f32.mrf.mxu1  ;;  %vm15475_vm2 = vmor %vm2898_vm4, %vm2899_vm8 }
 0x2d0   :  { %v2911_v47 = vmul.f32 %v15400_v62, %v2910_v34  ;;  %10455 = vrcp.f32 %v15414_v58  ;;  %v10452_v0 = vpop.eup %10451  ;;  %vm2914_vm10 = vweird.f32 %v15400_v62  ;;  %v2920_v17 = vor.u32 1.1754944e-38, %v2919_v29 }
 0x2d1   :  { %v2925_v28 = vsub.f32 1.0, %v2924_v48  ;;  %v2939_v24 = vmul.f32 %v15450_v15, %v15369_v6  ;;  %vm2928_vm0 = vweird.f32 %v15357_v27  ;;  %v2932_v21 = vand.u32 2147483647, %v15357_v27  ;;  %vm15488_vm12 = vmor %vm2913_vm6, %vm2914_vm10 }
 0x2d2   :  { %v2912_v20 = vadd.f32 %v15400_v62, %v2911_v47  ;;  %v2934_v4 = vand.u32 2147483648, %v15357_v27  ;;  %v2891_v34 = vsel %vm15393_vm1, %v2890_v51, %v2886_v42  ;;  %vm2943_vm11 = vweird.f32 %v15369_v6 }
 0x2d3   :  { %v2926_v12 = vmul.f32 %v15419_v23, %v2925_v28  ;;  %v2940_v48 = vsub.f32 1.0, %v2939_v24  ;;  %v2901_v45 = vsel %vm15475_vm2, %v15372_v56, %v2897_v43  ;;  %v2947_v51 = vand.u32 2147483647, %v15369_v6 }
 0x2d4   :  { %v10454_v47 = vpop.eup %10453  ;;  %10457 = vrcp.f32 %v15439_v22  ;;  %v15494_v28 = vadd.f32 1.0, %v10452_v0  ;;  %v2916_v24 = vsel %vm15488_vm12, %v15400_v62, %v2912_v20  ;;  %vm2929_vm13 = vweird.f32 %v15419_v23 }
 0x2d5   :  { %v2927_v56 = vadd.f32 %v15419_v23, %v2926_v12  ;;  %v2941_v32 = vmul.f32 %v15450_v15, %v2940_v48  ;;  %v3160_v42 = vmul.f32 %v2891_v34, %v15153_v54  ;;  %vm15505_vm14 = vcmp.eq.f32.partialorder %v2932_v21, 8.507059e+37  ;;  %v15519_v54 = vpop.f32.mrf.mxu3  ;;  %vm15525_vm1 = vmor %vm2928_vm0, %vm2929_vm13 }
 0x2d6   :  { %v15502_v40 = vpop.eup %10455  ;;  %vm2944_vm15 = vweird.f32 %v15450_v15  ;;  %v2949_v0 = vand.u32 2147483648, %v15369_v6  ;;  %v2906_v62 = vsel %vm15421_vm5, %v2905_v55, %v2901_v45  ;;  %v2964_v12 = vand.u32 2147483648, %v15414_v58  ;;  %v15517_v48 = vpop.f32.mrf.mxu2 }
 0x2d7   :  { %v2942_v20 = vadd.f32 %v15450_v15, %v2941_v32  ;;  %v2954_v29 = vmul.f32 %v15502_v40, %v15414_v58  ;;  %v2921_v21 = vsel %vm15433_vm9, %v2920_v17, %v2916_v24  ;;  %v2935_v45 = vor.u32 1.1754944e-38, %v2934_v4  ;;  %vm15537_vm3 = vmor %vm2943_vm11, %vm2944_vm15  ;;  %v15546_v4 = vpop.f32.mrf.mxu0  ;;  %4086 = vmatmul.bf16.gmra.mxu0 %v15109_v57 }
 0x2d8   :  { %v2979_v14 = vand.u32 2147483648, %v15439_v22  ;;  %v15530_v55 = vadd.f32 1.0, %v10454_v47  ;;  %v2931_v52 = vsel %vm15525_vm1, %v15419_v23, %v2927_v56  ;;  %vm15541_vm4 = vcmp.eq.f32.partialorder %v2947_v51, 8.507059e+37  ;;  %v15548_v47 = vpop.f32.mrf.mxu1  ;;  %4175 = vmatmul.bf16.gmra.mxu1 %v15117_v59 }
 0x2d9   :  { %v2955_v27 = vsub.f32 1.0, %v2954_v29  ;;  %10459 = vrcp.f32 %v15494_v28  ;;  %v15555_v23 = vpack.c.bf16 %v3160_v42, %v15364_v26  ;;  %v3161_v51 = vmul.f32 %v2906_v62, %v15157_v7  ;;  %v3363_v26 = vld [vmem:[%s19272_s4] sm:$0xf] }
 0x2da   :  { %v15552_v6 = vpop.eup %10457  ;;  %v2946_v24 = vsel %vm15537_vm3, %v15450_v15, %v2942_v20  ;;  %v2950_v56 = vor.u32 1.1754944e-38, %v2949_v0  ;;  %v3162_v32 = vmul.f32 %v2921_v21, %v15233_v61  ;;  %v2962_v29 = vand.u32 2147483647, %v15414_v58 }
 0x2db   :  { %v15563_v34 = vor.u32 1.1754944e-38, %v2964_v12  ;;  %v2969_v59 = vmul.f32 %v15552_v6, %v15439_v22  ;;  %v2936_v7 = vsel %vm15505_vm14, %v2935_v45, %v2931_v52  ;;  %vm2958_vm5 = vweird.f32 %v15414_v58  ;;  %v9865_v45 = vld [vmem:[#allocation2 + $0x264] sm:$0xf] }
 0x2dc   :  { %v15574_v42 = vor.u32 1.1754944e-38, %v2979_v14  ;;  %10461 = vrcp.f32 %v15530_v55  ;;  %v2951_v61 = vsel %vm15541_vm4, %v2950_v56, %v2946_v24  ;;  %v2956_v0 = vmul.f32 %v15502_v40, %v2955_v27  ;;  %v9309_v14 = vld [vmem:[#allocation2 + $0x270] sm:$0xf0]  ;;  %v9897_v27 = vld [vmem:[#allocation2 + $0x364] sm:$0xf] }
 0x2dd   :  { %v2992_v62 = vand.u32 2147483647, %v15494_v28  ;;  %v2994_v20 = vand.u32 2147483648, %v15494_v28  ;;  %v15583_v43 = vpack.c.bf16 %v3161_v51, %v15367_v63  ;;  %v2970_v12 = vsub.f32 1.0, %v2969_v59  ;;  %v9801_v63 = vld [vmem:[#allocation2 + $0x64] sm:$0xf]  ;;  %v15600_v51 = vpop.f32.mrf.mxu3  ;;  %4353 = vmatmul.bf16.gmra.mxu3 %v15208_v60 }
 0x2de   :  { %10463 = vpow2.f32 %v15417_v53  ;;  %v15586_v21 = vperm.slane %v3363_v26, 0  ;;  %v15591_v30 = vpack.c.bf16 %v3162_v32, %v15375_v36  ;;  %v15594_v17 = vmul.f32 %v2936_v7, %v15253_v13  ;;  %v9053_v59 = vld [vmem:[#allocation2 + $0x70] sm:$0xf0]  ;;  %v15598_v53 = vpop.f32.mrf.mxu2  ;;  %4264 = vmatmul.bf16.gmra.mxu2 %v15196_v16 }
 0x2df   :  { %v15588_v52 = vpop.eup %10459  ;;  %vm2959_vm6 = vweird.f32 %v15502_v40  ;;  %vm2988_vm7 = vweird.f32 %v15494_v28  ;;  %v15605_v36 = vmul.f32 %v2951_v61, %v15257_v33  ;;  %vm2974_vm8 = vweird.f32 %v15552_v6  ;;  %v9437_v24 = vld [vmem:[#allocation2 + $0x370] sm:$0xf0]  ;;  %v15620_v7 = vpop.f32.mrf.mxu0 }
 0x2e0   :  { %v2984_v13 = vmul.f32 %v15588_v52, %v15494_v28  ;;  %10465 = vpow2.f32 %v15442_v49  ;;  %v15612_v56 = vadd.f32 %v15502_v40, %v2956_v0  ;;  %vm15614_vm9 = vcmp.eq.f32.partialorder %v2992_v62, 8.507059e+37  ;;  %v15622_v61 = vpop.f32.mrf.mxu1  ;;  %vm15645_vm12 = vmor %vm2958_vm5, %vm2959_vm6 }
 0x2e1   :  { %v4023_v26 = vadd.f32 %v15297_v50, %v15586_v21  ;;  %v9312_v33 = vor.u32 %v9865_v45, %v9309_v14  ;;  %vm15626_vm10 = vcmp.eq.f32.partialorder %v2962_v29, 8.507059e+37  ;;  %vm2973_vm0 = vweird.f32 %v15439_v22 }
 0x2e2   :  { %v15624_v15 = vpop.eup %10461  ;;  %v2985_v0 = vsub.f32 1.0, %v2984_v13  ;;  %v9056_v62 = vor.u32 %v9801_v63, %v9053_v59  ;;  %v9440_v60 = vor.u32 %v9897_v27, %v9437_v24  ;;  %v4025_v16 = vadd.f32 %v15386_v8, %v15586_v21  ;;  %vm15717_vm3 = vmor %vm2973_vm0, %vm2974_vm8 }
 0x2e3   :  { %v2971_v50 = vmul.f32 %v15552_v6, %v2970_v12  ;;  %v2995_v45 = vor.u32 1.1754944e-38, %v2994_v20  ;;  %v2999_v14 = vmul.f32 %v15624_v15, %v15530_v55  ;;  %v4112_v57 = vadd.f32 %v15310_v3, %v4023_v26  ;;  %4551 = vmatpush.bf16.msra.mxu2 %v9312_v33 }
 0x2e4   :  { %v10464_v29 = vpop.eup %10463  ;;  %v2986_v38 = vmul.f32 %v15588_v52, %v2985_v0  ;;  %vm2989_vm2 = vweird.f32 %v15588_v52  ;;  %vm3003_vm11 = vweird.f32 %v15530_v55  ;;  %4373 = vmatpush.bf16.msra.mxu0 %v9056_v62  ;;  %4640 = vmatpush.bf16.msra.mxu3 %v9440_v60  ;;  %v4114_v8 = vadd.f32 %v15388_v19, %v4025_v16 }
 0x2e5   :  { %v3000_v3 = vsub.f32 1.0, %v2999_v14  ;;  %v3007_v12 = vand.u32 2147483647, %v15530_v55  ;;  %v15650_v63 = vadd.f32 1.0, %v10464_v29  ;;  %v4201_v59 = vadd.f32 %v15359_v39, %v4112_v57  ;;  %vm15667_vm13 = vmor %vm2988_vm7, %vm2989_vm2  ;;  %v15676_v24 = vpop.f32.mrf.mxu3 }
 0x2e6   :  { %v10466_v27 = vpop.eup %10465  ;;  %v2961_v16 = vsel %vm15645_vm12, %v15502_v40, %v15612_v56  ;;  %v2987_v60 = vadd.f32 %v15588_v52, %v2986_v38  ;;  %v3009_v19 = vand.u32 2147483648, %v15530_v55  ;;  %v4203_v58 = vadd.f32 %v15444_v1, %v4114_v8  ;;  %v9833_v38 = vld [vmem:[#allocation2 + $0x164] sm:$0xf]  ;;  %v9181_v40 = vld [vmem:[#allocation2 + $0x170] sm:$0xf0]  ;;  %v15674_v1 = vpop.f32.mrf.mxu2 }
 0x2e7   :  { %v15661_v13 = vadd.f32 %v15552_v6, %v2971_v50  ;;  %v3001_v39 = vmul.f32 %v15624_v15, %v3000_v3  ;;  %vm3004_vm14 = vweird.f32 %v15624_v15  ;;  %10467 = vrcp.f32 %v15650_v63  ;;  %v4034_v29 = vpop.f32.mrf.mxu0  ;;  %4091 = vmatmul.bf16.gmra.mxu0 %v15333_v46  ;;  %v9165_v55 = vld [vmem:[#allocation2 + $0x150] sm:$0xf0] }
 0x2e8   :  { %v2991_v28 = vsel %vm15667_vm13, %v15588_v52, %v2987_v60  ;;  %v15681_v56 = vadd.f32 1.0, %v10466_v27  ;;  %v15684_v26 = vadd.f32 %v15361_v35, %v4201_v59  ;;  %v4028_v33 = vadd.f32 %v15461_v31, %v15586_v21  ;;  %v4123_v8 = vpop.f32.mrf.mxu1  ;;  %4180 = vmatmul.bf16.gmra.mxu1 %v15555_v23  ;;  %vm15702_vm1 = vmor %vm3003_vm11, %vm3004_vm14  ;;  %v9861_v31 = vld [vmem:[#allocation2 + $0x244] sm:$0xf] }
 0x2e9   :  { %v3002_v0 = vadd.f32 %v15624_v15, %v3001_v39  ;;  %vm15689_vm15 = vcmp.eq.f32.partialorder %v3007_v12, 8.507059e+37  ;;  %v3024_v50 = vand.u32 2147483648, %v15650_v63  ;;  %v9184_v14 = vor.u32 %v9833_v38, %v9181_v40 }
 0x2ea   :  { %v2996_v35 = vsel %vm15614_vm9, %v2995_v45, %v2991_v28  ;;  %v3010_v52 = vor.u32 1.1754944e-38, %v3009_v19  ;;  %v3022_v20 = vand.u32 2147483647, %v15650_v63  ;;  %10469 = vrcp.f32 %v15681_v56 }
 0x2eb   :  { %v15711_v3 = vsel %vm15626_vm10, %v15563_v34, %v2961_v16  ;;  %v3006_v32 = vsel %vm15702_vm1, %v15624_v15, %v3002_v0  ;;  %v9513_v45 = vmul.f32 -1.442695, %v15684_v26  ;;  %4462 = vmatpush.bf16.msra.mxu1 %v9184_v14  ;;  %v4030_v49 = vadd.f32 %v15546_v4, %v15586_v21 }
 0x2ec   :  { %v2976_v34 = vsel %vm15717_vm3, %v15552_v6, %v15661_v13  ;;  %vm3018_vm4 = vweird.f32 %v15650_v63  ;;  %v15733_v12 = vadd.f32 %v15446_v11, %v4203_v58  ;;  %v4117_v59 = vadd.f32 %v15463_v44, %v4028_v33 }
 0x2ed   :  { %v15736_v27 = vpop.eup %10467  ;;  %v3167_v15 = vmul.f32 %v2996_v35, %v15339_v2  ;;  %v3011_v16 = vsel %vm15689_vm15, %v3010_v52, %v3006_v32  ;;  %v3025_v4 = vor.u32 1.1754944e-38, %v3024_v50  ;;  %10471 = vpow2.f32 %v9513_v45  ;;  %v9293_v52 = vld [vmem:[#allocation2 + $0x250] sm:$0xf0] }
 0x2ee   :  { %v3014_v60 = vmul.f32 %v15736_v27, %v15650_v63  ;;  %vm15743_vm5 = vcmp.eq.f32.partialorder %v3022_v20, 8.507059e+37  ;;  %v3037_v11 = vand.u32 2147483647, %v15681_v56  ;;  %v9517_v44 = vmul.f32 -1.442695, %v15733_v12  ;;  %v15762_v33 = vpop.f32.mrf.mxu2  ;;  %4269 = vmatmul.bf16.gmra.mxu2 %v15583_v43 }
 0x2ef   :  { %v4206_v58 = vadd.f32 %v15517_v48, %v4117_v59  ;;  %v19954_v2 = vand.u32 2147483647, %v15439_v22  ;;  %vm3033_vm7 = vweird.f32 %v15681_v56  ;;  %v3039_v39 = vand.u32 2147483648, %v15681_v56  ;;  %v15764_v48 = vpop.f32.mrf.mxu3  ;;  %4358 = vmatmul.bf16.gmra.mxu3 %v15591_v30  ;;  %v9797_v59 = vld [vmem:[#allocation2 + $0x44] sm:$0xf] }
 0x2f0   :  { %v4119_v38 = vadd.f32 %v15548_v47, %v4030_v49  ;;  %v4033_v40 = vadd.f32 %v15620_v7, %v15586_v21  ;;  %v4035_v28 = vadd.f32 %v4034_v29, %v15586_v21  ;;  %v15767_v22 = vpop.eup %10469  ;;  %v3168_v0 = vmul.f32 %v3011_v16, %v15352_v5  ;;  %v4037_v29 = vpop.f32.mrf.mxu0 }
 0x2f1   :  { %vm15752_vm6 = vcmp.eq.f32.partialorder %v19954_v2, 8.507059e+37  ;;  %v3015_v62 = vsub.f32 1.0, %v3014_v60  ;;  %10473 = vpow2.f32 %v9517_v44  ;;  %v15771_v50 = vadd.f32 %v15519_v54, %v4206_v58  ;;  %v15779_v35 = vpop.f32.mrf.mxu1  ;;  %v9893_v2 = vld [vmem:[#allocation2 + $0x344] sm:$0xf] }
 0x2f2   :  { %vm3019_vm8 = vweird.f32 %v15736_v27  ;;  %v3029_v47 = vmul.f32 %v15767_v22, %v15681_v56  ;;  %v4208_v7 = vadd.f32 %v15598_v53, %v4119_v38  ;;  %v4122_v14 = vadd.f32 %v15622_v61, %v4033_v40  ;;  %v9037_v61 = vld [vmem:[#allocation2 + $0x50] sm:$0xf0] }
 0x2f3   :  { %v3016_v5 = vmul.f32 %v15736_v27, %v3015_v62  ;;  %vm3034_vm9 = vweird.f32 %v15767_v22  ;;  %v9521_v54 = vmul.f32 -1.442695, %v15771_v50  ;;  %v4124_v20 = vadd.f32 %v4123_v8, %v4035_v28  ;;  %v10472_v32 = vpop.eup %10471  ;;  %v9421_v38 = vld [vmem:[#allocation2 + $0x350] sm:$0xf0]  ;;  %vm3020_vm10 = vmor %vm3018_vm4, %vm3019_vm8 }
 0x2f4   :  { %v3030_v45 = vsub.f32 1.0, %v3029_v47  ;;  %v15785_v49 = vadd.f32 %v15600_v51, %v4208_v7  ;;  %v9296_v53 = vor.u32 %v9861_v31, %v9293_v52  ;;  %v4211_v16 = vadd.f32 %v15674_v1, %v4122_v14  ;;  %vm15825_vm0 = vmor %vm3033_vm7, %vm3034_vm9 }
 0x2f5   :  { %v3017_v60 = vadd.f32 %v15736_v27, %v3016_v5  ;;  %v15789_v44 = vadd.f32 1.0, %v10472_v32  ;;  %10475 = vpow2.f32 %v9521_v54  ;;  %v9040_v58 = vor.u32 %v9797_v59, %v9037_v61 }
 0x2f6   :  { %v3031_v51 = vmul.f32 %v15767_v22, %v3030_v45  ;;  %v9525_v8 = vmul.f32 -1.442695, %v15785_v49  ;;  %4552 = vmatpush.bf16.msra.mxu2 %v9296_v53  ;;  %v9424_v40 = vor.u32 %v9893_v2, %v9421_v38  ;;  %v15798_v1 = vadd.f32 %v15676_v24, %v4211_v16  ;;  %v4215_v54 = vpop.f32.mrf.mxu2 }
 0x2f7   :  { %v10474_v28 = vpop.eup %10473  ;;  %v15801_v62 = vpack.c.bf16 %v3167_v15, %v15594_v17  ;;  %v3021_v47 = vsel %vm3020_vm10, %v15736_v27, %v3017_v60  ;;  %v3040_v7 = vor.u32 1.1754944e-38, %v3039_v39  ;;  %10477 = vrcp.f32 %v15789_v44  ;;  %4374 = vmatpush.bf16.msra.mxu0 %v9040_v58  ;;  %v4304_v17 = vpop.f32.mrf.mxu3 }
 0x2f8   :  { %v15806_v63 = vpack.c.bf16 %v3168_v0, %v15605_v36  ;;  %v3026_v14 = vsel %vm15743_vm5, %v3025_v4, %v3021_v47  ;;  %v3032_v5 = vadd.f32 %v15767_v22, %v3031_v51  ;;  %v15811_v24 = vadd.f32 1.0, %v10474_v28  ;;  %4641 = vmatpush.bf16.msra.mxu3 %v9424_v40  ;;  %v9829_v4 = vld [vmem:[#allocation2 + $0x144] sm:$0xf]  ;;  %v4039_v13 = vpop.f32.mrf.mxu0 }
 0x2f9   :  { %v2981_v36 = vsel %vm15752_vm6, %v15574_v42, %v2976_v34  ;;  %10479 = vpow2.f32 %v9525_v8  ;;  %v9529_v15 = vmul.f32 -1.442695, %v15798_v1  ;;  %v4038_v19 = vadd.f32 %v4037_v29, %v15586_v21  ;;  %v4128_v34 = vpop.f32.mrf.mxu1  ;;  %4096 = vmatmul.bf16.gmra.mxu0 %v15801_v62 }
 0x2fa   :  { %v3169_v6 = vmul.f32 %v3026_v14, %v15380_v25  ;;  %v3036_v42 = vsel %vm15825_vm0, %v15767_v22, %v3032_v5  ;;  %vm3038_vm2 = vcmp.eq.f32.partialorder %v3037_v11, 8.507059e+37  ;;  %10481 = vrcp.f32 %v15811_v24  ;;  %4185 = vmatmul.bf16.gmra.mxu1 %v15806_v63 }
 0x2fb   :  { %v10476_v57 = vpop.eup %10475  ;;  %v3165_v39 = vmul.f32 %v15711_v3, %v15276_v9  ;;  %v3041_v25 = vsel %vm3038_vm2, %v3040_v7, %v3036_v42  ;;  %10483 = vpow2.f32 %v9529_v15  ;;  %v9168_v56 = vor.u32 %v9829_v4, %v9165_v55 }
 0x2fc   :  { %v3170_v0 = vmul.f32 %v3041_v25, %v15405_v41  ;;  %v15843_v29 = vadd.f32 1.0, %v10476_v57  ;;  %v3166_v22 = vmul.f32 %v2981_v36, %v15285_v10  ;;  %v4213_v31 = vadd.f32 %v15762_v33, %v4124_v20 }
 0x2fd   :  { %v10478_v11 = vpop.eup %10477  ;;  %v4127_v52 = vadd.f32 %v15779_v35, %v4038_v19  ;;  %v15848_v32 = vpack.c.bf16 %v3169_v6, %v3165_v39  ;;  %4463 = vmatpush.bf16.msra.mxu1 %v9168_v56  ;;  %v4040_v35 = vadd.f32 %v4039_v13, %v15586_v21  ;;  %vm5954_vm11 = vweird.f32 %v15789_v44 }
 0x2fe   :  { %v5950_v45 = vmul.f32 %v10478_v11, %v15789_v44  ;;  %10485 = vrcp.f32 %v15843_v29  ;;  %v15852_v41 = vpack.c.bf16 %v3170_v0, %v3166_v22  ;;  %v15855_v3 = vadd.f32 %v15764_v48, %v4213_v31  ;;  %v4217_v20 = vpop.f32.mrf.mxu2 }
 0x2ff   :  { %v10480_v9 = vpop.eup %10479  ;;  %v4216_v33 = vadd.f32 %v4215_v54, %v4127_v52  ;;  %v15860_v61 = vpop.f32.mrf.mxu3  ;;  %4274 = vmatmul.bf16.gmra.mxu2 %v15848_v32  ;;  %v5958_v16 = vand.u32 2147483647, %v15789_v44  ;;  %vm5955_vm12 = vweird.f32 %v10478_v11  ;;  %v5960_v2 = vand.u32 2147483648, %v15789_v44 }
 0x300   :  { %19959 = vst [vmem:[#allocation67_spill] sm:$0xff] %v15852_v41  ;;  %v10482_v53 = vpop.eup %10481  ;;  %v5951_v59 = vsub.f32 1.0, %v5950_v45  ;;  %v15857_v10 = vadd.f32 1.0, %v10480_v9  ;;  %4363 = vmatmul.bf16.gmra.mxu3 %v15852_v41  ;;  %v4042_v38 = vpop.f32.mrf.mxu0  ;;  %v6018_v40 = vand.u32 2147483647, %v15811_v24  ;;  %v6020_v28 = vand.u32 2147483648, %v15811_v24  ;;  %vm5956_vm13 = vmor %vm5954_vm11, %vm5955_vm12 }
 0x301   :  { %v6010_v60 = vmul.f32 %v10482_v53, %v15811_v24  ;;  %v10484_v48 = vpop.eup %10483  ;;  %v15869_v51 = vpop.f32.mrf.mxu1  ;;  %v9533_v5 = vmul.f32 -1.442695, %v15855_v3  ;;  %v15878_v54 = vadd.f32 %v4304_v17, %v4216_v33  ;;  %v4129_v36 = vadd.f32 %v4128_v34, %v4040_v35  ;;  %v9857_v45 = vld [vmem:[#allocation2 + $0x224] sm:$0xf]  ;;  %v9277_v9 = vld [vmem:[#allocation2 + $0x230] sm:$0xf0] }
 0x302   :  { %v5952_v58 = vmul.f32 %v10478_v11, %v5951_v59  ;;  %10487 = vrcp.f32 %v15857_v10  ;;  %v15873_v47 = vadd.f32 1.0, %v10484_v48  ;;  %vm5959_vm14 = vcmp.eq.f32.partialorder %v5958_v16, 8.507059e+37  ;;  %v9793_v48 = vld [vmem:[#allocation2 + $0x24] sm:$0xf] }
 0x303   :  { %v6011_v8 = vsub.f32 1.0, %v6010_v60  ;;  %vm6015_vm15 = vweird.f32 %v10482_v53  ;;  %v5961_v55 = vor.u32 1.1754944e-38, %v5960_v2  ;;  %vm6014_vm1 = vweird.f32 %v15811_v24 }
 0x304   :  { %v15875_v7 = vpop.eup %10485  ;;  %v5953_v14 = vadd.f32 %v10478_v11, %v5952_v58  ;;  %10489 = vrcp.f32 %v15873_v47  ;;  %vm15886_vm3 = vcmp.eq.f32.partialorder %v6018_v40, 8.507059e+37  ;;  %v6021_v6 = vor.u32 1.1754944e-38, %v6020_v28  ;;  %vm6016_vm4 = vmor %vm6014_vm1, %vm6015_vm15  ;;  %v9021_v58 = vld [vmem:[#allocation2 + $0x30] sm:$0xf0] }
 0x305   :  { %v6012_v27 = vmul.f32 %v10482_v53, %v6011_v8  ;;  %v6070_v15 = vmul.f32 %v15875_v7, %v15843_v29  ;;  %vm6074_vm5 = vweird.f32 %v15843_v29  ;;  %v6078_v34 = vand.u32 2147483647, %v15843_v29 }
 0x306   :  { %v5957_v4 = vsel %vm5956_vm13, %v10478_v11, %v5953_v14  ;;  %10491 = vpow2.f32 %v9533_v5  ;;  %v9537_v24 = vmul.f32 -1.442695, %v15878_v54  ;;  %v4220_v57 = vpop.f32.mrf.mxu2  ;;  %v6138_v56 = vand.u32 2147483647, %v15857_v10  ;;  %v9889_v14 = vld [vmem:[#allocation2 + $0x324] sm:$0xf] }
 0x307   :  { %v6013_v19 = vadd.f32 %v10482_v53, %v6012_v27  ;;  %v6071_v44 = vsub.f32 1.0, %v6070_v15  ;;  %v5962_v13 = vsel %vm5959_vm14, %v5961_v55, %v5957_v4  ;;  %v15895_v39 = vpop.f32.mrf.mxu3  ;;  %v6140_v11 = vand.u32 2147483648, %v15857_v10  ;;  %v9405_v5 = vld [vmem:[#allocation2 + $0x330] sm:$0xf0] }
 0x308   :  { %v15890_v42 = vpop.eup %10487  ;;  %10493 = vpow2.f32 %v9537_v24  ;;  %v4218_v52 = vadd.f32 %v4217_v20, %v4129_v36  ;;  %v4044_v59 = vpop.f32.mrf.mxu0  ;;  %v4043_v60 = vadd.f32 %v4042_v38, %v15586_v21  ;;  %v9280_v20 = vor.u32 %v9857_v45, %v9277_v9 }
 0x309   :  { %v6017_v25 = vsel %vm6016_vm4, %v10482_v53, %v6013_v19  ;;  %v6130_v0 = vmul.f32 %v15890_v42, %v15857_v10  ;;  %v6072_v31 = vmul.f32 %v15875_v7, %v6071_v44  ;;  %v4133_v33 = vpop.f32.mrf.mxu1  ;;  %v15905_v53 = vmul.f32 %v5962_v13, %v15684_v26 }
 0x30a   :  { %v6022_v22 = vsel %vm15886_vm3, %v6021_v6, %v6017_v25  ;;  %v15911_v2 = vpop.eup %10489  ;;  %v15914_v8 = vadd.f32 %v15860_v61, %v4218_v52  ;;  %v9024_v40 = vor.u32 %v9793_v48, %v9021_v58  ;;  %v4045_v28 = vadd.f32 %v4044_v59, %v15586_v21  ;;  %4553 = vmatpush.bf16.msra.mxu2 %v9280_v20 }
 0x30b   :  { %19962 = vst [vmem:[#allocation68_spill] sm:$0xff] %v15905_v53  ;;  %v15908_v35 = vmul.f32 %v6022_v22, %v15733_v12  ;;  %v6131_v16 = vsub.f32 1.0, %v6130_v0  ;;  %vm6135_vm6 = vweird.f32 %v15890_v42  ;;  %v6190_v38 = vmul.f32 %v15911_v2, %v15873_v47  ;;  %v9908_v53 = vld [vmem:[#allocation2 + $0x3b4] sm:$0xf0] }
 0x30c   :  { %v10492_v36 = vpop.eup %10491  ;;  %v6073_v61 = vadd.f32 %v15875_v7, %v6072_v31  ;;  %vm6075_vm7 = vweird.f32 %v15875_v7  ;;  %v9541_v27 = vmul.f32 -1.442695, %v15914_v8  ;;  %v4132_v15 = vadd.f32 %v15869_v51, %v4043_v60  ;;  %4375 = vmatpush.bf16.msra.mxu0 %v9024_v40 }
 0x30d   :  { %19963 = vst [vmem:[#allocation69_spill] sm:$0xff] %v15908_v35  ;;  %v6132_v12 = vmul.f32 %v15890_v42, %v6131_v16  ;;  %v6080_v4 = vand.u32 2147483648, %v15843_v29  ;;  %vm6134_vm8 = vweird.f32 %v15857_v10  ;;  %v15930_v19 = vadd.f32 1.0, %v10492_v36  ;;  %vm15942_vm10 = vmor %vm6074_vm5, %vm6075_vm7 }
 0x30e   :  { %v10494_v17 = vpop.eup %10493  ;;  %vm15934_vm9 = vmor %vm6134_vm8, %vm6135_vm6  ;;  %10495 = vpow2.f32 %v9541_v27  ;;  %v9408_v44 = vor.u32 %v9889_v14, %v9405_v5  ;;  %v4221_v51 = vadd.f32 %v4220_v57, %v4132_v15  ;;  %v4134_v13 = vadd.f32 %v4133_v33, %v4045_v28  ;;  %v4222_v24 = vpop.f32.mrf.mxu2 }
 0x30f   :  { %v6133_v55 = vadd.f32 %v15890_v42, %v6132_v12  ;;  %v4311_v25 = vpop.f32.mrf.mxu3  ;;  %v6141_v22 = vor.u32 1.1754944e-38, %v6140_v11  ;;  %v6191_v31 = vsub.f32 1.0, %v6190_v38  ;;  %10497 = vrcp.f32 %v15930_v19  ;;  %v9149_v11 = vld [vmem:[#allocation2 + $0x130] sm:$0xf0] }
 0x310   :  { %v6077_v57 = vsel %vm15942_vm10, %v15875_v7, %v6073_v61  ;;  %vm6139_vm0 = vcmp.eq.f32.partialorder %v6138_v56, 8.507059e+37  ;;  %v15953_v52 = vadd.f32 1.0, %v10494_v17  ;;  %4642 = vmatpush.bf16.msra.mxu3 %v9408_v44  ;;  %v4047_v45 = vpop.f32.mrf.mxu0  ;;  %v6081_v59 = vor.u32 1.1754944e-38, %v6080_v4 }
 0x311   :  { %v6137_v0 = vsel %vm15934_vm9, %v15890_v42, %v6133_v55  ;;  %v4136_v9 = vpop.f32.mrf.mxu1  ;;  %v15956_v16 = vadd.f32 %v15895_v39, %v4221_v51  ;;  %v9825_v42 = vld [vmem:[#allocation2 + $0x124] sm:$0xf]  ;;  %v4223_v60 = vadd.f32 %v4222_v24, %v4134_v13  ;;  %vm6079_vm2 = vcmp.eq.f32.partialorder %v6078_v34, 8.507059e+37 }
 0x312   :  { %v6142_v33 = vsel %vm6139_vm0, %v6141_v22, %v6137_v0  ;;  %10499 = vrcp.f32 %v15953_v52  ;;  %v6082_v7 = vsel %vm6079_vm2, %v6081_v59, %v6077_v57  ;;  %v6192_v56 = vmul.f32 %v15911_v2, %v6191_v31 }
 0x313   :  { %v9545_v48 = vmul.f32 -1.442695, %v15956_v16  ;;  %v15964_v20 = vmul.f32 %v6142_v33, %v15785_v49  ;;  %v9152_v40 = vor.u32 %v9825_v42, %v9149_v11  ;;  %v15966_v39 = vadd.f32 %v4311_v25, %v4223_v60 }
 0x314   :  { %v10496_v58 = vpop.eup %10495  ;;  %v4048_v28 = vadd.f32 %v4047_v45, %v15586_v21  ;;  %v6198_v29 = vand.u32 2147483647, %v15873_v47  ;;  %v6200_v34 = vand.u32 2147483648, %v15873_v47  ;;  %v15974_v14 = vmul.f32 %v6082_v7, %v15771_v50 }
 0x315   :  { %19968 = vst [vmem:[#allocation70_spill] sm:$0xff] %v15964_v20  ;;  %v10498_v12 = vpop.eup %10497  ;;  %v15971_v38 = vadd.f32 1.0, %v10496_v58  ;;  %10501 = vpow2.f32 %v9545_v48  ;;  %4464 = vmatpush.bf16.msra.mxu1 %v9152_v40  ;;  %v9549_v49 = vmul.f32 -1.442695, %v15966_v39  ;;  %v6193_v27 = vadd.f32 %v15911_v2, %v6192_v56  ;;  %v9475_v20 = vld [vmem:[#allocation2 + $0x3a8] sm:$0xf] }
 0x316   :  { %19969 = vst [vmem:[#allocation71_spill] sm:$0xff] %v15974_v14  ;;  %v6250_v5 = vmul.f32 %v10498_v12, %v15930_v19  ;;  %v4225_v36 = vpop.f32.mrf.mxu2  ;;  %vm6195_vm11 = vweird.f32 %v15911_v2  ;;  %v6258_v15 = vand.u32 2147483647, %v15930_v19  ;;  %v4137_v55 = vadd.f32 %v4136_v9, %v4048_v28  ;;  %v20031_v14 = vld [vmem:[#allocation34_spill] sm:$0xff] }
 0x317   :  { %v4314_v61 = vpop.f32.mrf.mxu3  ;;  %10503 = vrcp.f32 %v15971_v38  ;;  %vm6194_vm12 = vweird.f32 %v15873_v47  ;;  %vm15987_vm13 = vcmp.eq.f32.partialorder %v6198_v29, 8.507059e+37  ;;  %v6260_v13 = vand.u32 2147483648, %v15930_v19 }
 0x318   :  { %v15982_v4 = vpop.eup %10499  ;;  %v6251_v50 = vsub.f32 1.0, %v6250_v5  ;;  %10505 = vpow2.f32 %v9549_v49  ;;  %v4049_v17 = vpop.f32.mrf.mxu0  ;;  %vm6255_vm14 = vweird.f32 %v10498_v12  ;;  %v4226_v10 = vadd.f32 %v4225_v36, %v4137_v55  ;;  %vm15997_vm15 = vmor %vm6194_vm12, %vm6195_vm11 }
 0x319   :  { %v4138_v6 = vpop.f32.mrf.mxu1  ;;  %v6310_v24 = vmul.f32 %v15982_v4, %v15953_v52  ;;  %v4050_v0 = vadd.f32 %v4049_v17, %v15586_v21  ;;  %v6201_v47 = vor.u32 1.1754944e-38, %v6200_v34  ;;  %vm6254_vm1 = vweird.f32 %v15930_v19 }
 0x31a   :  { %v6252_v25 = vmul.f32 %v10498_v12, %v6251_v50  ;;  %vm16002_vm3 = vcmp.eq.f32.partialorder %v6258_v15, 8.507059e+37  ;;  %v6197_v9 = vsel %vm15997_vm15, %v15911_v2, %v6193_v27  ;;  %v16009_v33 = vadd.f32 %v4314_v61, %v4226_v10  ;;  %vm6256_vm4 = vmor %vm6254_vm1, %vm6255_vm14  ;;  %v9261_v10 = vld [vmem:[#allocation2 + $0x210] sm:$0xf0] }
 0x31b   :  { %v6311_v57 = vsub.f32 1.0, %v6310_v24  ;;  %v10502_v45 = vpop.eup %10501  ;;  %v4139_v42 = vadd.f32 %v4138_v6, %v4050_v0  ;;  %v6261_v60 = vor.u32 1.1754944e-38, %v6260_v13  ;;  %vm6314_vm5 = vweird.f32 %v15953_v52 }
 0x31c   :  { %v6253_v59 = vadd.f32 %v10498_v12, %v6252_v25  ;;  %v16013_v19 = vadd.f32 1.0, %v10502_v45  ;;  %v6318_v58 = vand.u32 2147483647, %v15953_v52  ;;  %v9553_v2 = vmul.f32 -1.442695, %v16009_v33 }
 0x31d   :  { %v10504_v11 = vpop.eup %10503  ;;  %v6312_v7 = vmul.f32 %v15982_v4, %v6311_v57  ;;  %v6202_v34 = vsel %vm15987_vm13, %v6201_v47, %v6197_v9  ;;  %v6320_v49 = vand.u32 2147483648, %v15953_v52  ;;  %vm6315_vm6 = vweird.f32 %v15982_v4  ;;  %v9789_v57 = vld [vmem:[#allocation2 + $0x4] sm:$0xf] }
 0x31e   :  { %v10506_v56 = vpop.eup %10505  ;;  %v6257_v48 = vsel %vm6256_vm4, %v10498_v12, %v6253_v59  ;;  %v6370_v40 = vmul.f32 %v10504_v11, %v15971_v38  ;;  %v4227_v28 = vpop.f32.mrf.mxu2  ;;  %10507 = vrcp.f32 %v16013_v19  ;;  %v6380_v61 = vand.u32 2147483648, %v15971_v38  ;;  %vm16046_vm10 = vmor %vm6314_vm5, %vm6315_vm6 }
 0x31f   :  { %v4316_v29 = vpop.f32.mrf.mxu3  ;;  %v6262_v5 = vsel %vm16002_vm3, %v6261_v60, %v6257_v48  ;;  %v6313_v12 = vadd.f32 %v15982_v4, %v6312_v7  ;;  %v16030_v55 = vadd.f32 1.0, %v10506_v56  ;;  %10509 = vpow2.f32 %v9553_v2  ;;  %v9389_v60 = vld [vmem:[#allocation2 + $0x310] sm:$0xf0]  ;;  %v20001_v7 = vld [vmem:[#allocation16_spill] sm:$0xff] }
 0x320   :  { %v6371_v36 = vsub.f32 1.0, %v6370_v40  ;;  %v4052_v27 = vpop.f32.mrf.mxu0  ;;  %v16028_v50 = vmul.f32 %v6262_v5, %v15855_v3  ;;  %v4228_v17 = vadd.f32 %v4227_v28, %v4139_v42  ;;  %v16033_v6 = vmul.f32 %v6202_v34, %v15798_v1  ;;  %v9853_v3 = vld [vmem:[#allocation2 + $0x204] sm:$0xf]  ;;  %v19984_v1 = vld [vmem:[#allocation13_spill] sm:$0xff] }
 0x321   :  { %v4141_v15 = vpop.f32.mrf.mxu1  ;;  %vm6375_vm7 = vweird.f32 %v10504_v11  ;;  %v6378_v13 = vand.u32 2147483647, %v15971_v38  ;;  %vm16036_vm8 = vcmp.eq.f32.partialorder %v6318_v58, 8.507059e+37  ;;  %v6321_v25 = vor.u32 1.1754944e-38, %v6320_v49  ;;  %v9885_v42 = vld [vmem:[#allocation2 + $0x304] sm:$0xf] }
 0x322   :  { %19976 = vst [vmem:[#allocation72_spill] sm:$0xff] %v16028_v50  ;;  %v6372_v51 = vmul.f32 %v10504_v11, %v6371_v36  ;;  %vm6374_vm9 = vweird.f32 %v15971_v38  ;;  %10511 = vrcp.f32 %v16030_v55  ;;  %v6381_v22 = vor.u32 1.1754944e-38, %v6380_v61  ;;  %v9005_v38 = vld [vmem:[#allocation2 + $0x10] sm:$0xf0] }
 0x323   :  { %19977 = vst [vmem:[#allocation73_spill] sm:$0xff] %v16033_v6  ;;  %v16050_v47 = vadd.f32 %v4316_v29, %v4228_v17  ;;  %v4053_v31 = vadd.f32 %v4052_v27, %v15586_v21  ;;  %v6317_v9 = vsel %vm16046_vm10, %v15982_v4, %v6313_v12  ;;  %vm6376_vm0 = vmor %vm6374_vm9, %vm6375_vm7  ;;  %v9264_v52 = vor.u32 %v9853_v3, %v9261_v10  ;;  %v19983_v10 = vld [vmem:[#allocation11_spill] sm:$0xff] }
 0x324   :  { %v6373_v0 = vadd.f32 %v10504_v11, %v6372_v51  ;;  %v16053_v45 = vpop.eup %10507  ;;  %v9008_v59 = vor.u32 %v9789_v57, %v9005_v38  ;;  %vm6379_vm2 = vcmp.eq.f32.partialorder %v6378_v13, 8.507059e+37  ;;  %vm6434_vm11 = vweird.f32 %v16013_v19  ;;  %v9821_v51 = vld [vmem:[#allocation2 + $0x104] sm:$0xf]  ;;  %v9133_v13 = vld [vmem:[#allocation2 + $0x110] sm:$0xf0] }
 0x325   :  { %v6430_v48 = vmul.f32 %v16053_v45, %v16013_v19  ;;  %v10510_v2 = vpop.eup %10509  ;;  %v9557_v28 = vmul.f32 -1.442695, %v16050_v47  ;;  %v4142_v29 = vadd.f32 %v4141_v15, %v4053_v31  ;;  %4554 = vmatpush.bf16.msra.mxu2 %v9264_v52  ;;  %v9392_v34 = vor.u32 %v9885_v42, %v9389_v60  ;;  %v9916_v60 = vld [vmem:[#allocation2 + $0x3f4] sm:$0xf0] }
 0x326   :  { %v6377_v56 = vsel %vm6376_vm0, %v10504_v11, %v6373_v0  ;;  %v4230_v58 = vpop.f32.mrf.mxu2  ;;  %4376 = vmatpush.bf16.msra.mxu0 %v9008_v59  ;;  %v6322_v5 = vsel %vm16036_vm8, %v6321_v25, %v6317_v9  ;;  %v6438_v49 = vand.u32 2147483647, %v16013_v19  ;;  %v16068_v12 = vadd.f32 1.0, %v10510_v2  ;;  %v19986_v59 = vld [vmem:[#allocation14_spill] sm:$0xff] }
 0x327   :  { %v4319_v40 = vpop.f32.mrf.mxu3  ;;  %v6382_v4 = vsel %vm6379_vm2, %v6381_v22, %v6377_v56  ;;  %v6431_v11 = vsub.f32 1.0, %v6430_v48  ;;  %10513 = vpow2.f32 %v9557_v28  ;;  %4643 = vmatpush.bf16.msra.mxu3 %v9392_v34  ;;  %v4231_v15 = vadd.f32 %v4230_v58, %v4142_v29 }
 0x328   :  { %v4054_v36 = vpop.f32.mrf.mxu0  ;;  %v10512_v27 = vpop.eup %10511  ;;  %v16071_v17 = vmul.f32 %v6382_v4, %v15914_v8  ;;  %vm6435_vm12 = vweird.f32 %v16053_v45  ;;  %10515 = vrcp.f32 %v16068_v12  ;;  %4555 = vmatmul.bf16.vlgmr.msra.gmra.mxu2 %v19984_v1  ;;  %v16081_v8 = vmul.f32 %v6322_v5, %v15878_v54 }
 0x329   :  { %v4143_v61 = vpop.f32.mrf.mxu1  ;;  %v4055_v3 = vadd.f32 %v4054_v36, %v15586_v21  ;;  %v6432_v24 = vmul.f32 %v16053_v45, %v6431_v11  ;;  %v6490_v25 = vmul.f32 %v10512_v27, %v16030_v55  ;;  %4377 = vmatmul.bf16.vlgmr.msra.gmra.mxu0 %v19983_v10  ;;  %v6440_v0 = vand.u32 2147483648, %v16013_v19  ;;  %vm16091_vm13 = vmor %vm6434_vm11, %vm6435_vm12 }
 0x32a   :  { %19982 = vst [vmem:[#allocation74_spill] sm:$0xff] %v16071_v17  ;;  %v6500_v22 = vand.u32 2147483648, %v16030_v55  ;;  %v16085_v31 = vadd.f32 %v4319_v40, %v4231_v15  ;;  %v9136_v9 = vor.u32 %v9821_v51, %v9133_v13  ;;  %4644 = vmatmul.bf16.vlgmr.msra.gmra.mxu3 %v19986_v59  ;;  %vm6495_vm14 = vweird.f32 %v10512_v27  ;;  %v19989_v13 = vld [vmem:[#allocation12_spill] sm:$0xff] }
 0x32b   :  { %19985 = vst [vmem:[#allocation11_spill] sm:$0xff] %v16081_v8  ;;  %v6433_v57 = vadd.f32 %v16053_v45, %v6432_v24  ;;  %v6491_v38 = vsub.f32 1.0, %v6490_v25  ;;  %v4144_v52 = vadd.f32 %v4143_v61, %v4055_v3  ;;  %v6498_v58 = vand.u32 2147483647, %v16030_v55  ;;  %v20023_v8 = vld [vmem:[#allocation29_spill] sm:$0xff] }
 0x32c   :  { %v9561_v54 = vmul.f32 -1.442695, %v16085_v31  ;;  %4465 = vmatpush.bf16.msra.mxu1 %v9136_v9  ;;  %vm6439_vm15 = vcmp.eq.f32.partialorder %v6438_v49, 8.507059e+37  ;;  %v6441_v4 = vor.u32 1.1754944e-38, %v6440_v0  ;;  %vm6494_vm1 = vweird.f32 %v16030_v55 }
 0x32d   :  { %v6437_v56 = vsel %vm16091_vm13, %v16053_v45, %v6433_v57  ;;  %v6492_v48 = vmul.f32 %v10512_v27, %v6491_v38  ;;  %v10514_v2 = vpop.eup %10513  ;;  %v6501_v5 = vor.u32 1.1754944e-38, %v6500_v22  ;;  %vm6496_vm3 = vmor %vm6494_vm1, %vm6495_vm14  ;;  %vm6499_vm4 = vcmp.eq.f32.partialorder %v6498_v58, 8.507059e+37 }
 0x32e   :  { %v4232_v40 = vpop.f32.mrf.mxu2  ;;  %10517 = vpow2.f32 %v9561_v54  ;;  %v16102_v29 = vpop.eup %10515  ;;  %v16105_v11 = vadd.f32 1.0, %v10514_v2  ;;  %v6442_v61 = vsel %vm6439_vm15, %v6441_v4, %v6437_v56  ;;  %v6560_v2 = vand.u32 2147483648, %v16068_v12 }
 0x32f   :  { %v4321_v19 = vpop.f32.mrf.mxu3  ;;  %v4233_v28 = vadd.f32 %v4232_v40, %v4144_v52  ;;  %v6493_v34 = vadd.f32 %v10512_v27, %v6492_v48  ;;  %v6550_v15 = vmul.f32 %v16102_v29, %v16068_v12  ;;  %4466 = vmatmul.bf16.vlgmr.msra.gmra.mxu1 %v19989_v13  ;;  %v16117_v0 = vmul.f32 %v6442_v61, %v15956_v16 }
 0x330   :  { %v4057_v45 = vpop.f32.mrf.mxu0  ;;  %10519 = vrcp.f32 %v16105_v11  ;;  %vm6555_vm5 = vweird.f32 %v16102_v29  ;;  %vm6554_vm6 = vweird.f32 %v16068_v12  ;;  %vm6614_vm10 = vweird.f32 %v16105_v11 }
 0x331   :  { %v4146_v36 = vpop.f32.mrf.mxu1  ;;  %v16110_v49 = vadd.f32 %v4321_v19, %v4233_v28  ;;  %v4058_v51 = vadd.f32 %v4057_v45, %v15586_v21  ;;  %v6497_v3 = vsel %vm6496_vm3, %v10512_v27, %v6493_v34  ;;  %v6551_v24 = vsub.f32 1.0, %v6550_v15  ;;  %19990 = vst [vmem:[#allocation13_spill] sm:$0xff] %v16117_v0  ;;  %v19992_v28 = vld [vmem:[#allocation15_spill] sm:$0xff]  ;;  %v19993_v34 = vld [vmem:[#allocation17_spill] sm:$0xff]  ;;  %vm16147_vm8 = vmor %vm6554_vm6, %vm6555_vm5 }
 0x332   :  { %v6502_v55 = vsel %vm6499_vm4, %v6501_v5, %v6497_v3  ;;  %v6558_v19 = vand.u32 2147483647, %v16068_v12  ;;  %v6618_v15 = vand.u32 2147483647, %v16105_v11  ;;  %v9912_v0 = vld [vmem:[#allocation2 + $0x3d4] sm:$0xf0] }
 0x333   :  { %v9565_v25 = vmul.f32 -1.442695, %v16110_v49  ;;  %v16120_v22 = vmul.f32 %v6502_v55, %v15966_v39  ;;  %v4147_v57 = vadd.f32 %v4146_v36, %v4058_v51  ;;  %v6552_v54 = vmul.f32 %v16102_v29, %v6551_v24  ;;  %v19994_v24 = vld [vmem:[#allocation18_spill] sm:$0xff] }
 0x334   :  { %v10518_v38 = vpop.eup %10517  ;;  %v6620_v51 = vand.u32 2147483648, %v16105_v11  ;;  %vm16151_vm9 = vcmp.eq.f32.partialorder %v6558_v19, 8.507059e+37  ;;  %v9379_v19 = vld [vmem:[#allocation2 + $0x2e8] sm:$0xf]  ;;  %vm6619_vm2 = vcmp.eq.f32.partialorder %v6618_v15, 8.507059e+37 }
 0x335   :  { %19991 = vst [vmem:[#allocation14_spill] sm:$0xff] %v16120_v22  ;;  %10521 = vpow2.f32 %v9565_v25  ;;  %v16122_v9 = vadd.f32 1.0, %v10518_v38  ;;  %v6553_v45 = vadd.f32 %v16102_v29, %v6552_v54  ;;  %v9820_v38 = vld [vmem:[#allocation2 + $0xf4] sm:$0xf0] }
 0x336   :  { %v4235_v52 = vpop.f32.mrf.mxu2  ;;  %v10520_v48 = vpop.eup %10519 }
 0x337   :  { %v4324_v27 = vpop.f32.mrf.mxu3  ;;  %v4236_v56 = vadd.f32 %v4235_v52, %v4147_v57  ;;  %10523 = vrcp.f32 %v16122_v9  ;;  %v6610_v39 = vmul.f32 %v10520_v48, %v16105_v11  ;;  %vm6615_vm7 = vweird.f32 %v10520_v48 }
 0x338   :  { %v4059_v16 = vpop.f32.mrf.mxu0  ;;  %4560 = vmatmul.bf16.gmra.mxu2 %v19993_v34  ;;  %vm16163_vm0 = vmor %vm6614_vm10, %vm6615_vm7  ;;  %v6621_v11 = vor.u32 1.1754944e-38, %v6620_v51  ;;  %vm6674_vm12 = vweird.f32 %v16122_v9 }
 0x339   :  { %v4148_v58 = vpop.f32.mrf.mxu1  ;;  %v16129_v40 = vadd.f32 %v4324_v27, %v4236_v56  ;;  %v4060_v4 = vadd.f32 %v4059_v16, %v15586_v21  ;;  %4382 = vmatmul.bf16.gmra.mxu0 %v19992_v28  ;;  %v6611_v36 = vsub.f32 1.0, %v6610_v39  ;;  %v6561_v27 = vor.u32 1.1754944e-38, %v6560_v2  ;;  %v9251_v2 = vld [vmem:[#allocation2 + $0x1e8] sm:$0xf] }
 0x33a   :  { %4649 = vmatmul.bf16.gmra.mxu3 %v19994_v24  ;;  %v6557_v56 = vsel %vm16147_vm8, %v16102_v29, %v6553_v45  ;;  %v9507_v29 = vld [vmem:[#allocation2 + $0x3e8] sm:$0xf] }
 0x33b   :  { %v10522_v5 = vpop.eup %10521  ;;  %v9569_v61 = vmul.f32 -1.442695, %v16129_v40  ;;  %v4149_v55 = vadd.f32 %v4148_v58, %v4060_v4  ;;  %v6612_v25 = vmul.f32 %v10520_v48, %v6611_v36  ;;  %v9884_v4 = vld [vmem:[#allocation2 + $0x2f4] sm:$0xf0]  ;;  %v6562_v15 = vsel %vm16151_vm9, %v6561_v27, %v6557_v56 }
 0x33c   :  { %v16141_v3 = vadd.f32 1.0, %v10522_v5  ;;  %v9123_v5 = vld [vmem:[#allocation2 + $0xe8] sm:$0xf]  ;;  %v9380_v42 = vor.u32 %v9884_v4, %v9379_v19  ;;  %v9508_v19 = vor.u32 %v9916_v60, %v9507_v29  ;;  %v16183_v52 = vmul.f32 %v6562_v15, %v16009_v33  ;;  %v9852_v33 = vld [vmem:[#allocation2 + $0x1f4] sm:$0xf0] }
 0x33d   :  { %10525 = vpow2.f32 %v9569_v61  ;;  %v16145_v57 = vpop.eup %10523  ;;  %v6613_v16 = vadd.f32 %v10520_v48, %v6612_v25  ;;  %v9124_v44 = vor.u32 %v9820_v38, %v9123_v5  ;;  %v9252_v29 = vor.u32 %v9852_v33, %v9251_v2 }
 0x33e   :  { %10527 = vrcp.f32 %v16141_v3  ;;  %v4237_v54 = vpop.f32.mrf.mxu2  ;;  %v6670_v58 = vmul.f32 %v16145_v57, %v16122_v9  ;;  %4903 = vmatpush.bf16.msrb.mxu2 %v9380_v42  ;;  %4992 = vmatpush.bf16.msrb.mxu3 %v9508_v19  ;;  %20003 = vst [vmem:[#allocation15_spill] sm:$0xff] %v16183_v52  ;;  %vm6675_vm11 = vweird.f32 %v16145_v57  ;;  %v6740_v38 = vand.u32 2147483648, %v16141_v3  ;;  %v20015_v52 = vld [vmem:[#allocation25_spill] sm:$0xff] }
 0x33f   :  { %v4326_v12 = vpop.f32.mrf.mxu3  ;;  %v4238_v39 = vadd.f32 %v4237_v54, %v4149_v55  ;;  %v6617_v45 = vsel %vm16163_vm0, %v10520_v48, %v6613_v16  ;;  %4471 = vmatmul.bf16.gmra.mxu1 %v20001_v7  ;;  %4725 = vmatpush.bf16.msrb.mxu0 %v9124_v44  ;;  %vm16198_vm13 = vmor %vm6674_vm12, %vm6675_vm11  ;;  %vm6734_vm15 = vweird.f32 %v16141_v3 }
 0x340   :  { %v4062_v36 = vpop.f32.mrf.mxu0  ;;  %v6671_v25 = vsub.f32 1.0, %v6670_v58  ;;  %v6622_v51 = vsel %vm6619_vm2, %v6621_v11, %v6617_v45  ;;  %4814 = vmatpush.bf16.msrb.mxu1 %v9252_v29 }
 0x341   :  { %v4151_v61 = vpop.f32.mrf.mxu1  ;;  %v16169_v55 = vadd.f32 %v4326_v12, %v4238_v39  ;;  %v4063_v54 = vadd.f32 %v4062_v36, %v15586_v21  ;;  %v16176_v26 = vmul.f32 %v6622_v51, %v16050_v47  ;;  %v6680_v47 = vand.u32 2147483648, %v16122_v9 }
 0x342   :  { %v6672_v48 = vmul.f32 %v16145_v57, %v6671_v25  ;;  %v6678_v36 = vand.u32 2147483647, %v16122_v9 }
 0x343   :  { %v10526_v4 = vpop.eup %10525  ;;  %20002 = vst [vmem:[#allocation12_spill] sm:$0xff] %v16176_v26  ;;  %v9573_v12 = vmul.f32 -1.442695, %v16169_v55  ;;  %v4152_v16 = vadd.f32 %v4151_v61, %v4063_v54  ;;  %v6738_v61 = vand.u32 2147483647, %v16141_v3 }
 0x344   :  { %v10528_v58 = vpop.eup %10527  ;;  %v16180_v39 = vadd.f32 1.0, %v10526_v4  ;;  %v6673_v60 = vadd.f32 %v16145_v57, %v6672_v48  ;;  %v6681_v4 = vor.u32 1.1754944e-38, %v6680_v47  ;;  %v20006_v48 = vld [vmem:[#allocation19_spill] sm:$0xff]  ;;  %vm6679_vm1 = vcmp.eq.f32.partialorder %v6678_v36, 8.507059e+37  ;;  %v20008_v47 = vld [vmem:[#allocation22_spill] sm:$0xff] }
 0x345   :  { %v6730_v42 = vmul.f32 %v10528_v58, %v16141_v3  ;;  %10529 = vpow2.f32 %v9573_v12  ;;  %vm6735_vm14 = vweird.f32 %v10528_v58  ;;  %vm6739_vm4 = vcmp.eq.f32.partialorder %v6738_v61, 8.507059e+37  ;;  %v9491_v26 = vld [vmem:[#allocation2 + $0x3c8] sm:$0xf] }
 0x346   :  { %10531 = vrcp.f32 %v16180_v39  ;;  %v4240_v27 = vpop.f32.mrf.mxu2  ;;  %v6677_v9 = vsel %vm16198_vm13, %v16145_v57, %v6673_v60  ;;  %vm6736_vm3 = vmor %vm6734_vm15, %vm6735_vm14  ;;  %v6741_v57 = vor.u32 1.1754944e-38, %v6740_v38  ;;  %vm6794_vm6 = vweird.f32 %v16180_v39 }
 0x347   :  { %v4329_v56 = vpop.f32.mrf.mxu3  ;;  %v6731_v44 = vsub.f32 1.0, %v6730_v42  ;;  %v4241_v5 = vadd.f32 %v4240_v27, %v4152_v16 }
 0x348   :  { %v4064_v45 = vpop.f32.mrf.mxu0 }
 0x349   :  { %v4153_v25 = vpop.f32.mrf.mxu1  ;;  %v6732_v15 = vmul.f32 %v10528_v58, %v6731_v44  ;;  %v16202_v51 = vadd.f32 %v4329_v56, %v4241_v5  ;;  %v4065_v19 = vadd.f32 %v4064_v45, %v15586_v21  ;;  %4387 = vmatmul.bf16.gmra.mxu0 %v20006_v48  ;;  %v20007_v44 = vld [vmem:[#allocation21_spill] sm:$0xff]  ;;  %v6682_v5 = vsel %vm6679_vm1, %v6681_v4, %v6677_v9  ;;  %v20011_v9 = vld [vmem:[#allocation20_spill] sm:$0xff] }
 0x34a   :  { %4565 = vmatmul.bf16.gmra.mxu2 %v20007_v44  ;;  %4654 = vmatmul.bf16.gmra.mxu3 %v20008_v47  ;;  %v16222_v61 = vmul.f32 %v6682_v5, %v16085_v31 }
 0x34b   :  { %v10530_v12 = vpop.eup %10529  ;;  %v6733_v16 = vadd.f32 %v10528_v58, %v6732_v15  ;;  %v9577_v42 = vmul.f32 -1.442695, %v16202_v51  ;;  %v4154_v27 = vadd.f32 %v4153_v25, %v4065_v19 }
 0x34c   :  { %v16212_v56 = vpop.eup %10531  ;;  %v5881_v60 = vadd.f32 1.0, %v10530_v12  ;;  %20010 = vst [vmem:[#allocation18_spill] sm:$0xff] %v16222_v61 }
 0x34d   :  { %v6737_v2 = vsel %vm6736_vm3, %v10528_v58, %v6733_v16  ;;  %v6790_v3 = vmul.f32 %v16212_v56, %v16180_v39  ;;  %10533 = vpow2.f32 %v9577_v42  ;;  %vm6795_vm5 = vweird.f32 %v16212_v56 }
 0x34e   :  { %v6742_v33 = vsel %vm6739_vm4, %v6741_v57, %v6737_v2  ;;  %10535 = vrcp.f32 %v5881_v60  ;;  %v4242_v29 = vpop.f32.mrf.mxu2  ;;  %v6800_v2 = vand.u32 2147483648, %v16180_v39  ;;  %vm16240_vm7 = vmor %vm6794_vm6, %vm6795_vm5  ;;  %vm6854_vm9 = vweird.f32 %v5881_v60 }
 0x34f   :  { %v4331_v45 = vpop.f32.mrf.mxu3  ;;  %v16219_v25 = vmul.f32 %v6742_v33, %v16110_v49  ;;  %v6791_v36 = vsub.f32 1.0, %v6790_v3  ;;  %v4243_v54 = vadd.f32 %v4242_v29, %v4154_v27  ;;  %4476 = vmatmul.bf16.gmra.mxu1 %v20011_v9 }
 0x350   :  { %v4067_v38 = vpop.f32.mrf.mxu0 }
 0x351   :  { %20009 = vst [vmem:[#allocation17_spill] sm:$0xff] %v16219_v25  ;;  %v4156_v15 = vpop.f32.mrf.mxu1  ;;  %v16224_v19 = vadd.f32 %v4331_v45, %v4243_v54  ;;  %v4068_v58 = vadd.f32 %v4067_v38, %v15586_v21  ;;  %v6792_v4 = vmul.f32 %v16212_v56, %v6791_v36  ;;  %v6798_v36 = vand.u32 2147483647, %v16180_v39  ;;  %v20014_v39 = vld [vmem:[#allocation23_spill] sm:$0xff] }
 0x352   :  { %v6858_v54 = vand.u32 2147483647, %v5881_v60  ;;  %v6860_v38 = vand.u32 2147483648, %v5881_v60 }
 0x353   :  { %v10534_v49 = vpop.eup %10533  ;;  %v9581_v16 = vmul.f32 -1.442695, %v16224_v19  ;;  %v4157_v42 = vadd.f32 %v4156_v15, %v4068_v58  ;;  %v6793_v5 = vadd.f32 %v16212_v56, %v6792_v4  ;;  %vm6799_vm10 = vcmp.eq.f32.partialorder %v6798_v36, 8.507059e+37  ;;  %v9363_v4 = vld [vmem:[#allocation2 + $0x2c8] sm:$0xf] }
 0x354   :  { %v10536_v27 = vpop.eup %10535  ;;  %v16232_v31 = vadd.f32 1.0, %v10534_v49  ;;  %vm6859_vm2 = vcmp.eq.f32.partialorder %v6858_v54, 8.507059e+37 }
 0x355   :  { %v6850_v57 = vmul.f32 %v10536_v27, %v5881_v60  ;;  %10537 = vpow2.f32 %v9581_v16  ;;  %vm6855_vm8 = vweird.f32 %v10536_v27 }
 0x356   :  { %10539 = vrcp.f32 %v16232_v31  ;;  %v4245_v3 = vpop.f32.mrf.mxu2  ;;  %vm6856_vm0 = vmor %vm6854_vm9, %vm6855_vm8  ;;  %vm6914_vm12 = vweird.f32 %v16232_v31 }
 0x357   :  { %v4334_v33 = vpop.f32.mrf.mxu3  ;;  %v6851_v29 = vsub.f32 1.0, %v6850_v57  ;;  %v4246_v45 = vadd.f32 %v4245_v3, %v4157_v42  ;;  %v6797_v42 = vsel %vm16240_vm7, %v16212_v56, %v6793_v5  ;;  %v6801_v57 = vor.u32 1.1754944e-38, %v6800_v2  ;;  %v20016_v56 = vld [vmem:[#allocation26_spill] sm:$0xff] }
 0x358   :  { %v4069_v15 = vpop.f32.mrf.mxu0 }
 0x359   :  { %v4158_v58 = vpop.f32.mrf.mxu1  ;;  %v6852_v49 = vmul.f32 %v10536_v27, %v6851_v29  ;;  %v16244_v16 = vadd.f32 %v4334_v33, %v4246_v45  ;;  %v4070_v12 = vadd.f32 %v4069_v15, %v15586_v21  ;;  %4392 = vmatmul.bf16.gmra.mxu0 %v20014_v39  ;;  %v6861_v33 = vor.u32 1.1754944e-38, %v6860_v38 }
 0x35a   :  { %4570 = vmatmul.bf16.gmra.mxu2 %v20015_v52  ;;  %4659 = vmatmul.bf16.gmra.mxu3 %v20016_v56  ;;  %v6802_v5 = vsel %vm6799_vm10, %v6801_v57, %v6797_v42  ;;  %v9107_v57 = vld [vmem:[#allocation2 + $0xc8] sm:$0xf] }
 0x35b   :  { %v10538_v3 = vpop.eup %10537  ;;  %v6853_v11 = vadd.f32 %v10536_v27, %v6852_v49  ;;  %v9585_v61 = vmul.f32 -1.442695, %v16244_v16  ;;  %v4159_v25 = vadd.f32 %v4158_v58, %v4070_v12  ;;  %v9880_v49 = vld [vmem:[#allocation2 + $0x2d4] sm:$0xf0] }
 0x35c   :  { %v16253_v29 = vpop.eup %10539  ;;  %v16255_v45 = vadd.f32 1.0, %v10538_v3  ;;  %v16265_v3 = vmul.f32 %v6802_v5, %v16129_v40  ;;  %v9364_v42 = vor.u32 %v9880_v49, %v9363_v4 }
 0x35d   :  { %v6857_v2 = vsel %vm6856_vm0, %v10536_v27, %v6853_v11  ;;  %v6910_v60 = vmul.f32 %v16253_v29, %v16232_v31  ;;  %10541 = vpow2.f32 %v9585_v61  ;;  %v9816_v61 = vld [vmem:[#allocation2 + $0xd4] sm:$0xf0]  ;;  %vm6915_vm11 = vweird.f32 %v16253_v29 }
 0x35e   :  { %v6862_v15 = vsel %vm6859_vm2, %v6861_v33, %v6857_v2  ;;  %10543 = vrcp.f32 %v16255_v45  ;;  %v4247_v12 = vpop.f32.mrf.mxu2  ;;  %20018 = vst [vmem:[#allocation19_spill] sm:$0xff] %v16265_v3  ;;  %4904 = vmatpush.bf16.msrb.mxu2 %v9364_v42  ;;  %vm16288_vm13 = vmor %vm6914_vm12, %vm6915_vm11  ;;  %vm6974_vm15 = vweird.f32 %v16255_v45 }
 0x35f   :  { %v4336_v58 = vpop.f32.mrf.mxu3  ;;  %v16262_v36 = vmul.f32 %v6862_v15, %v16169_v55  ;;  %v6911_v54 = vsub.f32 1.0, %v6910_v60  ;;  %v4248_v38 = vadd.f32 %v4247_v12, %v4159_v25  ;;  %v20019_v55 = vld [vmem:[#allocation24_spill] sm:$0xff]  ;;  %v9108_v60 = vor.u32 %v9816_v61, %v9107_v57  ;;  %v9848_v61 = vld [vmem:[#allocation2 + $0x1d4] sm:$0xf0] }
 0x360   :  { %v4072_v11 = vpop.f32.mrf.mxu0  ;;  %4481 = vmatmul.bf16.gmra.mxu1 %v20019_v55  ;;  %v9492_v15 = vor.u32 %v9912_v0, %v9491_v26  ;;  %v6920_v26 = vand.u32 2147483648, %v16232_v31  ;;  %v9235_v57 = vld [vmem:[#allocation2 + $0x1c8] sm:$0xf] }
 0x361   :  { %20017 = vst [vmem:[#allocation16_spill] sm:$0xff] %v16262_v36  ;;  %v4161_v27 = vpop.f32.mrf.mxu1  ;;  %v16267_v33 = vadd.f32 %v4336_v58, %v4248_v38  ;;  %v4073_v2 = vadd.f32 %v4072_v11, %v15586_v21  ;;  %v6912_v25 = vmul.f32 %v16253_v29, %v6911_v54  ;;  %4726 = vmatpush.bf16.msrb.mxu0 %v9108_v60  ;;  %v6978_v60 = vand.u32 2147483647, %v16255_v45 }
 0x362   :  { %4993 = vmatpush.bf16.msrb.mxu3 %v9492_v15  ;;  %v9236_v15 = vor.u32 %v9848_v61, %v9235_v57  ;;  %v20022_v57 = vld [vmem:[#allocation27_spill] sm:$0xff] }
 0x363   :  { %v10542_v5 = vpop.eup %10541  ;;  %v9589_v12 = vmul.f32 -1.442695, %v16267_v33  ;;  %v4162_v4 = vadd.f32 %v4161_v27, %v4073_v2  ;;  %v6913_v54 = vadd.f32 %v16253_v29, %v6912_v25  ;;  %v6918_v2 = vand.u32 2147483647, %v16232_v31 }
 0x364   :  { %v10544_v58 = vpop.eup %10543  ;;  %v16275_v38 = vadd.f32 1.0, %v10542_v5  ;;  %v6980_v25 = vand.u32 2147483648, %v16255_v45  ;;  %4815 = vmatpush.bf16.msrb.mxu1 %v9236_v15  ;;  %vm6979_vm4 = vcmp.eq.f32.partialorder %v6978_v60, 8.507059e+37 }
 0x365   :  { %v6970_v49 = vmul.f32 %v10544_v58, %v16255_v45  ;;  %10545 = vpow2.f32 %v9589_v12  ;;  %vm6975_vm14 = vweird.f32 %v10544_v58  ;;  %v6917_v31 = vsel %vm16288_vm13, %v16253_v29, %v6913_v54  ;;  %v20024_v54 = vld [vmem:[#allocation30_spill] sm:$0xff] }
 0x366   :  { %10547 = vrcp.f32 %v16275_v38  ;;  %v4250_v0 = vpop.f32.mrf.mxu2  ;;  %vm6919_vm1 = vcmp.eq.f32.partialorder %v6918_v2, 8.507059e+37  ;;  %vm6976_vm3 = vmor %vm6974_vm15, %vm6975_vm14  ;;  %v6981_v29 = vor.u32 1.1754944e-38, %v6980_v25  ;;  %vm7034_vm6 = vweird.f32 %v16275_v38 }
 0x367   :  { %v4339_v11 = vpop.f32.mrf.mxu3  ;;  %v6971_v27 = vsub.f32 1.0, %v6970_v49  ;;  %v4251_v42 = vadd.f32 %v4250_v0, %v4162_v4  ;;  %v6921_v0 = vor.u32 1.1754944e-38, %v6920_v26 }
 0x368   :  { %v4074_v5 = vpop.f32.mrf.mxu0 }
 0x369   :  { %v4163_v12 = vpop.f32.mrf.mxu1  ;;  %v6972_v3 = vmul.f32 %v10544_v58, %v6971_v27  ;;  %v16292_v4 = vadd.f32 %v4339_v11, %v4251_v42  ;;  %v4075_v49 = vadd.f32 %v4074_v5, %v15586_v21  ;;  %4397 = vmatmul.bf16.gmra.mxu0 %v20022_v57  ;;  %v6922_v26 = vsel %vm6919_vm1, %v6921_v0, %v6917_v31 }
 0x36a   :  { %4575 = vmatmul.bf16.gmra.mxu2 %v20023_v8  ;;  %4664 = vmatmul.bf16.gmra.mxu3 %v20024_v54  ;;  %v16312_v60 = vmul.f32 %v6922_v26, %v16202_v51 }
 0x36b   :  { %v10546_v61 = vpop.eup %10545  ;;  %v6973_v36 = vadd.f32 %v10544_v58, %v6972_v3  ;;  %v9593_v22 = vmul.f32 -1.442695, %v16292_v4  ;;  %v4164_v27 = vadd.f32 %v4163_v12, %v4075_v49 }
 0x36c   :  { %v16302_v11 = vpop.eup %10547  ;;  %v5897_v40 = vadd.f32 1.0, %v10546_v61  ;;  %20026 = vst [vmem:[#allocation22_spill] sm:$0xff] %v16312_v60 }
 0x36d   :  { %v6977_v42 = vsel %vm6976_vm3, %v10544_v58, %v6973_v36  ;;  %v7030_v45 = vmul.f32 %v16302_v11, %v16275_v38  ;;  %10549 = vpow2.f32 %v9593_v22  ;;  %v20027_v58 = vld [vmem:[#allocation28_spill] sm:$0xff]  ;;  %vm7035_vm5 = vweird.f32 %v16302_v11 }
 0x36e   :  { %v6982_v3 = vsel %vm6979_vm4, %v6981_v29, %v6977_v42  ;;  %10551 = vrcp.f32 %v5897_v40  ;;  %v4252_v15 = vpop.f32.mrf.mxu2  ;;  %vm16330_vm7 = vmor %vm7034_vm6, %vm7035_vm5  ;;  %vm7094_vm9 = vweird.f32 %v5897_v40 }
 0x36f   :  { %v4341_v5 = vpop.f32.mrf.mxu3  ;;  %v16309_v12 = vmul.f32 %v6982_v3, %v16224_v19  ;;  %v7031_v2 = vsub.f32 1.0, %v7030_v45  ;;  %v4253_v49 = vadd.f32 %v4252_v15, %v4164_v27  ;;  %v7040_v3 = vand.u32 2147483648, %v16275_v38 }
 0x370   :  { %v4077_v25 = vpop.f32.mrf.mxu0  ;;  %4486 = vmatmul.bf16.gmra.mxu1 %v20027_v58 }
 0x371   :  { %20025 = vst [vmem:[#allocation21_spill] sm:$0xff] %v16309_v12  ;;  %v4166_v61 = vpop.f32.mrf.mxu1  ;;  %v16314_v31 = vadd.f32 %v4341_v5, %v4253_v49  ;;  %v4078_v36 = vadd.f32 %v4077_v25, %v15586_v21  ;;  %v7032_v22 = vmul.f32 %v16302_v11, %v7031_v2  ;;  %v7038_v25 = vand.u32 2147483647, %v16275_v38  ;;  %v20030_v38 = vld [vmem:[#allocation32_spill] sm:$0xff] }
 0x373   :  { %v10550_v19 = vpop.eup %10549  ;;  %v9597_v29 = vmul.f32 -1.442695, %v16314_v31  ;;  %v4167_v27 = vadd.f32 %v4166_v61, %v4078_v36  ;;  %v7033_v45 = vadd.f32 %v16302_v11, %v7032_v22  ;;  %v7098_v61 = vand.u32 2147483647, %v5897_v40  ;;  %v9876_v22 = vld [vmem:[#allocation2 + $0x2b4] sm:$0xf0] }
 0x374   :  { %v10552_v42 = vpop.eup %10551  ;;  %v16322_v51 = vadd.f32 1.0, %v10550_v19  ;;  %v7100_v36 = vand.u32 2147483648, %v5897_v40  ;;  %vm7039_vm10 = vcmp.eq.f32.partialorder %v7038_v25, 8.507059e+37 }
 0x375   :  { %v7090_v26 = vmul.f32 %v10552_v42, %v5897_v40  ;;  %10553 = vpow2.f32 %v9597_v29  ;;  %vm7095_vm8 = vweird.f32 %v10552_v42  ;;  %vm7099_vm2 = vcmp.eq.f32.partialorder %v7098_v61, 8.507059e+37 }
 0x376   :  { %10555 = vrcp.f32 %v16322_v51  ;;  %v4255_v15 = vpop.f32.mrf.mxu2  ;;  %vm7096_vm0 = vmor %vm7094_vm9, %vm7095_vm8  ;;  %vm7154_vm12 = vweird.f32 %v16322_v51 }
 0x377   :  { %v4344_v5 = vpop.f32.mrf.mxu3  ;;  %v7091_v2 = vsub.f32 1.0, %v7090_v26  ;;  %v4256_v49 = vadd.f32 %v4255_v15, %v4167_v27  ;;  %v7037_v27 = vsel %vm16330_vm7, %v16302_v11, %v7033_v45  ;;  %v7041_v26 = vor.u32 1.1754944e-38, %v7040_v3  ;;  %v20032_v11 = vld [vmem:[#allocation35_spill] sm:$0xff] }
 0x378   :  { %v4079_v19 = vpop.f32.mrf.mxu0 }
 0x379   :  { %v4168_v29 = vpop.f32.mrf.mxu1  ;;  %v7092_v0 = vmul.f32 %v10552_v42, %v7091_v2  ;;  %v16334_v60 = vadd.f32 %v4344_v5, %v4256_v49  ;;  %v4080_v12 = vadd.f32 %v4079_v19, %v15586_v21  ;;  %4402 = vmatmul.bf16.gmra.mxu0 %v20030_v38  ;;  %v7101_v5 = vor.u32 1.1754944e-38, %v7100_v36 }
 0x37a   :  { %4580 = vmatmul.bf16.gmra.mxu2 %v20031_v14  ;;  %4669 = vmatmul.bf16.gmra.mxu3 %v20032_v11  ;;  %v7042_v45 = vsel %vm7039_vm10, %v7041_v26, %v7037_v27  ;;  %v9091_v26 = vld [vmem:[#allocation2 + $0xa8] sm:$0xf] }
 0x37b   :  { %v10554_v15 = vpop.eup %10553  ;;  %v7093_v17 = vadd.f32 %v10552_v42, %v7092_v0  ;;  %v9601_v6 = vmul.f32 -1.442695, %v16334_v60  ;;  %v4169_v50 = vadd.f32 %v4168_v29, %v4080_v12  ;;  %v9347_v29 = vld [vmem:[#allocation2 + $0x2a8] sm:$0xf] }
 0x37c   :  { %v16343_v2 = vpop.eup %10555  ;;  %v16345_v49 = vadd.f32 1.0, %v10554_v15  ;;  %v16355_v15 = vmul.f32 %v7042_v45, %v16244_v16  ;;  %v9348_v27 = vor.u32 %v9876_v22, %v9347_v29 }
 0x37d   :  { %v7097_v3 = vsel %vm7096_vm0, %v10552_v42, %v7093_v17  ;;  %v7150_v40 = vmul.f32 %v16343_v2, %v16322_v51  ;;  %10557 = vpow2.f32 %v9601_v6  ;;  %v9812_v6 = vld [vmem:[#allocation2 + $0xb4] sm:$0xf0]  ;;  %vm7155_vm11 = vweird.f32 %v16343_v2 }
 0x37e   :  { %v7102_v0 = vsel %vm7099_vm2, %v7101_v5, %v7097_v3  ;;  %10559 = vrcp.f32 %v16345_v49  ;;  %v4257_v12 = vpop.f32.mrf.mxu2  ;;  %20034 = vst [vmem:[#allocation23_spill] sm:$0xff] %v16355_v15  ;;  %4905 = vmatpush.bf16.msrb.mxu2 %v9348_v27  ;;  %vm16378_vm13 = vmor %vm7154_vm12, %vm7155_vm11  ;;  %vm7214_vm15 = vweird.f32 %v16345_v49 }
 0x37f   :  { %v4346_v19 = vpop.f32.mrf.mxu3  ;;  %v16352_v25 = vmul.f32 %v7102_v0, %v16267_v33  ;;  %v7151_v61 = vsub.f32 1.0, %v7150_v40  ;;  %v4258_v36 = vadd.f32 %v4257_v12, %v4169_v50  ;;  %v20035_v33 = vld [vmem:[#allocation33_spill] sm:$0xff]  ;;  %v9092_v40 = vor.u32 %v9812_v6, %v9091_v26  ;;  %v9219_v26 = vld [vmem:[#allocation2 + $0x1a8] sm:$0xf]  ;;  %v9844_v6 = vld [vmem:[#allocation2 + $0x1b4] sm:$0xf0] }
 0x380   :  { %v4082_v17 = vpop.f32.mrf.mxu0  ;;  %4491 = vmatmul.bf16.gmra.mxu1 %v20035_v33  ;;  %v9476_v0 = vor.u32 %v9908_v53, %v9475_v20  ;;  %v7160_v53 = vand.u32 2147483648, %v16322_v51  ;;  %v20039_v33 = vld [vmem:[#allocation37_spill] sm:$0xff] }
 0x381   :  { %20033 = vst [vmem:[#allocation20_spill] sm:$0xff] %v16352_v25  ;;  %v4171_v42 = vpop.f32.mrf.mxu1  ;;  %v16357_v5 = vadd.f32 %v4346_v19, %v4258_v36  ;;  %v4083_v3 = vadd.f32 %v4082_v17, %v15586_v21  ;;  %v7152_v50 = vmul.f32 %v16343_v2, %v7151_v61  ;;  %4727 = vmatpush.bf16.msrb.mxu0 %v9092_v40  ;;  %v7218_v40 = vand.u32 2147483647, %v16345_v49 }
 0x382   :  { %4994 = vmatpush.bf16.msrb.mxu3 %v9476_v0  ;;  %v9220_v0 = vor.u32 %v9844_v6, %v9219_v26  ;;  %v20038_v26 = vld [vmem:[#allocation39_spill] sm:$0xff] }
 0x383   :  { %v10558_v45 = vpop.eup %10557  ;;  %v9605_v12 = vmul.f32 -1.442695, %v16357_v5  ;;  %v4172_v29 = vadd.f32 %v4171_v42, %v4083_v3  ;;  %v7153_v61 = vadd.f32 %v16343_v2, %v7152_v50  ;;  %v7158_v3 = vand.u32 2147483647, %v16322_v51 }
 0x384   :  { %v10560_v19 = vpop.eup %10559  ;;  %v16365_v36 = vadd.f32 1.0, %v10558_v45  ;;  %v7220_v50 = vand.u32 2147483648, %v16345_v49  ;;  %4816 = vmatpush.bf16.msrb.mxu1 %v9220_v0  ;;  %vm7219_vm4 = vcmp.eq.f32.partialorder %v7218_v40, 8.507059e+37 }
 0x385   :  { %v7210_v22 = vmul.f32 %v10560_v19, %v16345_v49  ;;  %10561 = vpow2.f32 %v9605_v12  ;;  %vm7215_vm14 = vweird.f32 %v10560_v19  ;;  %v7157_v51 = vsel %vm16378_vm13, %v16343_v2, %v7153_v61  ;;  %v20040_v61 = vld [vmem:[#allocation36_spill] sm:$0xff] }
 0x386   :  { %10563 = vrcp.f32 %v16365_v36  ;;  %v4260_v20 = vpop.f32.mrf.mxu2  ;;  %vm7159_vm1 = vcmp.eq.f32.partialorder %v7158_v3, 8.507059e+37  ;;  %vm7216_vm3 = vmor %vm7214_vm15, %vm7215_vm14  ;;  %v7221_v2 = vor.u32 1.1754944e-38, %v7220_v50  ;;  %vm7274_vm6 = vweird.f32 %v16365_v36 }
 0x387   :  { %v4349_v17 = vpop.f32.mrf.mxu3  ;;  %v7211_v42 = vsub.f32 1.0, %v7210_v22  ;;  %v4261_v27 = vadd.f32 %v4260_v20, %v4172_v29  ;;  %v7161_v20 = vor.u32 1.1754944e-38, %v7160_v53 }
 0x388   :  { %v4084_v45 = vpop.f32.mrf.mxu0 }
 0x389   :  { %v4173_v12 = vpop.f32.mrf.mxu1  ;;  %v7212_v15 = vmul.f32 %v10560_v19, %v7211_v42  ;;  %v16382_v29 = vadd.f32 %v4349_v17, %v4261_v27  ;;  %v4085_v22 = vadd.f32 %v4084_v45, %v15586_v21  ;;  %4407 = vmatmul.bf16.gmra.mxu0 %v20038_v26  ;;  %v7162_v53 = vsel %vm7159_vm1, %v7161_v20, %v7157_v51  ;;  %v20047_v26 = vld [vmem:[#allocation43_spill] sm:$0xff] }
 0x38a   :  { %4585 = vmatmul.bf16.gmra.mxu2 %v20039_v33  ;;  %4674 = vmatmul.bf16.gmra.mxu3 %v20040_v61  ;;  %v16402_v40 = vmul.f32 %v7162_v53, %v16292_v4 }
 0x38b   :  { %v10562_v6 = vpop.eup %10561  ;;  %v7213_v25 = vadd.f32 %v10560_v19, %v7212_v15  ;;  %v9609_v35 = vmul.f32 -1.442695, %v16382_v29  ;;  %v4174_v42 = vadd.f32 %v4173_v12, %v4085_v22 }
 0x38c   :  { %v16392_v17 = vpop.eup %10563  ;;  %v5913_v16 = vadd.f32 1.0, %v10562_v6  ;;  %20042 = vst [vmem:[#allocation26_spill] sm:$0xff] %v16402_v40 }
 0x38d   :  { %v7217_v27 = vsel %vm7216_vm3, %v10560_v19, %v7213_v25  ;;  %v7270_v49 = vmul.f32 %v16392_v17, %v16365_v36  ;;  %10565 = vpow2.f32 %v9609_v35  ;;  %v20043_v19 = vld [vmem:[#allocation40_spill] sm:$0xff]  ;;  %vm7275_vm5 = vweird.f32 %v16392_v17 }
 0x38e   :  { %v7222_v15 = vsel %vm7219_vm4, %v7221_v2, %v7217_v27  ;;  %10567 = vrcp.f32 %v5913_v16  ;;  %v4262_v0 = vpop.f32.mrf.mxu2  ;;  %vm16420_vm7 = vmor %vm7274_vm6, %vm7275_vm5  ;;  %vm7334_vm9 = vweird.f32 %v5913_v16 }
 0x38f   :  { %v4351_v45 = vpop.f32.mrf.mxu3  ;;  %v16399_v12 = vmul.f32 %v7222_v15, %v16314_v31  ;;  %v7271_v3 = vsub.f32 1.0, %v7270_v49  ;;  %v4263_v22 = vadd.f32 %v4262_v0, %v4174_v42  ;;  %v7280_v15 = vand.u32 2147483648, %v16365_v36 }
 0x390   :  { %v4087_v50 = vpop.f32.mrf.mxu0  ;;  %4496 = vmatmul.bf16.gmra.mxu1 %v20043_v19 }
 0x391   :  { %20041 = vst [vmem:[#allocation25_spill] sm:$0xff] %v16399_v12  ;;  %v4176_v6 = vpop.f32.mrf.mxu1  ;;  %v16404_v51 = vadd.f32 %v4351_v45, %v4263_v22  ;;  %v4088_v25 = vadd.f32 %v4087_v50, %v15586_v21  ;;  %v7272_v35 = vmul.f32 %v16392_v17, %v7271_v3  ;;  %v7278_v50 = vand.u32 2147483647, %v16365_v36  ;;  %v20046_v36 = vld [vmem:[#allocation31_spill] sm:$0xff] }
 0x393   :  { %v10566_v31 = vpop.eup %10565  ;;  %v9613_v2 = vmul.f32 -1.442695, %v16404_v51  ;;  %v4177_v42 = vadd.f32 %v4176_v6, %v4088_v25  ;;  %v7273_v49 = vadd.f32 %v16392_v17, %v7272_v35  ;;  %v7338_v6 = vand.u32 2147483647, %v5913_v16  ;;  %v9872_v35 = vld [vmem:[#allocation2 + $0x294] sm:$0xf0] }
 0x394   :  { %v10568_v27 = vpop.eup %10567  ;;  %v16412_v4 = vadd.f32 1.0, %v10566_v31  ;;  %v7340_v25 = vand.u32 2147483648, %v5913_v16  ;;  %vm7279_vm10 = vcmp.eq.f32.partialorder %v7278_v50, 8.507059e+37 }
 0x395   :  { %v7330_v53 = vmul.f32 %v10568_v27, %v5913_v16  ;;  %10569 = vpow2.f32 %v9613_v2  ;;  %vm7335_vm8 = vweird.f32 %v10568_v27  ;;  %vm7339_vm2 = vcmp.eq.f32.partialorder %v7338_v6, 8.507059e+37 }
 0x396   :  { %10571 = vrcp.f32 %v16412_v4  ;;  %v4265_v0 = vpop.f32.mrf.mxu2  ;;  %vm7336_vm0 = vmor %vm7334_vm9, %vm7335_vm8  ;;  %vm7394_vm12 = vweird.f32 %v16412_v4 }
 0x397   :  { %v4354_v45 = vpop.f32.mrf.mxu3  ;;  %v7331_v3 = vsub.f32 1.0, %v7330_v53  ;;  %v4266_v22 = vadd.f32 %v4265_v0, %v4177_v42  ;;  %v7277_v42 = vsel %vm16420_vm7, %v16392_v17, %v7273_v49  ;;  %v7281_v53 = vor.u32 1.1754944e-38, %v7280_v15  ;;  %v20048_v17 = vld [vmem:[#allocation44_spill] sm:$0xff] }
 0x398   :  { %v4089_v31 = vpop.f32.mrf.mxu0 }
 0x399   :  { %v4178_v2 = vpop.f32.mrf.mxu1  ;;  %v7332_v20 = vmul.f32 %v10568_v27, %v7331_v3  ;;  %v16424_v40 = vadd.f32 %v4354_v45, %v4266_v22  ;;  %v4090_v12 = vadd.f32 %v4089_v31, %v15586_v21  ;;  %4412 = vmatmul.bf16.gmra.mxu0 %v20046_v36  ;;  %v7341_v45 = vor.u32 1.1754944e-38, %v7340_v25  ;;  %v20055_v36 = vld [vmem:[#allocation47_spill] sm:$0xff] }
 0x39a   :  { %4590 = vmatmul.bf16.gmra.mxu2 %v20047_v26  ;;  %4679 = vmatmul.bf16.gmra.mxu3 %v20048_v17  ;;  %v7282_v49 = vsel %vm7279_vm10, %v7281_v53, %v7277_v42  ;;  %v9075_v53 = vld [vmem:[#allocation2 + $0x88] sm:$0xf]  ;;  %v9904_v26 = vld [vmem:[#allocation2 + $0x394] sm:$0xf0] }
 0x39b   :  { %v10570_v0 = vpop.eup %10569  ;;  %v7333_v19 = vadd.f32 %v10568_v27, %v7332_v20  ;;  %v9617_v61 = vmul.f32 -1.442695, %v16424_v40  ;;  %v4179_v33 = vadd.f32 %v4178_v2, %v4090_v12  ;;  %v9331_v2 = vld [vmem:[#allocation2 + $0x288] sm:$0xf] }
 0x39c   :  { %v16433_v3 = vpop.eup %10571  ;;  %v16435_v22 = vadd.f32 1.0, %v10570_v0  ;;  %v16445_v0 = vmul.f32 %v7282_v49, %v16334_v60  ;;  %v9332_v42 = vor.u32 %v9872_v35, %v9331_v2  ;;  %v9459_v17 = vld [vmem:[#allocation2 + $0x388] sm:$0xf] }
 0x39d   :  { %v7337_v15 = vsel %vm7336_vm0, %v10568_v27, %v7333_v19  ;;  %v7390_v16 = vmul.f32 %v16433_v3, %v16412_v4  ;;  %10573 = vpow2.f32 %v9617_v61  ;;  %v9808_v61 = vld [vmem:[#allocation2 + $0x94] sm:$0xf0]  ;;  %vm7395_vm11 = vweird.f32 %v16433_v3 }
 0x39e   :  { %v7342_v20 = vsel %vm7339_vm2, %v7341_v45, %v7337_v15  ;;  %10575 = vrcp.f32 %v16435_v22  ;;  %v4267_v12 = vpop.f32.mrf.mxu2  ;;  %20050 = vst [vmem:[#allocation27_spill] sm:$0xff] %v16445_v0  ;;  %4906 = vmatpush.bf16.msrb.mxu2 %v9332_v42  ;;  %vm16468_vm13 = vmor %vm7394_vm12, %vm7395_vm11  ;;  %vm7454_vm15 = vweird.f32 %v16435_v22 }
 0x39f   :  { %v4356_v31 = vpop.f32.mrf.mxu3  ;;  %v16442_v50 = vmul.f32 %v7342_v20, %v16357_v5  ;;  %v7391_v6 = vsub.f32 1.0, %v7390_v16  ;;  %v4268_v25 = vadd.f32 %v4267_v12, %v4179_v33  ;;  %v20051_v5 = vld [vmem:[#allocation42_spill] sm:$0xff]  ;;  %v9076_v16 = vor.u32 %v9808_v61, %v9075_v53  ;;  %v9203_v53 = vld [vmem:[#allocation2 + $0x188] sm:$0xf] }
 0x3a0   :  { %v4092_v19 = vpop.f32.mrf.mxu0  ;;  %4501 = vmatmul.bf16.gmra.mxu1 %v20051_v5  ;;  %v9460_v20 = vor.u32 %v9904_v26, %v9459_v17  ;;  %v7400_v26 = vand.u32 2147483648, %v16412_v4  ;;  %v9840_v61 = vld [vmem:[#allocation2 + $0x194] sm:$0xf0] }
 0x3a1   :  { %20049 = vst [vmem:[#allocation24_spill] sm:$0xff] %v16442_v50  ;;  %v4181_v27 = vpop.f32.mrf.mxu1  ;;  %v16447_v45 = vadd.f32 %v4356_v31, %v4268_v25  ;;  %v4093_v15 = vadd.f32 %v4092_v19, %v15586_v21  ;;  %v7392_v33 = vmul.f32 %v16433_v3, %v7391_v6  ;;  %4728 = vmatpush.bf16.msrb.mxu0 %v9076_v16  ;;  %v7458_v16 = vand.u32 2147483647, %v16435_v22 }
 0x3a2   :  { %4995 = vmatpush.bf16.msrb.mxu3 %v9460_v20  ;;  %v9204_v20 = vor.u32 %v9840_v61, %v9203_v53  ;;  %v20054_v53 = vld [vmem:[#allocation45_spill] sm:$0xff] }
 0x3a3   :  { %v10574_v49 = vpop.eup %10573  ;;  %v9621_v12 = vmul.f32 -1.442695, %v16447_v45  ;;  %v4182_v2 = vadd.f32 %v4181_v27, %v4093_v15  ;;  %v7393_v6 = vadd.f32 %v16433_v3, %v7392_v33  ;;  %v7398_v15 = vand.u32 2147483647, %v16412_v4 }
 0x3a4   :  { %v10576_v31 = vpop.eup %10575  ;;  %v16455_v25 = vadd.f32 1.0, %v10574_v49  ;;  %v7460_v33 = vand.u32 2147483648, %v16435_v22  ;;  %4817 = vmatpush.bf16.msrb.mxu1 %v9204_v20  ;;  %vm7459_vm4 = vcmp.eq.f32.partialorder %v7458_v16, 8.507059e+37 }
 0x3a5   :  { %v7450_v35 = vmul.f32 %v10576_v31, %v16435_v22  ;;  %10577 = vpow2.f32 %v9621_v12  ;;  %vm7455_vm14 = vweird.f32 %v10576_v31  ;;  %v7397_v4 = vsel %vm16468_vm13, %v16433_v3, %v7393_v6  ;;  %v20056_v6 = vld [vmem:[#allocation41_spill] sm:$0xff] }
 0x3a6   :  { %10579 = vrcp.f32 %v16455_v25  ;;  %v4270_v17 = vpop.f32.mrf.mxu2  ;;  %vm7399_vm1 = vcmp.eq.f32.partialorder %v7398_v15, 8.507059e+37  ;;  %vm7456_vm3 = vmor %vm7454_vm15, %vm7455_vm14  ;;  %v7461_v3 = vor.u32 1.1754944e-38, %v7460_v33  ;;  %vm7514_vm6 = vweird.f32 %v16455_v25 }
 0x3a7   :  { %v4359_v19 = vpop.f32.mrf.mxu3  ;;  %v7451_v27 = vsub.f32 1.0, %v7450_v35  ;;  %v4271_v42 = vadd.f32 %v4270_v17, %v4182_v2  ;;  %v7401_v17 = vor.u32 1.1754944e-38, %v7400_v26 }
 0x3a8   :  { %v4094_v49 = vpop.f32.mrf.mxu0 }
 0x3a9   :  { %v4183_v12 = vpop.f32.mrf.mxu1  ;;  %v7452_v0 = vmul.f32 %v10576_v31, %v7451_v27  ;;  %v16472_v2 = vadd.f32 %v4359_v19, %v4271_v42  ;;  %v4095_v35 = vadd.f32 %v4094_v49, %v15586_v21  ;;  %4417 = vmatmul.bf16.gmra.mxu0 %v20054_v53  ;;  %v7402_v26 = vsel %vm7399_vm1, %v7401_v17, %v7397_v4  ;;  %v20063_v53 = vld [vmem:[#allocation49_spill] sm:$0xff] }
 0x3aa   :  { %4595 = vmatmul.bf16.gmra.mxu2 %v20055_v36  ;;  %4684 = vmatmul.bf16.gmra.mxu3 %v20056_v6  ;;  %v16492_v16 = vmul.f32 %v7402_v26, %v16382_v29 }
 0x3ab   :  { %v10578_v61 = vpop.eup %10577  ;;  %v7453_v50 = vadd.f32 %v10576_v31, %v7452_v0  ;;  %v9625_v5 = vmul.f32 -1.442695, %v16472_v2  ;;  %v4184_v27 = vadd.f32 %v4183_v12, %v4095_v35 }
 0x3ac   :  { %v16482_v19 = vpop.eup %10579  ;;  %v5929_v60 = vadd.f32 1.0, %v10578_v61  ;;  %20058 = vst [vmem:[#allocation30_spill] sm:$0xff] %v16492_v16 }
 0x3ad   :  { %v7457_v42 = vsel %vm7456_vm3, %v10576_v31, %v7453_v50  ;;  %v7510_v22 = vmul.f32 %v16482_v19, %v16455_v25  ;;  %10581 = vpow2.f32 %v9625_v5  ;;  %v20059_v31 = vld [vmem:[#allocation46_spill] sm:$0xff]  ;;  %vm7515_vm5 = vweird.f32 %v16482_v19 }
 0x3ae   :  { %v7462_v0 = vsel %vm7459_vm4, %v7461_v3, %v7457_v42  ;;  %10583 = vrcp.f32 %v5929_v60  ;;  %v4272_v20 = vpop.f32.mrf.mxu2  ;;  %vm16510_vm7 = vmor %vm7514_vm6, %vm7515_vm5  ;;  %vm7574_vm9 = vweird.f32 %v5929_v60 }
 0x3af   :  { %v4361_v49 = vpop.f32.mrf.mxu3  ;;  %v16489_v12 = vmul.f32 %v7462_v0, %v16404_v51  ;;  %v7511_v15 = vsub.f32 1.0, %v7510_v22  ;;  %v4273_v35 = vadd.f32 %v4272_v20, %v4184_v27  ;;  %v7520_v0 = vand.u32 2147483648, %v16455_v25 }
 0x3b0   :  { %v4097_v33 = vpop.f32.mrf.mxu0  ;;  %4506 = vmatmul.bf16.gmra.mxu1 %v20059_v31 }
 0x3b1   :  { %20057 = vst [vmem:[#allocation29_spill] sm:$0xff] %v16489_v12  ;;  %v4186_v61 = vpop.f32.mrf.mxu1  ;;  %v16494_v4 = vadd.f32 %v4361_v49, %v4273_v35  ;;  %v4098_v50 = vadd.f32 %v4097_v33, %v15586_v21  ;;  %v7512_v5 = vmul.f32 %v16482_v19, %v7511_v15  ;;  %v7518_v33 = vand.u32 2147483647, %v16455_v25  ;;  %v20062_v25 = vld [vmem:[#allocation38_spill] sm:$0xff] }
 0x3b3   :  { %v10582_v51 = vpop.eup %10581  ;;  %v9629_v3 = vmul.f32 -1.442695, %v16494_v4  ;;  %v4187_v27 = vadd.f32 %v4186_v61, %v4098_v50  ;;  %v7513_v22 = vadd.f32 %v16482_v19, %v7512_v5  ;;  %v7578_v61 = vand.u32 2147483647, %v5929_v60 }
 0x3b4   :  { %v10584_v42 = vpop.eup %10583  ;;  %v16502_v29 = vadd.f32 1.0, %v10582_v51  ;;  %v7580_v50 = vand.u32 2147483648, %v5929_v60  ;;  %vm7519_vm10 = vcmp.eq.f32.partialorder %v7518_v33, 8.507059e+37 }
 0x3b5   :  { %v7570_v26 = vmul.f32 %v10584_v42, %v5929_v60  ;;  %10585 = vpow2.f32 %v9629_v3  ;;  %vm7575_vm8 = vweird.f32 %v10584_v42  ;;  %vm7579_vm2 = vcmp.eq.f32.partialorder %v7578_v61, 8.507059e+37 }
 0x3b6   :  { %10587 = vrcp.f32 %v16502_v29  ;;  %v4275_v20 = vpop.f32.mrf.mxu2  ;;  %vm7576_vm0 = vmor %vm7574_vm9, %vm7575_vm8  ;;  %vm7634_vm12 = vweird.f32 %v16502_v29 }
 0x3b7   :  { %v4364_v49 = vpop.f32.mrf.mxu3  ;;  %v7571_v15 = vsub.f32 1.0, %v7570_v26  ;;  %v4276_v35 = vadd.f32 %v4275_v20, %v4187_v27  ;;  %v7517_v27 = vsel %vm16510_vm7, %v16482_v19, %v7513_v22  ;;  %v7521_v26 = vor.u32 1.1754944e-38, %v7520_v0  ;;  %v20064_v19 = vld [vmem:[#allocation50_spill] sm:$0xff] }
 0x3b8   :  { %v4099_v51 = vpop.f32.mrf.mxu0 }
 0x3b9   :  { %v4188_v3 = vpop.f32.mrf.mxu1  ;;  %v7572_v17 = vmul.f32 %v10584_v42, %v7571_v15  ;;  %v16514_v16 = vadd.f32 %v4364_v49, %v4276_v35  ;;  %v4100_v12 = vadd.f32 %v4099_v51, %v15586_v21  ;;  %4422 = vmatmul.bf16.gmra.mxu0 %v20062_v25  ;;  %v7581_v21 = vor.u32 1.1754944e-38, %v7580_v50  ;;  %v9315_v51 = vld [vmem:[#allocation2 + $0x268] sm:$0xf] }
 0x3ba   :  { %4600 = vmatmul.bf16.gmra.mxu2 %v20063_v53  ;;  %4689 = vmatmul.bf16.gmra.mxu3 %v20064_v19  ;;  %v7522_v22 = vsel %vm7519_vm10, %v7521_v26, %v7517_v27 }
 0x3bb   :  { %v10586_v20 = vpop.eup %10585  ;;  %v7573_v31 = vadd.f32 %v10584_v42, %v7572_v17  ;;  %v9633_v6 = vmul.f32 -1.442695, %v16514_v16  ;;  %v4189_v36 = vadd.f32 %v4188_v3, %v4100_v12  ;;  %v9868_v3 = vld [vmem:[#allocation2 + $0x274] sm:$0xf0]  ;;  %v16535_v5 = vmul.f32 %v7522_v22, %v16424_v40 }
 0x3bc   :  { %v16523_v15 = vpop.eup %10587  ;;  %v16525_v49 = vadd.f32 1.0, %v10586_v20  ;;  %v9316_v26 = vor.u32 %v9868_v3, %v9315_v51  ;;  %v9059_v20 = vld [vmem:[#allocation2 + $0x68] sm:$0xf] }
 0x3bd   :  { %v7577_v0 = vsel %vm7576_vm0, %v10584_v42, %v7573_v31  ;;  %v7630_v60 = vmul.f32 %v16523_v15, %v16502_v29  ;;  %10589 = vpow2.f32 %v9633_v6  ;;  %20066 = vst [vmem:[#allocation32_spill] sm:$0xff] %v16535_v5  ;;  %v10983_v31 = vld [vmem:[%s19272_s4] sm:$0xf]  ;;  %vm7635_vm11 = vweird.f32 %v16523_v15 }
 0x3be   :  { %v7582_v17 = vsel %vm7579_vm2, %v7581_v21, %v7577_v0  ;;  %10591 = vrcp.f32 %v16525_v49  ;;  %v4277_v12 = vpop.f32.mrf.mxu2  ;;  %v16540_v6 = vperm.slane %v10983_v31, 1  ;;  %v9804_v21 = vld [vmem:[#allocation2 + $0x74] sm:$0xf0]  ;;  %4907 = vmatpush.bf16.msrb.mxu2 %v9316_v26  ;;  %vm16563_vm13 = vmor %vm7634_vm12, %vm7635_vm11  ;;  %vm7694_vm15 = vweird.f32 %v16525_v49 }
 0x3bf   :  { %v4366_v35 = vpop.f32.mrf.mxu3  ;;  %v16532_v33 = vmul.f32 %v7582_v17, %v16447_v45  ;;  %v7631_v61 = vsub.f32 1.0, %v7630_v60  ;;  %v4278_v50 = vadd.f32 %v4277_v12, %v4189_v36  ;;  %v9060_v0 = vor.u32 %v9804_v21, %v9059_v20  ;;  %v9443_v36 = vld [vmem:[#allocation2 + $0x368] sm:$0xf]  ;;  %v9900_v60 = vld [vmem:[#allocation2 + $0x374] sm:$0xf0] }
 0x3c0   :  { %v4378_v42 = vpop.f32.mrf.mxu0  ;;  %v20067_v17 = vld [vmem:[#allocation48_spill] sm:$0xff]  ;;  %v9444_v12 = vor.u32 %v9900_v60, %v9443_v36  ;;  %v7638_v60 = vand.u32 2147483647, %v16502_v29 }
 0x3c1   :  { %20065 = vst [vmem:[#allocation28_spill] sm:$0xff] %v16532_v33  ;;  %v4467_v27 = vpop.f32.mrf.mxu1  ;;  %v16542_v45 = vadd.f32 %v4366_v35, %v4278_v50  ;;  %4511 = vmatmul.bf16.gmra.mxu1 %v20067_v17  ;;  %v7632_v40 = vmul.f32 %v16523_v15, %v7631_v61  ;;  %v4379_v22 = vadd.f32 %v4378_v42, %v16540_v6  ;;  %v7640_v42 = vand.u32 2147483648, %v16502_v29  ;;  %v9187_v36 = vld [vmem:[#allocation2 + $0x168] sm:$0xf] }
 0x3c2   :  { %4729 = vmatpush.bf16.msrb.mxu0 %v9060_v0  ;;  %4996 = vmatpush.bf16.msrb.mxu3 %v9444_v12  ;;  %vm7639_vm1 = vcmp.eq.f32.partialorder %v7638_v60, 8.507059e+37 }
 0x3c3   :  { %v10590_v19 = vpop.eup %10589  ;;  %v9637_v51 = vmul.f32 -1.442695, %v16542_v45  ;;  %v4468_v3 = vadd.f32 %v4467_v27, %v4379_v22  ;;  %v7633_v61 = vadd.f32 %v16523_v15, %v7632_v40  ;;  %v9836_v27 = vld [vmem:[#allocation2 + $0x174] sm:$0xf0]  ;;  %v7698_v22 = vand.u32 2147483647, %v16525_v49 }
 0x3c4   :  { %v10592_v35 = vpop.eup %10591  ;;  %v16550_v50 = vadd.f32 1.0, %v10590_v19  ;;  %v7700_v40 = vand.u32 2147483648, %v16525_v49  ;;  %v9188_v12 = vor.u32 %v9836_v27, %v9187_v36 }
 0x3c5   :  { %v7690_v20 = vmul.f32 %v10592_v35, %v16525_v49  ;;  %10593 = vpow2.f32 %v9637_v51  ;;  %vm7695_vm14 = vweird.f32 %v10592_v35  ;;  %v7637_v29 = vsel %vm16563_vm13, %v16523_v15, %v7633_v61  ;;  %v20070_v61 = vld [vmem:[#allocation54_spill] sm:$0xff] }
 0x3c6   :  { %10595 = vrcp.f32 %v16550_v50  ;;  %v4556_v26 = vpop.f32.mrf.mxu2  ;;  %4818 = vmatpush.bf16.msrb.mxu1 %v9188_v12  ;;  %vm7696_vm3 = vmor %vm7694_vm15, %vm7695_vm14  ;;  %vm7699_vm4 = vcmp.eq.f32.partialorder %v7698_v22, 8.507059e+37  ;;  %v7701_v15 = vor.u32 1.1754944e-38, %v7700_v40  ;;  %vm7754_vm6 = vweird.f32 %v16550_v50 }
 0x3c7   :  { %v4645_v21 = vpop.f32.mrf.mxu3  ;;  %v7691_v0 = vsub.f32 1.0, %v7690_v20  ;;  %v4557_v19 = vadd.f32 %v4556_v26, %v4468_v3  ;;  %v7641_v26 = vor.u32 1.1754944e-38, %v7640_v42 }
 0x3c8   :  { %v4380_v51 = vpop.f32.mrf.mxu0 }
 0x3c9   :  { %v4469_v31 = vpop.f32.mrf.mxu1  ;;  %v7692_v33 = vmul.f32 %v10592_v35, %v7691_v0  ;;  %v16567_v3 = vadd.f32 %v4645_v21, %v4557_v19  ;;  %v4381_v20 = vadd.f32 %v4380_v51, %v16540_v6  ;;  %4427 = vmatmul.bf16.gmra.mxu0 %v14363_v18  ;;  %v7642_v42 = vsel %vm7639_vm1, %v7641_v26, %v7637_v29  ;;  %v20073_v26 = vld [vmem:[#allocation52_spill] sm:$0xff]  ;;  %v20077_v18 = vld [vmem:[#allocation57_spill] sm:$0xff] }
 0x3ca   :  { %4605 = vmatmul.bf16.gmra.mxu2 %v14411_v37  ;;  %4694 = vmatmul.bf16.gmra.mxu3 %v20070_v61  ;;  %v16587_v22 = vmul.f32 %v7642_v42, %v16472_v2 }
 0x3cb   :  { %v10594_v36 = vpop.eup %10593  ;;  %v7693_v27 = vadd.f32 %v10592_v35, %v7692_v33  ;;  %v9514_v17 = vmul.f32 -1.442695, %v16567_v3  ;;  %v4470_v0 = vadd.f32 %v4469_v31, %v4381_v20 }
 0x3cc   :  { %v16577_v21 = vpop.eup %10595  ;;  %v5945_v5 = vadd.f32 1.0, %v10594_v36  ;;  %20072 = vst [vmem:[#allocation75_spill] sm:$0xff] %v16587_v22 }
 0x3cd   :  { %v7697_v19 = vsel %vm7696_vm3, %v10592_v35, %v7693_v27  ;;  %v7750_v49 = vmul.f32 %v16577_v21, %v16550_v50  ;;  %10597 = vpow2.f32 %v9514_v17  ;;  %vm7755_vm5 = vweird.f32 %v16577_v21 }
 0x3ce   :  { %v7702_v33 = vsel %vm7699_vm4, %v7701_v15, %v7697_v19  ;;  %10599 = vrcp.f32 %v5945_v5  ;;  %v4558_v31 = vpop.f32.mrf.mxu2  ;;  %vm16605_vm7 = vmor %vm7754_vm6, %vm7755_vm5  ;;  %vm7814_vm9 = vweird.f32 %v5945_v5 }
 0x3cf   :  { %v4647_v12 = vpop.f32.mrf.mxu3  ;;  %v16584_v51 = vmul.f32 %v7702_v33, %v16494_v4  ;;  %v7751_v60 = vsub.f32 1.0, %v7750_v49  ;;  %v4559_v20 = vadd.f32 %v4558_v31, %v4470_v0  ;;  %v7760_v33 = vand.u32 2147483648, %v16550_v50 }
 0x3d0   :  { %v4383_v40 = vpop.f32.mrf.mxu0 }
 0x3d1   :  { %20071 = vst [vmem:[#allocation34_spill] sm:$0xff] %v16584_v51  ;;  %v4472_v36 = vpop.f32.mrf.mxu1  ;;  %v16589_v29 = vadd.f32 %v4647_v12, %v4559_v20  ;;  %v4384_v35 = vadd.f32 %v4383_v40, %v16540_v6  ;;  %4516 = vmatmul.bf16.gmra.mxu1 %v20073_v26  ;;  %v7752_v17 = vmul.f32 %v16577_v21, %v7751_v60  ;;  %v7758_v40 = vand.u32 2147483647, %v16550_v50  ;;  %v20076_v50 = vld [vmem:[#allocation55_spill] sm:$0xff] }
 0x3d3   :  { %v10598_v4 = vpop.eup %10597  ;;  %v9518_v15 = vmul.f32 -1.442695, %v16589_v29  ;;  %v4473_v0 = vadd.f32 %v4472_v36, %v4384_v35  ;;  %v7753_v49 = vadd.f32 %v16577_v21, %v7752_v17  ;;  %v7818_v36 = vand.u32 2147483647, %v5945_v5  ;;  %v9864_v17 = vld [vmem:[#allocation2 + $0x254] sm:$0xf0] }
 0x3d4   :  { %v10600_v19 = vpop.eup %10599  ;;  %v16597_v2 = vadd.f32 1.0, %v10598_v4  ;;  %v7820_v35 = vand.u32 2147483648, %v5945_v5  ;;  %vm7759_vm10 = vcmp.eq.f32.partialorder %v7758_v40, 8.507059e+37 }
 0x3d5   :  { %v7810_v42 = vmul.f32 %v10600_v19, %v5945_v5  ;;  %10601 = vpow2.f32 %v9518_v15  ;;  %vm7815_vm8 = vweird.f32 %v10600_v19  ;;  %vm7819_vm2 = vcmp.eq.f32.partialorder %v7818_v36, 8.507059e+37 }
 0x3d6   :  { %10603 = vrcp.f32 %v16597_v2  ;;  %v4561_v31 = vpop.f32.mrf.mxu2  ;;  %vm7816_vm0 = vmor %vm7814_vm9, %vm7815_vm8  ;;  %vm5969_vm12 = vweird.f32 %v16597_v2 }
 0x3d7   :  { %v4650_v12 = vpop.f32.mrf.mxu3  ;;  %v7811_v60 = vsub.f32 1.0, %v7810_v42  ;;  %v4562_v20 = vadd.f32 %v4561_v31, %v4473_v0  ;;  %v7757_v0 = vsel %vm16605_vm7, %v16577_v21, %v7753_v49  ;;  %v7761_v42 = vor.u32 1.1754944e-38, %v7760_v33  ;;  %v20078_v21 = vld [vmem:[#allocation58_spill] sm:$0xff] }
 0x3d8   :  { %v4385_v4 = vpop.f32.mrf.mxu0 }
 0x3d9   :  { %v4474_v15 = vpop.f32.mrf.mxu1  ;;  %v7812_v27 = vmul.f32 %v10600_v19, %v7811_v60  ;;  %v16609_v22 = vadd.f32 %v4650_v12, %v4562_v20  ;;  %v4386_v51 = vadd.f32 %v4385_v4, %v16540_v6  ;;  %4432 = vmatmul.bf16.gmra.mxu0 %v20076_v50  ;;  %v7821_v12 = vor.u32 1.1754944e-38, %v7820_v35  ;;  %v20093_v50 = vld [vmem:[#allocation65_spill] sm:$0xff] }
 0x3da   :  { %4610 = vmatmul.bf16.gmra.mxu2 %v20077_v18  ;;  %4699 = vmatmul.bf16.gmra.mxu3 %v20078_v21  ;;  %v7762_v49 = vsel %vm7759_vm10, %v7761_v42, %v7757_v0  ;;  %v9043_v42 = vld [vmem:[#allocation2 + $0x48] sm:$0xf] }
 0x3db   :  { %v10602_v31 = vpop.eup %10601  ;;  %v7813_v26 = vadd.f32 %v10600_v19, %v7812_v27  ;;  %v9522_v61 = vmul.f32 -1.442695, %v16609_v22  ;;  %v4475_v37 = vadd.f32 %v4474_v15, %v4386_v51  ;;  %v9299_v15 = vld [vmem:[#allocation2 + $0x248] sm:$0xf] }
 0x3dc   :  { %v16618_v60 = vpop.eup %10603  ;;  %v16620_v20 = vadd.f32 1.0, %v10602_v31  ;;  %v16630_v31 = vmul.f32 %v7762_v49, %v16514_v16  ;;  %v9300_v0 = vor.u32 %v9864_v17, %v9299_v15 }
 0x3dd   :  { %v7817_v33 = vsel %vm7816_vm0, %v10600_v19, %v7813_v26  ;;  %v5965_v5 = vmul.f32 %v16618_v60, %v16597_v2  ;;  %10605 = vpow2.f32 %v9522_v61  ;;  %v9800_v61 = vld [vmem:[#allocation2 + $0x54] sm:$0xf0]  ;;  %vm5970_vm11 = vweird.f32 %v16618_v60 }
 0x3de   :  { %v7822_v27 = vsel %vm7819_vm2, %v7821_v12, %v7817_v33  ;;  %10607 = vrcp.f32 %v16620_v20  ;;  %v4563_v51 = vpop.f32.mrf.mxu2  ;;  %20080 = vst [vmem:[#allocation77_spill] sm:$0xff] %v16630_v31  ;;  %4908 = vmatpush.bf16.msrb.mxu2 %v9300_v0  ;;  %v5975_v0 = vand.u32 2147483648, %v16597_v2  ;;  %vm16649_vm13 = vmor %vm5969_vm12, %vm5970_vm11  ;;  %vm6029_vm1 = vweird.f32 %v16620_v20 }
 0x3df   :  { %v4652_v4 = vpop.f32.mrf.mxu3  ;;  %v16627_v40 = vmul.f32 %v7822_v27, %v16542_v45  ;;  %v5966_v36 = vsub.f32 1.0, %v5965_v5  ;;  %v4564_v35 = vadd.f32 %v4563_v51, %v4475_v37  ;;  %v9427_v45 = vld [vmem:[#allocation2 + $0x348] sm:$0xf]  ;;  %v9896_v27 = vld [vmem:[#allocation2 + $0x354] sm:$0xf0]  ;;  %v9044_v37 = vor.u32 %v9800_v61, %v9043_v42 }
 0x3e0   :  { %v4388_v26 = vpop.f32.mrf.mxu0  ;;  %v20081_v5 = vld [vmem:[#allocation56_spill] sm:$0xff]  ;;  %v9428_v51 = vor.u32 %v9896_v27, %v9427_v45  ;;  %v9832_v27 = vld [vmem:[#allocation2 + $0x154] sm:$0xf0] }
 0x3e1   :  { %20079 = vst [vmem:[#allocation76_spill] sm:$0xff] %v16627_v40  ;;  %v4477_v19 = vpop.f32.mrf.mxu1  ;;  %v5967_v12 = vmul.f32 %v16618_v60, %v5966_v36  ;;  %v16633_v33 = vadd.f32 %v4652_v4, %v4564_v35  ;;  %v4389_v21 = vadd.f32 %v4388_v26, %v16540_v6  ;;  %4521 = vmatmul.bf16.gmra.mxu1 %v20081_v5  ;;  %v5973_v26 = vand.u32 2147483647, %v16597_v2  ;;  %v9171_v45 = vld [vmem:[#allocation2 + $0x148] sm:$0xf] }
 0x3e2   :  { %4730 = vmatpush.bf16.msrb.mxu0 %v9044_v37  ;;  %4997 = vmatpush.bf16.msrb.mxu3 %v9428_v51  ;;  %v6033_v51 = vand.u32 2147483647, %v16620_v20  ;;  %v6035_v2 = vand.u32 2147483648, %v16620_v20 }
 0x3e3   :  { %v10606_v49 = vpop.eup %10605  ;;  %v9526_v15 = vmul.f32 -1.442695, %v16633_v33  ;;  %v4478_v17 = vadd.f32 %v4477_v19, %v4389_v21  ;;  %v5968_v4 = vadd.f32 %v16618_v60, %v5967_v12  ;;  %vm5974_vm15 = vcmp.eq.f32.partialorder %v5973_v26, 8.507059e+37 }
 0x3e4   :  { %v10608_v18 = vpop.eup %10607  ;;  %v16642_v36 = vadd.f32 1.0, %v10606_v49  ;;  %v9172_v49 = vor.u32 %v9832_v27, %v9171_v45  ;;  %v20085_v27 = vld [vmem:[#allocation61_spill] sm:$0xff]  ;;  %vm6034_vm4 = vcmp.eq.f32.partialorder %v6033_v51, 8.507059e+37 }
 0x3e5   :  { %v6025_v35 = vmul.f32 %v10608_v18, %v16620_v20  ;;  %10609 = vpow2.f32 %v9526_v15  ;;  %v5972_v37 = vsel %vm16649_vm13, %v16618_v60, %v5968_v4  ;;  %vm6030_vm14 = vweird.f32 %v10608_v18 }
 0x3e6   :  { %10611 = vrcp.f32 %v16642_v36  ;;  %v4566_v21 = vpop.f32.mrf.mxu2  ;;  %4819 = vmatpush.bf16.msrb.mxu1 %v9172_v49  ;;  %vm6031_vm3 = vmor %vm6029_vm1, %vm6030_vm14  ;;  %vm6089_vm6 = vweird.f32 %v16642_v36 }
 0x3e7   :  { %v4655_v19 = vpop.f32.mrf.mxu3  ;;  %v6026_v61 = vsub.f32 1.0, %v6025_v35  ;;  %v4567_v12 = vadd.f32 %v4566_v21, %v4478_v17  ;;  %v5976_v17 = vor.u32 1.1754944e-38, %v5975_v0  ;;  %v20084_v21 = vld [vmem:[#allocation59_spill] sm:$0xff]  ;;  %v20086_v0 = vld [vmem:[#allocation62_spill] sm:$0xff] }
 0x3e8   :  { %v4390_v15 = vpop.f32.mrf.mxu0 }
 0x3e9   :  { %v4479_v16 = vpop.f32.mrf.mxu1  ;;  %v6027_v31 = vmul.f32 %v10608_v18, %v6026_v61  ;;  %v16658_v40 = vadd.f32 %v4655_v19, %v4567_v12  ;;  %v4391_v35 = vadd.f32 %v4390_v15, %v16540_v6  ;;  %4437 = vmatmul.bf16.gmra.mxu0 %v20084_v21  ;;  %v5977_v19 = vsel %vm5974_vm15, %v5976_v17, %v5972_v37 }
 0x3ea   :  { %4615 = vmatmul.bf16.gmra.mxu2 %v20085_v27  ;;  %v6036_v12 = vor.u32 1.1754944e-38, %v6035_v2  ;;  %4704 = vmatmul.bf16.gmra.mxu3 %v20086_v0 }
 0x3eb   :  { %v10610_v42 = vpop.eup %10609  ;;  %v6028_v60 = vadd.f32 %v10608_v18, %v6027_v31  ;;  %v9530_v4 = vmul.f32 -1.442695, %v16658_v40  ;;  %v4480_v45 = vadd.f32 %v4479_v16, %v4391_v35  ;;  %v16672_v35 = vmul.f32 %v5977_v19, %v16567_v3 }
 0x3ec   :  { %v16665_v61 = vpop.eup %10611  ;;  %v5834_v26 = vadd.f32 1.0, %v10610_v42 }
 0x3ed   :  { %v6032_v49 = vsel %vm6031_vm3, %v10608_v18, %v6028_v60  ;;  %v6085_v31 = vmul.f32 %v16665_v61, %v16642_v36  ;;  %10613 = vpow2.f32 %v9530_v4  ;;  %20087 = vst [vmem:[#allocation78_spill] sm:$0xff] %v16672_v35  ;;  %v20089_v60 = vld [vmem:[#allocation60_spill] sm:$0xff]  ;;  %vm6090_vm5 = vweird.f32 %v16665_v61 }
 0x3ee   :  { %v6037_v20 = vsel %vm6034_vm4, %v6036_v12, %v6032_v49  ;;  %10615 = vrcp.f32 %v5834_v26  ;;  %v4568_v16 = vpop.f32.mrf.mxu2  ;;  %v6153_v18 = vand.u32 2147483647, %v5834_v26  ;;  %vm16693_vm7 = vmor %vm6089_vm6, %vm6090_vm5  ;;  %vm6149_vm9 = vweird.f32 %v5834_v26 }
 0x3ef   :  { %v4657_v15 = vpop.f32.mrf.mxu3  ;;  %v16675_v37 = vmul.f32 %v6037_v20, %v16589_v29  ;;  %v6086_v2 = vsub.f32 1.0, %v6085_v31  ;;  %v4569_v17 = vadd.f32 %v4568_v16, %v4480_v45  ;;  %v6095_v16 = vand.u32 2147483648, %v16642_v36 }
 0x3f0   :  { %v4393_v42 = vpop.f32.mrf.mxu0  ;;  %vm6154_vm2 = vcmp.eq.f32.partialorder %v6153_v18, 8.507059e+37 }
 0x3f1   :  { %20088 = vst [vmem:[#allocation79_spill] sm:$0xff] %v16675_v37  ;;  %v4482_v0 = vpop.f32.mrf.mxu1  ;;  %v16679_v51 = vadd.f32 %v4657_v15, %v4569_v17  ;;  %4526 = vmatmul.bf16.gmra.mxu1 %v20089_v60  ;;  %v6087_v4 = vmul.f32 %v16665_v61, %v6086_v2  ;;  %v4394_v12 = vadd.f32 %v4393_v42, %v16540_v6 }
 0x3f3   :  { %v10614_v3 = vpop.eup %10613  ;;  %v9534_v19 = vmul.f32 -1.442695, %v16679_v51  ;;  %v4483_v45 = vadd.f32 %v4482_v0, %v4394_v12  ;;  %v6088_v20 = vadd.f32 %v16665_v61, %v6087_v4  ;;  %v6155_v0 = vand.u32 2147483648, %v5834_v26  ;;  %v9860_v4 = vld [vmem:[#allocation2 + $0x234] sm:$0xf0] }
 0x3f4   :  { %v10616_v29 = vpop.eup %10615  ;;  %v16685_v49 = vadd.f32 1.0, %v10614_v3  ;;  %v6093_v3 = vand.u32 2147483647, %v16642_v36  ;;  %v20092_v36 = vld [vmem:[#allocation63_spill] sm:$0xff] }
 0x3f5   :  { %v6145_v31 = vmul.f32 %v10616_v29, %v5834_v26  ;;  %10617 = vpow2.f32 %v9534_v19  ;;  %vm6150_vm8 = vweird.f32 %v10616_v29 }
 0x3f6   :  { %10619 = vrcp.f32 %v16685_v49  ;;  %v4571_v15 = vpop.f32.mrf.mxu2  ;;  %vm6094_vm10 = vcmp.eq.f32.partialorder %v6093_v3, 8.507059e+37  ;;  %vm6151_vm0 = vmor %vm6149_vm9, %vm6150_vm8  ;;  %vm6209_vm12 = vweird.f32 %v16685_v49 }
 0x3f7   :  { %v4660_v2 = vpop.f32.mrf.mxu3  ;;  %v6146_v17 = vsub.f32 1.0, %v6145_v31  ;;  %v4572_v42 = vadd.f32 %v4571_v15, %v4483_v45  ;;  %v6092_v45 = vsel %vm16693_vm7, %v16665_v61, %v6088_v20  ;;  %v6096_v31 = vor.u32 1.1754944e-38, %v6095_v16  ;;  %v20094_v61 = vld [vmem:[#allocation66_spill] sm:$0xff] }
 0x3f8   :  { %v4395_v12 = vpop.f32.mrf.mxu0 }
 0x3f9   :  { %v4484_v19 = vpop.f32.mrf.mxu1  ;;  %v6147_v35 = vmul.f32 %v10616_v29, %v6146_v17  ;;  %v16697_v37 = vadd.f32 %v4660_v2, %v4572_v42  ;;  %v4396_v60 = vadd.f32 %v4395_v12, %v16540_v6  ;;  %4442 = vmatmul.bf16.gmra.mxu0 %v20092_v36  ;;  %v6156_v2 = vor.u32 1.1754944e-38, %v6155_v0 }
 0x3fa   :  { %4620 = vmatmul.bf16.gmra.mxu2 %v20093_v50  ;;  %4709 = vmatmul.bf16.gmra.mxu3 %v20094_v61  ;;  %v6097_v20 = vsel %vm6094_vm10, %v6096_v31, %v6092_v45  ;;  %v9027_v31 = vld [vmem:[#allocation2 + $0x28] sm:$0xf]  ;;  %v9892_v50 = vld [vmem:[#allocation2 + $0x334] sm:$0xf0] }
 0x3fb   :  { %v10618_v15 = vpop.eup %10617  ;;  %v6148_v27 = vadd.f32 %v10616_v29, %v6147_v35  ;;  %v9538_v21 = vmul.f32 -1.442695, %v16697_v37  ;;  %v4485_v5 = vadd.f32 %v4484_v19, %v4396_v60  ;;  %v9283_v19 = vld [vmem:[#allocation2 + $0x228] sm:$0xf] }
 0x3fc   :  { %v16706_v17 = vpop.eup %10619  ;;  %v16708_v42 = vadd.f32 1.0, %v10618_v15  ;;  %v16718_v15 = vmul.f32 %v6097_v20, %v16609_v22  ;;  %v9284_v45 = vor.u32 %v9860_v4, %v9283_v19  ;;  %v9411_v61 = vld [vmem:[#allocation2 + $0x328] sm:$0xf] }
 0x3fd   :  { %v6152_v16 = vsel %vm6151_vm0, %v10616_v29, %v6148_v27  ;;  %v6205_v26 = vmul.f32 %v16706_v17, %v16685_v49  ;;  %10621 = vpow2.f32 %v9538_v21  ;;  %v9796_v21 = vld [vmem:[#allocation2 + $0x34] sm:$0xf0]  ;;  %vm6210_vm11 = vweird.f32 %v16706_v17 }
 0x3fe   :  { %v6157_v35 = vsel %vm6154_vm2, %v6156_v2, %v6152_v16  ;;  %10623 = vrcp.f32 %v16708_v42  ;;  %v4573_v60 = vpop.f32.mrf.mxu2  ;;  %20096 = vst [vmem:[#allocation80_spill] sm:$0xff] %v16718_v15  ;;  %4909 = vmatpush.bf16.msrb.mxu2 %v9284_v45  ;;  %vm16741_vm13 = vmor %vm6209_vm12, %vm6210_vm11  ;;  %vm6269_vm15 = vweird.f32 %v16708_v42 }
 0x3ff   :  { %v4662_v12 = vpop.f32.mrf.mxu3  ;;  %v16715_v3 = vmul.f32 %v6157_v35, %v16633_v33  ;;  %v6206_v18 = vsub.f32 1.0, %v6205_v26  ;;  %v4574_v0 = vadd.f32 %v4573_v60, %v4485_v5  ;;  %v20097_v33 = vld [vmem:[#allocation64_spill] sm:$0xff]  ;;  %v9028_v26 = vor.u32 %v9796_v21, %v9027_v31  ;;  %v9828_v21 = vld [vmem:[#allocation2 + $0x134] sm:$0xf0] }
 0x400   :  { %v4398_v27 = vpop.f32.mrf.mxu0  ;;  %v9412_v35 = vor.u32 %v9892_v50, %v9411_v61  ;;  %v6215_v50 = vand.u32 2147483648, %v16685_v49  ;;  %v9155_v31 = vld [vmem:[#allocation2 + $0x128] sm:$0xf] }
 0x401   :  { %20095 = vst [vmem:[#allocation63_spill] sm:$0xff] %v16715_v3  ;;  %v4487_v29 = vpop.f32.mrf.mxu1  ;;  %v16720_v2 = vadd.f32 %v4662_v12, %v4574_v0  ;;  %v4399_v16 = vadd.f32 %v4398_v27, %v16540_v6  ;;  %4531 = vmatmul.bf16.gmra.mxu1 %v20097_v33  ;;  %v6207_v5 = vmul.f32 %v16706_v17, %v6206_v18 }
 0x402   :  { %4731 = vmatpush.bf16.msrb.mxu0 %v9028_v26  ;;  %4998 = vmatpush.bf16.msrb.mxu3 %v9412_v35  ;;  %v6273_v26 = vand.u32 2147483647, %v16708_v42  ;;  %v9156_v35 = vor.u32 %v9828_v21, %v9155_v31 }
 0x403   :  { %v10622_v20 = vpop.eup %10621  ;;  %v9542_v60 = vmul.f32 -1.442695, %v16720_v2  ;;  %v4488_v19 = vadd.f32 %v4487_v29, %v4399_v16  ;;  %v6208_v18 = vadd.f32 %v16706_v17, %v6207_v5  ;;  %v6213_v16 = vand.u32 2147483647, %v16685_v49 }
 0x404   :  { %v10624_v12 = vpop.eup %10623  ;;  %v16728_v0 = vadd.f32 1.0, %v10622_v20  ;;  %v6275_v5 = vand.u32 2147483648, %v16708_v42  ;;  %4820 = vmatpush.bf16.msrb.mxu1 %v9156_v35  ;;  %vm6274_vm4 = vcmp.eq.f32.partialorder %v6273_v26, 8.507059e+37 }
 0x405   :  { %v6265_v4 = vmul.f32 %v10624_v12, %v16708_v42  ;;  %10625 = vpow2.f32 %v9542_v60  ;;  %vm6270_vm14 = vweird.f32 %v10624_v12  ;;  %v6212_v49 = vsel %vm16741_vm13, %v16706_v17, %v6208_v18 }
 0x406   :  { %10627 = vrcp.f32 %v16728_v0  ;;  %v4576_v61 = vpop.f32.mrf.mxu2  ;;  %vm6214_vm1 = vcmp.eq.f32.partialorder %v6213_v16, 8.507059e+37  ;;  %vm6271_vm3 = vmor %vm6269_vm15, %vm6270_vm14  ;;  %v6276_v17 = vor.u32 1.1754944e-38, %v6275_v5  ;;  %vm6329_vm6 = vweird.f32 %v16728_v0 }
 0x407   :  { %v4665_v27 = vpop.f32.mrf.mxu3  ;;  %v6266_v29 = vsub.f32 1.0, %v6265_v4  ;;  %v4577_v45 = vadd.f32 %v4576_v61, %v4488_v19  ;;  %v6216_v61 = vor.u32 1.1754944e-38, %v6215_v50 }
 0x408   :  { %v4400_v20 = vpop.f32.mrf.mxu0 }
 0x409   :  { %v4489_v60 = vpop.f32.mrf.mxu1  ;;  %v6267_v15 = vmul.f32 %v10624_v12, %v6266_v29  ;;  %v16745_v19 = vadd.f32 %v4665_v27, %v4577_v45  ;;  %v4401_v4 = vadd.f32 %v4400_v20, %v16540_v6  ;;  %4447 = vmatmul.bf16.gmra.mxu0 %v15333_v46  ;;  %v6217_v18 = vsel %vm6214_vm1, %v6216_v61, %v6212_v49 }
 0x40a   :  { %4625 = vmatmul.bf16.gmra.mxu2 %v15583_v43  ;;  %4714 = vmatmul.bf16.gmra.mxu3 %v15591_v30  ;;  %v16765_v26 = vmul.f32 %v6217_v18, %v16658_v40 }
 0x40b   :  { %v10626_v31 = vpop.eup %10625  ;;  %v6268_v21 = vadd.f32 %v10624_v12, %v6267_v15  ;;  %v9546_v3 = vmul.f32 -1.442695, %v16745_v19  ;;  %v4490_v29 = vadd.f32 %v4489_v60, %v4401_v4 }
 0x40c   :  { %v16755_v27 = vpop.eup %10627  ;;  %v5850_v22 = vadd.f32 1.0, %v10626_v31  ;;  %20101 = vst [vmem:[#allocation81_spill] sm:$0xff] %v16765_v26 }
 0x40d   :  { %v6272_v50 = vsel %vm6271_vm3, %v10624_v12, %v6268_v21  ;;  %v6325_v42 = vmul.f32 %v16755_v27, %v16728_v0  ;;  %10629 = vpow2.f32 %v9546_v3  ;;  %vm6330_vm5 = vweird.f32 %v16755_v27 }
 0x40e   :  { %v6277_v15 = vsel %vm6274_vm4, %v6276_v17, %v6272_v50  ;;  %10631 = vrcp.f32 %v5850_v22  ;;  %v4578_v45 = vpop.f32.mrf.mxu2  ;;  %v6335_v50 = vand.u32 2147483648, %v16728_v0  ;;  %vm16783_vm7 = vmor %vm6329_vm6, %vm6330_vm5  ;;  %vm6389_vm9 = vweird.f32 %v5850_v22 }
 0x40f   :  { %v4667_v35 = vpop.f32.mrf.mxu3  ;;  %v16762_v20 = vmul.f32 %v6277_v15, %v16679_v51  ;;  %v6326_v16 = vsub.f32 1.0, %v6325_v42  ;;  %v4579_v60 = vadd.f32 %v4578_v45, %v4490_v29 }
 0x410   :  { %v4403_v5 = vpop.f32.mrf.mxu0 }
 0x411   :  { %20100 = vst [vmem:[#allocation64_spill] sm:$0xff] %v16762_v20  ;;  %v4492_v4 = vpop.f32.mrf.mxu1  ;;  %v16767_v49 = vadd.f32 %v4667_v35, %v4579_v60  ;;  %v4404_v12 = vadd.f32 %v4403_v5, %v16540_v6  ;;  %4536 = vmatmul.bf16.gmra.mxu1 %v15555_v23  ;;  %v6327_v3 = vmul.f32 %v16755_v27, %v6326_v16  ;;  %v6333_v16 = vand.u32 2147483647, %v16728_v0 }
 0x412   :  { %v6393_v60 = vand.u32 2147483647, %v5850_v22  ;;  %v6395_v5 = vand.u32 2147483648, %v5850_v22 }
 0x413   :  { %v10630_v51 = vpop.eup %10629  ;;  %v9550_v31 = vmul.f32 -1.442695, %v16767_v49  ;;  %v4493_v21 = vadd.f32 %v4492_v4, %v4404_v12  ;;  %v6328_v18 = vadd.f32 %v16755_v27, %v6327_v3  ;;  %vm6334_vm10 = vcmp.eq.f32.partialorder %v6333_v16, 8.507059e+37  ;;  %v9856_v3 = vld [vmem:[#allocation2 + $0x214] sm:$0xf0] }
 0x414   :  { %v10632_v29 = vpop.eup %10631  ;;  %v16775_v40 = vadd.f32 1.0, %v10630_v51  ;;  %vm6394_vm2 = vcmp.eq.f32.partialorder %v6393_v60, 8.507059e+37 }
 0x415   :  { %v6385_v17 = vmul.f32 %v10632_v29, %v5850_v22  ;;  %10633 = vpow2.f32 %v9550_v31  ;;  %vm6390_vm8 = vweird.f32 %v10632_v29 }
 0x416   :  { %10635 = vrcp.f32 %v16775_v40  ;;  %v4581_v42 = vpop.f32.mrf.mxu2  ;;  %vm6391_vm0 = vmor %vm6389_vm9, %vm6390_vm8  ;;  %vm6449_vm12 = vweird.f32 %v16775_v40 }
 0x417   :  { %v4670_v15 = vpop.f32.mrf.mxu3  ;;  %v6386_v45 = vsub.f32 1.0, %v6385_v17  ;;  %v4582_v35 = vadd.f32 %v4581_v42, %v4493_v21  ;;  %v6332_v21 = vsel %vm16783_vm7, %v16755_v27, %v6328_v18  ;;  %v6336_v17 = vor.u32 1.1754944e-38, %v6335_v50 }
 0x418   :  { %v4405_v4 = vpop.f32.mrf.mxu0 }
 0x419   :  { %v4494_v12 = vpop.f32.mrf.mxu1  ;;  %v6387_v51 = vmul.f32 %v10632_v29, %v6386_v45  ;;  %v16787_v31 = vadd.f32 %v4670_v15, %v4582_v35  ;;  %v4406_v61 = vadd.f32 %v4405_v4, %v16540_v6  ;;  %4452 = vmatmul.bf16.gmra.mxu0 %v15801_v62  ;;  %v6396_v15 = vor.u32 1.1754944e-38, %v6395_v5 }
 0x41a   :  { %4630 = vmatmul.bf16.gmra.mxu2 %v15848_v32  ;;  %4719 = vmatmul.bf16.gmra.mxu3 %v15852_v41  ;;  %v6337_v27 = vsel %vm6334_vm10, %v6336_v17, %v6332_v21  ;;  %v9888_v41 = vld [vmem:[#allocation2 + $0x314] sm:$0xf0] }
 0x41b   :  { %v10634_v0 = vpop.eup %10633  ;;  %v6388_v42 = vadd.f32 %v10632_v29, %v6387_v51  ;;  %v9554_v26 = vmul.f32 -1.442695, %v16787_v31  ;;  %v4495_v20 = vadd.f32 %v4494_v12, %v4406_v61  ;;  %v9267_v12 = vld [vmem:[#allocation2 + $0x208] sm:$0xf]  ;;  %v16808_v51 = vmul.f32 %v6337_v27, %v16697_v37 }
 0x41c   :  { %v16796_v45 = vpop.eup %10635  ;;  %v16798_v35 = vadd.f32 1.0, %v10634_v0  ;;  %v9268_v17 = vor.u32 %v9856_v3, %v9267_v12  ;;  %v9011_v0 = vld [vmem:[#allocation2 + $0x8] sm:$0xf] }
 0x41d   :  { %v6392_v18 = vsel %vm6391_vm0, %v10632_v29, %v6388_v42  ;;  %v6445_v22 = vmul.f32 %v16796_v45, %v16775_v40  ;;  %10637 = vpow2.f32 %v9554_v26  ;;  %20105 = vst [vmem:[#allocation83_spill] sm:$0xff] %v16808_v51  ;;  %v9792_v26 = vld [vmem:[#allocation2 + $0x14] sm:$0xf0]  ;;  %vm6450_vm11 = vweird.f32 %v16796_v45 }
 0x41e   :  { %v6397_v50 = vsel %vm6394_vm2, %v6396_v15, %v6392_v18  ;;  %10639 = vrcp.f32 %v16798_v35  ;;  %v4583_v61 = vpop.f32.mrf.mxu2  ;;  %v9395_v18 = vld [vmem:[#allocation2 + $0x308] sm:$0xf]  ;;  %4910 = vmatpush.bf16.msrb.mxu2 %v9268_v17  ;;  %vm16831_vm13 = vmor %vm6449_vm12, %vm6450_vm11  ;;  %vm6509_vm15 = vweird.f32 %v16798_v35 }
 0x41f   :  { %v4672_v4 = vpop.f32.mrf.mxu3  ;;  %v16805_v16 = vmul.f32 %v6397_v50, %v16720_v2  ;;  %v6446_v60 = vsub.f32 1.0, %v6445_v22  ;;  %v4584_v5 = vadd.f32 %v4583_v61, %v4495_v20  ;;  %v9012_v20 = vor.u32 %v9792_v26, %v9011_v0  ;;  %v9139_v0 = vld [vmem:[#allocation2 + $0x108] sm:$0xf]  ;;  %v9824_v26 = vld [vmem:[#allocation2 + $0x114] sm:$0xf0] }
 0x420   :  { %v4408_v29 = vpop.f32.mrf.mxu0  ;;  %v9396_v22 = vor.u32 %v9888_v41, %v9395_v18  ;;  %v6455_v41 = vand.u32 2147483648, %v16775_v40  ;;  %v6513_v18 = vand.u32 2147483647, %v16798_v35 }
 0x421   :  { %20104 = vst [vmem:[#allocation82_spill] sm:$0xff] %v16805_v16  ;;  %v4497_v21 = vpop.f32.mrf.mxu1  ;;  %v16810_v42 = vadd.f32 %v4672_v4, %v4584_v5  ;;  %v4409_v15 = vadd.f32 %v4408_v29, %v16540_v6  ;;  %4541 = vmatmul.bf16.gmra.mxu1 %v15806_v63  ;;  %v6447_v2 = vmul.f32 %v16796_v45, %v6446_v60  ;;  %v9509_v16 = vld [vmem:[#allocation2 + $0x3f8] sm:$0xf0] }
 0x422   :  { %4732 = vmatpush.bf16.msrb.mxu0 %v9012_v20  ;;  %4999 = vmatpush.bf16.msrb.mxu3 %v9396_v22  ;;  %v9140_v20 = vor.u32 %v9824_v26, %v9139_v0  ;;  %vm6514_vm4 = vcmp.eq.f32.partialorder %v6513_v18, 8.507059e+37 }
 0x423   :  { %v10638_v27 = vpop.eup %10637  ;;  %v9558_v50 = vmul.f32 -1.442695, %v16810_v42  ;;  %v4498_v61 = vadd.f32 %v4497_v21, %v4409_v15  ;;  %v6448_v60 = vadd.f32 %v16796_v45, %v6447_v2  ;;  %v6453_v15 = vand.u32 2147483647, %v16775_v40 }
 0x424   :  { %v10640_v4 = vpop.eup %10639  ;;  %v16818_v5 = vadd.f32 1.0, %v10638_v27  ;;  %v6515_v2 = vand.u32 2147483648, %v16798_v35  ;;  %4821 = vmatpush.bf16.msrb.mxu1 %v9140_v20 }
 0x425   :  { %v6505_v12 = vmul.f32 %v10640_v4, %v16798_v35  ;;  %10641 = vpow2.f32 %v9558_v50  ;;  %vm6510_vm14 = vweird.f32 %v10640_v4  ;;  %v6452_v40 = vsel %vm16831_vm13, %v16796_v45, %v6448_v60 }
 0x426   :  { %10643 = vrcp.f32 %v16818_v5  ;;  %v4586_v3 = vpop.f32.mrf.mxu2  ;;  %vm6454_vm1 = vcmp.eq.f32.partialorder %v6453_v15, 8.507059e+37  ;;  %vm6511_vm3 = vmor %vm6509_vm15, %vm6510_vm14  ;;  %v6516_v45 = vor.u32 1.1754944e-38, %v6515_v2  ;;  %vm6569_vm6 = vweird.f32 %v16818_v5 }
 0x427   :  { %v4675_v29 = vpop.f32.mrf.mxu3  ;;  %v6506_v21 = vsub.f32 1.0, %v6505_v12  ;;  %v4587_v17 = vadd.f32 %v4586_v3, %v4498_v61  ;;  %v6456_v3 = vor.u32 1.1754944e-38, %v6455_v41 }
 0x428   :  { %v4410_v22 = vpop.f32.mrf.mxu0 }
 0x429   :  { %v4499_v27 = vpop.f32.mrf.mxu1  ;;  %v6507_v37 = vmul.f32 %v10640_v4, %v6506_v21  ;;  %v16835_v61 = vadd.f32 %v4675_v29, %v4587_v17  ;;  %v4411_v12 = vadd.f32 %v4410_v22, %v16540_v6  ;;  %4733 = vmatmul.bf16.vlgmr.msrb.gmra.mxu0 %v19983_v10  ;;  %v6457_v41 = vsel %vm6454_vm1, %v6456_v3, %v6452_v40 }
 0x42a   :  { %4911 = vmatmul.bf16.vlgmr.msrb.gmra.mxu2 %v19984_v1  ;;  %5000 = vmatmul.bf16.vlgmr.msrb.gmra.mxu3 %v19986_v59  ;;  %v16855_v18 = vmul.f32 %v6457_v41, %v16745_v19 }
 0x42b   :  { %v10642_v0 = vpop.eup %10641  ;;  %v6508_v26 = vadd.f32 %v10640_v4, %v6507_v37  ;;  %v9562_v51 = vmul.f32 -1.442695, %v16835_v61  ;;  %v4500_v21 = vadd.f32 %v4499_v27, %v4411_v12 }
 0x42c   :  { %v16845_v29 = vpop.eup %10643  ;;  %v5866_v60 = vadd.f32 1.0, %v10642_v0  ;;  %20109 = vst [vmem:[#allocation85_spill] sm:$0xff] %v16855_v18 }
 0x42d   :  { %v6512_v17 = vsel %vm6511_vm3, %v10640_v4, %v6508_v26  ;;  %v6565_v35 = vmul.f32 %v16845_v29, %v16818_v5  ;;  %10645 = vpow2.f32 %v9562_v51  ;;  %vm6570_vm5 = vweird.f32 %v16845_v29 }
 0x42e   :  { %v6517_v37 = vsel %vm6514_vm4, %v6516_v45, %v6512_v17  ;;  %10647 = vrcp.f32 %v5866_v60  ;;  %v4588_v20 = vpop.f32.mrf.mxu2  ;;  %v6575_v17 = vand.u32 2147483648, %v16818_v5  ;;  %vm16873_vm7 = vmor %vm6569_vm6, %vm6570_vm5  ;;  %vm6629_vm9 = vweird.f32 %v5866_v60 }
 0x42f   :  { %v4677_v22 = vpop.f32.mrf.mxu3  ;;  %v16852_v27 = vmul.f32 %v6517_v37, %v16767_v49  ;;  %v6566_v15 = vsub.f32 1.0, %v6565_v35  ;;  %v4589_v50 = vadd.f32 %v4588_v20, %v4500_v21 }
 0x430   :  { %v4413_v2 = vpop.f32.mrf.mxu0 }
 0x431   :  { %20108 = vst [vmem:[#allocation84_spill] sm:$0xff] %v16852_v27  ;;  %v4502_v12 = vpop.f32.mrf.mxu1  ;;  %v16857_v40 = vadd.f32 %v4677_v22, %v4589_v50  ;;  %v4414_v4 = vadd.f32 %v4413_v2, %v16540_v6  ;;  %4822 = vmatmul.bf16.vlgmr.msrb.gmra.mxu1 %v19989_v13  ;;  %v6567_v51 = vmul.f32 %v16845_v29, %v6566_v15  ;;  %v6573_v15 = vand.u32 2147483647, %v16818_v5 }
 0x432   :  { %v6633_v50 = vand.u32 2147483647, %v5866_v60  ;;  %v6635_v2 = vand.u32 2147483648, %v5866_v60 }
 0x433   :  { %v10646_v49 = vpop.eup %10645  ;;  %v9566_v0 = vmul.f32 -1.442695, %v16857_v40  ;;  %v4503_v26 = vadd.f32 %v4502_v12, %v4414_v4  ;;  %v6568_v41 = vadd.f32 %v16845_v29, %v6567_v51  ;;  %vm6574_vm10 = vcmp.eq.f32.partialorder %v6573_v15, 8.507059e+37  ;;  %v9381_v51 = vld [vmem:[#allocation2 + $0x2f8] sm:$0xf0] }
 0x434   :  { %v10648_v21 = vpop.eup %10647  ;;  %v16865_v19 = vadd.f32 1.0, %v10646_v49  ;;  %vm6634_vm2 = vcmp.eq.f32.partialorder %v6633_v50, 8.507059e+37 }
 0x435   :  { %v6625_v45 = vmul.f32 %v10648_v21, %v5866_v60  ;;  %10649 = vpow2.f32 %v9566_v0  ;;  %vm6630_vm8 = vweird.f32 %v10648_v21 }
 0x436   :  { %10651 = vrcp.f32 %v16865_v19  ;;  %v4591_v35 = vpop.f32.mrf.mxu2  ;;  %vm6631_vm0 = vmor %vm6629_vm9, %vm6630_vm8  ;;  %vm6689_vm12 = vweird.f32 %v16865_v19 }
 0x437   :  { %v4680_v37 = vpop.f32.mrf.mxu3  ;;  %v6626_v20 = vsub.f32 1.0, %v6625_v45  ;;  %v4592_v22 = vadd.f32 %v4591_v35, %v4503_v26  ;;  %v6572_v26 = vsel %vm16873_vm7, %v16845_v29, %v6568_v41  ;;  %v6576_v45 = vor.u32 1.1754944e-38, %v6575_v17 }
 0x438   :  { %v4415_v12 = vpop.f32.mrf.mxu0 }
 0x439   :  { %v4504_v4 = vpop.f32.mrf.mxu1  ;;  %v6627_v49 = vmul.f32 %v10648_v21, %v6626_v20  ;;  %v16877_v0 = vadd.f32 %v4680_v37, %v4592_v22  ;;  %v4416_v3 = vadd.f32 %v4415_v12, %v16540_v6  ;;  %4738 = vmatmul.bf16.gmra.mxu0 %v19992_v28  ;;  %v6636_v37 = vor.u32 1.1754944e-38, %v6635_v2 }
 0x43a   :  { %4916 = vmatmul.bf16.gmra.mxu2 %v19993_v34  ;;  %5005 = vmatmul.bf16.gmra.mxu3 %v19994_v24  ;;  %v6577_v29 = vsel %vm6574_vm10, %v6576_v45, %v6572_v26 }
 0x43b   :  { %v10650_v5 = vpop.eup %10649  ;;  %v6628_v35 = vadd.f32 %v10648_v21, %v6627_v49  ;;  %v9570_v18 = vmul.f32 -1.442695, %v16877_v0  ;;  %v4505_v27 = vadd.f32 %v4504_v4, %v4416_v3  ;;  %v9882_v4 = vld [vmem:[#allocation2 + $0x2ec] sm:$0xf]  ;;  %v16898_v49 = vmul.f32 %v6577_v29, %v16787_v31 }
 0x43c   :  { %v16886_v20 = vpop.eup %10651  ;;  %v16888_v22 = vadd.f32 1.0, %v10650_v5  ;;  %v9384_v45 = vor.u32 %v9882_v4, %v9381_v51  ;;  %v9818_v5 = vld [vmem:[#allocation2 + $0xec] sm:$0xf] }
 0x43d   :  { %v6632_v41 = vsel %vm6631_vm0, %v10648_v21, %v6628_v35  ;;  %v6685_v60 = vmul.f32 %v16886_v20, %v16865_v19  ;;  %10653 = vpow2.f32 %v9570_v18  ;;  %20113 = vst [vmem:[#allocation87_spill] sm:$0xff] %v16898_v49  ;;  %v9125_v18 = vld [vmem:[#allocation2 + $0xf8] sm:$0xf0]  ;;  %vm6690_vm11 = vweird.f32 %v16886_v20 }
 0x43e   :  { %v6637_v17 = vsel %vm6634_vm2, %v6636_v37, %v6632_v41  ;;  %10655 = vrcp.f32 %v16888_v22  ;;  %v4593_v3 = vpop.f32.mrf.mxu2  ;;  %v9914_v41 = vld [vmem:[#allocation2 + $0x3ec] sm:$0xf]  ;;  %5259 = vmatpush.bf16.msra.mxu2 %v9384_v45  ;;  %vm16921_vm13 = vmor %vm6689_vm12, %vm6690_vm11  ;;  %vm6749_vm15 = vweird.f32 %v16888_v22 }
 0x43f   :  { %v4682_v12 = vpop.f32.mrf.mxu3  ;;  %v16895_v15 = vmul.f32 %v6637_v17, %v16810_v42  ;;  %v6686_v50 = vsub.f32 1.0, %v6685_v60  ;;  %v4594_v2 = vadd.f32 %v4593_v3, %v4505_v27  ;;  %v9128_v27 = vor.u32 %v9818_v5, %v9125_v18  ;;  %v9850_v5 = vld [vmem:[#allocation2 + $0x1ec] sm:$0xf]  ;;  %v9253_v18 = vld [vmem:[#allocation2 + $0x1f8] sm:$0xf0] }
 0x440   :  { %v4418_v21 = vpop.f32.mrf.mxu0  ;;  %v9512_v60 = vor.u32 %v9914_v41, %v9509_v16  ;;  %v6695_v16 = vand.u32 2147483648, %v16865_v19  ;;  %v6753_v41 = vand.u32 2147483647, %v16888_v22 }
 0x441   :  { %20112 = vst [vmem:[#allocation86_spill] sm:$0xff] %v16895_v15  ;;  %v4507_v26 = vpop.f32.mrf.mxu1  ;;  %v16900_v35 = vadd.f32 %v4682_v12, %v4594_v2  ;;  %v4419_v37 = vadd.f32 %v4418_v21, %v16540_v6  ;;  %4827 = vmatmul.bf16.gmra.mxu1 %v20001_v7  ;;  %v6687_v42 = vmul.f32 %v16886_v20, %v6686_v50  ;;  %v9493_v15 = vld [vmem:[#allocation2 + $0x3d8] sm:$0xf0] }
 0x442   :  { %5081 = vmatpush.bf16.msra.mxu0 %v9128_v27  ;;  %5348 = vmatpush.bf16.msra.mxu3 %v9512_v60  ;;  %v9256_v27 = vor.u32 %v9850_v5, %v9253_v18  ;;  %vm6754_vm4 = vcmp.eq.f32.partialorder %v6753_v41, 8.507059e+37 }
 0x443   :  { %v10654_v29 = vpop.eup %10653  ;;  %v9574_v17 = vmul.f32 -1.442695, %v16900_v35  ;;  %v4508_v3 = vadd.f32 %v4507_v26, %v4419_v37  ;;  %v6688_v50 = vadd.f32 %v16886_v20, %v6687_v42  ;;  %v6693_v37 = vand.u32 2147483647, %v16865_v19 }
 0x444   :  { %v10656_v12 = vpop.eup %10655  ;;  %v16908_v2 = vadd.f32 1.0, %v10654_v29  ;;  %v6755_v42 = vand.u32 2147483648, %v16888_v22  ;;  %5170 = vmatpush.bf16.msra.mxu1 %v9256_v27 }
 0x445   :  { %v6745_v4 = vmul.f32 %v10656_v12, %v16888_v22  ;;  %10657 = vpow2.f32 %v9574_v17  ;;  %vm6750_vm14 = vweird.f32 %v10656_v12  ;;  %v6692_v19 = vsel %vm16921_vm13, %v16886_v20, %v6688_v50 }
 0x446   :  { %10659 = vrcp.f32 %v16908_v2  ;;  %v4596_v51 = vpop.f32.mrf.mxu2  ;;  %vm6694_vm1 = vcmp.eq.f32.partialorder %v6693_v37, 8.507059e+37  ;;  %vm6751_vm3 = vmor %vm6749_vm15, %vm6750_vm14  ;;  %v6756_v20 = vor.u32 1.1754944e-38, %v6755_v42  ;;  %vm6809_vm6 = vweird.f32 %v16908_v2 }
 0x447   :  { %v4685_v21 = vpop.f32.mrf.mxu3  ;;  %v6746_v26 = vsub.f32 1.0, %v6745_v4  ;;  %v4597_v45 = vadd.f32 %v4596_v51, %v4508_v3  ;;  %v6696_v51 = vor.u32 1.1754944e-38, %v6695_v16 }
 0x448   :  { %v4420_v60 = vpop.f32.mrf.mxu0 }
 0x449   :  { %v4509_v29 = vpop.f32.mrf.mxu1  ;;  %v6747_v31 = vmul.f32 %v10656_v12, %v6746_v26  ;;  %v16925_v3 = vadd.f32 %v4685_v21, %v4597_v45  ;;  %v4421_v4 = vadd.f32 %v4420_v60, %v16540_v6  ;;  %4743 = vmatmul.bf16.gmra.mxu0 %v20006_v48  ;;  %v6697_v16 = vsel %vm6694_vm1, %v6696_v51, %v6692_v19 }
 0x44a   :  { %4921 = vmatmul.bf16.gmra.mxu2 %v20007_v44  ;;  %5010 = vmatmul.bf16.gmra.mxu3 %v20008_v47  ;;  %v16945_v41 = vmul.f32 %v6697_v16, %v16835_v61 }
 0x44b   :  { %v10658_v5 = vpop.eup %10657  ;;  %v6748_v18 = vadd.f32 %v10656_v12, %v6747_v31  ;;  %v9578_v49 = vmul.f32 -1.442695, %v16925_v3  ;;  %v4510_v26 = vadd.f32 %v4509_v29, %v4421_v4 }
 0x44c   :  { %v16935_v21 = vpop.eup %10659  ;;  %v5882_v50 = vadd.f32 1.0, %v10658_v5  ;;  %20117 = vst [vmem:[#allocation89_spill] sm:$0xff] %v16945_v41 }
 0x44d   :  { %v6752_v45 = vsel %vm6751_vm3, %v10656_v12, %v6748_v18  ;;  %v6805_v22 = vmul.f32 %v16935_v21, %v16908_v2  ;;  %10661 = vpow2.f32 %v9578_v49  ;;  %vm6810_vm5 = vweird.f32 %v16935_v21 }
 0x44e   :  { %v6757_v31 = vsel %vm6754_vm4, %v6756_v20, %v6752_v45  ;;  %10663 = vrcp.f32 %v5882_v50  ;;  %v4598_v27 = vpop.f32.mrf.mxu2  ;;  %v6815_v45 = vand.u32 2147483648, %v16908_v2  ;;  %vm16963_vm7 = vmor %vm6809_vm6, %vm6810_vm5  ;;  %vm6869_vm9 = vweird.f32 %v5882_v50 }
 0x44f   :  { %v4687_v60 = vpop.f32.mrf.mxu3  ;;  %v16942_v29 = vmul.f32 %v6757_v31, %v16857_v40  ;;  %v6806_v37 = vsub.f32 1.0, %v6805_v22  ;;  %v4599_v17 = vadd.f32 %v4598_v27, %v4510_v26 }
 0x450   :  { %v4423_v42 = vpop.f32.mrf.mxu0 }
 0x451   :  { %20116 = vst [vmem:[#allocation88_spill] sm:$0xff] %v16942_v29  ;;  %v4512_v4 = vpop.f32.mrf.mxu1  ;;  %v16947_v19 = vadd.f32 %v4687_v60, %v4599_v17  ;;  %v4424_v12 = vadd.f32 %v4423_v42, %v16540_v6  ;;  %4832 = vmatmul.bf16.gmra.mxu1 %v20011_v9  ;;  %v6807_v49 = vmul.f32 %v16935_v21, %v6806_v37  ;;  %v6813_v37 = vand.u32 2147483647, %v16908_v2 }
 0x452   :  { %v6873_v17 = vand.u32 2147483647, %v5882_v50  ;;  %v6875_v42 = vand.u32 2147483648, %v5882_v50 }
 0x453   :  { %v10662_v40 = vpop.eup %10661  ;;  %v9582_v5 = vmul.f32 -1.442695, %v16947_v19  ;;  %v4513_v18 = vadd.f32 %v4512_v4, %v4424_v12  ;;  %v6808_v16 = vadd.f32 %v16935_v21, %v6807_v49  ;;  %vm6814_vm10 = vcmp.eq.f32.partialorder %v6813_v37, 8.507059e+37  ;;  %v9365_v49 = vld [vmem:[#allocation2 + $0x2d8] sm:$0xf0] }
 0x454   :  { %v10664_v26 = vpop.eup %10663  ;;  %v16955_v61 = vadd.f32 1.0, %v10662_v40  ;;  %vm6874_vm2 = vcmp.eq.f32.partialorder %v6873_v17, 8.507059e+37 }
 0x455   :  { %v6865_v20 = vmul.f32 %v10664_v26, %v5882_v50  ;;  %10665 = vpow2.f32 %v9582_v5  ;;  %vm6870_vm8 = vweird.f32 %v10664_v26 }
 0x456   :  { %10667 = vrcp.f32 %v16955_v61  ;;  %v4601_v22 = vpop.f32.mrf.mxu2  ;;  %vm6871_vm0 = vmor %vm6869_vm9, %vm6870_vm8  ;;  %vm6929_vm12 = vweird.f32 %v16955_v61 }
 0x457   :  { %v4690_v31 = vpop.f32.mrf.mxu3  ;;  %v6866_v27 = vsub.f32 1.0, %v6865_v20  ;;  %v4602_v60 = vadd.f32 %v4601_v22, %v4513_v18  ;;  %v6812_v18 = vsel %vm16963_vm7, %v16935_v21, %v6808_v16  ;;  %v6816_v20 = vor.u32 1.1754944e-38, %v6815_v45 }
 0x458   :  { %v4425_v4 = vpop.f32.mrf.mxu0 }
 0x459   :  { %v4514_v12 = vpop.f32.mrf.mxu1  ;;  %v6867_v40 = vmul.f32 %v10664_v26, %v6866_v27  ;;  %v16967_v5 = vadd.f32 %v4690_v31, %v4602_v60  ;;  %v4426_v51 = vadd.f32 %v4425_v4, %v16540_v6  ;;  %4748 = vmatmul.bf16.gmra.mxu0 %v20014_v39  ;;  %v6876_v31 = vor.u32 1.1754944e-38, %v6875_v42 }
 0x45a   :  { %4926 = vmatmul.bf16.gmra.mxu2 %v20015_v52  ;;  %5015 = vmatmul.bf16.gmra.mxu3 %v20016_v56  ;;  %v6817_v21 = vsel %vm6814_vm10, %v6816_v20, %v6812_v18 }
 0x45b   :  { %v10666_v2 = vpop.eup %10665  ;;  %v6868_v22 = vadd.f32 %v10664_v26, %v6867_v40  ;;  %v9586_v41 = vmul.f32 -1.442695, %v16967_v5  ;;  %v4515_v29 = vadd.f32 %v4514_v12, %v4426_v51  ;;  %v9878_v12 = vld [vmem:[#allocation2 + $0x2cc] sm:$0xf]  ;;  %v16988_v40 = vmul.f32 %v6817_v21, %v16877_v0 }
 0x45c   :  { %v16976_v27 = vpop.eup %10667  ;;  %v16978_v60 = vadd.f32 1.0, %v10666_v2  ;;  %v9368_v20 = vor.u32 %v9878_v12, %v9365_v49  ;;  %v9814_v2 = vld [vmem:[#allocation2 + $0xcc] sm:$0xf] }
 0x45d   :  { %v6872_v16 = vsel %vm6871_vm0, %v10664_v26, %v6868_v22  ;;  %v6925_v50 = vmul.f32 %v16976_v27, %v16955_v61  ;;  %10669 = vpow2.f32 %v9586_v41  ;;  %20121 = vst [vmem:[#allocation91_spill] sm:$0xff] %v16988_v40  ;;  %v9109_v41 = vld [vmem:[#allocation2 + $0xd8] sm:$0xf0]  ;;  %vm6930_vm11 = vweird.f32 %v16976_v27 }
 0x45e   :  { %v6877_v45 = vsel %vm6874_vm2, %v6876_v31, %v6872_v16  ;;  %10671 = vrcp.f32 %v16978_v60  ;;  %v4603_v51 = vpop.f32.mrf.mxu2  ;;  %v9910_v16 = vld [vmem:[#allocation2 + $0x3cc] sm:$0xf]  ;;  %5260 = vmatpush.bf16.msra.mxu2 %v9368_v20  ;;  %vm17011_vm13 = vmor %vm6929_vm12, %vm6930_vm11  ;;  %vm6989_vm15 = vweird.f32 %v16978_v60 }
 0x45f   :  { %v4692_v4 = vpop.f32.mrf.mxu3  ;;  %v16985_v37 = vmul.f32 %v6877_v45, %v16900_v35  ;;  %v6926_v17 = vsub.f32 1.0, %v6925_v50  ;;  %v4604_v42 = vadd.f32 %v4603_v51, %v4515_v29  ;;  %v9112_v29 = vor.u32 %v9814_v2, %v9109_v41  ;;  %v9846_v2 = vld [vmem:[#allocation2 + $0x1cc] sm:$0xf]  ;;  %v9237_v41 = vld [vmem:[#allocation2 + $0x1d8] sm:$0xf0] }
 0x460   :  { %v4428_v26 = vpop.f32.mrf.mxu0  ;;  %v9496_v50 = vor.u32 %v9910_v16, %v9493_v15  ;;  %v6935_v15 = vand.u32 2147483648, %v16955_v61  ;;  %v6993_v16 = vand.u32 2147483647, %v16978_v60 }
 0x461   :  { %20120 = vst [vmem:[#allocation90_spill] sm:$0xff] %v16985_v37  ;;  %v4517_v18 = vpop.f32.mrf.mxu1  ;;  %v16990_v22 = vadd.f32 %v4692_v4, %v4604_v42  ;;  %v4429_v31 = vadd.f32 %v4428_v26, %v16540_v6  ;;  %4837 = vmatmul.bf16.gmra.mxu1 %v20019_v55  ;;  %v6927_v35 = vmul.f32 %v16976_v27, %v6926_v17  ;;  %v9477_v37 = vld [vmem:[#allocation2 + $0x3b8] sm:$0xf0] }
 0x462   :  { %5082 = vmatpush.bf16.msra.mxu0 %v9112_v29  ;;  %5349 = vmatpush.bf16.msra.mxu3 %v9496_v50  ;;  %v9240_v29 = vor.u32 %v9846_v2, %v9237_v41  ;;  %vm6994_vm4 = vcmp.eq.f32.partialorder %v6993_v16, 8.507059e+37 }
 0x463   :  { %v10670_v21 = vpop.eup %10669  ;;  %v9590_v45 = vmul.f32 -1.442695, %v16990_v22  ;;  %v4518_v51 = vadd.f32 %v4517_v18, %v4429_v31  ;;  %v6928_v17 = vadd.f32 %v16976_v27, %v6927_v35  ;;  %v6933_v31 = vand.u32 2147483647, %v16955_v61 }
 0x464   :  { %v10672_v4 = vpop.eup %10671  ;;  %v16998_v42 = vadd.f32 1.0, %v10670_v21  ;;  %v6995_v35 = vand.u32 2147483648, %v16978_v60  ;;  %5171 = vmatpush.bf16.msra.mxu1 %v9240_v29 }
 0x465   :  { %v6985_v12 = vmul.f32 %v10672_v4, %v16978_v60  ;;  %10673 = vpow2.f32 %v9590_v45  ;;  %vm6990_vm14 = vweird.f32 %v10672_v4  ;;  %v6932_v61 = vsel %vm17011_vm13, %v16976_v27, %v6928_v17 }
 0x466   :  { %10675 = vrcp.f32 %v16998_v42  ;;  %v4606_v49 = vpop.f32.mrf.mxu2  ;;  %vm6934_vm1 = vcmp.eq.f32.partialorder %v6933_v31, 8.507059e+37  ;;  %vm6991_vm3 = vmor %vm6989_vm15, %vm6990_vm14  ;;  %v6996_v27 = vor.u32 1.1754944e-38, %v6995_v35  ;;  %vm7049_vm6 = vweird.f32 %v16998_v42 }
 0x467   :  { %v4695_v26 = vpop.f32.mrf.mxu3  ;;  %v6986_v18 = vsub.f32 1.0, %v6985_v12  ;;  %v4607_v20 = vadd.f32 %v4606_v49, %v4518_v51  ;;  %v6936_v49 = vor.u32 1.1754944e-38, %v6935_v15 }
 0x468   :  { %v4430_v50 = vpop.f32.mrf.mxu0 }
 0x469   :  { %v4519_v21 = vpop.f32.mrf.mxu1  ;;  %v6987_v0 = vmul.f32 %v10672_v4, %v6986_v18  ;;  %v17015_v51 = vadd.f32 %v4695_v26, %v4607_v20  ;;  %v4431_v12 = vadd.f32 %v4430_v50, %v16540_v6  ;;  %4753 = vmatmul.bf16.gmra.mxu0 %v20022_v57  ;;  %v6937_v15 = vsel %vm6934_vm1, %v6936_v49, %v6932_v61 }
 0x46a   :  { %4931 = vmatmul.bf16.gmra.mxu2 %v20023_v8  ;;  %5020 = vmatmul.bf16.gmra.mxu3 %v20024_v54  ;;  %v17035_v16 = vmul.f32 %v6937_v15, %v16925_v3 }
 0x46b   :  { %v10674_v2 = vpop.eup %10673  ;;  %v6988_v41 = vadd.f32 %v10672_v4, %v6987_v0  ;;  %v9594_v40 = vmul.f32 -1.442695, %v17015_v51  ;;  %v4520_v18 = vadd.f32 %v4519_v21, %v4431_v12 }
 0x46c   :  { %v17025_v26 = vpop.eup %10675  ;;  %v5898_v17 = vadd.f32 1.0, %v10674_v2  ;;  %20125 = vst [vmem:[#allocation93_spill] sm:$0xff] %v17035_v16 }
 0x46d   :  { %v6992_v20 = vsel %vm6991_vm3, %v10672_v4, %v6988_v41  ;;  %v7045_v60 = vmul.f32 %v17025_v26, %v16998_v42  ;;  %10677 = vpow2.f32 %v9594_v40  ;;  %vm7050_vm5 = vweird.f32 %v17025_v26 }
 0x46e   :  { %v6997_v0 = vsel %vm6994_vm4, %v6996_v27, %v6992_v20  ;;  %10679 = vrcp.f32 %v5898_v17  ;;  %v4608_v29 = vpop.f32.mrf.mxu2  ;;  %v7055_v20 = vand.u32 2147483648, %v16998_v42  ;;  %vm17053_vm7 = vmor %vm7049_vm6, %vm7050_vm5  ;;  %vm7109_vm9 = vweird.f32 %v5898_v17 }
 0x46f   :  { %v4697_v50 = vpop.f32.mrf.mxu3  ;;  %v17032_v21 = vmul.f32 %v6997_v0, %v16947_v19  ;;  %v7046_v31 = vsub.f32 1.0, %v7045_v60  ;;  %v4609_v45 = vadd.f32 %v4608_v29, %v4520_v18 }
 0x470   :  { %v4433_v35 = vpop.f32.mrf.mxu0 }
 0x471   :  { %20124 = vst [vmem:[#allocation92_spill] sm:$0xff] %v17032_v21  ;;  %v4522_v12 = vpop.f32.mrf.mxu1  ;;  %v17037_v61 = vadd.f32 %v4697_v50, %v4609_v45  ;;  %v4434_v4 = vadd.f32 %v4433_v35, %v16540_v6  ;;  %4842 = vmatmul.bf16.gmra.mxu1 %v20027_v58  ;;  %v7047_v40 = vmul.f32 %v17025_v26, %v7046_v31  ;;  %v7053_v31 = vand.u32 2147483647, %v16998_v42 }
 0x472   :  { %v7113_v45 = vand.u32 2147483647, %v5898_v17  ;;  %v7115_v35 = vand.u32 2147483648, %v5898_v17 }
 0x473   :  { %v10678_v19 = vpop.eup %10677  ;;  %v9598_v2 = vmul.f32 -1.442695, %v17037_v61  ;;  %v4523_v41 = vadd.f32 %v4522_v12, %v4434_v4  ;;  %v7048_v15 = vadd.f32 %v17025_v26, %v7047_v40  ;;  %vm7054_vm10 = vcmp.eq.f32.partialorder %v7053_v31, 8.507059e+37  ;;  %v9349_v40 = vld [vmem:[#allocation2 + $0x2b8] sm:$0xf0] }
 0x474   :  { %v10680_v18 = vpop.eup %10679  ;;  %v17045_v3 = vadd.f32 1.0, %v10678_v19  ;;  %vm7114_vm2 = vcmp.eq.f32.partialorder %v7113_v45, 8.507059e+37 }
 0x475   :  { %v7105_v27 = vmul.f32 %v10680_v18, %v5898_v17  ;;  %10681 = vpow2.f32 %v9598_v2  ;;  %vm7110_vm8 = vweird.f32 %v10680_v18 }
 0x476   :  { %10683 = vrcp.f32 %v17045_v3  ;;  %v4611_v60 = vpop.f32.mrf.mxu2  ;;  %vm7111_vm0 = vmor %vm7109_vm9, %vm7110_vm8  ;;  %vm7169_vm12 = vweird.f32 %v17045_v3 }
 0x477   :  { %v4700_v0 = vpop.f32.mrf.mxu3  ;;  %v7106_v29 = vsub.f32 1.0, %v7105_v27  ;;  %v4612_v50 = vadd.f32 %v4611_v60, %v4523_v41  ;;  %v7052_v41 = vsel %vm17053_vm7, %v17025_v26, %v7048_v15  ;;  %v7056_v27 = vor.u32 1.1754944e-38, %v7055_v20 }
 0x478   :  { %v4435_v12 = vpop.f32.mrf.mxu0 }
 0x479   :  { %v4524_v4 = vpop.f32.mrf.mxu1  ;;  %v7107_v19 = vmul.f32 %v10680_v18, %v7106_v29  ;;  %v17057_v2 = vadd.f32 %v4700_v0, %v4612_v50  ;;  %v4436_v49 = vadd.f32 %v4435_v12, %v16540_v6  ;;  %4758 = vmatmul.bf16.gmra.mxu0 %v20030_v38  ;;  %v7116_v0 = vor.u32 1.1754944e-38, %v7115_v35 }
 0x47a   :  { %4936 = vmatmul.bf16.gmra.mxu2 %v20031_v14  ;;  %5025 = vmatmul.bf16.gmra.mxu3 %v20032_v11  ;;  %v7057_v26 = vsel %vm7054_vm10, %v7056_v27, %v7052_v41  ;;  %v20134_v11 = vld [vmem:[#allocation37_spill] sm:$0xff] }
 0x47b   :  { %v10682_v42 = vpop.eup %10681  ;;  %v7108_v60 = vadd.f32 %v10680_v18, %v7107_v19  ;;  %v9602_v16 = vmul.f32 -1.442695, %v17057_v2  ;;  %v4525_v21 = vadd.f32 %v4524_v4, %v4436_v49  ;;  %v9874_v4 = vld [vmem:[#allocation2 + $0x2ac] sm:$0xf]  ;;  %v17078_v19 = vmul.f32 %v7057_v26, %v16967_v5 }
 0x47c   :  { %v17066_v29 = vpop.eup %10683  ;;  %v17068_v50 = vadd.f32 1.0, %v10682_v42  ;;  %v9352_v27 = vor.u32 %v9874_v4, %v9349_v40  ;;  %v9810_v42 = vld [vmem:[#allocation2 + $0xac] sm:$0xf] }
 0x47d   :  { %v7112_v15 = vsel %vm7111_vm0, %v10680_v18, %v7108_v60  ;;  %v7165_v17 = vmul.f32 %v17066_v29, %v17045_v3  ;;  %10685 = vpow2.f32 %v9602_v16  ;;  %20129 = vst [vmem:[#allocation95_spill] sm:$0xff] %v17078_v19  ;;  %v9093_v16 = vld [vmem:[#allocation2 + $0xb8] sm:$0xf0]  ;;  %vm7170_vm11 = vweird.f32 %v17066_v29 }
 0x47e   :  { %v7117_v20 = vsel %vm7114_vm2, %v7116_v0, %v7112_v15  ;;  %10687 = vrcp.f32 %v17068_v50  ;;  %v4613_v49 = vpop.f32.mrf.mxu2  ;;  %v9906_v15 = vld [vmem:[#allocation2 + $0x3ac] sm:$0xf]  ;;  %5261 = vmatpush.bf16.msra.mxu2 %v9352_v27  ;;  %vm17101_vm13 = vmor %vm7169_vm12, %vm7170_vm11  ;;  %vm7229_vm15 = vweird.f32 %v17068_v50 }
 0x47f   :  { %v4702_v12 = vpop.f32.mrf.mxu3  ;;  %v17075_v31 = vmul.f32 %v7117_v20, %v16990_v22  ;;  %v7166_v45 = vsub.f32 1.0, %v7165_v17  ;;  %v4614_v35 = vadd.f32 %v4613_v49, %v4525_v21  ;;  %v20130_v22 = vld [vmem:[#allocation33_spill] sm:$0xff]  ;;  %v9096_v17 = vor.u32 %v9810_v42, %v9093_v16  ;;  %v9842_v16 = vld [vmem:[#allocation2 + $0x1ac] sm:$0xf] }
 0x480   :  { %v4438_v18 = vpop.f32.mrf.mxu0  ;;  %v9480_v20 = vor.u32 %v9906_v15, %v9477_v37  ;;  %v7175_v37 = vand.u32 2147483648, %v17045_v3  ;;  %v7173_v15 = vand.u32 2147483647, %v17045_v3 }
 0x481   :  { %20128 = vst [vmem:[#allocation94_spill] sm:$0xff] %v17075_v31  ;;  %v4527_v41 = vpop.f32.mrf.mxu1  ;;  %v17080_v60 = vadd.f32 %v4702_v12, %v4614_v35  ;;  %v4439_v0 = vadd.f32 %v4438_v18, %v16540_v6  ;;  %4847 = vmatmul.bf16.gmra.mxu1 %v20130_v22  ;;  %v7167_v21 = vmul.f32 %v17066_v29, %v7166_v45 }
 0x482   :  { %5083 = vmatpush.bf16.msra.mxu0 %v9096_v17  ;;  %5350 = vmatpush.bf16.msra.mxu3 %v9480_v20  ;;  %v7233_v17 = vand.u32 2147483647, %v17068_v50  ;;  %vm7174_vm1 = vcmp.eq.f32.partialorder %v7173_v15, 8.507059e+37 }
 0x483   :  { %v10686_v26 = vpop.eup %10685  ;;  %v9606_v49 = vmul.f32 -1.442695, %v17080_v60  ;;  %v4528_v4 = vadd.f32 %v4527_v41, %v4439_v0  ;;  %v7168_v45 = vadd.f32 %v17066_v29, %v7167_v21  ;;  %v9221_v0 = vld [vmem:[#allocation2 + $0x1b8] sm:$0xf0]  ;;  %v7235_v21 = vand.u32 2147483648, %v17068_v50 }
 0x484   :  { %v10688_v12 = vpop.eup %10687  ;;  %v17088_v35 = vadd.f32 1.0, %v10686_v26  ;;  %v9224_v20 = vor.u32 %v9842_v16, %v9221_v0  ;;  %v20133_v16 = vld [vmem:[#allocation39_spill] sm:$0xff]  ;;  %vm7234_vm4 = vcmp.eq.f32.partialorder %v7233_v17, 8.507059e+37 }
 0x485   :  { %v7225_v40 = vmul.f32 %v10688_v12, %v17068_v50  ;;  %10689 = vpow2.f32 %v9606_v49  ;;  %vm7230_vm14 = vweird.f32 %v10688_v12  ;;  %v7172_v3 = vsel %vm17101_vm13, %v17066_v29, %v7168_v45  ;;  %v20135_v45 = vld [vmem:[#allocation36_spill] sm:$0xff] }
 0x486   :  { %10691 = vrcp.f32 %v17088_v35  ;;  %v4616_v18 = vpop.f32.mrf.mxu2  ;;  %5172 = vmatpush.bf16.msra.mxu1 %v9224_v20  ;;  %vm7231_vm3 = vmor %vm7229_vm15, %vm7230_vm14  ;;  %v7236_v29 = vor.u32 1.1754944e-38, %v7235_v21  ;;  %vm7289_vm6 = vweird.f32 %v17088_v35 }
 0x487   :  { %v4705_v27 = vpop.f32.mrf.mxu3  ;;  %v7226_v41 = vsub.f32 1.0, %v7225_v40  ;;  %v4617_v42 = vadd.f32 %v4616_v18, %v4528_v4  ;;  %v7176_v18 = vor.u32 1.1754944e-38, %v7175_v37 }
 0x488   :  { %v4440_v26 = vpop.f32.mrf.mxu0 }
 0x489   :  { %v4529_v49 = vpop.f32.mrf.mxu1  ;;  %v7227_v19 = vmul.f32 %v10688_v12, %v7226_v41  ;;  %v17105_v4 = vadd.f32 %v4705_v27, %v4617_v42  ;;  %v4441_v40 = vadd.f32 %v4440_v26, %v16540_v6  ;;  %4763 = vmatmul.bf16.gmra.mxu0 %v20133_v16  ;;  %v7177_v37 = vsel %vm7174_vm1, %v7176_v18, %v7172_v3  ;;  %v20142_v16 = vld [vmem:[#allocation43_spill] sm:$0xff] }
 0x48a   :  { %4941 = vmatmul.bf16.gmra.mxu2 %v20134_v11  ;;  %5030 = vmatmul.bf16.gmra.mxu3 %v20135_v45  ;;  %v17125_v17 = vmul.f32 %v7177_v37, %v17015_v51 }
 0x48b   :  { %v10690_v0 = vpop.eup %10689  ;;  %v7228_v31 = vadd.f32 %v10688_v12, %v7227_v19  ;;  %v9610_v22 = vmul.f32 -1.442695, %v17105_v4  ;;  %v4530_v41 = vadd.f32 %v4529_v49, %v4441_v40 }
 0x48c   :  { %v17115_v27 = vpop.eup %10691  ;;  %v5914_v5 = vadd.f32 1.0, %v10690_v0  ;;  %20137 = vst [vmem:[#allocation97_spill] sm:$0xff] %v17125_v17 }
 0x48d   :  { %v7232_v42 = vsel %vm7231_vm3, %v10688_v12, %v7228_v31  ;;  %v7285_v50 = vmul.f32 %v17115_v27, %v17088_v35  ;;  %10693 = vpow2.f32 %v9610_v22  ;;  %v20138_v12 = vld [vmem:[#allocation40_spill] sm:$0xff]  ;;  %vm7290_vm5 = vweird.f32 %v17115_v27 }
 0x48e   :  { %v7237_v19 = vsel %vm7234_vm4, %v7236_v29, %v7232_v42  ;;  %10695 = vrcp.f32 %v5914_v5  ;;  %v4618_v20 = vpop.f32.mrf.mxu2  ;;  %vm17143_vm7 = vmor %vm7289_vm6, %vm7290_vm5  ;;  %vm7349_vm9 = vweird.f32 %v5914_v5 }
 0x48f   :  { %v4707_v26 = vpop.f32.mrf.mxu3  ;;  %v17122_v49 = vmul.f32 %v7237_v19, %v17037_v61  ;;  %v7286_v15 = vsub.f32 1.0, %v7285_v50  ;;  %v4619_v40 = vadd.f32 %v4618_v20, %v4530_v41  ;;  %v7295_v19 = vand.u32 2147483648, %v17088_v35 }
 0x490   :  { %v4443_v21 = vpop.f32.mrf.mxu0 }
 0x491   :  { %20136 = vst [vmem:[#allocation96_spill] sm:$0xff] %v17122_v49  ;;  %v4532_v0 = vpop.f32.mrf.mxu1  ;;  %v17127_v3 = vadd.f32 %v4707_v26, %v4619_v40  ;;  %v4444_v31 = vadd.f32 %v4443_v21, %v16540_v6  ;;  %4852 = vmatmul.bf16.gmra.mxu1 %v20138_v12  ;;  %v7287_v22 = vmul.f32 %v17115_v27, %v7286_v15  ;;  %v7293_v21 = vand.u32 2147483647, %v17088_v35  ;;  %v20141_v35 = vld [vmem:[#allocation31_spill] sm:$0xff] }
 0x493   :  { %v10694_v61 = vpop.eup %10693  ;;  %v9614_v29 = vmul.f32 -1.442695, %v17127_v3  ;;  %v4533_v41 = vadd.f32 %v4532_v0, %v4444_v31  ;;  %v7288_v50 = vadd.f32 %v17115_v27, %v7287_v22  ;;  %v7353_v0 = vand.u32 2147483647, %v5914_v5  ;;  %v9333_v22 = vld [vmem:[#allocation2 + $0x298] sm:$0xf0] }
 0x494   :  { %v10696_v42 = vpop.eup %10695  ;;  %v17135_v51 = vadd.f32 1.0, %v10694_v61  ;;  %v7355_v31 = vand.u32 2147483648, %v5914_v5  ;;  %vm7294_vm10 = vcmp.eq.f32.partialorder %v7293_v21, 8.507059e+37 }
 0x495   :  { %v7345_v37 = vmul.f32 %v10696_v42, %v5914_v5  ;;  %10697 = vpow2.f32 %v9614_v29  ;;  %vm7350_vm8 = vweird.f32 %v10696_v42  ;;  %vm7354_vm2 = vcmp.eq.f32.partialorder %v7353_v0, 8.507059e+37 }
 0x496   :  { %10699 = vrcp.f32 %v17135_v51  ;;  %v4621_v20 = vpop.f32.mrf.mxu2  ;;  %vm7351_vm0 = vmor %vm7349_vm9, %vm7350_vm8  ;;  %vm7409_vm12 = vweird.f32 %v17135_v51 }
 0x497   :  { %v4710_v26 = vpop.f32.mrf.mxu3  ;;  %v7346_v15 = vsub.f32 1.0, %v7345_v37  ;;  %v4622_v40 = vadd.f32 %v4621_v20, %v4533_v41  ;;  %v7292_v41 = vsel %vm17143_vm7, %v17115_v27, %v7288_v50  ;;  %v7296_v37 = vor.u32 1.1754944e-38, %v7295_v19  ;;  %v20143_v27 = vld [vmem:[#allocation44_spill] sm:$0xff] }
 0x498   :  { %v4445_v61 = vpop.f32.mrf.mxu0 }
 0x499   :  { %v4534_v29 = vpop.f32.mrf.mxu1  ;;  %v7347_v18 = vmul.f32 %v10696_v42, %v7346_v15  ;;  %v17147_v17 = vadd.f32 %v4710_v26, %v4622_v40  ;;  %v4446_v49 = vadd.f32 %v4445_v61, %v16540_v6  ;;  %4768 = vmatmul.bf16.gmra.mxu0 %v20141_v35  ;;  %v7356_v26 = vor.u32 1.1754944e-38, %v7355_v31  ;;  %v20150_v35 = vld [vmem:[#allocation47_spill] sm:$0xff] }
 0x49a   :  { %4946 = vmatmul.bf16.gmra.mxu2 %v20142_v16  ;;  %5035 = vmatmul.bf16.gmra.mxu3 %v20143_v27  ;;  %v7297_v50 = vsel %vm7294_vm10, %v7296_v37, %v7292_v41  ;;  %v9806_v37 = vld [vmem:[#allocation2 + $0x8c] sm:$0xf]  ;;  %v9461_v16 = vld [vmem:[#allocation2 + $0x398] sm:$0xf0] }
 0x49b   :  { %v10698_v20 = vpop.eup %10697  ;;  %v7348_v12 = vadd.f32 %v10696_v42, %v7347_v18  ;;  %v9618_v45 = vmul.f32 -1.442695, %v17147_v17  ;;  %v4535_v11 = vadd.f32 %v4534_v29, %v4446_v49  ;;  %v9870_v29 = vld [vmem:[#allocation2 + $0x28c] sm:$0xf] }
 0x49c   :  { %v17156_v15 = vpop.eup %10699  ;;  %v17158_v40 = vadd.f32 1.0, %v10698_v20  ;;  %v17168_v20 = vmul.f32 %v7297_v50, %v17057_v2  ;;  %v9336_v41 = vor.u32 %v9870_v29, %v9333_v22  ;;  %v9902_v27 = vld [vmem:[#allocation2 + $0x38c] sm:$0xf] }
 0x49d   :  { %v7352_v19 = vsel %vm7351_vm0, %v10696_v42, %v7348_v12  ;;  %v7405_v5 = vmul.f32 %v17156_v15, %v17135_v51  ;;  %10701 = vpow2.f32 %v9618_v45  ;;  %v9077_v45 = vld [vmem:[#allocation2 + $0x98] sm:$0xf0]  ;;  %vm7410_vm11 = vweird.f32 %v17156_v15 }
 0x49e   :  { %v7357_v18 = vsel %vm7354_vm2, %v7356_v26, %v7352_v19  ;;  %10703 = vrcp.f32 %v17158_v40  ;;  %v4623_v49 = vpop.f32.mrf.mxu2  ;;  %20145 = vst [vmem:[#allocation99_spill] sm:$0xff] %v17168_v20  ;;  %5262 = vmatpush.bf16.msra.mxu2 %v9336_v41  ;;  %vm17191_vm13 = vmor %vm7409_vm12, %vm7410_vm11  ;;  %vm7469_vm15 = vweird.f32 %v17158_v40 }
 0x49f   :  { %v4712_v61 = vpop.f32.mrf.mxu3  ;;  %v17165_v21 = vmul.f32 %v7357_v18, %v17080_v60  ;;  %v7406_v0 = vsub.f32 1.0, %v7405_v5  ;;  %v4624_v31 = vadd.f32 %v4623_v49, %v4535_v11  ;;  %v20146_v60 = vld [vmem:[#allocation42_spill] sm:$0xff]  ;;  %v9080_v5 = vor.u32 %v9806_v37, %v9077_v45  ;;  %v9838_v37 = vld [vmem:[#allocation2 + $0x18c] sm:$0xf] }
 0x4a0   :  { %v4448_v12 = vpop.f32.mrf.mxu0  ;;  %v9464_v18 = vor.u32 %v9902_v27, %v9461_v16  ;;  %v7415_v16 = vand.u32 2147483648, %v17135_v51  ;;  %v9205_v45 = vld [vmem:[#allocation2 + $0x198] sm:$0xf0] }
 0x4a1   :  { %20144 = vst [vmem:[#allocation98_spill] sm:$0xff] %v17165_v21  ;;  %v4537_v42 = vpop.f32.mrf.mxu1  ;;  %v17170_v26 = vadd.f32 %v4712_v61, %v4624_v31  ;;  %v4449_v19 = vadd.f32 %v4448_v12, %v16540_v6  ;;  %4857 = vmatmul.bf16.gmra.mxu1 %v20146_v60  ;;  %v7407_v11 = vmul.f32 %v17156_v15, %v7406_v0 }
 0x4a2   :  { %5084 = vmatpush.bf16.msra.mxu0 %v9080_v5  ;;  %5351 = vmatpush.bf16.msra.mxu3 %v9464_v18  ;;  %v7473_v5 = vand.u32 2147483647, %v17158_v40  ;;  %v9208_v18 = vor.u32 %v9838_v37, %v9205_v45  ;;  %v20149_v37 = vld [vmem:[#allocation45_spill] sm:$0xff] }
 0x4a3   :  { %v10702_v50 = vpop.eup %10701  ;;  %v9622_v49 = vmul.f32 -1.442695, %v17170_v26  ;;  %v4538_v29 = vadd.f32 %v4537_v42, %v4449_v19  ;;  %v7408_v0 = vadd.f32 %v17156_v15, %v7407_v11  ;;  %v7413_v19 = vand.u32 2147483647, %v17135_v51 }
 0x4a4   :  { %v10704_v61 = vpop.eup %10703  ;;  %v17178_v31 = vadd.f32 1.0, %v10702_v50  ;;  %v7475_v11 = vand.u32 2147483648, %v17158_v40  ;;  %5173 = vmatpush.bf16.msra.mxu1 %v9208_v18  ;;  %vm7474_vm4 = vcmp.eq.f32.partialorder %v7473_v5, 8.507059e+37 }
 0x4a5   :  { %v7465_v22 = vmul.f32 %v10704_v61, %v17158_v40  ;;  %10705 = vpow2.f32 %v9622_v49  ;;  %vm7470_vm14 = vweird.f32 %v10704_v61  ;;  %v7412_v51 = vsel %vm17191_vm13, %v17156_v15, %v7408_v0  ;;  %v20151_v0 = vld [vmem:[#allocation41_spill] sm:$0xff] }
 0x4a6   :  { %10707 = vrcp.f32 %v17178_v31  ;;  %v4626_v27 = vpop.f32.mrf.mxu2  ;;  %vm7414_vm1 = vcmp.eq.f32.partialorder %v7413_v19, 8.507059e+37  ;;  %vm7471_vm3 = vmor %vm7469_vm15, %vm7470_vm14  ;;  %v7476_v15 = vor.u32 1.1754944e-38, %v7475_v11  ;;  %vm7529_vm6 = vweird.f32 %v17178_v31 }
 0x4a7   :  { %v4715_v12 = vpop.f32.mrf.mxu3  ;;  %v7466_v42 = vsub.f32 1.0, %v7465_v22  ;;  %v4627_v41 = vadd.f32 %v4626_v27, %v4538_v29  ;;  %v7416_v27 = vor.u32 1.1754944e-38, %v7415_v16 }
 0x4a8   :  { %v4450_v50 = vpop.f32.mrf.mxu0 }
 0x4a9   :  { %v4539_v49 = vpop.f32.mrf.mxu1  ;;  %v7467_v20 = vmul.f32 %v10704_v61, %v7466_v42  ;;  %v17195_v29 = vadd.f32 %v4715_v12, %v4627_v41  ;;  %v4451_v22 = vadd.f32 %v4450_v50, %v16540_v6  ;;  %4773 = vmatmul.bf16.gmra.mxu0 %v20149_v37  ;;  %v7417_v16 = vsel %vm7414_vm1, %v7416_v27, %v7412_v51 }
 0x4aa   :  { %4951 = vmatmul.bf16.gmra.mxu2 %v20150_v35  ;;  %5040 = vmatmul.bf16.gmra.mxu3 %v20151_v0  ;;  %v17215_v5 = vmul.f32 %v7417_v16, %v17105_v4 }
 0x4ab   :  { %v10706_v45 = vpop.eup %10705  ;;  %v7468_v21 = vadd.f32 %v10704_v61, %v7467_v20  ;;  %v9626_v60 = vmul.f32 -1.442695, %v17195_v29  ;;  %v4540_v42 = vadd.f32 %v4539_v49, %v4451_v22 }
 0x4ac   :  { %v17205_v12 = vpop.eup %10707  ;;  %v5930_v2 = vadd.f32 1.0, %v10706_v45  ;;  %20153 = vst [vmem:[#allocation47_spill] sm:$0xff] %v17215_v5 }
 0x4ad   :  { %v7472_v41 = vsel %vm7471_vm3, %v10704_v61, %v7468_v21  ;;  %v7525_v40 = vmul.f32 %v17205_v12, %v17178_v31  ;;  %10709 = vpow2.f32 %v9626_v60  ;;  %v20154_v61 = vld [vmem:[#allocation46_spill] sm:$0xff]  ;;  %vm7530_vm5 = vweird.f32 %v17205_v12 }
 0x4ae   :  { %v7477_v20 = vsel %vm7474_vm4, %v7476_v15, %v7472_v41  ;;  %10711 = vrcp.f32 %v5930_v2  ;;  %v4628_v18 = vpop.f32.mrf.mxu2  ;;  %vm17233_vm7 = vmor %vm7529_vm6, %vm7530_vm5  ;;  %vm7589_vm9 = vweird.f32 %v5930_v2 }
 0x4af   :  { %v4717_v50 = vpop.f32.mrf.mxu3  ;;  %v17212_v49 = vmul.f32 %v7477_v20, %v17127_v3  ;;  %v7526_v19 = vsub.f32 1.0, %v7525_v40  ;;  %v4629_v22 = vadd.f32 %v4628_v18, %v4540_v42  ;;  %v7535_v20 = vand.u32 2147483648, %v17178_v31 }
 0x4b0   :  { %v4453_v11 = vpop.f32.mrf.mxu0 }
 0x4b1   :  { %20152 = vst [vmem:[#allocation45_spill] sm:$0xff] %v17212_v49  ;;  %v4542_v45 = vpop.f32.mrf.mxu1  ;;  %v17217_v51 = vadd.f32 %v4717_v50, %v4629_v22  ;;  %v4454_v21 = vadd.f32 %v4453_v11, %v16540_v6  ;;  %4862 = vmatmul.bf16.gmra.mxu1 %v20154_v61  ;;  %v7527_v60 = vmul.f32 %v17205_v12, %v7526_v19  ;;  %v7533_v11 = vand.u32 2147483647, %v17178_v31 }
 0x4b3   :  { %v10710_v3 = vpop.eup %10709  ;;  %v9630_v15 = vmul.f32 -1.442695, %v17217_v51  ;;  %v4543_v42 = vadd.f32 %v4542_v45, %v4454_v21  ;;  %v7528_v40 = vadd.f32 %v17205_v12, %v7527_v60  ;;  %v7593_v45 = vand.u32 2147483647, %v5930_v2 }
 0x4b4   :  { %v10712_v41 = vpop.eup %10711  ;;  %v17225_v4 = vadd.f32 1.0, %v10710_v3  ;;  %v7595_v21 = vand.u32 2147483648, %v5930_v2  ;;  %vm7534_vm10 = vcmp.eq.f32.partialorder %v7533_v11, 8.507059e+37 }
 0x4b5   :  { %v7585_v16 = vmul.f32 %v10712_v41, %v5930_v2  ;;  %10713 = vpow2.f32 %v9630_v15  ;;  %vm7590_vm8 = vweird.f32 %v10712_v41  ;;  %vm7594_vm2 = vcmp.eq.f32.partialorder %v7593_v45, 8.507059e+37 }
 0x4b6   :  { %10715 = vrcp.f32 %v17225_v4  ;;  %v4631_v18 = vpop.f32.mrf.mxu2  ;;  %vm7591_vm0 = vmor %vm7589_vm9, %vm7590_vm8  ;;  %vm7649_vm12 = vweird.f32 %v17225_v4 }
 0x4b7   :  { %v4720_v50 = vpop.f32.mrf.mxu3  ;;  %v7586_v19 = vsub.f32 1.0, %v7585_v16  ;;  %v4632_v22 = vadd.f32 %v4631_v18, %v4543_v42  ;;  %v7532_v42 = vsel %vm17233_vm7, %v17205_v12, %v7528_v40  ;;  %v7536_v16 = vor.u32 1.1754944e-38, %v7535_v20  ;;  %v20157_v12 = vld [vmem:[#allocation50_spill] sm:$0xff] }
 0x4b8   :  { %v4455_v3 = vpop.f32.mrf.mxu0 }
 0x4b9   :  { %v4544_v15 = vpop.f32.mrf.mxu1  ;;  %v7587_v27 = vmul.f32 %v10712_v41, %v7586_v19  ;;  %v17237_v5 = vadd.f32 %v4720_v50, %v4632_v22  ;;  %v4456_v49 = vadd.f32 %v4455_v3, %v16540_v6  ;;  %4778 = vmatmul.bf16.gmra.mxu0 %v20062_v25  ;;  %v7596_v6 = vor.u32 1.1754944e-38, %v7595_v21  ;;  %v9866_v3 = vld [vmem:[#allocation2 + $0x26c] sm:$0xf]  ;;  %v20164_v25 = vld [vmem:[#allocation53_spill] sm:$0xff] }
 0x4ba   :  { %4956 = vmatmul.bf16.gmra.mxu2 %v20063_v53  ;;  %5045 = vmatmul.bf16.gmra.mxu3 %v20157_v12  ;;  %v7537_v40 = vsel %vm7534_vm10, %v7536_v16, %v7532_v42 }
 0x4bb   :  { %v10714_v31 = vpop.eup %10713  ;;  %v7588_v18 = vadd.f32 %v10712_v41, %v7587_v27  ;;  %v9634_v61 = vmul.f32 -1.442695, %v17237_v5  ;;  %v4545_v0 = vadd.f32 %v4544_v15, %v4456_v49  ;;  %v9317_v15 = vld [vmem:[#allocation2 + $0x278] sm:$0xf0]  ;;  %v17258_v60 = vmul.f32 %v7537_v40, %v17147_v17 }
 0x4bc   :  { %v17246_v19 = vpop.eup %10715  ;;  %v17248_v50 = vadd.f32 1.0, %v10714_v31  ;;  %v9320_v31 = vor.u32 %v9866_v3, %v9317_v15 }
 0x4bd   :  { %v7592_v20 = vsel %vm7591_vm0, %v10712_v41, %v7588_v18  ;;  %v7645_v2 = vmul.f32 %v17246_v19, %v17225_v4  ;;  %10717 = vpow2.f32 %v9634_v61  ;;  %20159 = vst [vmem:[#allocation101_spill] sm:$0xff] %v17258_v60  ;;  %v10984_v41 = vld [vmem:[%s19272_s4] sm:$0xf]  ;;  %v9802_v18 = vld [vmem:[#allocation2 + $0x6c] sm:$0xf]  ;;  %vm7650_vm11 = vweird.f32 %v17246_v19 }
 0x4be   :  { %v7597_v27 = vsel %vm7594_vm2, %v7596_v6, %v7592_v20  ;;  %10719 = vrcp.f32 %v17248_v50  ;;  %v4633_v49 = vpop.f32.mrf.mxu2  ;;  %v17263_v61 = vperm.slane %v10984_v41, 2  ;;  %v9061_v6 = vld [vmem:[#allocation2 + $0x78] sm:$0xf0]  ;;  %5263 = vmatpush.bf16.msra.mxu2 %v9320_v31  ;;  %vm17286_vm13 = vmor %vm7649_vm12, %vm7650_vm11  ;;  %vm7709_vm15 = vweird.f32 %v17248_v50 }
 0x4bf   :  { %v4722_v22 = vpop.f32.mrf.mxu3  ;;  %v17255_v11 = vmul.f32 %v7597_v27, %v17170_v26  ;;  %v7646_v45 = vsub.f32 1.0, %v7645_v2  ;;  %v4634_v21 = vadd.f32 %v4633_v49, %v4545_v0  ;;  %v9064_v20 = vor.u32 %v9802_v18, %v9061_v6  ;;  %v9898_v0 = vld [vmem:[#allocation2 + $0x36c] sm:$0xf]  ;;  %v9445_v2 = vld [vmem:[#allocation2 + $0x378] sm:$0xf0] }
 0x4c0   :  { %v4734_v42 = vpop.f32.mrf.mxu0  ;;  %v20160_v27 = vld [vmem:[#allocation48_spill] sm:$0xff]  ;;  %v9448_v49 = vor.u32 %v9898_v0, %v9445_v2  ;;  %v7653_v2 = vand.u32 2147483647, %v17225_v4 }
 0x4c1   :  { %20158 = vst [vmem:[#allocation100_spill] sm:$0xff] %v17255_v11  ;;  %v4823_v16 = vpop.f32.mrf.mxu1  ;;  %v17265_v26 = vadd.f32 %v4722_v22, %v4634_v21  ;;  %4867 = vmatmul.bf16.gmra.mxu1 %v20160_v27  ;;  %v7647_v17 = vmul.f32 %v17246_v19, %v7646_v45  ;;  %v4735_v40 = vadd.f32 %v4734_v42, %v17263_v61  ;;  %v7655_v42 = vand.u32 2147483648, %v17225_v4  ;;  %v9834_v0 = vld [vmem:[#allocation2 + $0x16c] sm:$0xf] }
 0x4c2   :  { %5085 = vmatpush.bf16.msra.mxu0 %v9064_v20  ;;  %5352 = vmatpush.bf16.msra.mxu3 %v9448_v49  ;;  %vm7654_vm1 = vcmp.eq.f32.partialorder %v7653_v2, 8.507059e+37 }
 0x4c3   :  { %v10718_v12 = vpop.eup %10717  ;;  %v9638_v3 = vmul.f32 -1.442695, %v17265_v26  ;;  %v4824_v15 = vadd.f32 %v4823_v16, %v4735_v40  ;;  %v7648_v45 = vadd.f32 %v17246_v19, %v7647_v17  ;;  %v9189_v16 = vld [vmem:[#allocation2 + $0x178] sm:$0xf0]  ;;  %v7713_v40 = vand.u32 2147483647, %v17248_v50 }
 0x4c4   :  { %v10720_v22 = vpop.eup %10719  ;;  %v17273_v21 = vadd.f32 1.0, %v10718_v12  ;;  %v7715_v17 = vand.u32 2147483648, %v17248_v50  ;;  %v9192_v49 = vor.u32 %v9834_v0, %v9189_v16  ;;  %v20163_v0 = vld [vmem:[#allocation51_spill] sm:$0xff] }
 0x4c5   :  { %v7705_v18 = vmul.f32 %v10720_v22, %v17248_v50  ;;  %10721 = vpow2.f32 %v9638_v3  ;;  %vm7710_vm14 = vweird.f32 %v10720_v22  ;;  %v7652_v4 = vsel %vm17286_vm13, %v17246_v19, %v7648_v45  ;;  %v20165_v45 = vld [vmem:[#allocation54_spill] sm:$0xff] }
 0x4c6   :  { %10723 = vrcp.f32 %v17273_v21  ;;  %v4912_v31 = vpop.f32.mrf.mxu2  ;;  %5174 = vmatpush.bf16.msra.mxu1 %v9192_v49  ;;  %vm7711_vm3 = vmor %vm7709_vm15, %vm7710_vm14  ;;  %vm7714_vm4 = vcmp.eq.f32.partialorder %v7713_v40, 8.507059e+37  ;;  %v7716_v19 = vor.u32 1.1754944e-38, %v7715_v17  ;;  %vm7769_vm6 = vweird.f32 %v17273_v21 }
 0x4c7   :  { %v5001_v6 = vpop.f32.mrf.mxu3  ;;  %v7706_v20 = vsub.f32 1.0, %v7705_v18  ;;  %v4913_v12 = vadd.f32 %v4912_v31, %v4824_v15  ;;  %v7656_v31 = vor.u32 1.1754944e-38, %v7655_v42 }
 0x4c8   :  { %v4736_v3 = vpop.f32.mrf.mxu0 }
 0x4c9   :  { %v4825_v41 = vpop.f32.mrf.mxu1  ;;  %v7707_v11 = vmul.f32 %v10720_v22, %v7706_v20  ;;  %v17290_v15 = vadd.f32 %v5001_v6, %v4913_v12  ;;  %v4737_v18 = vadd.f32 %v4736_v3, %v17263_v61  ;;  %4783 = vmatmul.bf16.gmra.mxu0 %v20163_v0  ;;  %v7657_v42 = vsel %vm7654_vm1, %v7656_v31, %v7652_v4  ;;  %v20172_v0 = vld [vmem:[#allocation57_spill] sm:$0xff] }
 0x4ca   :  { %4961 = vmatmul.bf16.gmra.mxu2 %v20164_v25  ;;  %5050 = vmatmul.bf16.gmra.mxu3 %v20165_v45  ;;  %v17310_v40 = vmul.f32 %v7657_v42, %v17195_v29 }
 0x4cb   :  { %v10722_v16 = vpop.eup %10721  ;;  %v7708_v27 = vadd.f32 %v10720_v22, %v7707_v11  ;;  %v9515_v53 = vmul.f32 -1.442695, %v17290_v15  ;;  %v4826_v20 = vadd.f32 %v4825_v41, %v4737_v18 }
 0x4cc   :  { %v17300_v6 = vpop.eup %10723  ;;  %v5946_v60 = vadd.f32 1.0, %v10722_v16  ;;  %20167 = vst [vmem:[#allocation103_spill] sm:$0xff] %v17310_v40 }
 0x4cd   :  { %v7712_v12 = vsel %vm7711_vm3, %v10720_v22, %v7708_v27  ;;  %v7765_v50 = vmul.f32 %v17300_v6, %v17273_v21  ;;  %10725 = vpow2.f32 %v9515_v53  ;;  %v20168_v22 = vld [vmem:[#allocation52_spill] sm:$0xff]  ;;  %vm7770_vm5 = vweird.f32 %v17300_v6 }
 0x4ce   :  { %v7717_v11 = vsel %vm7714_vm4, %v7716_v19, %v7712_v12  ;;  %10727 = vrcp.f32 %v5946_v60  ;;  %v4914_v41 = vpop.f32.mrf.mxu2  ;;  %vm17328_vm7 = vmor %vm7769_vm6, %vm7770_vm5  ;;  %vm7829_vm9 = vweird.f32 %v5946_v60 }
 0x4cf   :  { %v5003_v49 = vpop.f32.mrf.mxu3  ;;  %v17307_v3 = vmul.f32 %v7717_v11, %v17217_v51  ;;  %v7766_v2 = vsub.f32 1.0, %v7765_v50  ;;  %v4915_v18 = vadd.f32 %v4914_v41, %v4826_v20  ;;  %v7775_v11 = vand.u32 2147483648, %v17273_v21 }
 0x4d0   :  { %v4739_v17 = vpop.f32.mrf.mxu0 }
 0x4d1   :  { %20166 = vst [vmem:[#allocation102_spill] sm:$0xff] %v17307_v3  ;;  %v4828_v16 = vpop.f32.mrf.mxu1  ;;  %v17312_v4 = vadd.f32 %v5003_v49, %v4915_v18  ;;  %v4740_v27 = vadd.f32 %v4739_v17, %v17263_v61  ;;  %4872 = vmatmul.bf16.gmra.mxu1 %v20168_v22  ;;  %v7767_v53 = vmul.f32 %v17300_v6, %v7766_v2  ;;  %v7773_v17 = vand.u32 2147483647, %v17273_v21  ;;  %v20171_v21 = vld [vmem:[#allocation55_spill] sm:$0xff] }
 0x4d3   :  { %v10726_v51 = vpop.eup %10725  ;;  %v9519_v19 = vmul.f32 -1.442695, %v17312_v4  ;;  %v4829_v20 = vadd.f32 %v4828_v16, %v4740_v27  ;;  %v7768_v50 = vadd.f32 %v17300_v6, %v7767_v53  ;;  %v7833_v16 = vand.u32 2147483647, %v5946_v60  ;;  %v9301_v53 = vld [vmem:[#allocation2 + $0x258] sm:$0xf0] }
 0x4d4   :  { %v10728_v12 = vpop.eup %10727  ;;  %v17320_v29 = vadd.f32 1.0, %v10726_v51  ;;  %v7835_v27 = vand.u32 2147483648, %v5946_v60  ;;  %vm7774_vm10 = vcmp.eq.f32.partialorder %v7773_v17, 8.507059e+37 }
 0x4d5   :  { %v7825_v42 = vmul.f32 %v10728_v12, %v5946_v60  ;;  %10729 = vpow2.f32 %v9519_v19  ;;  %vm7830_vm8 = vweird.f32 %v10728_v12  ;;  %vm7834_vm2 = vcmp.eq.f32.partialorder %v7833_v16, 8.507059e+37 }
 0x4d6   :  { %10731 = vrcp.f32 %v17320_v29  ;;  %v4917_v41 = vpop.f32.mrf.mxu2  ;;  %vm7831_vm0 = vmor %vm7829_vm9, %vm7830_vm8  ;;  %vm5984_vm12 = vweird.f32 %v17320_v29 }
 0x4d7   :  { %v5006_v49 = vpop.f32.mrf.mxu3  ;;  %v7826_v2 = vsub.f32 1.0, %v7825_v42  ;;  %v4918_v18 = vadd.f32 %v4917_v41, %v4829_v20  ;;  %v7772_v20 = vsel %vm17328_vm7, %v17300_v6, %v7768_v50  ;;  %v7776_v42 = vor.u32 1.1754944e-38, %v7775_v11  ;;  %v20173_v6 = vld [vmem:[#allocation58_spill] sm:$0xff] }
 0x4d8   :  { %v4741_v51 = vpop.f32.mrf.mxu0 }
 0x4d9   :  { %v4830_v19 = vpop.f32.mrf.mxu1  ;;  %v7827_v31 = vmul.f32 %v10728_v12, %v7826_v2  ;;  %v17332_v40 = vadd.f32 %v5006_v49, %v4918_v18  ;;  %v4742_v3 = vadd.f32 %v4741_v51, %v17263_v61  ;;  %4788 = vmatmul.bf16.gmra.mxu0 %v20171_v21  ;;  %v7836_v49 = vor.u32 1.1754944e-38, %v7835_v27 }
 0x4da   :  { %4966 = vmatmul.bf16.gmra.mxu2 %v20172_v0  ;;  %5055 = vmatmul.bf16.gmra.mxu3 %v20173_v6  ;;  %v7777_v50 = vsel %vm7774_vm10, %v7776_v42, %v7772_v20  ;;  %v9798_v42 = vld [vmem:[#allocation2 + $0x4c] sm:$0xf] }
 0x4db   :  { %v10730_v41 = vpop.eup %10729  ;;  %v7828_v22 = vadd.f32 %v10728_v12, %v7827_v31  ;;  %v9523_v45 = vmul.f32 -1.442695, %v17332_v40  ;;  %v4831_v25 = vadd.f32 %v4830_v19, %v4742_v3  ;;  %v9862_v19 = vld [vmem:[#allocation2 + $0x24c] sm:$0xf] }
 0x4dc   :  { %v17341_v2 = vpop.eup %10731  ;;  %v17343_v18 = vadd.f32 1.0, %v10730_v41  ;;  %v17353_v41 = vmul.f32 %v7777_v50, %v17237_v5  ;;  %v9304_v20 = vor.u32 %v9862_v19, %v9301_v53 }
 0x4dd   :  { %v7832_v11 = vsel %vm7831_vm0, %v10728_v12, %v7828_v22  ;;  %v5980_v60 = vmul.f32 %v17341_v2, %v17320_v29  ;;  %10733 = vpow2.f32 %v9523_v45  ;;  %v9045_v45 = vld [vmem:[#allocation2 + $0x58] sm:$0xf0]  ;;  %vm5985_vm11 = vweird.f32 %v17341_v2 }
 0x4de   :  { %v7837_v31 = vsel %vm7834_vm2, %v7836_v49, %v7832_v11  ;;  %10735 = vrcp.f32 %v17343_v18  ;;  %v4919_v3 = vpop.f32.mrf.mxu2  ;;  %20175 = vst [vmem:[#allocation104_spill] sm:$0xff] %v17353_v41  ;;  %5264 = vmatpush.bf16.msra.mxu2 %v9304_v20  ;;  %v5990_v20 = vand.u32 2147483648, %v17320_v29  ;;  %vm17372_vm13 = vmor %vm5984_vm12, %vm5985_vm11  ;;  %vm6044_vm1 = vweird.f32 %v17343_v18 }
 0x4df   :  { %v5008_v51 = vpop.f32.mrf.mxu3  ;;  %v17350_v17 = vmul.f32 %v7837_v31, %v17265_v26  ;;  %v5981_v16 = vsub.f32 1.0, %v5980_v60  ;;  %v4920_v27 = vadd.f32 %v4919_v3, %v4831_v25  ;;  %v9894_v26 = vld [vmem:[#allocation2 + $0x34c] sm:$0xf]  ;;  %v9429_v31 = vld [vmem:[#allocation2 + $0x358] sm:$0xf0]  ;;  %v9048_v25 = vor.u32 %v9798_v42, %v9045_v45 }
 0x4e0   :  { %v4744_v22 = vpop.f32.mrf.mxu0  ;;  %v20176_v60 = vld [vmem:[#allocation56_spill] sm:$0xff]  ;;  %v9432_v3 = vor.u32 %v9894_v26, %v9429_v31  ;;  %v9173_v31 = vld [vmem:[#allocation2 + $0x158] sm:$0xf0] }
 0x4e1   :  { %20174 = vst [vmem:[#allocation55_spill] sm:$0xff] %v17350_v17  ;;  %v4833_v12 = vpop.f32.mrf.mxu1  ;;  %v5982_v49 = vmul.f32 %v17341_v2, %v5981_v16  ;;  %v17356_v11 = vadd.f32 %v5008_v51, %v4920_v27  ;;  %v4745_v6 = vadd.f32 %v4744_v22, %v17263_v61  ;;  %4877 = vmatmul.bf16.gmra.mxu1 %v20176_v60  ;;  %v5988_v22 = vand.u32 2147483647, %v17320_v29  ;;  %v9830_v26 = vld [vmem:[#allocation2 + $0x14c] sm:$0xf]  ;;  %v20187_v60 = vld [vmem:[#allocation65_spill] sm:$0xff] }
 0x4e2   :  { %5086 = vmatpush.bf16.msra.mxu0 %v9048_v25  ;;  %5353 = vmatpush.bf16.msra.mxu3 %v9432_v3  ;;  %v6048_v3 = vand.u32 2147483647, %v17343_v18  ;;  %v6050_v29 = vand.u32 2147483648, %v17343_v18 }
 0x4e3   :  { %v10734_v50 = vpop.eup %10733  ;;  %v9527_v19 = vmul.f32 -1.442695, %v17356_v11  ;;  %v4834_v53 = vadd.f32 %v4833_v12, %v4745_v6  ;;  %v5983_v51 = vadd.f32 %v17341_v2, %v5982_v49  ;;  %vm5989_vm15 = vcmp.eq.f32.partialorder %v5988_v22, 8.507059e+37 }
 0x4e4   :  { %v10736_v0 = vpop.eup %10735  ;;  %v17365_v16 = vadd.f32 1.0, %v10734_v50  ;;  %v9176_v50 = vor.u32 %v9830_v26, %v9173_v31  ;;  %v20180_v31 = vld [vmem:[#allocation61_spill] sm:$0xff]  ;;  %vm6049_vm4 = vcmp.eq.f32.partialorder %v6048_v3, 8.507059e+37 }
 0x4e5   :  { %v6040_v27 = vmul.f32 %v10736_v0, %v17343_v18  ;;  %10737 = vpow2.f32 %v9527_v19  ;;  %v5987_v25 = vsel %vm17372_vm13, %v17341_v2, %v5983_v51  ;;  %vm6045_vm14 = vweird.f32 %v10736_v0 }
 0x4e6   :  { %10739 = vrcp.f32 %v17365_v16  ;;  %v4922_v6 = vpop.f32.mrf.mxu2  ;;  %5175 = vmatpush.bf16.msra.mxu1 %v9176_v50  ;;  %vm6046_vm3 = vmor %vm6044_vm1, %vm6045_vm14  ;;  %vm6104_vm6 = vweird.f32 %v17365_v16 }
 0x4e7   :  { %v5011_v12 = vpop.f32.mrf.mxu3  ;;  %v6041_v45 = vsub.f32 1.0, %v6040_v27  ;;  %v4923_v49 = vadd.f32 %v4922_v6, %v4834_v53  ;;  %v5991_v53 = vor.u32 1.1754944e-38, %v5990_v20  ;;  %v20179_v6 = vld [vmem:[#allocation59_spill] sm:$0xff]  ;;  %v20181_v20 = vld [vmem:[#allocation62_spill] sm:$0xff] }
 0x4e8   :  { %v4746_v19 = vpop.f32.mrf.mxu0 }
 0x4e9   :  { %v4835_v5 = vpop.f32.mrf.mxu1  ;;  %v6042_v41 = vmul.f32 %v10736_v0, %v6041_v45  ;;  %v17381_v17 = vadd.f32 %v5011_v12, %v4923_v49  ;;  %v4747_v27 = vadd.f32 %v4746_v19, %v17263_v61  ;;  %4793 = vmatmul.bf16.gmra.mxu0 %v20179_v6  ;;  %v5992_v12 = vsel %vm5989_vm15, %v5991_v53, %v5987_v25 }
 0x4ea   :  { %4971 = vmatmul.bf16.gmra.mxu2 %v20180_v31  ;;  %v6051_v49 = vor.u32 1.1754944e-38, %v6050_v29  ;;  %5060 = vmatmul.bf16.gmra.mxu3 %v20181_v20 }
 0x4eb   :  { %v10738_v42 = vpop.eup %10737  ;;  %v6043_v2 = vadd.f32 %v10736_v0, %v6042_v41  ;;  %v9531_v51 = vmul.f32 -1.442695, %v17381_v17  ;;  %v4836_v26 = vadd.f32 %v4835_v5, %v4747_v27  ;;  %v17395_v27 = vmul.f32 %v5992_v12, %v17290_v15 }
 0x4ec   :  { %v17388_v45 = vpop.eup %10739  ;;  %v5835_v22 = vadd.f32 1.0, %v10738_v42 }
 0x4ed   :  { %v6047_v50 = vsel %vm6046_vm3, %v10736_v0, %v6043_v2  ;;  %v6100_v41 = vmul.f32 %v17388_v45, %v17365_v16  ;;  %10741 = vpow2.f32 %v9531_v51  ;;  %20182 = vst [vmem:[#allocation105_spill] sm:$0xff] %v17395_v27  ;;  %v20184_v2 = vld [vmem:[#allocation60_spill] sm:$0xff]  ;;  %vm6105_vm5 = vweird.f32 %v17388_v45 }
 0x4ee   :  { %v6052_v18 = vsel %vm6049_vm4, %v6051_v49, %v6047_v50  ;;  %10743 = vrcp.f32 %v5835_v22  ;;  %v4924_v5 = vpop.f32.mrf.mxu2  ;;  %v6168_v0 = vand.u32 2147483647, %v5835_v22  ;;  %vm17416_vm7 = vmor %vm6104_vm6, %vm6105_vm5  ;;  %vm6164_vm9 = vweird.f32 %v5835_v22 }
 0x4ef   :  { %v5013_v19 = vpop.f32.mrf.mxu3  ;;  %v17398_v25 = vmul.f32 %v6052_v18, %v17312_v4  ;;  %v6101_v29 = vsub.f32 1.0, %v6100_v41  ;;  %v4925_v53 = vadd.f32 %v4924_v5, %v4836_v26  ;;  %v6110_v5 = vand.u32 2147483648, %v17365_v16 }
 0x4f0   :  { %v4749_v42 = vpop.f32.mrf.mxu0  ;;  %vm6169_vm2 = vcmp.eq.f32.partialorder %v6168_v0, 8.507059e+37 }
 0x4f1   :  { %20183 = vst [vmem:[#allocation106_spill] sm:$0xff] %v17398_v25  ;;  %v4838_v20 = vpop.f32.mrf.mxu1  ;;  %v17402_v3 = vadd.f32 %v5013_v19, %v4925_v53  ;;  %4882 = vmatmul.bf16.gmra.mxu1 %v20184_v2  ;;  %v6102_v51 = vmul.f32 %v17388_v45, %v6101_v29  ;;  %v4750_v49 = vadd.f32 %v4749_v42, %v17263_v61 }
 0x4f3   :  { %v10742_v15 = vpop.eup %10741  ;;  %v9535_v12 = vmul.f32 -1.442695, %v17402_v3  ;;  %v4839_v26 = vadd.f32 %v4838_v20, %v4750_v49  ;;  %v6103_v18 = vadd.f32 %v17388_v45, %v6102_v51  ;;  %v6170_v20 = vand.u32 2147483648, %v5835_v22  ;;  %v9285_v51 = vld [vmem:[#allocation2 + $0x238] sm:$0xf0] }
 0x4f4   :  { %v10744_v4 = vpop.eup %10743  ;;  %v17408_v50 = vadd.f32 1.0, %v10742_v15  ;;  %v6108_v15 = vand.u32 2147483647, %v17365_v16 }
 0x4f5   :  { %v6160_v41 = vmul.f32 %v10744_v4, %v5835_v22  ;;  %10745 = vpow2.f32 %v9535_v12  ;;  %vm6165_vm8 = vweird.f32 %v10744_v4 }
 0x4f6   :  { %10747 = vrcp.f32 %v17408_v50  ;;  %v4927_v19 = vpop.f32.mrf.mxu2  ;;  %vm6109_vm10 = vcmp.eq.f32.partialorder %v6108_v15, 8.507059e+37  ;;  %vm6166_vm0 = vmor %vm6164_vm9, %vm6165_vm8  ;;  %vm6224_vm12 = vweird.f32 %v17408_v50 }
 0x4f7   :  { %v5016_v29 = vpop.f32.mrf.mxu3  ;;  %v6161_v53 = vsub.f32 1.0, %v6160_v41  ;;  %v4928_v42 = vadd.f32 %v4927_v19, %v4839_v26  ;;  %v6107_v26 = vsel %vm17416_vm7, %v17388_v45, %v6103_v18  ;;  %v6111_v41 = vor.u32 1.1754944e-38, %v6110_v5  ;;  %v20188_v45 = vld [vmem:[#allocation66_spill] sm:$0xff] }
 0x4f8   :  { %v4751_v49 = vpop.f32.mrf.mxu0 }
 0x4f9   :  { %v4840_v12 = vpop.f32.mrf.mxu1  ;;  %v6162_v27 = vmul.f32 %v10744_v4, %v6161_v53  ;;  %v17420_v25 = vadd.f32 %v5016_v29, %v4928_v42  ;;  %v4752_v2 = vadd.f32 %v4751_v49, %v17263_v61  ;;  %4798 = vmatmul.bf16.gmra.mxu0 %v20092_v36  ;;  %v6171_v29 = vor.u32 1.1754944e-38, %v6170_v20 }
 0x4fa   :  { %4976 = vmatmul.bf16.gmra.mxu2 %v20187_v60  ;;  %5065 = vmatmul.bf16.gmra.mxu3 %v20188_v45  ;;  %v6112_v18 = vsel %vm6109_vm10, %v6111_v41, %v6107_v26  ;;  %v9890_v45 = vld [vmem:[#allocation2 + $0x32c] sm:$0xf]  ;;  %v9413_v60 = vld [vmem:[#allocation2 + $0x338] sm:$0xf0] }
 0x4fb   :  { %v10746_v16 = vpop.eup %10745  ;;  %v6163_v19 = vadd.f32 %v10744_v4, %v6162_v27  ;;  %v9539_v31 = vmul.f32 -1.442695, %v17420_v25  ;;  %v4841_v6 = vadd.f32 %v4840_v12, %v4752_v2  ;;  %v9858_v12 = vld [vmem:[#allocation2 + $0x22c] sm:$0xf] }
 0x4fc   :  { %v17429_v53 = vpop.eup %10747  ;;  %v17431_v42 = vadd.f32 1.0, %v10746_v16  ;;  %v17441_v16 = vmul.f32 %v6112_v18, %v17332_v40  ;;  %v9288_v41 = vor.u32 %v9858_v12, %v9285_v51 }
 0x4fd   :  { %v6167_v5 = vsel %vm6166_vm0, %v10744_v4, %v6163_v19  ;;  %v6220_v22 = vmul.f32 %v17429_v53, %v17408_v50  ;;  %10749 = vpow2.f32 %v9539_v31  ;;  %v9794_v19 = vld [vmem:[#allocation2 + $0x2c] sm:$0xf]  ;;  %v9029_v31 = vld [vmem:[#allocation2 + $0x38] sm:$0xf0]  ;;  %vm6225_vm11 = vweird.f32 %v17429_v53 }
 0x4fe   :  { %v6172_v27 = vsel %vm6169_vm2, %v6171_v29, %v6167_v5  ;;  %10751 = vrcp.f32 %v17431_v42  ;;  %v4929_v2 = vpop.f32.mrf.mxu2  ;;  %20190 = vst [vmem:[#allocation108_spill] sm:$0xff] %v17441_v16  ;;  %5265 = vmatpush.bf16.msra.mxu2 %v9288_v41  ;;  %v9826_v41 = vld [vmem:[#allocation2 + $0x12c] sm:$0xf]  ;;  %vm17464_vm13 = vmor %vm6224_vm12, %vm6225_vm11  ;;  %vm6284_vm15 = vweird.f32 %v17431_v42 }
 0x4ff   :  { %v5018_v49 = vpop.f32.mrf.mxu3  ;;  %v17438_v15 = vmul.f32 %v6172_v27, %v17356_v11  ;;  %v6221_v0 = vsub.f32 1.0, %v6220_v22  ;;  %v4930_v20 = vadd.f32 %v4929_v2, %v4841_v6  ;;  %v9032_v6 = vor.u32 %v9794_v19, %v9029_v31  ;;  %v9157_v19 = vld [vmem:[#allocation2 + $0x138] sm:$0xf0] }
 0x500   :  { %v4754_v4 = vpop.f32.mrf.mxu0  ;;  %v9416_v22 = vor.u32 %v9890_v45, %v9413_v60  ;;  %v6230_v60 = vand.u32 2147483648, %v17408_v50  ;;  %v6228_v31 = vand.u32 2147483647, %v17408_v50 }
 0x501   :  { %20189 = vst [vmem:[#allocation107_spill] sm:$0xff] %v17438_v15  ;;  %v4843_v26 = vpop.f32.mrf.mxu1  ;;  %v17443_v29 = vadd.f32 %v5018_v49, %v4930_v20  ;;  %v4755_v5 = vadd.f32 %v4754_v4, %v17263_v61  ;;  %4887 = vmatmul.bf16.gmra.mxu1 %v20097_v33  ;;  %v6222_v11 = vmul.f32 %v17429_v53, %v6221_v0  ;;  %v9886_v15 = vld [vmem:[#allocation2 + $0x30c] sm:$0xf] }
 0x502   :  { %5087 = vmatpush.bf16.msra.mxu0 %v9032_v6  ;;  %5354 = vmatpush.bf16.msra.mxu3 %v9416_v22  ;;  %v9160_v6 = vor.u32 %v9826_v41, %v9157_v19  ;;  %vm6229_vm1 = vcmp.eq.f32.partialorder %v6228_v31, 8.507059e+37 }
 0x503   :  { %v10750_v18 = vpop.eup %10749  ;;  %v9543_v27 = vmul.f32 -1.442695, %v17443_v29  ;;  %v4844_v2 = vadd.f32 %v4843_v26, %v4755_v5  ;;  %v6223_v0 = vadd.f32 %v17429_v53, %v6222_v11  ;;  %v6288_v5 = vand.u32 2147483647, %v17431_v42 }
 0x504   :  { %v10752_v49 = vpop.eup %10751  ;;  %v17451_v20 = vadd.f32 1.0, %v10750_v18  ;;  %v6290_v11 = vand.u32 2147483648, %v17431_v42  ;;  %5176 = vmatpush.bf16.msra.mxu1 %v9160_v6 }
 0x505   :  { %v6280_v12 = vmul.f32 %v10752_v49, %v17431_v42  ;;  %10753 = vpow2.f32 %v9543_v27  ;;  %vm6285_vm14 = vweird.f32 %v10752_v49  ;;  %v6227_v50 = vsel %vm17464_vm13, %v17429_v53, %v6223_v0 }
 0x506   :  { %10755 = vrcp.f32 %v17451_v20  ;;  %v4932_v45 = vpop.f32.mrf.mxu2  ;;  %vm6286_vm3 = vmor %vm6284_vm15, %vm6285_vm14  ;;  %vm6289_vm4 = vcmp.eq.f32.partialorder %v6288_v5, 8.507059e+37  ;;  %v6291_v53 = vor.u32 1.1754944e-38, %v6290_v11  ;;  %vm6344_vm6 = vweird.f32 %v17451_v20 }
 0x507   :  { %v5021_v51 = vpop.f32.mrf.mxu3  ;;  %v6281_v4 = vsub.f32 1.0, %v6280_v12  ;;  %v4933_v26 = vadd.f32 %v4932_v45, %v4844_v2  ;;  %v6231_v45 = vor.u32 1.1754944e-38, %v6230_v60 }
 0x508   :  { %v4756_v22 = vpop.f32.mrf.mxu0 }
 0x509   :  { %v4845_v18 = vpop.f32.mrf.mxu1  ;;  %v6282_v40 = vmul.f32 %v10752_v49, %v6281_v4  ;;  %v17468_v2 = vadd.f32 %v5021_v51, %v4933_v26  ;;  %v4757_v12 = vadd.f32 %v4756_v22, %v17263_v61  ;;  %4803 = vmatmul.bf16.gmra.mxu0 %v15333_v46  ;;  %v6232_v60 = vsel %vm6229_vm1, %v6231_v45, %v6227_v50 }
 0x50a   :  { %4981 = vmatmul.bf16.gmra.mxu2 %v15583_v43  ;;  %5070 = vmatmul.bf16.gmra.mxu3 %v15591_v30  ;;  %v17488_v5 = vmul.f32 %v6232_v60, %v17381_v17 }
 0x50b   :  { %v10754_v41 = vpop.eup %10753  ;;  %v6283_v19 = vadd.f32 %v10752_v49, %v6282_v40  ;;  %v9547_v16 = vmul.f32 -1.442695, %v17468_v2  ;;  %v4846_v4 = vadd.f32 %v4845_v18, %v4757_v12 }
 0x50c   :  { %v17478_v51 = vpop.eup %10755  ;;  %v5851_v0 = vadd.f32 1.0, %v10754_v41  ;;  %20194 = vst [vmem:[#allocation110_spill] sm:$0xff] %v17488_v5 }
 0x50d   :  { %v6287_v26 = vsel %vm6286_vm3, %v10752_v49, %v6283_v19  ;;  %v6340_v42 = vmul.f32 %v17478_v51, %v17451_v20  ;;  %10757 = vpow2.f32 %v9547_v16  ;;  %vm6345_vm5 = vweird.f32 %v17478_v51 }
 0x50e   :  { %v6292_v40 = vsel %vm6289_vm4, %v6291_v53, %v6287_v26  ;;  %10759 = vrcp.f32 %v5851_v0  ;;  %v4934_v6 = vpop.f32.mrf.mxu2  ;;  %v6350_v26 = vand.u32 2147483648, %v17451_v20  ;;  %vm17506_vm7 = vmor %vm6344_vm6, %vm6345_vm5  ;;  %vm6404_vm9 = vweird.f32 %v5851_v0 }
 0x50f   :  { %v5023_v22 = vpop.f32.mrf.mxu3  ;;  %v17485_v18 = vmul.f32 %v6292_v40, %v17402_v3  ;;  %v6341_v31 = vsub.f32 1.0, %v6340_v42  ;;  %v4935_v27 = vadd.f32 %v4934_v6, %v4846_v4 }
 0x510   :  { %v4759_v11 = vpop.f32.mrf.mxu0 }
 0x511   :  { %20193 = vst [vmem:[#allocation109_spill] sm:$0xff] %v17485_v18  ;;  %v4848_v12 = vpop.f32.mrf.mxu1  ;;  %v17490_v50 = vadd.f32 %v5023_v22, %v4935_v27  ;;  %v4760_v49 = vadd.f32 %v4759_v11, %v17263_v61  ;;  %4892 = vmatmul.bf16.gmra.mxu1 %v15555_v23  ;;  %v6342_v16 = vmul.f32 %v17478_v51, %v6341_v31  ;;  %v6348_v31 = vand.u32 2147483647, %v17451_v20 }
 0x512   :  { %v6408_v27 = vand.u32 2147483647, %v5851_v0  ;;  %v6410_v11 = vand.u32 2147483648, %v5851_v0 }
 0x513   :  { %v10758_v3 = vpop.eup %10757  ;;  %v9551_v41 = vmul.f32 -1.442695, %v17490_v50  ;;  %v4849_v19 = vadd.f32 %v4848_v12, %v4760_v49  ;;  %v6343_v60 = vadd.f32 %v17478_v51, %v6342_v16  ;;  %vm6349_vm10 = vcmp.eq.f32.partialorder %v6348_v31, 8.507059e+37  ;;  %v9854_v16 = vld [vmem:[#allocation2 + $0x20c] sm:$0xf] }
 0x514   :  { %v10760_v4 = vpop.eup %10759  ;;  %v17498_v17 = vadd.f32 1.0, %v10758_v3  ;;  %vm6409_vm2 = vcmp.eq.f32.partialorder %v6408_v27, 8.507059e+37 }
 0x515   :  { %v6400_v53 = vmul.f32 %v10760_v4, %v5851_v0  ;;  %10761 = vpow2.f32 %v9551_v41  ;;  %vm6405_vm8 = vweird.f32 %v10760_v4 }
 0x516   :  { %10763 = vrcp.f32 %v17498_v17  ;;  %v4937_v42 = vpop.f32.mrf.mxu2  ;;  %vm6406_vm0 = vmor %vm6404_vm9, %vm6405_vm8  ;;  %vm6464_vm12 = vweird.f32 %v17498_v17 }
 0x517   :  { %v5026_v40 = vpop.f32.mrf.mxu3  ;;  %v6401_v6 = vsub.f32 1.0, %v6400_v53  ;;  %v4938_v22 = vadd.f32 %v4937_v42, %v4849_v19  ;;  %v6347_v19 = vsel %vm17506_vm7, %v17478_v51, %v6343_v60  ;;  %v6351_v53 = vor.u32 1.1754944e-38, %v6350_v26  ;;  %v20197_v51 = vld [vmem:[#allocation67_spill] sm:$0xff] }
 0x518   :  { %v4761_v12 = vpop.f32.mrf.mxu0 }
 0x519   :  { %v4850_v49 = vpop.f32.mrf.mxu1  ;;  %v6402_v3 = vmul.f32 %v10760_v4, %v6401_v6  ;;  %v17510_v41 = vadd.f32 %v5026_v40, %v4938_v22  ;;  %v4762_v45 = vadd.f32 %v4761_v12, %v17263_v61  ;;  %4808 = vmatmul.bf16.gmra.mxu0 %v15801_v62  ;;  %v6411_v40 = vor.u32 1.1754944e-38, %v6410_v11 }
 0x51a   :  { %4986 = vmatmul.bf16.gmra.mxu2 %v15848_v32  ;;  %5075 = vmatmul.bf16.gmra.mxu3 %v20197_v51  ;;  %v6352_v60 = vsel %vm6349_vm10, %v6351_v53, %v6347_v19  ;;  %v9397_v51 = vld [vmem:[#allocation2 + $0x318] sm:$0xf0] }
 0x51b   :  { %v10762_v20 = vpop.eup %10761  ;;  %v6403_v42 = vadd.f32 %v10760_v4, %v6402_v3  ;;  %v9555_v5 = vmul.f32 -1.442695, %v17510_v41  ;;  %v4851_v18 = vadd.f32 %v4850_v49, %v4762_v45  ;;  %v9269_v3 = vld [vmem:[#allocation2 + $0x218] sm:$0xf0] }
 0x51c   :  { %v17519_v6 = vpop.eup %10763  ;;  %v17521_v22 = vadd.f32 1.0, %v10762_v20  ;;  %v17531_v20 = vmul.f32 %v6352_v60, %v17420_v25  ;;  %v9272_v53 = vor.u32 %v9854_v16, %v9269_v3 }
 0x51d   :  { %v6407_v26 = vsel %vm6406_vm0, %v10760_v4, %v6403_v42  ;;  %v6460_v0 = vmul.f32 %v17519_v6, %v17498_v17  ;;  %10765 = vpow2.f32 %v9555_v5  ;;  %v9790_v42 = vld [vmem:[#allocation2 + $0xc] sm:$0xf]  ;;  %v9013_v5 = vld [vmem:[#allocation2 + $0x18] sm:$0xf0]  ;;  %vm6465_vm11 = vweird.f32 %v17519_v6 }
 0x51e   :  { %v6412_v12 = vsel %vm6409_vm2, %v6411_v40, %v6407_v26  ;;  %10767 = vrcp.f32 %v17521_v22  ;;  %v4939_v45 = vpop.f32.mrf.mxu2  ;;  %20198 = vst [vmem:[#allocation111_spill] sm:$0xff] %v17531_v20  ;;  %5266 = vmatpush.bf16.msra.mxu2 %v9272_v53  ;;  %v9822_v53 = vld [vmem:[#allocation2 + $0x10c] sm:$0xf]  ;;  %vm17554_vm13 = vmor %vm6464_vm12, %vm6465_vm11  ;;  %vm6524_vm15 = vweird.f32 %v17521_v22 }
 0x51f   :  { %v5028_v49 = vpop.f32.mrf.mxu3  ;;  %v17528_v31 = vmul.f32 %v6412_v12, %v17443_v29  ;;  %v6461_v27 = vsub.f32 1.0, %v6460_v0  ;;  %v4940_v11 = vadd.f32 %v4939_v45, %v4851_v18  ;;  %v9016_v18 = vor.u32 %v9790_v42, %v9013_v5  ;;  %v9141_v42 = vld [vmem:[#allocation2 + $0x118] sm:$0xf0] }
 0x520   :  { %v4764_v4 = vpop.f32.mrf.mxu0  ;;  %v9400_v0 = vor.u32 %v9886_v15, %v9397_v51  ;;  %v6470_v15 = vand.u32 2147483648, %v17498_v17  ;;  %v6468_v5 = vand.u32 2147483647, %v17498_v17 }
 0x521   :  { %v4853_v19 = vpop.f32.mrf.mxu1  ;;  %v17533_v40 = vadd.f32 %v5028_v49, %v4940_v11  ;;  %v4765_v26 = vadd.f32 %v4764_v4, %v17263_v61  ;;  %4897 = vmatmul.bf16.gmra.mxu1 %v15806_v63  ;;  %v6462_v29 = vmul.f32 %v17519_v6, %v6461_v27  ;;  %5088 = vmatpush.bf16.msra.mxu0 %v9016_v18 }
 0x522   :  { %5355 = vmatpush.bf16.msra.mxu3 %v9400_v0  ;;  %v9144_v18 = vor.u32 %v9822_v53, %v9141_v42  ;;  %vm6469_vm1 = vcmp.eq.f32.partialorder %v6468_v5, 8.507059e+37 }
 0x523   :  { %v10766_v60 = vpop.eup %10765  ;;  %v9559_v12 = vmul.f32 -1.442695, %v17533_v40  ;;  %v4854_v45 = vadd.f32 %v4853_v19, %v4765_v26  ;;  %v6463_v27 = vadd.f32 %v17519_v6, %v6462_v29  ;;  %v6528_v26 = vand.u32 2147483647, %v17521_v22 }
 0x524   :  { %v10768_v49 = vpop.eup %10767  ;;  %v17541_v11 = vadd.f32 1.0, %v10766_v60  ;;  %v6530_v29 = vand.u32 2147483648, %v17521_v22  ;;  %5177 = vmatpush.bf16.msra.mxu1 %v9144_v18 }
 0x525   :  { %v6520_v16 = vmul.f32 %v10768_v49, %v17521_v22  ;;  %10769 = vpow2.f32 %v9559_v12  ;;  %vm6525_vm14 = vweird.f32 %v10768_v49  ;;  %v6467_v17 = vsel %vm17554_vm13, %v17519_v6, %v6463_v27 }
 0x526   :  { %10771 = vrcp.f32 %v17541_v11  ;;  %v4942_v51 = vpop.f32.mrf.mxu2  ;;  %vm6526_vm3 = vmor %vm6524_vm15, %vm6525_vm14  ;;  %vm6529_vm4 = vcmp.eq.f32.partialorder %v6528_v26, 8.507059e+37  ;;  %v6531_v6 = vor.u32 1.1754944e-38, %v6530_v29  ;;  %vm6584_vm6 = vweird.f32 %v17541_v11 }
 0x527   :  { %v5031_v3 = vpop.f32.mrf.mxu3  ;;  %v6521_v4 = vsub.f32 1.0, %v6520_v16  ;;  %v4943_v19 = vadd.f32 %v4942_v51, %v4854_v45  ;;  %v6471_v51 = vor.u32 1.1754944e-38, %v6470_v15 }
 0x528   :  { %v4766_v0 = vpop.f32.mrf.mxu0 }
 0x529   :  { %v4855_v60 = vpop.f32.mrf.mxu1  ;;  %v6522_v25 = vmul.f32 %v10768_v49, %v6521_v4  ;;  %v17558_v45 = vadd.f32 %v5031_v3, %v4943_v19  ;;  %v4767_v16 = vadd.f32 %v4766_v0, %v17263_v61  ;;  %5089 = vmatmul.bf16.vlgmr.msra.gmra.mxu0 %v19983_v10  ;;  %v6472_v10 = vsel %vm6469_vm1, %v6471_v51, %v6467_v17 }
 0x52a   :  { %5267 = vmatmul.bf16.vlgmr.msra.gmra.mxu2 %v19984_v1  ;;  %5356 = vmatmul.bf16.vlgmr.msra.gmra.mxu3 %v19986_v59  ;;  %v17578_v26 = vmul.f32 %v6472_v10, %v17468_v2 }
 0x52b   :  { %v10770_v53 = vpop.eup %10769  ;;  %v6523_v42 = vadd.f32 %v10768_v49, %v6522_v25  ;;  %v9563_v20 = vmul.f32 -1.442695, %v17558_v45  ;;  %v4856_v4 = vadd.f32 %v4855_v60, %v4767_v16 }
 0x52c   :  { %v17568_v3 = vpop.eup %10771  ;;  %v5867_v27 = vadd.f32 1.0, %v10770_v53 }
 0x52d   :  { %v6527_v15 = vsel %vm6526_vm3, %v10768_v49, %v6523_v42  ;;  %v6580_v22 = vmul.f32 %v17568_v3, %v17541_v11  ;;  %10773 = vpow2.f32 %v9563_v20  ;;  %vm6585_vm5 = vweird.f32 %v17568_v3 }
 0x52e   :  { %v6532_v25 = vsel %vm6529_vm4, %v6531_v6, %v6527_v15  ;;  %10775 = vrcp.f32 %v5867_v27  ;;  %v4944_v19 = vpop.f32.mrf.mxu2  ;;  %vm17596_vm7 = vmor %vm6584_vm6, %vm6585_vm5  ;;  %vm6644_vm9 = vweird.f32 %v5867_v27 }
 0x52f   :  { %v5033_v1 = vpop.f32.mrf.mxu3  ;;  %v17575_v18 = vmul.f32 %v6532_v25, %v17490_v50  ;;  %v6581_v5 = vsub.f32 1.0, %v6580_v22  ;;  %v4945_v0 = vadd.f32 %v4944_v19, %v4856_v4  ;;  %v6588_v22 = vand.u32 2147483647, %v17541_v11 }
 0x530   :  { %v4769_v29 = vpop.f32.mrf.mxu0  ;;  %v6648_v25 = vand.u32 2147483647, %v5867_v27  ;;  %v6650_v19 = vand.u32 2147483648, %v5867_v27 }
 0x531   :  { %v4858_v59 = vpop.f32.mrf.mxu1  ;;  %v17580_v60 = vadd.f32 %v5033_v1, %v4945_v0  ;;  %v4770_v49 = vadd.f32 %v4769_v29, %v17263_v61  ;;  %5178 = vmatmul.bf16.vlgmr.msra.gmra.mxu1 %v19989_v13  ;;  %v6582_v20 = vmul.f32 %v17568_v3, %v6581_v5  ;;  %v6590_v13 = vand.u32 2147483648, %v17541_v11 }
 0x532   :  { %vm6589_vm10 = vcmp.eq.f32.partialorder %v6588_v22, 8.507059e+37  ;;  %vm6649_vm2 = vcmp.eq.f32.partialorder %v6648_v25, 8.507059e+37 }
 0x533   :  { %v10774_v50 = vpop.eup %10773  ;;  %v9567_v16 = vmul.f32 -1.442695, %v17580_v60  ;;  %v4859_v17 = vadd.f32 %v4858_v59, %v4770_v49  ;;  %v6583_v42 = vadd.f32 %v17568_v3, %v6582_v20 }
 0x534   :  { %v10776_v51 = vpop.eup %10775  ;;  %v17588_v2 = vadd.f32 1.0, %v10774_v50  ;;  %v6591_v50 = vor.u32 1.1754944e-38, %v6590_v13 }
 0x535   :  { %v6640_v53 = vmul.f32 %v10776_v51, %v5867_v27  ;;  %10777 = vpow2.f32 %v9567_v16  ;;  %vm6645_vm8 = vweird.f32 %v10776_v51  ;;  %v6587_v20 = vsel %vm17596_vm7, %v17568_v3, %v6583_v42 }
 0x536   :  { %10779 = vrcp.f32 %v17588_v2  ;;  %v4947_v4 = vpop.f32.mrf.mxu2  ;;  %vm6646_vm0 = vmor %vm6644_vm9, %vm6645_vm8  ;;  %v6592_v3 = vsel %vm6589_vm10, %v6591_v50, %v6587_v20  ;;  %vm6704_vm12 = vweird.f32 %v17588_v2 }
 0x537   :  { %v5036_v6 = vpop.f32.mrf.mxu3  ;;  %v6641_v10 = vsub.f32 1.0, %v6640_v53  ;;  %v4948_v15 = vadd.f32 %v4947_v4, %v4859_v17 }
 0x538   :  { %v4771_v1 = vpop.f32.mrf.mxu0 }
 0x539   :  { %v4860_v5 = vpop.f32.mrf.mxu1  ;;  %v6642_v29 = vmul.f32 %v10776_v51, %v6641_v10  ;;  %v17600_v59 = vadd.f32 %v5036_v6, %v4948_v15  ;;  %v4772_v49 = vadd.f32 %v4771_v1, %v17263_v61  ;;  %5094 = vmatmul.bf16.gmra.mxu0 %v19992_v28  ;;  %v6651_v6 = vor.u32 1.1754944e-38, %v6650_v19  ;;  %v9940_v19 = vld [vmem:[#allocation5 + $0xb8] sm:$0xff] }
 0x53a   :  { %5272 = vmatmul.bf16.gmra.mxu2 %v19993_v34  ;;  %5361 = vmatmul.bf16.gmra.mxu3 %v19994_v24  ;;  %v9924_v1 = vld [vmem:[#allocation5 + $0x38] sm:$0xff]  ;;  %v17621_v24 = vmul.f32 %v6592_v3, %v17510_v41  ;;  %v6710_v3 = vand.u32 2147483648, %v17588_v2 }
 0x53b   :  { %v10778_v11 = vpop.eup %10777  ;;  %v6643_v16 = vadd.f32 %v10776_v51, %v6642_v29  ;;  %v9571_v17 = vmul.f32 -1.442695, %v17600_v59  ;;  %v4861_v53 = vadd.f32 %v4860_v5, %v4772_v49  ;;  %v9948_v5 = vld [vmem:[#allocation5 + $0xf8] sm:$0xff]  ;;  %8499 = vmatpush.bf16.msrb.mxu2 %v9940_v19  ;;  %8321 = vmatpush.bf16.msrb.mxu0 %v9924_v1 }
 0x53c   :  { %v17609_v4 = vpop.eup %10779  ;;  %v17611_v10 = vadd.f32 1.0, %v10778_v11  ;;  %8588 = vmatpush.bf16.msrb.mxu3 %v9948_v5 }
 0x53d   :  { %v6647_v28 = vsel %vm6646_vm0, %v10776_v51, %v6643_v16  ;;  %v6700_v27 = vmul.f32 %v17609_v4, %v17588_v2  ;;  %10781 = vpow2.f32 %v9571_v17  ;;  %vm6705_vm11 = vweird.f32 %v17609_v4 }
 0x53e   :  { %v6652_v42 = vsel %vm6649_vm2, %v6651_v6, %v6647_v28  ;;  %10783 = vrcp.f32 %v17611_v10  ;;  %v4949_v34 = vpop.f32.mrf.mxu2  ;;  %vm17642_vm13 = vmor %vm6704_vm12, %vm6705_vm11  ;;  %vm6764_vm15 = vweird.f32 %v17611_v10 }
 0x53f   :  { %v5038_v13 = vpop.f32.mrf.mxu3  ;;  %v17618_v15 = vmul.f32 %v6652_v42, %v17533_v40  ;;  %v6701_v22 = vsub.f32 1.0, %v6700_v27  ;;  %v4950_v25 = vadd.f32 %v4949_v34, %v4861_v53  ;;  %v9932_v34 = vld [vmem:[#allocation5 + $0x78] sm:$0xff] }
 0x540   :  { %v4774_v51 = vpop.f32.mrf.mxu0  ;;  %8410 = vmatpush.bf16.msrb.mxu1 %v9932_v34  ;;  %v20252_v40 = vld [vmem:[#allocation58_spill] sm:$0xff] }
 0x541   :  { %v4863_v0 = vpop.f32.mrf.mxu1  ;;  %v17623_v29 = vadd.f32 %v5038_v13, %v4950_v25  ;;  %v4775_v49 = vadd.f32 %v4774_v51, %v17263_v61  ;;  %v6702_v20 = vmul.f32 %v17609_v4, %v6701_v22  ;;  %5183 = vmatmul.bf16.gmra.mxu1 %v20001_v7  ;;  %v6708_v13 = vand.u32 2147483647, %v17588_v2 }
 0x542   :  { %v6768_v22 = vand.u32 2147483647, %v17611_v10  ;;  %v6770_v25 = vand.u32 2147483648, %v17611_v10 }
 0x543   :  { %v10782_v50 = vpop.eup %10781  ;;  %v9575_v41 = vmul.f32 -1.442695, %v17623_v29  ;;  %v4864_v11 = vadd.f32 %v4863_v0, %v4775_v49  ;;  %v6703_v6 = vadd.f32 %v17609_v4, %v6702_v20  ;;  %v6711_v20 = vor.u32 1.1754944e-38, %v6710_v3 }
 0x544   :  { %v10784_v16 = vpop.eup %10783  ;;  %v17631_v17 = vadd.f32 1.0, %v10782_v50  ;;  %vm6709_vm1 = vcmp.eq.f32.partialorder %v6708_v13, 8.507059e+37  ;;  %vm6769_vm4 = vcmp.eq.f32.partialorder %v6768_v22, 8.507059e+37 }
 0x545   :  { %v6760_v53 = vmul.f32 %v10784_v16, %v17611_v10  ;;  %10785 = vpow2.f32 %v9575_v41  ;;  %vm6765_vm14 = vweird.f32 %v10784_v16  ;;  %v6707_v2 = vsel %vm17642_vm13, %v17609_v4, %v6703_v6 }
 0x546   :  { %10787 = vrcp.f32 %v17631_v17  ;;  %v4952_v7 = vpop.f32.mrf.mxu2  ;;  %vm6766_vm3 = vmor %vm6764_vm15, %vm6765_vm14  ;;  %vm6824_vm6 = vweird.f32 %v17631_v17 }
 0x547   :  { %v5041_v28 = vpop.f32.mrf.mxu3  ;;  %v6761_v27 = vsub.f32 1.0, %v6760_v53  ;;  %v4953_v42 = vadd.f32 %v4952_v7, %v4864_v11 }
 0x548   :  { %v4776_v19 = vpop.f32.mrf.mxu0 }
 0x549   :  { %v4865_v1 = vpop.f32.mrf.mxu1  ;;  %v6762_v51 = vmul.f32 %v10784_v16, %v6761_v27  ;;  %v17646_v0 = vadd.f32 %v5041_v28, %v4953_v42  ;;  %v4777_v49 = vadd.f32 %v4776_v19, %v17263_v61  ;;  %5099 = vmatmul.bf16.gmra.mxu0 %v20006_v48  ;;  %v6771_v28 = vor.u32 1.1754944e-38, %v6770_v25 }
 0x54a   :  { %5277 = vmatmul.bf16.gmra.mxu2 %v20007_v44  ;;  %5366 = vmatmul.bf16.gmra.mxu3 %v20008_v47  ;;  %v6712_v48 = vsel %vm6709_vm1, %v6711_v20, %v6707_v2 }
 0x54b   :  { %v10786_v50 = vpop.eup %10785  ;;  %v6763_v41 = vadd.f32 %v10784_v16, %v6762_v51  ;;  %v9579_v11 = vmul.f32 -1.442695, %v17646_v0  ;;  %v4866_v53 = vadd.f32 %v4865_v1, %v4777_v49  ;;  %v17666_v22 = vmul.f32 %v6712_v48, %v17558_v45 }
 0x54c   :  { %v17656_v7 = vpop.eup %10787  ;;  %v5883_v4 = vadd.f32 1.0, %v10786_v50  ;;  %v6828_v48 = vand.u32 2147483647, %v17631_v17 }
 0x54d   :  { %v6767_v6 = vsel %vm6766_vm3, %v10784_v16, %v6763_v41  ;;  %v6820_v10 = vmul.f32 %v17656_v7, %v17631_v17  ;;  %10789 = vpow2.f32 %v9579_v11  ;;  %vm6825_vm5 = vweird.f32 %v17656_v7 }
 0x54e   :  { %v6772_v3 = vsel %vm6769_vm4, %v6771_v28, %v6767_v6  ;;  %10791 = vrcp.f32 %v5883_v4  ;;  %v4954_v27 = vpop.f32.mrf.mxu2  ;;  %v6830_v41 = vand.u32 2147483648, %v17631_v17  ;;  %v6888_v6 = vand.u32 2147483647, %v5883_v4  ;;  %vm17684_vm7 = vmor %vm6824_vm6, %vm6825_vm5 }
 0x54f   :  { %v5043_v44 = vpop.f32.mrf.mxu3  ;;  %v17663_v42 = vmul.f32 %v6772_v3, %v17580_v60  ;;  %v6821_v34 = vsub.f32 1.0, %v6820_v10  ;;  %v4955_v13 = vadd.f32 %v4954_v27, %v4866_v53  ;;  %v6890_v10 = vand.u32 2147483648, %v5883_v4 }
 0x550   :  { %v4779_v25 = vpop.f32.mrf.mxu0  ;;  %vm6884_vm9 = vweird.f32 %v5883_v4  ;;  %vm6829_vm10 = vcmp.eq.f32.partialorder %v6828_v48, 8.507059e+37  ;;  %vm6889_vm2 = vcmp.eq.f32.partialorder %v6888_v6, 8.507059e+37  ;;  %v9939_v48 = vld [vmem:[#allocation5 + $0xb0] sm:$0xff] }
 0x551   :  { %v4868_v47 = vpop.f32.mrf.mxu1  ;;  %v17668_v19 = vadd.f32 %v5043_v44, %v4955_v13  ;;  %v4780_v16 = vadd.f32 %v4779_v25, %v17263_v61  ;;  %v6822_v1 = vmul.f32 %v17656_v7, %v6821_v34  ;;  %5188 = vmatmul.bf16.gmra.mxu1 %v20011_v9  ;;  %v9923_v6 = vld [vmem:[#allocation5 + $0x30] sm:$0xff]  ;;  %8500 = vmatpush.bf16.msrb.mxu2 %v9939_v48 }
 0x552   :  { %8322 = vmatpush.bf16.msrb.mxu0 %v9923_v6 }
 0x553   :  { %v10790_v60 = vpop.eup %10789  ;;  %v9583_v51 = vmul.f32 -1.442695, %v17668_v19  ;;  %v4869_v49 = vadd.f32 %v4868_v47, %v4780_v16  ;;  %v6823_v50 = vadd.f32 %v17656_v7, %v6822_v1  ;;  %v6831_v16 = vor.u32 1.1754944e-38, %v6830_v41 }
 0x554   :  { %v10792_v2 = vpop.eup %10791  ;;  %v17676_v45 = vadd.f32 1.0, %v10790_v60 }
 0x555   :  { %v6880_v20 = vmul.f32 %v10792_v2, %v5883_v4  ;;  %10793 = vpow2.f32 %v9583_v51  ;;  %vm6885_vm8 = vweird.f32 %v10792_v2  ;;  %v6827_v47 = vsel %vm17684_vm7, %v17656_v7, %v6823_v50 }
 0x556   :  { %10795 = vrcp.f32 %v17676_v45  ;;  %v4957_v9 = vpop.f32.mrf.mxu2  ;;  %vm6886_vm0 = vmor %vm6884_vm9, %vm6885_vm8  ;;  %v6832_v7 = vsel %vm6829_vm10, %v6831_v16, %v6827_v47  ;;  %vm6944_vm12 = vweird.f32 %v17676_v45 }
 0x557   :  { %v5046_v11 = vpop.f32.mrf.mxu3  ;;  %v6881_v53 = vsub.f32 1.0, %v6880_v20  ;;  %v4958_v28 = vadd.f32 %v4957_v9, %v4869_v49  ;;  %v6891_v20 = vor.u32 1.1754944e-38, %v6890_v10  ;;  %v9947_v10 = vld [vmem:[#allocation5 + $0xf0] sm:$0xff] }
 0x558   :  { %v4781_v3 = vpop.f32.mrf.mxu0  ;;  %8589 = vmatpush.bf16.msrb.mxu3 %v9947_v10 }
 0x559   :  { %v4870_v27 = vpop.f32.mrf.mxu1  ;;  %v6882_v34 = vmul.f32 %v10792_v2, %v6881_v53  ;;  %v17688_v13 = vadd.f32 %v5046_v11, %v4958_v28  ;;  %v4782_v25 = vadd.f32 %v4781_v3, %v17263_v61  ;;  %5104 = vmatmul.bf16.gmra.mxu0 %v20014_v39 }
 0x55a   :  { %5282 = vmatmul.bf16.gmra.mxu2 %v20015_v52  ;;  %5371 = vmatmul.bf16.gmra.mxu3 %v20016_v56  ;;  %v17709_v56 = vmul.f32 %v6832_v7, %v17600_v59 }
 0x55b   :  { %v10794_v17 = vpop.eup %10793  ;;  %v6883_v1 = vadd.f32 %v10792_v2, %v6882_v34  ;;  %v9587_v60 = vmul.f32 -1.442695, %v17688_v13  ;;  %v4871_v51 = vadd.f32 %v4870_v27, %v4782_v25 }
 0x55c   :  { %v17697_v49 = vpop.eup %10795  ;;  %v17699_v9 = vadd.f32 1.0, %v10794_v17 }
 0x55d   :  { %v6887_v39 = vsel %vm6886_vm0, %v10792_v2, %v6883_v1  ;;  %v6940_v4 = vmul.f32 %v17697_v49, %v17676_v45  ;;  %10797 = vpow2.f32 %v9587_v60  ;;  %vm6945_vm11 = vweird.f32 %v17697_v49 }
 0x55e   :  { %v6892_v50 = vsel %vm6889_vm2, %v6891_v20, %v6887_v39  ;;  %10799 = vrcp.f32 %v17699_v9  ;;  %v4959_v52 = vpop.f32.mrf.mxu2  ;;  %vm17730_vm13 = vmor %vm6944_vm12, %vm6945_vm11  ;;  %vm7004_vm15 = vweird.f32 %v17699_v9 }
 0x55f   :  { %v5048_v41 = vpop.f32.mrf.mxu3  ;;  %v17706_v11 = vmul.f32 %v6892_v50, %v17623_v29  ;;  %v6941_v53 = vsub.f32 1.0, %v6940_v4  ;;  %v4960_v28 = vadd.f32 %v4959_v52, %v4871_v51  ;;  %v6950_v51 = vand.u32 2147483648, %v17676_v45  ;;  %v9931_v4 = vld [vmem:[#allocation5 + $0x70] sm:$0xff] }
 0x560   :  { %v4784_v2 = vpop.f32.mrf.mxu0  ;;  %v6948_v50 = vand.u32 2147483647, %v17676_v45  ;;  %v7008_v52 = vand.u32 2147483647, %v17699_v9  ;;  %8411 = vmatpush.bf16.msrb.mxu1 %v9931_v4 }
 0x561   :  { %v4873_v3 = vpop.f32.mrf.mxu1  ;;  %v17711_v27 = vadd.f32 %v5048_v41, %v4960_v28  ;;  %v4785_v44 = vadd.f32 %v4784_v2, %v17263_v61  ;;  %v6942_v34 = vmul.f32 %v17697_v49, %v6941_v53  ;;  %5193 = vmatmul.bf16.gmra.mxu1 %v20019_v55  ;;  %v7010_v41 = vand.u32 2147483648, %v17699_v9 }
 0x562   :  { %vm6949_vm1 = vcmp.eq.f32.partialorder %v6948_v50, 8.507059e+37  ;;  %vm7009_vm4 = vcmp.eq.f32.partialorder %v7008_v52, 8.507059e+37 }
 0x563   :  { %v10798_v25 = vpop.eup %10797  ;;  %v9591_v59 = vmul.f32 -1.442695, %v17711_v27  ;;  %v4874_v47 = vadd.f32 %v4873_v3, %v4785_v44  ;;  %v6943_v60 = vadd.f32 %v17697_v49, %v6942_v34  ;;  %v6951_v3 = vor.u32 1.1754944e-38, %v6950_v51 }
 0x564   :  { %v10800_v16 = vpop.eup %10799  ;;  %v17719_v17 = vadd.f32 1.0, %v10798_v25 }
 0x565   :  { %v7000_v1 = vmul.f32 %v10800_v16, %v17699_v9  ;;  %10801 = vpow2.f32 %v9591_v59  ;;  %vm7005_vm14 = vweird.f32 %v10800_v16  ;;  %v6947_v45 = vsel %vm17730_vm13, %v17697_v49, %v6943_v60 }
 0x566   :  { %10803 = vrcp.f32 %v17719_v17  ;;  %v4962_v55 = vpop.f32.mrf.mxu2  ;;  %vm7006_vm3 = vmor %vm7004_vm15, %vm7005_vm14  ;;  %vm7064_vm6 = vweird.f32 %v17719_v17 }
 0x567   :  { %v5051_v20 = vpop.f32.mrf.mxu3  ;;  %v7001_v7 = vsub.f32 1.0, %v7000_v1  ;;  %v4963_v39 = vadd.f32 %v4962_v55, %v4874_v47  ;;  %v7011_v1 = vor.u32 1.1754944e-38, %v7010_v41 }
 0x568   :  { %v4786_v53 = vpop.f32.mrf.mxu0 }
 0x569   :  { %v4875_v28 = vpop.f32.mrf.mxu1  ;;  %v7002_v6 = vmul.f32 %v10800_v16, %v7001_v7  ;;  %v17734_v10 = vadd.f32 %v5051_v20, %v4963_v39  ;;  %v4787_v2 = vadd.f32 %v4786_v53, %v17263_v61  ;;  %5109 = vmatmul.bf16.gmra.mxu0 %v20022_v57  ;;  %v6952_v57 = vsel %vm6949_vm1, %v6951_v3, %v6947_v45  ;;  %v20244_v53 = vld [vmem:[#allocation53_spill] sm:$0xff] }
 0x56a   :  { %5287 = vmatmul.bf16.gmra.mxu2 %v20023_v8  ;;  %5376 = vmatmul.bf16.gmra.mxu3 %v20024_v54  ;;  %v17754_v4 = vmul.f32 %v6952_v57, %v17646_v0  ;;  %v7070_v3 = vand.u32 2147483648, %v17719_v17 }
 0x56b   :  { %v10802_v44 = vpop.eup %10801  ;;  %v7003_v34 = vadd.f32 %v10800_v16, %v7002_v6  ;;  %v9595_v25 = vmul.f32 -1.442695, %v17734_v10  ;;  %v4876_v59 = vadd.f32 %v4875_v28, %v4787_v2 }
 0x56c   :  { %v17744_v47 = vpop.eup %10803  ;;  %v5899_v49 = vadd.f32 1.0, %v10802_v44 }
 0x56d   :  { %v7007_v60 = vsel %vm7006_vm3, %v10800_v16, %v7003_v34  ;;  %v7060_v9 = vmul.f32 %v17744_v47, %v17719_v17  ;;  %10805 = vpow2.f32 %v9595_v25  ;;  %vm7065_vm5 = vweird.f32 %v17744_v47 }
 0x56e   :  { %v7012_v51 = vsel %vm7009_vm4, %v7011_v1, %v7007_v60  ;;  %10807 = vrcp.f32 %v5899_v49  ;;  %v4964_v55 = vpop.f32.mrf.mxu2  ;;  %v7128_v1 = vand.u32 2147483647, %v5899_v49  ;;  %v7130_v57 = vand.u32 2147483648, %v5899_v49  ;;  %vm17772_vm7 = vmor %vm7064_vm6, %vm7065_vm5 }
 0x56f   :  { %v5053_v8 = vpop.f32.mrf.mxu3  ;;  %v17751_v20 = vmul.f32 %v7012_v51, %v17668_v19  ;;  %v7061_v7 = vsub.f32 1.0, %v7060_v9  ;;  %v4965_v39 = vadd.f32 %v4964_v55, %v4876_v59  ;;  %v7068_v59 = vand.u32 2147483647, %v17719_v17 }
 0x570   :  { %v4789_v50 = vpop.f32.mrf.mxu0  ;;  %vm7124_vm9 = vweird.f32 %v5899_v49  ;;  %vm7129_vm2 = vcmp.eq.f32.partialorder %v7128_v1, 8.507059e+37  ;;  %v9946_v1 = vld [vmem:[#allocation5 + $0xe8] sm:$0xff] }
 0x571   :  { %v4878_v54 = vpop.f32.mrf.mxu1  ;;  %v17756_v52 = vadd.f32 %v5053_v8, %v4965_v39  ;;  %v4790_v16 = vadd.f32 %v4789_v50, %v17263_v61  ;;  %v7062_v41 = vmul.f32 %v17744_v47, %v7061_v7  ;;  %5198 = vmatmul.bf16.gmra.mxu1 %v20027_v58  ;;  %v7071_v50 = vor.u32 1.1754944e-38, %v7070_v3  ;;  %8590 = vmatpush.bf16.msrb.mxu3 %v9946_v1 }
 0x572   :  { %vm7069_vm10 = vcmp.eq.f32.partialorder %v7068_v59, 8.507059e+37  ;;  %v9922_v59 = vld [vmem:[#allocation5 + $0x28] sm:$0xff] }
 0x573   :  { %v10806_v19 = vpop.eup %10805  ;;  %v9599_v28 = vmul.f32 -1.442695, %v17756_v52  ;;  %v4879_v48 = vadd.f32 %v4878_v54, %v4790_v16  ;;  %v7063_v45 = vadd.f32 %v17744_v47, %v7062_v41  ;;  %8323 = vmatpush.bf16.msrb.mxu0 %v9922_v59 }
 0x574   :  { %v10808_v6 = vpop.eup %10807  ;;  %v17764_v0 = vadd.f32 1.0, %v10806_v19 }
 0x575   :  { %v7120_v2 = vmul.f32 %v10808_v6, %v5899_v49  ;;  %10809 = vpow2.f32 %v9599_v28  ;;  %vm7125_vm8 = vweird.f32 %v10808_v6  ;;  %v7067_v39 = vsel %vm17772_vm7, %v17744_v47, %v7063_v45  ;;  %v20211_v47 = vld [vmem:[#allocation35_spill] sm:$0xff] }
 0x576   :  { %10811 = vrcp.f32 %v17764_v0  ;;  %v4967_v58 = vpop.f32.mrf.mxu2  ;;  %vm7126_vm0 = vmor %vm7124_vm9, %vm7125_vm8  ;;  %v7131_v28 = vor.u32 1.1754944e-38, %v7130_v57  ;;  %vm7184_vm12 = vweird.f32 %v17764_v0 }
 0x577   :  { %v5056_v44 = vpop.f32.mrf.mxu3  ;;  %v7121_v34 = vsub.f32 1.0, %v7120_v2  ;;  %v4968_v25 = vadd.f32 %v4967_v58, %v4879_v48  ;;  %v7072_v2 = vsel %vm7069_vm10, %v7071_v50, %v7067_v39 }
 0x578   :  { %v4791_v60 = vpop.f32.mrf.mxu0  ;;  %v17797_v57 = vmul.f32 %v7072_v2, %v17688_v13 }
 0x579   :  { %v4880_v9 = vpop.f32.mrf.mxu1  ;;  %v7122_v55 = vmul.f32 %v10808_v6, %v7121_v34  ;;  %v17776_v8 = vadd.f32 %v5056_v44, %v4968_v25  ;;  %v4792_v7 = vadd.f32 %v4791_v60, %v17263_v61  ;;  %5114 = vmatmul.bf16.gmra.mxu0 %v20030_v38  ;;  %v9938_v25 = vld [vmem:[#allocation5 + $0xa8] sm:$0xff] }
 0x57a   :  { %5292 = vmatmul.bf16.gmra.mxu2 %v20031_v14  ;;  %5381 = vmatmul.bf16.gmra.mxu3 %v20211_v47 }
 0x57b   :  { %v10810_v17 = vpop.eup %10809  ;;  %v7123_v54 = vadd.f32 %v10808_v6, %v7122_v55  ;;  %v9603_v16 = vmul.f32 -1.442695, %v17776_v8  ;;  %v4881_v41 = vadd.f32 %v4880_v9, %v4792_v7  ;;  %8501 = vmatpush.bf16.msrb.mxu2 %v9938_v25 }
 0x57c   :  { %v17785_v19 = vpop.eup %10811  ;;  %v17787_v48 = vadd.f32 1.0, %v10810_v17 }
 0x57d   :  { %v7127_v38 = vsel %vm7126_vm0, %v10808_v6, %v7123_v54  ;;  %v7180_v49 = vmul.f32 %v17785_v19, %v17764_v0  ;;  %10813 = vpow2.f32 %v9603_v16  ;;  %vm7185_vm11 = vweird.f32 %v17785_v19 }
 0x57e   :  { %v7132_v45 = vsel %vm7129_vm2, %v7131_v28, %v7127_v38  ;;  %10815 = vrcp.f32 %v17787_v48  ;;  %v4969_v14 = vpop.f32.mrf.mxu2  ;;  %v7190_v28 = vand.u32 2147483648, %v17764_v0  ;;  %vm17818_vm13 = vmor %vm7184_vm12, %vm7185_vm11  ;;  %vm7244_vm15 = vweird.f32 %v17787_v48 }
 0x57f   :  { %v5058_v3 = vpop.f32.mrf.mxu3  ;;  %v17794_v58 = vmul.f32 %v7132_v45, %v17711_v27  ;;  %v7181_v44 = vsub.f32 1.0, %v7180_v49  ;;  %v4970_v34 = vadd.f32 %v4969_v14, %v4881_v41  ;;  %v20212_v27 = vld [vmem:[#allocation33_spill] sm:$0xff]  ;;  %v9930_v45 = vld [vmem:[#allocation5 + $0x68] sm:$0xff]  ;;  %v7188_v14 = vand.u32 2147483647, %v17764_v0 }
 0x580   :  { %v4794_v6 = vpop.f32.mrf.mxu0  ;;  %8412 = vmatpush.bf16.msrb.mxu1 %v9930_v45 }
 0x581   :  { %v4883_v60 = vpop.f32.mrf.mxu1  ;;  %v17799_v9 = vadd.f32 %v5058_v3, %v4970_v34  ;;  %v4795_v51 = vadd.f32 %v4794_v6, %v17263_v61  ;;  %v7182_v55 = vmul.f32 %v17785_v19, %v7181_v44  ;;  %5203 = vmatmul.bf16.gmra.mxu1 %v20212_v27  ;;  %v7248_v3 = vand.u32 2147483647, %v17787_v48 }
 0x582   :  { %v7250_v44 = vand.u32 2147483648, %v17787_v48  ;;  %vm7189_vm1 = vcmp.eq.f32.partialorder %v7188_v14, 8.507059e+37 }
 0x583   :  { %v10814_v39 = vpop.eup %10813  ;;  %v9607_v13 = vmul.f32 -1.442695, %v17799_v9  ;;  %v4884_v50 = vadd.f32 %v4883_v60, %v4795_v51  ;;  %v7183_v41 = vadd.f32 %v17785_v19, %v7182_v55  ;;  %v7191_v51 = vor.u32 1.1754944e-38, %v7190_v28  ;;  %v20215_v55 = vld [vmem:[#allocation39_spill] sm:$0xff] }
 0x584   :  { %v10816_v17 = vpop.eup %10815  ;;  %v17807_v54 = vadd.f32 1.0, %v10814_v39  ;;  %vm7249_vm4 = vcmp.eq.f32.partialorder %v7248_v3, 8.507059e+37 }
 0x585   :  { %v7240_v16 = vmul.f32 %v10816_v17, %v17787_v48  ;;  %10817 = vpow2.f32 %v9607_v13  ;;  %vm7245_vm14 = vweird.f32 %v10816_v17  ;;  %v7187_v0 = vsel %vm17818_vm13, %v17785_v19, %v7183_v41  ;;  %v20217_v41 = vld [vmem:[#allocation36_spill] sm:$0xff] }
 0x586   :  { %10819 = vrcp.f32 %v17807_v54  ;;  %v4972_v47 = vpop.f32.mrf.mxu2  ;;  %vm7246_vm3 = vmor %vm7244_vm15, %vm7245_vm14  ;;  %v7192_v28 = vsel %vm7189_vm1, %v7191_v51, %v7187_v0  ;;  %v20218_v51 = vld [vmem:[#allocation40_spill] sm:$0xff]  ;;  %vm7304_vm6 = vweird.f32 %v17807_v54 }
 0x587   :  { %v5061_v2 = vpop.f32.mrf.mxu3  ;;  %v7241_v38 = vsub.f32 1.0, %v7240_v16  ;;  %v4973_v49 = vadd.f32 %v4972_v47, %v4884_v50  ;;  %v20216_v16 = vld [vmem:[#allocation37_spill] sm:$0xff]  ;;  %v17842_v3 = vmul.f32 %v7192_v28, %v17734_v10 }
 0x588   :  { %v4796_v34 = vpop.f32.mrf.mxu0 }
 0x589   :  { %v4885_v25 = vpop.f32.mrf.mxu1  ;;  %v7242_v1 = vmul.f32 %v10816_v17, %v7241_v38  ;;  %v17822_v6 = vadd.f32 %v5061_v2, %v4973_v49  ;;  %v4797_v60 = vadd.f32 %v4796_v34, %v17263_v61  ;;  %5119 = vmatmul.bf16.gmra.mxu0 %v20215_v55  ;;  %v7251_v2 = vor.u32 1.1754944e-38, %v7250_v44  ;;  %v20222_v55 = vld [vmem:[#allocation43_spill] sm:$0xff] }
 0x58a   :  { %5297 = vmatmul.bf16.gmra.mxu2 %v20216_v16  ;;  %5386 = vmatmul.bf16.gmra.mxu3 %v20217_v41 }
 0x58b   :  { %v10818_v27 = vpop.eup %10817  ;;  %v7243_v39 = vadd.f32 %v10816_v17, %v7242_v1  ;;  %v9611_v13 = vmul.f32 -1.442695, %v17822_v6  ;;  %v4886_v50 = vadd.f32 %v4885_v25, %v4797_v60 }
 0x58c   :  { %v17832_v47 = vpop.eup %10819  ;;  %v5915_v19 = vadd.f32 1.0, %v10818_v27 }
 0x58d   :  { %v7247_v38 = vsel %vm7246_vm3, %v10816_v17, %v7243_v39  ;;  %v7300_v48 = vmul.f32 %v17832_v47, %v17807_v54  ;;  %10821 = vpow2.f32 %v9611_v13  ;;  %vm7305_vm5 = vweird.f32 %v17832_v47 }
 0x58e   :  { %v7252_v49 = vsel %vm7249_vm4, %v7251_v2, %v7247_v38  ;;  %10823 = vrcp.f32 %v5915_v19  ;;  %v4974_v45 = vpop.f32.mrf.mxu2  ;;  %v7310_v2 = vand.u32 2147483648, %v17807_v54  ;;  %vm17860_vm7 = vmor %vm7304_vm6, %vm7305_vm5  ;;  %vm7364_vm9 = vweird.f32 %v5915_v19 }
 0x58f   :  { %v5063_v34 = vpop.f32.mrf.mxu3  ;;  %v17839_v25 = vmul.f32 %v7252_v49, %v17756_v52  ;;  %v7301_v14 = vsub.f32 1.0, %v7300_v48  ;;  %v4975_v59 = vadd.f32 %v4974_v45, %v4886_v50  ;;  %v7308_v49 = vand.u32 2147483647, %v17807_v54  ;;  %v20221_v54 = vld [vmem:[#allocation31_spill] sm:$0xff] }
 0x590   :  { %v4799_v44 = vpop.f32.mrf.mxu0  ;;  %v7368_v45 = vand.u32 2147483647, %v5915_v19 }
 0x591   :  { %v4888_v1 = vpop.f32.mrf.mxu1  ;;  %v17844_v60 = vadd.f32 %v5063_v34, %v4975_v59  ;;  %v4800_v17 = vadd.f32 %v4799_v44, %v17263_v61  ;;  %v7302_v0 = vmul.f32 %v17832_v47, %v7301_v14  ;;  %5208 = vmatmul.bf16.gmra.mxu1 %v20218_v51  ;;  %v7370_v34 = vand.u32 2147483648, %v5915_v19  ;;  %v9937_v44 = vld [vmem:[#allocation5 + $0xa0] sm:$0xff] }
 0x592   :  { %vm7309_vm10 = vcmp.eq.f32.partialorder %v7308_v49, 8.507059e+37  ;;  %vm7369_vm2 = vcmp.eq.f32.partialorder %v7368_v45, 8.507059e+37  ;;  %8502 = vmatpush.bf16.msrb.mxu2 %v9937_v44  ;;  %v9929_v44 = vld [vmem:[#allocation5 + $0x60] sm:$0xff] }
 0x593   :  { %v10822_v52 = vpop.eup %10821  ;;  %v9615_v27 = vmul.f32 -1.442695, %v17844_v60  ;;  %v4889_v39 = vadd.f32 %v4888_v1, %v4800_v17  ;;  %v7303_v16 = vadd.f32 %v17832_v47, %v7302_v0  ;;  %8413 = vmatpush.bf16.msrb.mxu1 %v9929_v44 }
 0x594   :  { %v10824_v13 = vpop.eup %10823  ;;  %v17852_v10 = vadd.f32 1.0, %v10822_v52  ;;  %v7311_v52 = vor.u32 1.1754944e-38, %v7310_v2 }
 0x595   :  { %v7360_v50 = vmul.f32 %v10824_v13, %v5915_v19  ;;  %10825 = vpow2.f32 %v9615_v27  ;;  %vm7365_vm8 = vweird.f32 %v10824_v13  ;;  %v7307_v51 = vsel %vm17860_vm7, %v17832_v47, %v7303_v16  ;;  %v20223_v47 = vld [vmem:[#allocation44_spill] sm:$0xff] }
 0x596   :  { %10827 = vrcp.f32 %v17852_v10  ;;  %v4977_v41 = vpop.f32.mrf.mxu2  ;;  %vm7366_vm0 = vmor %vm7364_vm9, %vm7365_vm8  ;;  %v7312_v16 = vsel %vm7309_vm10, %v7311_v52, %v7307_v51  ;;  %vm7424_vm12 = vweird.f32 %v17852_v10 }
 0x597   :  { %v5066_v28 = vpop.f32.mrf.mxu3  ;;  %v7361_v38 = vsub.f32 1.0, %v7360_v50  ;;  %v4978_v48 = vadd.f32 %v4977_v41, %v4889_v39  ;;  %v17885_v51 = vmul.f32 %v7312_v16, %v17776_v8 }
 0x598   :  { %v4801_v14 = vpop.f32.mrf.mxu0 }
 0x599   :  { %v4890_v59 = vpop.f32.mrf.mxu1  ;;  %v7362_v1 = vmul.f32 %v10824_v13, %v7361_v38  ;;  %v17864_v17 = vadd.f32 %v5066_v28, %v4978_v48  ;;  %v4802_v0 = vadd.f32 %v4801_v14, %v17263_v61  ;;  %5124 = vmatmul.bf16.gmra.mxu0 %v20221_v54  ;;  %v7371_v28 = vor.u32 1.1754944e-38, %v7370_v34  ;;  %20225 = vst [vmem:[#allocation33_spill] sm:$0xff] %v17885_v51 }
 0x59a   :  { %5302 = vmatmul.bf16.gmra.mxu2 %v20222_v55  ;;  %5391 = vmatmul.bf16.gmra.mxu3 %v20223_v47 }
 0x59b   :  { %v10826_v27 = vpop.eup %10825  ;;  %v7363_v39 = vadd.f32 %v10824_v13, %v7362_v1  ;;  %v9619_v50 = vmul.f32 -1.442695, %v17864_v17  ;;  %v4891_v41 = vadd.f32 %v4890_v59, %v4802_v0  ;;  %v9921_v1 = vld [vmem:[#allocation5 + $0x20] sm:$0xff] }
 0x59c   :  { %v17873_v38 = vpop.eup %10827  ;;  %v17875_v48 = vadd.f32 1.0, %v10826_v27  ;;  %v9945_v0 = vld [vmem:[#allocation5 + $0xe0] sm:$0xff]  ;;  %8324 = vmatpush.bf16.msrb.mxu0 %v9921_v1  ;;  %v7428_v1 = vand.u32 2147483647, %v17852_v10 }
 0x59d   :  { %v7367_v2 = vsel %vm7366_vm0, %v10824_v13, %v7363_v39  ;;  %v7420_v19 = vmul.f32 %v17873_v38, %v17852_v10  ;;  %10829 = vpow2.f32 %v9619_v50  ;;  %8591 = vmatpush.bf16.msrb.mxu3 %v9945_v0  ;;  %vm7425_vm11 = vweird.f32 %v17873_v38 }
 0x59e   :  { %v7372_v14 = vsel %vm7369_vm2, %v7371_v28, %v7367_v2  ;;  %10831 = vrcp.f32 %v17875_v48  ;;  %v4979_v55 = vpop.f32.mrf.mxu2  ;;  %v7488_v0 = vand.u32 2147483647, %v17875_v48  ;;  %vm17906_vm13 = vmor %vm7424_vm12, %vm7425_vm11  ;;  %vm7484_vm15 = vweird.f32 %v17875_v48 }
 0x59f   :  { %v5068_v59 = vpop.f32.mrf.mxu3  ;;  %v17882_v49 = vmul.f32 %v7372_v14, %v17799_v9  ;;  %v7421_v45 = vsub.f32 1.0, %v7420_v19  ;;  %v4980_v34 = vadd.f32 %v4979_v55, %v4891_v41  ;;  %v20226_v9 = vld [vmem:[#allocation42_spill] sm:$0xff]  ;;  %v7430_v14 = vand.u32 2147483648, %v17852_v10 }
 0x5a0   :  { %v4804_v13 = vpop.f32.mrf.mxu0  ;;  %vm7429_vm1 = vcmp.eq.f32.partialorder %v7428_v1, 8.507059e+37  ;;  %vm7489_vm4 = vcmp.eq.f32.partialorder %v7488_v0, 8.507059e+37 }
 0x5a1   :  { %20224 = vst [vmem:[#allocation35_spill] sm:$0xff] %v17882_v49  ;;  %v4893_v52 = vpop.f32.mrf.mxu1  ;;  %v17887_v54 = vadd.f32 %v5068_v59, %v4980_v34  ;;  %v4805_v27 = vadd.f32 %v4804_v13, %v17263_v61  ;;  %v7422_v39 = vmul.f32 %v17873_v38, %v7421_v45  ;;  %5213 = vmatmul.bf16.gmra.mxu1 %v20226_v9  ;;  %v7490_v13 = vand.u32 2147483648, %v17875_v48 }
 0x5a3   :  { %v10830_v41 = vpop.eup %10829  ;;  %v9623_v8 = vmul.f32 -1.442695, %v17887_v54  ;;  %v4894_v28 = vadd.f32 %v4893_v52, %v4805_v27  ;;  %v7423_v19 = vadd.f32 %v17873_v38, %v7422_v39 }
 0x5a4   :  { %v10832_v47 = vpop.eup %10831  ;;  %v17895_v16 = vadd.f32 1.0, %v10830_v41 }
 0x5a5   :  { %v7480_v2 = vmul.f32 %v10832_v47, %v17875_v48  ;;  %10833 = vpow2.f32 %v9623_v8  ;;  %vm7485_vm14 = vweird.f32 %v10832_v47  ;;  %v7427_v10 = vsel %vm17906_vm13, %v17873_v38, %v7423_v19  ;;  %v20229_v19 = vld [vmem:[#allocation41_spill] sm:$0xff] }
 0x5a6   :  { %10835 = vrcp.f32 %v17895_v16  ;;  %v4982_v55 = vpop.f32.mrf.mxu2  ;;  %vm7486_vm3 = vmor %vm7484_vm15, %vm7485_vm14  ;;  %vm7544_vm6 = vweird.f32 %v17895_v16 }
 0x5a7   :  { %v5071_v59 = vpop.f32.mrf.mxu3  ;;  %v7481_v45 = vsub.f32 1.0, %v7480_v2  ;;  %v4983_v34 = vadd.f32 %v4982_v55, %v4894_v28  ;;  %v7431_v28 = vor.u32 1.1754944e-38, %v7430_v14 }
 0x5a8   :  { %v4806_v52 = vpop.f32.mrf.mxu0 }
 0x5a9   :  { %v4895_v27 = vpop.f32.mrf.mxu1  ;;  %v7482_v9 = vmul.f32 %v10832_v47, %v7481_v45  ;;  %v17910_v41 = vadd.f32 %v5071_v59, %v4983_v34  ;;  %v4807_v8 = vadd.f32 %v4806_v52, %v17263_v61  ;;  %5129 = vmatmul.bf16.gmra.mxu0 %v20149_v37  ;;  %v7491_v34 = vor.u32 1.1754944e-38, %v7490_v13 }
 0x5aa   :  { %5307 = vmatmul.bf16.gmra.mxu2 %v20150_v35  ;;  %5396 = vmatmul.bf16.gmra.mxu3 %v20229_v19  ;;  %v7432_v37 = vsel %vm7429_vm1, %v7431_v28, %v7427_v10  ;;  %v20232_v10 = vld [vmem:[#allocation46_spill] sm:$0xff] }
 0x5ab   :  { %v10834_v2 = vpop.eup %10833  ;;  %v7483_v55 = vadd.f32 %v10832_v47, %v7482_v9  ;;  %v9627_v50 = vmul.f32 -1.442695, %v17910_v41  ;;  %v4896_v45 = vadd.f32 %v4895_v27, %v4807_v8  ;;  %v17933_v27 = vmul.f32 %v7432_v37, %v17822_v6 }
 0x5ac   :  { %v17920_v59 = vpop.eup %10835  ;;  %v17923_v38 = vadd.f32 1.0, %v10834_v2  ;;  %v7548_v37 = vand.u32 2147483647, %v17895_v16 }
 0x5ad   :  { %v7487_v14 = vsel %vm7486_vm3, %v10832_v47, %v7483_v55  ;;  %v7540_v48 = vmul.f32 %v17920_v59, %v17895_v16  ;;  %10837 = vpow2.f32 %v9627_v50  ;;  %20231 = vst [vmem:[#allocation37_spill] sm:$0xff] %v17933_v27  ;;  %vm7545_vm5 = vweird.f32 %v17920_v59 }
 0x5ae   :  { %v7492_v44 = vsel %vm7489_vm4, %v7491_v34, %v7487_v14  ;;  %10839 = vrcp.f32 %v17923_v38  ;;  %v4984_v35 = vpop.f32.mrf.mxu2  ;;  %v7550_v14 = vand.u32 2147483648, %v17895_v16  ;;  %vm17952_vm7 = vmor %vm7544_vm6, %vm7545_vm5  ;;  %vm7549_vm9 = vcmp.eq.f32.partialorder %v7548_v37, 8.507059e+37 }
 0x5af   :  { %v5073_v52 = vpop.f32.mrf.mxu3  ;;  %v17930_v1 = vmul.f32 %v7492_v44, %v17844_v60  ;;  %v7541_v0 = vsub.f32 1.0, %v7540_v48  ;;  %v4985_v13 = vadd.f32 %v4984_v35, %v4896_v45  ;;  %vm7604_vm10 = vweird.f32 %v17923_v38  ;;  %v20236_v35 = vld [vmem:[#allocation49_spill] sm:$0xff] }
 0x5b0   :  { %v4809_v39 = vpop.f32.mrf.mxu0 }
 0x5b1   :  { %20230 = vst [vmem:[#allocation39_spill] sm:$0xff] %v17930_v1  ;;  %v4898_v9 = vpop.f32.mrf.mxu1  ;;  %v7542_v47 = vmul.f32 %v17920_v59, %v7541_v0  ;;  %v17936_v8 = vadd.f32 %v5073_v52, %v4985_v13  ;;  %v4810_v50 = vadd.f32 %v4809_v39, %v17263_v61  ;;  %5218 = vmatmul.bf16.gmra.mxu1 %v20232_v10  ;;  %v7608_v39 = vand.u32 2147483647, %v17923_v38 }
 0x5b3   :  { %v10838_v60 = vpop.eup %10837  ;;  %v9631_v2 = vmul.f32 -1.442695, %v17936_v8  ;;  %v4899_v55 = vadd.f32 %v4898_v9, %v4810_v50  ;;  %v7543_v6 = vadd.f32 %v17920_v59, %v7542_v47  ;;  %v7610_v9 = vand.u32 2147483648, %v17923_v38 }
 0x5b4   :  { %v10840_v45 = vpop.eup %10839  ;;  %v17945_v34 = vadd.f32 1.0, %v10838_v60  ;;  %vm7609_vm2 = vcmp.eq.f32.partialorder %v7608_v39, 8.507059e+37  ;;  %v9944_v39 = vld [vmem:[#allocation5 + $0xd8] sm:$0xff] }
 0x5b5   :  { %v7600_v19 = vmul.f32 %v10840_v45, %v17923_v38  ;;  %10841 = vpow2.f32 %v9631_v2  ;;  %v7547_v13 = vsel %vm17952_vm7, %v17920_v59, %v7543_v6  ;;  %vm7605_vm8 = vweird.f32 %v10840_v45  ;;  %8592 = vmatpush.bf16.msrb.mxu3 %v9944_v39 }
 0x5b6   :  { %10843 = vrcp.f32 %v17945_v34  ;;  %v4987_v48 = vpop.f32.mrf.mxu2  ;;  %v7551_v2 = vor.u32 1.1754944e-38, %v7550_v14  ;;  %vm7606_vm0 = vmor %vm7604_vm10, %vm7605_vm8  ;;  %vm7664_vm12 = vweird.f32 %v17945_v34 }
 0x5b7   :  { %v5076_v44 = vpop.f32.mrf.mxu3  ;;  %v7601_v52 = vsub.f32 1.0, %v7600_v19  ;;  %v4988_v0 = vadd.f32 %v4987_v48, %v4899_v55  ;;  %v20235_v19 = vld [vmem:[#allocation38_spill] sm:$0xff] }
 0x5b8   :  { %v4811_v47 = vpop.f32.mrf.mxu0 }
 0x5b9   :  { %v4900_v16 = vpop.f32.mrf.mxu1  ;;  %v7602_v50 = vmul.f32 %v10840_v45, %v7601_v52  ;;  %v17961_v10 = vadd.f32 %v5076_v44, %v4988_v0  ;;  %v4812_v60 = vadd.f32 %v4811_v47, %v17263_v61  ;;  %5134 = vmatmul.bf16.gmra.mxu0 %v20235_v19  ;;  %v7552_v52 = vsel %vm7549_vm9, %v7551_v2, %v7547_v13  ;;  %v20237_v61 = vld [vmem:[#allocation50_spill] sm:$0xff]  ;;  %v10985_v19 = vld [vmem:[%s19272_s4] sm:$0xf] }
 0x5ba   :  { %5312 = vmatmul.bf16.gmra.mxu2 %v20236_v35  ;;  %v7611_v44 = vor.u32 1.1754944e-38, %v7610_v9  ;;  %5401 = vmatmul.bf16.gmra.mxu3 %v20237_v61  ;;  %v9936_v2 = vld [vmem:[#allocation5 + $0x98] sm:$0xff] }
 0x5bb   :  { %v10842_v55 = vpop.eup %10841  ;;  %v7603_v48 = vadd.f32 %v10840_v45, %v7602_v50  ;;  %v9635_v59 = vmul.f32 -1.442695, %v17961_v10  ;;  %v4901_v6 = vadd.f32 %v4900_v16, %v4812_v60  ;;  %v17977_v50 = vmul.f32 %v7552_v52, %v17864_v17  ;;  %8503 = vmatpush.bf16.msrb.mxu2 %v9936_v2  ;;  %v20240_v52 = vld [vmem:[#allocation48_spill] sm:$0xff] }
 0x5bc   :  { %v17968_v28 = vpop.eup %10843  ;;  %v17970_v0 = vadd.f32 1.0, %v10842_v55  ;;  %v17985_v55 = vperm.slane %v10985_v19, 3  ;;  %v7670_v2 = vand.u32 2147483648, %v17945_v34  ;;  %v9928_v19 = vld [vmem:[#allocation5 + $0x58] sm:$0xff] }
 0x5bd   :  { %v7607_v37 = vsel %vm7606_vm0, %v10840_v45, %v7603_v48  ;;  %v7660_v14 = vmul.f32 %v17968_v28, %v17945_v34  ;;  %10845 = vpow2.f32 %v9635_v59  ;;  %20238 = vst [vmem:[#allocation36_spill] sm:$0xff] %v17977_v50  ;;  %v9920_v45 = vld [vmem:[#allocation5 + $0x18] sm:$0xff]  ;;  %vm7665_vm11 = vweird.f32 %v17968_v28  ;;  %8414 = vmatpush.bf16.msrb.mxu1 %v9928_v19 }
 0x5be   :  { %v7612_v38 = vsel %vm7609_vm2, %v7611_v44, %v7607_v37  ;;  %10847 = vrcp.f32 %v17970_v0  ;;  %v4989_v47 = vpop.f32.mrf.mxu2  ;;  %8325 = vmatpush.bf16.msrb.mxu0 %v9920_v45  ;;  %vm18009_vm13 = vmor %vm7664_vm12, %vm7665_vm11  ;;  %v7671_v17 = vor.u32 1.1754944e-38, %v7670_v2  ;;  %vm7724_vm15 = vweird.f32 %v17970_v0 }
 0x5bf   :  { %v5078_v16 = vpop.f32.mrf.mxu3  ;;  %v17980_v13 = vmul.f32 %v7612_v38, %v17887_v54  ;;  %v7661_v9 = vsub.f32 1.0, %v7660_v14  ;;  %v4990_v60 = vadd.f32 %v4989_v47, %v4901_v6 }
 0x5c0   :  { %v5090_v48 = vpop.f32.mrf.mxu0 }
 0x5c1   :  { %20239 = vst [vmem:[#allocation40_spill] sm:$0xff] %v17980_v13  ;;  %v5179_v59 = vpop.f32.mrf.mxu1  ;;  %v17987_v35 = vadd.f32 %v5078_v16, %v4990_v60  ;;  %v7662_v54 = vmul.f32 %v17968_v28, %v7661_v9  ;;  %v5091_v6 = vadd.f32 %v5090_v48, %v17985_v55  ;;  %5223 = vmatmul.bf16.gmra.mxu1 %v20240_v52  ;;  %v7668_v48 = vand.u32 2147483647, %v17945_v34 }
 0x5c3   :  { %v10846_v44 = vpop.eup %10845  ;;  %v9639_v61 = vmul.f32 -1.442695, %v17987_v35  ;;  %v5180_v38 = vadd.f32 %v5179_v59, %v5091_v6  ;;  %v7663_v16 = vadd.f32 %v17968_v28, %v7662_v54  ;;  %v7730_v59 = vand.u32 2147483648, %v17970_v0 }
 0x5c4   :  { %v10848_v37 = vpop.eup %10847  ;;  %v17995_v14 = vadd.f32 1.0, %v10846_v44  ;;  %vm7669_vm1 = vcmp.eq.f32.partialorder %v7668_v48, 8.507059e+37 }
 0x5c5   :  { %v7720_v47 = vmul.f32 %v10848_v37, %v17970_v0  ;;  %10849 = vpow2.f32 %v9639_v61  ;;  %vm7725_vm14 = vweird.f32 %v10848_v37  ;;  %v7728_v61 = vand.u32 2147483647, %v17970_v0 }
 0x5c6   :  { %10851 = vrcp.f32 %v17995_v14  ;;  %v5268_v9 = vpop.f32.mrf.mxu2  ;;  %v7667_v34 = vsel %vm18009_vm13, %v17968_v28, %v7663_v16  ;;  %vm7726_vm3 = vmor %vm7724_vm15, %vm7725_vm14  ;;  %v7731_v29 = vor.u32 1.1754944e-38, %v7730_v59  ;;  %vm7784_vm6 = vweird.f32 %v17995_v14 }
 0x5c7   :  { %v5357_v60 = vpop.f32.mrf.mxu3  ;;  %v7721_v45 = vsub.f32 1.0, %v7720_v47  ;;  %v5269_v39 = vadd.f32 %v5268_v9, %v5180_v38  ;;  %v20243_v47 = vld [vmem:[#allocation51_spill] sm:$0xff]  ;;  %v7672_v19 = vsel %vm7669_vm1, %v7671_v17, %v7667_v34  ;;  %vm7729_vm4 = vcmp.eq.f32.partialorder %v7728_v61, 8.507059e+37 }
 0x5c8   :  { %v18005_v6 = vpop.f32.mrf.mxu0  ;;  %v18032_v48 = vmul.f32 %v7672_v19, %v17910_v41  ;;  %v7790_v41 = vand.u32 2147483648, %v17995_v14 }
 0x5c9   :  { %v18007_v54 = vpop.f32.mrf.mxu1  ;;  %v7722_v44 = vmul.f32 %v10848_v37, %v7721_v45  ;;  %v18014_v38 = vadd.f32 %v5357_v60, %v5269_v39  ;;  %5139 = vmatmul.bf16.gmra.mxu0 %v20243_v47  ;;  %v20245_v39 = vld [vmem:[#allocation54_spill] sm:$0xff] }
 0x5ca   :  { %5317 = vmatmul.bf16.gmra.mxu2 %v20244_v53  ;;  %5406 = vmatmul.bf16.gmra.mxu3 %v20245_v39  ;;  %20247 = vst [vmem:[#allocation43_spill] sm:$0xff] %v18032_v48 }
 0x5cb   :  { %v10850_v9 = vpop.eup %10849  ;;  %v7723_v7 = vadd.f32 %v10848_v37, %v7722_v44 }
 0x5cc   :  { %v10852_v45 = vpop.eup %10851  ;;  %v5947_v60 = vadd.f32 1.0, %v10850_v9 }
 0x5cd   :  { %v7727_v5 = vsel %vm7726_vm3, %v10848_v37, %v7723_v7  ;;  %v7780_v28 = vmul.f32 %v10852_v45, %v17995_v14  ;;  %v20248_v37 = vld [vmem:[#allocation52_spill] sm:$0xff]  ;;  %vm7785_vm5 = vweird.f32 %v10852_v45 }
 0x5ce   :  { %v7732_v16 = vsel %vm7729_vm4, %v7731_v29, %v7727_v5  ;;  %10853 = vrcp.f32 %v5947_v60  ;;  %v18024_v2 = vpop.f32.mrf.mxu2  ;;  %vm18045_vm7 = vmor %vm7784_vm6, %vm7785_vm5  ;;  %vm7844_vm9 = vweird.f32 %v5947_v60 }
 0x5cf   :  { %v18026_v52 = vpop.f32.mrf.mxu3  ;;  %v18029_v53 = vmul.f32 %v7732_v16, %v17936_v8  ;;  %v7781_v0 = vsub.f32 1.0, %v7780_v28  ;;  %v7788_v28 = vand.u32 2147483647, %v17995_v14  ;;  %v7850_v16 = vand.u32 2147483648, %v5947_v60 }
 0x5d0   :  { %v5095_v59 = vpop.f32.mrf.mxu0  ;;  %v7791_v14 = vor.u32 1.1754944e-38, %v7790_v41 }
 0x5d1   :  { %20246 = vst [vmem:[#allocation31_spill] sm:$0xff] %v18029_v53  ;;  %v5184_v44 = vpop.f32.mrf.mxu1  ;;  %v5096_v7 = vadd.f32 %v5095_v59, %v17985_v55  ;;  %v7782_v17 = vmul.f32 %v10852_v45, %v7781_v0  ;;  %5228 = vmatmul.bf16.gmra.mxu1 %v20248_v37  ;;  %vm7789_vm10 = vcmp.eq.f32.partialorder %v7788_v28, 8.507059e+37  ;;  %v7851_v5 = vor.u32 1.1754944e-38, %v7850_v16 }
 0x5d3   :  { %v5185_v29 = vadd.f32 %v5184_v44, %v5096_v7  ;;  %v7783_v47 = vadd.f32 %v10852_v45, %v7782_v17  ;;  %v7848_v17 = vand.u32 2147483647, %v5947_v60 }
 0x5d4   :  { %v10854_v61 = vpop.eup %10853 }
 0x5d5   :  { %v7840_v34 = vmul.f32 %v10854_v61, %v5947_v60  ;;  %vm7845_vm8 = vweird.f32 %v10854_v61  ;;  %vm7849_vm2 = vcmp.eq.f32.partialorder %v7848_v17, 8.507059e+37  ;;  %v9943_v60 = vld [vmem:[#allocation5 + $0xd0] sm:$0xff] }
 0x5d6   :  { %v5273_v8 = vpop.f32.mrf.mxu2  ;;  %vm7846_vm0 = vmor %vm7844_vm9, %vm7845_vm8  ;;  %8593 = vmatpush.bf16.msrb.mxu3 %v9943_v60  ;;  %v9927_v17 = vld [vmem:[#allocation5 + $0x50] sm:$0xff] }
 0x5d7   :  { %v5362_v9 = vpop.f32.mrf.mxu3  ;;  %v7841_v39 = vsub.f32 1.0, %v7840_v34  ;;  %v5274_v19 = vadd.f32 %v5273_v8, %v5185_v29  ;;  %v7787_v29 = vsel %vm18045_vm7, %v10852_v45, %v7783_v47  ;;  %v20251_v8 = vld [vmem:[#allocation57_spill] sm:$0xff]  ;;  %8415 = vmatpush.bf16.msrb.mxu1 %v9927_v17 }
 0x5d8   :  { %v18041_v0 = vpop.f32.mrf.mxu0  ;;  %v9919_v47 = vld [vmem:[#allocation5 + $0x10] sm:$0xff] }
 0x5d9   :  { %v18043_v59 = vpop.f32.mrf.mxu1  ;;  %v7842_v7 = vmul.f32 %v10854_v61, %v7841_v39  ;;  %v18049_v37 = vadd.f32 %v5362_v9, %v5274_v19  ;;  %5144 = vmatmul.bf16.gmra.mxu0 %v20171_v21  ;;  %v7792_v39 = vsel %vm7789_vm10, %v7791_v14, %v7787_v29  ;;  %v9935_v21 = vld [vmem:[#allocation5 + $0x90] sm:$0xff] }
 0x5da   :  { %5322 = vmatmul.bf16.gmra.mxu2 %v20251_v8  ;;  %5411 = vmatmul.bf16.gmra.mxu3 %v20252_v40  ;;  %v18062_v41 = vmul.f32 %v7792_v39, %v17961_v10  ;;  %v5093_v10 = vadd.f32 %v18005_v6, %v17985_v55  ;;  %v20256_v8 = vld [vmem:[#allocation59_spill] sm:$0xff]  ;;  %v20257_v39 = vld [vmem:[#allocation61_spill] sm:$0xff] }
 0x5db   :  { %v7843_v34 = vadd.f32 %v10854_v61, %v7842_v7  ;;  %8504 = vmatpush.bf16.msrb.mxu2 %v9935_v21  ;;  %8326 = vmatpush.bf16.msrb.mxu0 %v9919_v47  ;;  %v20258_v21 = vld [vmem:[#allocation62_spill] sm:$0xff] }
 0x5dc   :  { %20254 = vst [vmem:[#allocation42_spill] sm:$0xff] %v18062_v41 }
 0x5dd   :  { %v7847_v12 = vsel %vm7846_vm0, %v10854_v61, %v7843_v34 }
 0x5de   :  { %v7852_v9 = vsel %vm7849_vm2, %v7851_v5, %v7847_v12  ;;  %v5275_v19 = vpop.f32.mrf.mxu2  ;;  %v20255_v12 = vld [vmem:[#allocation56_spill] sm:$0xff] }
 0x5df   :  { %v18056_v48 = vpop.f32.mrf.mxu3  ;;  %v18059_v45 = vmul.f32 %v7852_v9, %v17987_v35  ;;  %v5182_v9 = vadd.f32 %v18007_v54, %v5093_v10  ;;  %v5098_v10 = vadd.f32 %v18041_v0, %v17985_v55 }
 0x5e0   :  { %v5100_v28 = vpop.f32.mrf.mxu0 }
 0x5e1   :  { %20253 = vst [vmem:[#allocation44_spill] sm:$0xff] %v18059_v45  ;;  %v5189_v16 = vpop.f32.mrf.mxu1  ;;  %v5101_v40 = vadd.f32 %v5100_v28, %v17985_v55  ;;  %5233 = vmatmul.bf16.gmra.mxu1 %v20255_v12  ;;  %v5271_v47 = vadd.f32 %v18024_v2, %v5182_v9  ;;  %v9516_v2 = vmul.f32 -1.442695, %v18014_v38  ;;  %v20260_v9 = vld [vmem:[#allocation65_spill] sm:$0xff] }
 0x5e3   :  { %v5190_v35 = vadd.f32 %v5189_v16, %v5101_v40  ;;  %v18082_v40 = vadd.f32 %v18026_v52, %v5271_v47  ;;  %v20261_v47 = vld [vmem:[#allocation66_spill] sm:$0xff] }
 0x5e6   :  { %v5278_v61 = vpop.f32.mrf.mxu2 }
 0x5e7   :  { %v5367_v44 = vpop.f32.mrf.mxu3  ;;  %v5279_v7 = vadd.f32 %v5278_v61, %v5190_v35  ;;  %v20259_v35 = vld [vmem:[#allocation60_spill] sm:$0xff] }
 0x5e8   :  { %v5102_v29 = vpop.f32.mrf.mxu0 }
 0x5e9   :  { %v18070_v14 = vpop.f32.mrf.mxu1  ;;  %v18072_v34 = vadd.f32 %v5367_v44, %v5279_v7  ;;  %5149 = vmatmul.bf16.gmra.mxu0 %v20256_v8  ;;  %v9520_v44 = vmul.f32 -1.442695, %v18082_v40 }
 0x5ea   :  { %5327 = vmatmul.bf16.gmra.mxu2 %v20257_v39  ;;  %5416 = vmatmul.bf16.gmra.mxu3 %v20258_v21  ;;  %v5187_v21 = vadd.f32 %v18043_v59, %v5098_v10 }
 0x5eb   :  { %10855 = vpow2.f32 %v9520_v44 }
 0x5ec   :  { %10857 = vpow2.f32 %v9516_v2 }
 0x5ee   :  { %v5280_v60 = vpop.f32.mrf.mxu2 }
 0x5ef   :  { %v18079_v28 = vpop.f32.mrf.mxu3 }
 0x5f0   :  { %v5105_v6 = vpop.f32.mrf.mxu0 }
 0x5f1   :  { %v5194_v16 = vpop.f32.mrf.mxu1  ;;  %v5106_v12 = vadd.f32 %v5105_v6, %v17985_v55  ;;  %5238 = vmatmul.bf16.gmra.mxu1 %v20259_v35  ;;  %v5276_v6 = vadd.f32 %v5275_v19, %v5187_v21  ;;  %v9918_v35 = vld [vmem:[#allocation5 + $0x8] sm:$0xff] }
 0x5f2   :  { %8327 = vmatpush.bf16.msrb.mxu0 %v9918_v35  ;;  %v9926_v35 = vld [vmem:[#allocation5 + $0x48] sm:$0xff] }
 0x5f3   :  { %v5195_v61 = vadd.f32 %v5194_v16, %v5106_v12  ;;  %v9934_v12 = vld [vmem:[#allocation5 + $0x88] sm:$0xff]  ;;  %v18106_v59 = vadd.f32 %v18056_v48, %v5276_v6  ;;  %v5103_v48 = vadd.f32 %v5102_v29, %v17985_v55  ;;  %8416 = vmatpush.bf16.msrb.mxu1 %v9926_v35 }
 0x5f4   :  { %8505 = vmatpush.bf16.msrb.mxu2 %v9934_v12 }
 0x5f6   :  { %v5283_v54 = vpop.f32.mrf.mxu2 }
 0x5f7   :  { %v5372_v7 = vpop.f32.mrf.mxu3  ;;  %v5284_v17 = vadd.f32 %v5283_v54, %v5195_v61  ;;  %v9942_v61 = vld [vmem:[#allocation5 + $0xc8] sm:$0xff]  ;;  %v10856_v54 = vpop.eup %10855 }
 0x5f8   :  { %v18090_v8 = vpop.f32.mrf.mxu0  ;;  %8594 = vmatpush.bf16.msrb.mxu3 %v9942_v61  ;;  %v18109_v19 = vadd.f32 1.0, %v10856_v54  ;;  %v5192_v54 = vadd.f32 %v18070_v14, %v5103_v48 }
 0x5f9   :  { %v18092_v39 = vpop.f32.mrf.mxu1  ;;  %v18094_v52 = vadd.f32 %v5372_v7, %v5284_v17  ;;  %5154 = vmatmul.bf16.gmra.mxu0 %v20092_v36  ;;  %v10858_v17 = vpop.eup %10857 }
 0x5fa   :  { %5332 = vmatmul.bf16.gmra.mxu2 %v20260_v9  ;;  %5421 = vmatmul.bf16.gmra.mxu3 %v20261_v47  ;;  %v18111_v10 = vadd.f32 1.0, %v10858_v17  ;;  %v9528_v9 = vmul.f32 -1.442695, %v18106_v59  ;;  %10859 = vrcp.f32 %v18109_v19  ;;  %vm6059_vm12 = vweird.f32 %v18109_v19 }
 0x5fc   :  { %10861 = vrcp.f32 %v18111_v10  ;;  %vm5999_vm15 = vweird.f32 %v18111_v10 }
 0x5fd   :  { %10863 = vpow2.f32 %v9528_v9 }
 0x5fe   :  { %v18100_v16 = vpop.f32.mrf.mxu2 }
 0x5ff   :  { %v18102_v0 = vpop.f32.mrf.mxu3 }
 0x600   :  { %v5110_v7 = vpop.f32.mrf.mxu0  ;;  %v18128_v29 = vpop.eup %10859 }
 0x601   :  { %v5199_v44 = vpop.f32.mrf.mxu1  ;;  %v5111_v36 = vadd.f32 %v5110_v7, %v17985_v55  ;;  %5243 = vmatmul.bf16.gmra.mxu1 %v20097_v33  ;;  %v9524_v7 = vmul.f32 -1.442695, %v18049_v37  ;;  %vm6060_vm11 = vweird.f32 %v18128_v29 }
 0x602   :  { %vm18175_vm14 = vmor %vm6059_vm12, %vm6060_vm11 }
 0x603   :  { %v5200_v2 = vadd.f32 %v5199_v44, %v5111_v36  ;;  %10865 = vpow2.f32 %v9524_v7  ;;  %v5281_v44 = vadd.f32 %v5280_v60, %v5192_v54 }
 0x605   :  { %v18142_v60 = vadd.f32 %v18079_v28, %v5281_v44  ;;  %v9532_v28 = vmul.f32 -1.442695, %v18072_v34 }
 0x606   :  { %v5288_v21 = vpop.f32.mrf.mxu2 }
 0x607   :  { %v5377_v47 = vpop.f32.mrf.mxu3  ;;  %v5289_v12 = vadd.f32 %v5288_v21, %v5200_v2  ;;  %v18134_v2 = vpop.eup %10861  ;;  %v9536_v5 = vmul.f32 -1.442695, %v18142_v60 }
 0x608   :  { %v18117_v6 = vpop.f32.mrf.mxu0  ;;  %v10864_v21 = vpop.eup %10863  ;;  %vm6000_vm13 = vweird.f32 %v18134_v2 }
 0x609   :  { %v18119_v33 = vpop.f32.mrf.mxu1  ;;  %v18122_v61 = vadd.f32 %v5377_v47, %v5289_v12  ;;  %5159 = vmatmul.bf16.gmra.mxu0 %v15333_v46  ;;  %v6055_v46 = vmul.f32 %v18128_v29, %v18109_v19  ;;  %v10866_v14 = vpop.eup %10865  ;;  %v18145_v12 = vadd.f32 1.0, %v10864_v21  ;;  %vm18197_vm1 = vmor %vm5999_vm15, %vm6000_vm13 }
 0x60a   :  { %5337 = vmatmul.bf16.gmra.mxu2 %v15583_v43  ;;  %5426 = vmatmul.bf16.gmra.mxu3 %v15591_v30  ;;  %v5995_v30 = vmul.f32 %v18134_v2, %v18111_v10  ;;  %v18147_v48 = vadd.f32 1.0, %v10866_v14 }
 0x60b   :  { %v6056_v7 = vsub.f32 1.0, %v6055_v46  ;;  %10867 = vrcp.f32 %v18145_v12  ;;  %vm6179_vm7 = vweird.f32 %v18145_v12 }
 0x60c   :  { %v5996_v54 = vsub.f32 1.0, %v5995_v30  ;;  %10869 = vrcp.f32 %v18147_v48  ;;  %vm6119_vm9 = vweird.f32 %v18147_v48 }
 0x60d   :  { %v6057_v53 = vmul.f32 %v18128_v29, %v6056_v7  ;;  %10871 = vpow2.f32 %v9536_v5  ;;  %v6005_v7 = vand.u32 2147483648, %v18111_v10 }
 0x60e   :  { %v18130_v36 = vpop.f32.mrf.mxu2  ;;  %10873 = vpow2.f32 %v9532_v28  ;;  %v9941_v28 = vld [vmem:[#allocation5 + $0xc0] sm:$0xff] }
 0x60f   :  { %v18132_v17 = vpop.f32.mrf.mxu3  ;;  %8595 = vmatpush.bf16.msrb.mxu3 %v9941_v28  ;;  %v9540_v28 = vmul.f32 -1.442695, %v18094_v52 }
 0x610   :  { %v5115_v9 = vpop.f32.mrf.mxu0 }
 0x611   :  { %v5204_v43 = vpop.f32.mrf.mxu1  ;;  %v5116_v47 = vadd.f32 %v5115_v9, %v17985_v55  ;;  %5248 = vmatmul.bf16.gmra.mxu1 %v15555_v23  ;;  %v5108_v23 = vadd.f32 %v18090_v8, %v17985_v55  ;;  %v18169_v14 = vpop.eup %10867 }
 0x612   :  { %vm6180_vm5 = vweird.f32 %v18169_v14 }
 0x613   :  { %v5205_v35 = vadd.f32 %v5204_v43, %v5116_v47  ;;  %v5997_v43 = vmul.f32 %v18134_v2, %v5996_v54  ;;  %v5197_v8 = vadd.f32 %v18092_v39, %v5108_v23  ;;  %v20262_v47 = vld [vmem:[#allocation67_spill] sm:$0xff]  ;;  %vm18257_vm8 = vmor %vm6179_vm7, %vm6180_vm5 }
 0x614   :  { %v9933_v54 = vld [vmem:[#allocation5 + $0x80] sm:$0xff] }
 0x615   :  { %v5998_v5 = vadd.f32 %v18134_v2, %v5997_v43  ;;  %v6003_v43 = vand.u32 2147483647, %v18111_v10  ;;  %8506 = vmatpush.bf16.msrb.mxu2 %v9933_v54 }
 0x616   :  { %v5293_v41 = vpop.f32.mrf.mxu2 }
 0x617   :  { %v5382_v9 = vpop.f32.mrf.mxu3  ;;  %v5294_v45 = vadd.f32 %v5293_v41, %v5205_v35  ;;  %v6058_v41 = vadd.f32 %v18128_v29, %v6057_v53  ;;  %v5286_v53 = vadd.f32 %v18100_v16, %v5197_v8  ;;  %v18185_v35 = vpop.eup %10869  ;;  %vm6004_vm4 = vcmp.eq.f32.partialorder %v6003_v43, 8.507059e+37 }
 0x618   :  { %v18155_v44 = vpop.f32.mrf.mxu0  ;;  %v10872_v23 = vpop.eup %10871  ;;  %vm6120_vm6 = vweird.f32 %v18185_v35 }
 0x619   :  { %v18157_v21 = vpop.f32.mrf.mxu1  ;;  %v18160_v46 = vadd.f32 %v5382_v9, %v5294_v45  ;;  %5164 = vmatmul.bf16.gmra.mxu0 %v15801_v62  ;;  %v6065_v45 = vand.u32 2147483648, %v18109_v19  ;;  %v9917_v9 = vld [vmem:[#allocation5] sm:$0xff]  ;;  %v6062_v16 = vsel %vm18175_vm14, %v18128_v29, %v6058_v41  ;;  %v10874_v10 = vpop.eup %10873  ;;  %v6002_v29 = vsel %vm18197_vm1, %v18134_v2, %v5998_v5  ;;  %vm18270_vm10 = vmor %vm6119_vm9, %vm6120_vm6 }
 0x61a   :  { %5342 = vmatmul.bf16.gmra.mxu2 %v15848_v32  ;;  %5431 = vmatmul.bf16.gmra.mxu3 %v20262_v47  ;;  %v6063_v32 = vand.u32 2147483647, %v18109_v19  ;;  %v6175_v19 = vmul.f32 %v18169_v14, %v18145_v12  ;;  %v6115_v41 = vmul.f32 %v18185_v35, %v18147_v48  ;;  %v18208_v62 = vadd.f32 %v18102_v0, %v5286_v53 }
 0x61b   :  { %v6066_v13 = vor.u32 1.1754944e-38, %v6065_v45  ;;  %8328 = vmatpush.bf16.msrb.mxu0 %v9917_v9  ;;  %v6006_v45 = vor.u32 1.1754944e-38, %v6005_v7  ;;  %v18213_v50 = vadd.f32 1.0, %v10874_v10  ;;  %v9925_v7 = vld [vmem:[#allocation5 + $0x40] sm:$0xff]  ;;  %v20270_v10 = vld [vmem:[#allocation106_spill] sm:$0xff] }
 0x61c   :  { %vm6064_vm3 = vcmp.eq.f32.partialorder %v6063_v32, 8.507059e+37  ;;  %v6176_v9 = vsub.f32 1.0, %v6175_v19  ;;  %v6116_v5 = vsub.f32 1.0, %v6115_v41  ;;  %v9544_v32 = vmul.f32 -1.442695, %v18208_v62  ;;  %8417 = vmatpush.bf16.msrb.mxu1 %v9925_v7 }
 0x61d   :  { %v6067_v1 = vsel %vm6064_vm3, %v6066_v13, %v6062_v16  ;;  %v6007_v51 = vsel %vm6004_vm4, %v6006_v45, %v6002_v29  ;;  %v20271_v29 = vld [vmem:[#allocation105_spill] sm:$0xff]  ;;  %vm6239_vm15 = vweird.f32 %v18213_v50 }
 0x61e   :  { %v18181_v39 = vpop.f32.mrf.mxu2  ;;  %v7876_v2 = vmul.f32 %v6067_v1, %v18082_v40  ;;  %v7872_v13 = vmul.f32 %v6007_v51, %v18014_v38  ;;  %v6117_v19 = vmul.f32 %v18185_v35, %v6116_v5  ;;  %v20267_v51 = vld [vmem:[#allocation69_spill] sm:$0xff]  ;;  %v20268_v38 = vld [vmem:[#allocation68_spill] sm:$0xff]  ;;  %v6183_v5 = vand.u32 2147483647, %v18145_v12 }
 0x61f   :  { %v18183_v30 = vpop.f32.mrf.mxu3 }
 0x620   :  { %v5120_v8 = vpop.f32.mrf.mxu0  ;;  %v8000_v16 = vpack.c.bf16 %v7876_v2, %v7872_v13  ;;  %v6118_v2 = vadd.f32 %v18185_v35, %v6117_v19  ;;  %vm6184_vm0 = vcmp.eq.f32.partialorder %v6183_v5, 8.507059e+37 }
 0x621   :  { %v5209_v47 = vpop.f32.mrf.mxu1  ;;  %v5121_v27 = vadd.f32 %v5120_v8, %v17985_v55  ;;  %5253 = vmatmul.bf16.gmra.mxu1 %v15806_v63  ;;  %v18211_v8 = vadd.f32 1.0, %v10872_v23  ;;  %v5113_v23 = vadd.f32 %v18117_v6, %v17985_v55  ;;  %v20272_v6 = vpack.c.bf16 %v20270_v10, %v20271_v29  ;;  %v20277_v10 = vld [vmem:[#allocation79_spill] sm:$0xff]  ;;  %v20278_v29 = vld [vmem:[#allocation78_spill] sm:$0xff] }
 0x623   :  { %v5210_v54 = vadd.f32 %v5209_v47, %v5121_v27  ;;  %10875 = vrcp.f32 %v18211_v8  ;;  %v6177_v27 = vmul.f32 %v18169_v14, %v6176_v9  ;;  %v20269_v47 = vpack.c.bf16 %v20267_v51, %v20268_v38 }
 0x624   :  { %10877 = vrcp.f32 %v18213_v50  ;;  %v5202_v45 = vadd.f32 %v18119_v33, %v5113_v23  ;;  %v6185_v9 = vand.u32 2147483648, %v18145_v12  ;;  %v6123_v12 = vand.u32 2147483647, %v18147_v48 }
 0x625   :  { %10879 = vpow2.f32 %v9544_v32  ;;  %v6178_v41 = vadd.f32 %v18169_v14, %v6177_v27  ;;  %vm6299_vm13 = vweird.f32 %v18211_v8 }
 0x626   :  { %v5298_v0 = vpop.f32.mrf.mxu2  ;;  %10881 = vpow2.f32 %v9540_v28  ;;  %v5291_v32 = vadd.f32 %v18130_v36, %v5202_v45  ;;  %v6186_v19 = vor.u32 1.1754944e-38, %v6185_v9  ;;  %vm6124_vm2 = vcmp.eq.f32.partialorder %v6123_v12, 8.507059e+37 }
 0x627   :  { %v5387_v53 = vpop.f32.mrf.mxu3  ;;  %v5299_v63 = vadd.f32 %v5298_v0, %v5210_v54  ;;  %v6182_v36 = vsel %vm18257_vm8, %v18169_v14, %v6178_v41  ;;  %v9548_v12 = vmul.f32 -1.442695, %v18122_v61 }
 0x628   :  { %v18223_v43 = vpop.f32.mrf.mxu0  ;;  %v6187_v45 = vsel %vm6184_vm0, %v6186_v19, %v6182_v36  ;;  %v5118_v36 = vadd.f32 %v18155_v44, %v17985_v55 }
 0x629   :  { %v18225_v1 = vpop.f32.mrf.mxu1  ;;  %v18228_v40 = vadd.f32 %v5387_v53, %v5299_v63  ;;  %8329 = vmatmul.bf16.vlgmr.msrb.gmra.mxu0 %v20269_v47  ;;  %v18240_v54 = vpop.eup %10875  ;;  %v6125_v63 = vand.u32 2147483648, %v18147_v48  ;;  %v6122_v48 = vsel %vm18270_vm10, %v18185_v35, %v6118_v2  ;;  %v18281_v47 = vadd.f32 %v18132_v17, %v5291_v32 }
 0x62a   :  { %8507 = vmatmul.bf16.vlgmr.msrb.gmra.mxu2 %v20272_v6  ;;  %8596 = vmatmul.bf16.vlgmr.msrb.gmra.mxu3 %v8000_v16  ;;  %v18252_v33 = vpop.eup %10877  ;;  %v6295_v27 = vmul.f32 %v18240_v54, %v18211_v8  ;;  %v20279_v6 = vpack.c.bf16 %v20277_v10, %v20278_v29  ;;  %v7884_v2 = vmul.f32 %v6187_v45, %v18106_v59  ;;  %v20284_v29 = vld [vmem:[#allocation108_spill] sm:$0xff]  ;;  %vm6300_vm11 = vweird.f32 %v18240_v54 }
 0x62b   :  { %v10880_v13 = vpop.eup %10879  ;;  %v6235_v14 = vmul.f32 %v18252_v33, %v18213_v50  ;;  %v6126_v41 = vor.u32 1.1754944e-38, %v6125_v63  ;;  %v9552_v17 = vmul.f32 -1.442695, %v18281_v47  ;;  %vm6240_vm12 = vweird.f32 %v18252_v33  ;;  %vm18332_vm14 = vmor %vm6299_vm13, %vm6300_vm11 }
 0x62c   :  { %v10882_v38 = vpop.eup %10881  ;;  %v18286_v9 = vadd.f32 1.0, %v10880_v13  ;;  %v6305_v45 = vand.u32 2147483648, %v18211_v8  ;;  %vm18345_vm1 = vmor %vm6239_vm15, %vm6240_vm12 }
 0x62d   :  { %v6127_v16 = vsel %vm6124_vm2, %v6126_v41, %v6122_v48  ;;  %v18288_v35 = vadd.f32 1.0, %v10882_v38  ;;  %v6236_v5 = vsub.f32 1.0, %v6235_v14  ;;  %v20283_v14 = vld [vmem:[#allocation107_spill] sm:$0xff] }
 0x62e   :  { %v18248_v0 = vpop.f32.mrf.mxu2  ;;  %10883 = vrcp.f32 %v18286_v9  ;;  %v7880_v63 = vmul.f32 %v6127_v16, %v18049_v37  ;;  %v20281_v37 = vld [vmem:[#allocation71_spill] sm:$0xff]  ;;  %vm6419_vm7 = vweird.f32 %v18286_v9 }
 0x62f   :  { %v18250_v53 = vpop.f32.mrf.mxu3  ;;  %10885 = vrcp.f32 %v18288_v35  ;;  %v6237_v19 = vmul.f32 %v18252_v33, %v6236_v5  ;;  %vm6359_vm9 = vweird.f32 %v18288_v35 }
 0x630   :  { %v5125_v28 = vpop.f32.mrf.mxu0  ;;  %10887 = vpow2.f32 %v9552_v17  ;;  %v8004_v48 = vpack.c.bf16 %v7884_v2, %v7880_v63  ;;  %v6245_v17 = vand.u32 2147483648, %v18213_v50 }
 0x631   :  { %v5214_v23 = vpop.f32.mrf.mxu1  ;;  %v5126_v51 = vadd.f32 %v5125_v28, %v17985_v55  ;;  %8418 = vmatmul.bf16.vlgmr.msrb.gmra.mxu1 %v20279_v6  ;;  %v6296_v28 = vsub.f32 1.0, %v6295_v27  ;;  %v20285_v6 = vpack.c.bf16 %v20283_v14, %v20284_v29  ;;  %10889 = vpow2.f32 %v9548_v12  ;;  %v20291_v14 = vld [vmem:[#allocation80_spill] sm:$0xff] }
 0x633   :  { %v5215_v7 = vadd.f32 %v5214_v23, %v5126_v51  ;;  %v6297_v13 = vmul.f32 %v18240_v54, %v6296_v28  ;;  %v20280_v51 = vld [vmem:[#allocation70_spill] sm:$0xff]  ;;  %v6303_v28 = vand.u32 2147483647, %v18211_v8  ;;  %v6243_v8 = vand.u32 2147483647, %v18213_v50 }
 0x634   :  { %v20282_v38 = vpack.c.bf16 %v20280_v51, %v20281_v37  ;;  %v18315_v41 = vpop.eup %10883 }
 0x635   :  { %v6298_v44 = vadd.f32 %v18240_v54, %v6297_v13  ;;  %v6415_v63 = vmul.f32 %v18315_v41, %v18286_v9  ;;  %vm6304_vm3 = vcmp.eq.f32.partialorder %v6303_v28, 8.507059e+37  ;;  %vm6244_vm4 = vcmp.eq.f32.partialorder %v6243_v8, 8.507059e+37 }
 0x636   :  { %v5303_v32 = vpop.f32.mrf.mxu2  ;;  %v9556_v8 = vmul.f32 -1.442695, %v18160_v46  ;;  %vm6420_vm5 = vweird.f32 %v18315_v41 }
 0x637   :  { %v5392_v49 = vpop.f32.mrf.mxu3  ;;  %v5304_v10 = vadd.f32 %v5303_v32, %v5215_v7  ;;  %v6238_v7 = vadd.f32 %v18252_v33, %v6237_v19  ;;  %v6306_v19 = vor.u32 1.1754944e-38, %v6305_v45  ;;  %v6416_v32 = vsub.f32 1.0, %v6415_v63  ;;  %vm18407_vm8 = vmor %vm6419_vm7, %vm6420_vm5 }
 0x638   :  { %v18298_v27 = vpop.f32.mrf.mxu0 }
 0x639   :  { %v18300_v59 = vpop.f32.mrf.mxu1  ;;  %v18303_v23 = vadd.f32 %v5392_v49, %v5304_v10  ;;  %8334 = vmatmul.bf16.gmra.mxu0 %v20282_v38  ;;  %v5207_v49 = vadd.f32 %v18157_v21, %v5118_v36  ;;  %v18327_v21 = vpop.eup %10885  ;;  %v6242_v50 = vsel %vm18345_vm1, %v18252_v33, %v6238_v7 }
 0x63a   :  { %8512 = vmatmul.bf16.gmra.mxu2 %v20285_v6  ;;  %8601 = vmatmul.bf16.gmra.mxu3 %v8004_v48  ;;  %v10888_v10 = vpop.eup %10887  ;;  %v20290_v48 = vld [vmem:[#allocation63_spill] sm:$0xff]  ;;  %v6246_v6 = vor.u32 1.1754944e-38, %v6245_v17  ;;  %vm6360_vm6 = vweird.f32 %v18327_v21 }
 0x63b   :  { %v5296_v16 = vadd.f32 %v18181_v39, %v5207_v49  ;;  %v6302_v39 = vsel %vm18332_vm14, %v18240_v54, %v6298_v44  ;;  %v10890_v37 = vpop.eup %10889  ;;  %v6355_v54 = vmul.f32 %v18327_v21, %v18288_v35  ;;  %v20292_v29 = vpack.c.bf16 %v20290_v48, %v20291_v14  ;;  %v20297_v14 = vld [vmem:[#allocation110_spill] sm:$0xff]  ;;  %vm18420_vm10 = vmor %vm6359_vm9, %vm6360_vm6 }
 0x63c   :  { %v6307_v44 = vsel %vm6304_vm3, %v6306_v19, %v6302_v39  ;;  %v18361_v49 = vadd.f32 1.0, %v10888_v10  ;;  %v18363_v33 = vadd.f32 1.0, %v10890_v37  ;;  %v6417_v10 = vmul.f32 %v18315_v41, %v6416_v32 }
 0x63d   :  { %v18356_v38 = vadd.f32 %v18183_v30, %v5296_v16  ;;  %v7892_v7 = vmul.f32 %v6307_v44, %v18142_v60  ;;  %v6356_v28 = vsub.f32 1.0, %v6355_v54  ;;  %v5123_v39 = vadd.f32 %v18223_v43, %v17985_v55  ;;  %v20296_v54 = vld [vmem:[#allocation109_spill] sm:$0xff] }
 0x63e   :  { %v18323_v2 = vpop.f32.mrf.mxu2  ;;  %10891 = vrcp.f32 %v18361_v49  ;;  %v6418_v43 = vadd.f32 %v18315_v41, %v6417_v10  ;;  %vm6539_vm13 = vweird.f32 %v18361_v49  ;;  %vm6479_vm15 = vweird.f32 %v18363_v33 }
 0x63f   :  { %v18325_v5 = vpop.f32.mrf.mxu3  ;;  %v9560_v30 = vmul.f32 -1.442695, %v18356_v38  ;;  %10893 = vrcp.f32 %v18363_v33  ;;  %v6357_v19 = vmul.f32 %v18327_v21, %v6356_v28 }
 0x640   :  { %v5130_v13 = vpop.f32.mrf.mxu0 }
 0x641   :  { %v5219_v12 = vpop.f32.mrf.mxu1  ;;  %v5131_v51 = vadd.f32 %v5130_v13, %v17985_v55  ;;  %8423 = vmatmul.bf16.gmra.mxu1 %v20292_v29  ;;  %v6247_v13 = vsel %vm6244_vm4, %v6246_v6, %v6242_v50  ;;  %10895 = vpow2.f32 %v9560_v30  ;;  %v20298_v29 = vpack.c.bf16 %v20296_v54, %v20297_v14  ;;  %v20304_v54 = vld [vmem:[#allocation81_spill] sm:$0xff] }
 0x642   :  { %v7888_v17 = vmul.f32 %v6247_v13, %v18072_v34  ;;  %v20294_v34 = vld [vmem:[#allocation73_spill] sm:$0xff]  ;;  %10897 = vpow2.f32 %v9556_v8  ;;  %v5212_v6 = vadd.f32 %v18225_v1, %v5123_v39  ;;  %v6358_v32 = vadd.f32 %v18327_v21, %v6357_v19 }
 0x643   :  { %v5220_v45 = vadd.f32 %v5219_v12, %v5131_v51  ;;  %v20293_v51 = vld [vmem:[#allocation72_spill] sm:$0xff]  ;;  %v6423_v13 = vand.u32 2147483647, %v18286_v9 }
 0x644   :  { %v20295_v37 = vpack.c.bf16 %v20293_v51, %v20294_v34  ;;  %v8008_v50 = vpack.c.bf16 %v7892_v7, %v7888_v17  ;;  %v18390_v44 = vpop.eup %10891  ;;  %v5301_v7 = vadd.f32 %v18248_v0, %v5212_v6  ;;  %v6422_v0 = vsel %vm18407_vm8, %v18315_v41, %v6418_v43 }
 0x645   :  { %v18402_v1 = vpop.eup %10893  ;;  %v6535_v17 = vmul.f32 %v18390_v44, %v18361_v49  ;;  %vm6424_vm0 = vcmp.eq.f32.partialorder %v6423_v13, 8.507059e+37  ;;  %vm6540_vm11 = vweird.f32 %v18390_v44 }
 0x646   :  { %v5308_v16 = vpop.f32.mrf.mxu2  ;;  %v6475_v41 = vmul.f32 %v18402_v1, %v18363_v33  ;;  %vm6480_vm12 = vweird.f32 %v18402_v1  ;;  %vm18482_vm14 = vmor %vm6539_vm13, %vm6540_vm11 }
 0x647   :  { %v5397_v36 = vpop.f32.mrf.mxu3  ;;  %v5309_v48 = vadd.f32 %v5308_v16, %v5220_v45  ;;  %v6425_v45 = vand.u32 2147483648, %v18286_v9  ;;  %v6365_v16 = vand.u32 2147483648, %v18288_v35  ;;  %v6363_v9 = vand.u32 2147483647, %v18288_v35  ;;  %vm18495_vm1 = vmor %vm6479_vm15, %vm6480_vm12 }
 0x648   :  { %v18373_v63 = vpop.f32.mrf.mxu0  ;;  %v6362_v35 = vsel %vm18420_vm10, %v18327_v21, %v6358_v32  ;;  %v6476_v13 = vsub.f32 1.0, %v6475_v41  ;;  %v20309_v41 = vld [vmem:[#allocation111_spill] sm:$0xff] }
 0x649   :  { %v18375_v60 = vpop.f32.mrf.mxu1  ;;  %v18378_v12 = vadd.f32 %v5397_v36, %v5309_v48  ;;  %8339 = vmatmul.bf16.gmra.mxu0 %v20295_v37  ;;  %v10896_v48 = vpop.eup %10895  ;;  %v6426_v19 = vor.u32 1.1754944e-38, %v6425_v45  ;;  %v18431_v37 = vadd.f32 %v18250_v53, %v5301_v7  ;;  %vm6364_vm2 = vcmp.eq.f32.partialorder %v6363_v9, 8.507059e+37 }
 0x64a   :  { %8517 = vmatmul.bf16.gmra.mxu2 %v20298_v29  ;;  %8606 = vmatmul.bf16.gmra.mxu3 %v8008_v50  ;;  %v10898_v34 = vpop.eup %10897  ;;  %v20303_v50 = vld [vmem:[#allocation64_spill] sm:$0xff]  ;;  %v6366_v29 = vor.u32 1.1754944e-38, %v6365_v16  ;;  %v18436_v6 = vadd.f32 1.0, %v10896_v48  ;;  %v6536_v36 = vsub.f32 1.0, %v6535_v17  ;;  %v9564_v9 = vmul.f32 -1.442695, %v18228_v40 }
 0x64b   :  { %v20305_v14 = vpack.c.bf16 %v20303_v50, %v20304_v54  ;;  %v6427_v43 = vsel %vm6424_vm0, %v6426_v19, %v6422_v0  ;;  %v18438_v21 = vadd.f32 1.0, %v10898_v34  ;;  %v9568_v53 = vmul.f32 -1.442695, %v18431_v37 }
 0x64c   :  { %v7900_v32 = vmul.f32 %v6427_v43, %v18208_v62  ;;  %10899 = vrcp.f32 %v18436_v6  ;;  %v6537_v48 = vmul.f32 %v18390_v44, %v6536_v36  ;;  %v5128_v0 = vadd.f32 %v18298_v27, %v17985_v55 }
 0x64d   :  { %10901 = vrcp.f32 %v18438_v21  ;;  %v6477_v19 = vmul.f32 %v18402_v1, %v6476_v13  ;;  %v20310_v54 = vpack.c.bf16 %v17528_v31, %v20309_v41  ;;  %v6545_v43 = vand.u32 2147483648, %v18361_v49 }
 0x64e   :  { %v18398_v28 = vpop.f32.mrf.mxu2  ;;  %10903 = vpow2.f32 %v9568_v53  ;;  %v6538_v27 = vadd.f32 %v18390_v44, %v6537_v48  ;;  %v6543_v31 = vand.u32 2147483647, %v18361_v49  ;;  %v6485_v13 = vand.u32 2147483648, %v18363_v33 }
 0x64f   :  { %v18400_v30 = vpop.f32.mrf.mxu3  ;;  %10905 = vpow2.f32 %v9564_v9  ;;  %v6483_v49 = vand.u32 2147483647, %v18363_v33  ;;  %v6546_v9 = vor.u32 1.1754944e-38, %v6545_v43  ;;  %vm6659_vm7 = vweird.f32 %v18436_v6 }
 0x650   :  { %v5135_v10 = vpop.f32.mrf.mxu0  ;;  %vm6544_vm3 = vcmp.eq.f32.partialorder %v6543_v31, 8.507059e+37  ;;  %v6486_v41 = vor.u32 1.1754944e-38, %v6485_v13  ;;  %vm6599_vm9 = vweird.f32 %v18438_v21 }
 0x651   :  { %v5224_v8 = vpop.f32.mrf.mxu1  ;;  %v5136_v51 = vadd.f32 %v5135_v10, %v17985_v55  ;;  %8428 = vmatmul.bf16.gmra.mxu1 %v20305_v14  ;;  %v6367_v10 = vsel %vm6364_vm2, %v6366_v29, %v6362_v35  ;;  %v5217_v14 = vadd.f32 %v18300_v59, %v5128_v0  ;;  %vm6484_vm4 = vcmp.eq.f32.partialorder %v6483_v49, 8.507059e+37 }
 0x652   :  { %v7896_v16 = vmul.f32 %v6367_v10, %v18094_v52  ;;  %v20307_v52 = vld [vmem:[#allocation11_spill] sm:$0xff]  ;;  %v18465_v29 = vpop.eup %10899  ;;  %v9572_v49 = vmul.f32 -1.442695, %v18303_v23 }
 0x653   :  { %v5225_v45 = vadd.f32 %v5224_v8, %v5136_v51  ;;  %v20306_v51 = vld [vmem:[#allocation74_spill] sm:$0xff]  ;;  %v5306_v36 = vadd.f32 %v18323_v2, %v5217_v14  ;;  %v18477_v59 = vpop.eup %10901  ;;  %v6542_v2 = vsel %vm18482_vm14, %v18390_v44, %v6538_v27  ;;  %vm6660_vm5 = vweird.f32 %v18465_v29 }
 0x654   :  { %v20308_v34 = vpack.c.bf16 %v20306_v51, %v20307_v52  ;;  %v8012_v35 = vpack.c.bf16 %v7900_v32, %v7896_v16  ;;  %v6595_v44 = vmul.f32 %v18477_v59, %v18438_v21  ;;  %v20315_v52 = vld [vmem:[#allocation82_spill] sm:$0xff]  ;;  %vm6600_vm6 = vweird.f32 %v18477_v59  ;;  %vm18557_vm8 = vmor %vm6659_vm7, %vm6660_vm5 }
 0x655   :  { %v18506_v51 = vadd.f32 %v18325_v5, %v5306_v36  ;;  %vm18570_vm10 = vmor %vm6599_vm9, %vm6600_vm6 }
 0x656   :  { %v5313_v7 = vpop.f32.mrf.mxu2  ;;  %v6596_v31 = vsub.f32 1.0, %v6595_v44  ;;  %v20321_v44 = vpack.c.bf16 %v17575_v18, %v17578_v26  ;;  %v6663_v18 = vand.u32 2147483647, %v18436_v6 }
 0x657   :  { %v5402_v39 = vpop.f32.mrf.mxu3  ;;  %v5314_v50 = vadd.f32 %v5313_v7, %v5225_v45  ;;  %v6478_v45 = vadd.f32 %v18402_v1, %v6477_v19  ;;  %v10904_v7 = vpop.eup %10903  ;;  %v9576_v5 = vmul.f32 -1.442695, %v18506_v51 }
 0x658   :  { %v18448_v17 = vpop.f32.mrf.mxu0  ;;  %v10906_v19 = vpop.eup %10905  ;;  %v18511_v27 = vadd.f32 1.0, %v10904_v7  ;;  %vm6664_vm0 = vcmp.eq.f32.partialorder %v6663_v18, 8.507059e+37 }
 0x659   :  { %v18450_v62 = vpop.f32.mrf.mxu1  ;;  %v18453_v8 = vadd.f32 %v5402_v39, %v5314_v50  ;;  %8344 = vmatmul.bf16.gmra.mxu0 %v20308_v34  ;;  %v6655_v39 = vmul.f32 %v18465_v29, %v18436_v6  ;;  %v6482_v33 = vsel %vm18495_vm1, %v18402_v1, %v6478_v45  ;;  %v20316_v34 = vld [vmem:[#allocation83_spill] sm:$0xff]  ;;  %v18513_v1 = vadd.f32 1.0, %v10906_v19 }
 0x65a   :  { %8522 = vmatmul.bf16.gmra.mxu2 %v20310_v54  ;;  %8611 = vmatmul.bf16.gmra.mxu3 %v8012_v35  ;;  %v20317_v35 = vpack.c.bf16 %v20315_v52, %v20316_v34  ;;  %v6547_v54 = vsel %vm6544_vm3, %v6546_v9, %v6542_v2  ;;  %v6487_v53 = vsel %vm6484_vm4, %v6486_v41, %v6482_v33  ;;  %10907 = vrcp.f32 %v18511_v27 }
 0x65b   :  { %v6656_v43 = vsub.f32 1.0, %v6655_v39  ;;  %v7908_v45 = vmul.f32 %v6547_v54, %v18281_v47  ;;  %v7904_v13 = vmul.f32 %v6487_v53, %v18122_v61  ;;  %v5133_v2 = vadd.f32 %v18373_v63, %v17985_v55  ;;  %v20319_v61 = vld [vmem:[#allocation13_spill] sm:$0xff] }
 0x65c   :  { %10909 = vrcp.f32 %v18513_v1  ;;  %v6597_v9 = vmul.f32 %v18477_v59, %v6596_v31  ;;  %vm6779_vm13 = vweird.f32 %v18511_v27  ;;  %vm6719_vm15 = vweird.f32 %v18513_v1 }
 0x65d   :  { %v6657_v7 = vmul.f32 %v18465_v29, %v6656_v43  ;;  %10911 = vpow2.f32 %v9576_v5  ;;  %v8016_v33 = vpack.c.bf16 %v7908_v45, %v7904_v13  ;;  %v5222_v52 = vadd.f32 %v18375_v60, %v5133_v2  ;;  %v20326_v2 = vld [vmem:[#allocation84_spill] sm:$0xff] }
 0x65e   :  { %v18473_v10 = vpop.f32.mrf.mxu2  ;;  %10913 = vpow2.f32 %v9572_v49  ;;  %v6598_v41 = vadd.f32 %v18477_v59, %v6597_v9  ;;  %v6605_v43 = vand.u32 2147483648, %v18438_v21  ;;  %v20327_v9 = vld [vmem:[#allocation85_spill] sm:$0xff] }
 0x65f   :  { %v18475_v32 = vpop.f32.mrf.mxu3  ;;  %v6658_v63 = vadd.f32 %v18465_v29, %v6657_v7  ;;  %v5311_v26 = vadd.f32 %v18398_v28, %v5222_v52 }
 0x660   :  { %v5140_v50 = vpop.f32.mrf.mxu0  ;;  %v18540_v34 = vpop.eup %10907 }
 0x661   :  { %v5229_v16 = vpop.f32.mrf.mxu1  ;;  %v5141_v0 = vadd.f32 %v5140_v50, %v17985_v55  ;;  %8433 = vmatmul.bf16.gmra.mxu1 %v20317_v35  ;;  %v6665_v35 = vand.u32 2147483648, %v18436_v6  ;;  %v6603_v6 = vand.u32 2147483647, %v18438_v21  ;;  %v6662_v28 = vsel %vm18557_vm8, %v18465_v29, %v6658_v63 }
 0x662   :  { %v18552_v60 = vpop.eup %10909  ;;  %v6775_v31 = vmul.f32 %v18540_v34, %v18511_v27  ;;  %v6602_v21 = vsel %vm18570_vm10, %v18477_v59, %v6598_v41  ;;  %v18581_v49 = vadd.f32 %v18400_v30, %v5311_v26  ;;  %vm6780_vm11 = vweird.f32 %v18540_v34 }
 0x663   :  { %v5230_v14 = vadd.f32 %v5229_v16, %v5141_v0  ;;  %v20318_v0 = vld [vmem:[#allocation14_spill] sm:$0xff]  ;;  %v10912_v45 = vpop.eup %10911  ;;  %v6715_v29 = vmul.f32 %v18552_v60, %v18513_v1  ;;  %vm6604_vm2 = vcmp.eq.f32.partialorder %v6603_v6, 8.507059e+37  ;;  %v9580_v6 = vmul.f32 -1.442695, %v18378_v12  ;;  %vm18632_vm14 = vmor %vm6779_vm13, %vm6780_vm11 }
 0x664   :  { %v20320_v19 = vpack.c.bf16 %v20318_v0, %v20319_v61  ;;  %v10914_v7 = vpop.eup %10913  ;;  %v20328_v0 = vpack.c.bf16 %v20326_v2, %v20327_v9  ;;  %v6606_v61 = vor.u32 1.1754944e-38, %v6605_v43  ;;  %v6776_v63 = vsub.f32 1.0, %v6775_v31 }
 0x665   :  { %v18588_v59 = vadd.f32 1.0, %v10914_v7  ;;  %v6716_v41 = vsub.f32 1.0, %v6715_v29  ;;  %v9584_v30 = vmul.f32 -1.442695, %v18581_v49  ;;  %v20332_v7 = vpack.c.bf16 %v17618_v15, %v17621_v24 }
 0x666   :  { %v5318_v36 = vpop.f32.mrf.mxu2  ;;  %v6607_v52 = vsel %vm6604_vm2, %v6606_v61, %v6602_v21  ;;  %vm6720_vm12 = vweird.f32 %v18552_v60  ;;  %v6785_v2 = vand.u32 2147483648, %v18511_v27  ;;  %v6783_v15 = vand.u32 2147483647, %v18511_v27 }
 0x667   :  { %v5407_v50 = vpop.f32.mrf.mxu3  ;;  %v5319_v48 = vadd.f32 %v5318_v36, %v5230_v14  ;;  %v7912_v43 = vmul.f32 %v6607_v52, %v18160_v46  ;;  %v20330_v46 = vld [vmem:[#allocation15_spill] sm:$0xff]  ;;  %v6723_v27 = vand.u32 2147483647, %v18513_v1  ;;  %vm18645_vm1 = vmor %vm6719_vm15, %vm6720_vm12  ;;  %vm6839_vm9 = vweird.f32 %v18588_v59 }
 0x668   :  { %v18523_v39 = vpop.f32.mrf.mxu0  ;;  %vm6784_vm3 = vcmp.eq.f32.partialorder %v6783_v15, 8.507059e+37 }
 0x669   :  { %v18525_v47 = vpop.f32.mrf.mxu1  ;;  %v18528_v16 = vadd.f32 %v5407_v50, %v5319_v48  ;;  %8349 = vmatmul.bf16.gmra.mxu0 %v20320_v19  ;;  %v6666_v48 = vor.u32 1.1754944e-38, %v6665_v35  ;;  %v20329_v50 = vld [vmem:[#allocation12_spill] sm:$0xff]  ;;  %vm6724_vm4 = vcmp.eq.f32.partialorder %v6723_v27, 8.507059e+37 }
 0x66a   :  { %8527 = vmatmul.bf16.gmra.mxu2 %v20321_v44  ;;  %8616 = vmatmul.bf16.gmra.mxu3 %v8016_v33  ;;  %v18586_v33 = vadd.f32 1.0, %v10912_v45  ;;  %v6777_v45 = vmul.f32 %v18540_v34, %v6776_v63 }
 0x66b   :  { %v6667_v19 = vsel %vm6664_vm0, %v6666_v48, %v6662_v28  ;;  %v5138_v28 = vadd.f32 %v18448_v17, %v17985_v55  ;;  %v20331_v48 = vpack.c.bf16 %v20329_v50, %v20330_v46 }
 0x66c   :  { %v7916_v35 = vmul.f32 %v6667_v19, %v18356_v38  ;;  %10915 = vrcp.f32 %v18586_v33  ;;  %v6778_v17 = vadd.f32 %v18540_v34, %v6777_v45  ;;  %v6725_v19 = vand.u32 2147483648, %v18513_v1  ;;  %v20337_v45 = vld [vmem:[#allocation86_spill] sm:$0xff] }
 0x66d   :  { %10917 = vrcp.f32 %v18588_v59  ;;  %v5227_v21 = vadd.f32 %v18450_v62, %v5138_v28  ;;  %vm6899_vm7 = vweird.f32 %v18586_v33 }
 0x66e   :  { %v18548_v54 = vpop.f32.mrf.mxu2  ;;  %10919 = vpow2.f32 %v9584_v30 }
 0x66f   :  { %v18550_v14 = vpop.f32.mrf.mxu3  ;;  %10921 = vpow2.f32 %v9580_v6  ;;  %v5316_v24 = vadd.f32 %v18473_v10, %v5227_v21  ;;  %v6782_v10 = vsel %vm18632_vm14, %v18540_v34, %v6778_v17  ;;  %v20338_v6 = vld [vmem:[#allocation87_spill] sm:$0xff] }
 0x670   :  { %v5145_v5 = vpop.f32.mrf.mxu0  ;;  %v20339_v28 = vpack.c.bf16 %v20337_v45, %v20338_v6 }
 0x671   :  { %v5234_v36 = vpop.f32.mrf.mxu1  ;;  %v5146_v13 = vadd.f32 %v5145_v5, %v17985_v55  ;;  %8438 = vmatmul.bf16.gmra.mxu1 %v20328_v0 }
 0x672   :  { %v18615_v29 = vpop.eup %10915 }
 0x673   :  { %v5235_v44 = vadd.f32 %v5234_v36, %v5146_v13  ;;  %v6717_v36 = vmul.f32 %v18552_v60, %v6716_v41  ;;  %v8020_v13 = vpack.c.bf16 %v7916_v35, %v7912_v43  ;;  %v18627_v62 = vpop.eup %10917  ;;  %v6895_v52 = vmul.f32 %v18615_v29, %v18586_v33 }
 0x674   :  { %v10920_v63 = vpop.eup %10919  ;;  %v6835_v34 = vmul.f32 %v18627_v62, %v18588_v59  ;;  %v18656_v43 = vadd.f32 %v18475_v32, %v5316_v24  ;;  %vm6900_vm5 = vweird.f32 %v18615_v29  ;;  %vm6840_vm6 = vweird.f32 %v18627_v62 }
 0x675   :  { %v6718_v9 = vadd.f32 %v18552_v60, %v6717_v36  ;;  %v6726_v36 = vor.u32 1.1754944e-38, %v6725_v19  ;;  %v18661_v46 = vadd.f32 1.0, %v10920_v63  ;;  %v5143_v63 = vadd.f32 %v18523_v39, %v17985_v55  ;;  %vm18707_vm8 = vmor %vm6899_vm7, %vm6900_vm5 }
 0x676   :  { %v5323_v18 = vpop.f32.mrf.mxu2  ;;  %v6836_v21 = vsub.f32 1.0, %v6835_v34  ;;  %v9592_v32 = vmul.f32 -1.442695, %v18656_v43  ;;  %vm18720_vm10 = vmor %vm6839_vm9, %vm6840_vm6 }
 0x677   :  { %v5412_v26 = vpop.f32.mrf.mxu3  ;;  %v5324_v53 = vadd.f32 %v5323_v18, %v5235_v44  ;;  %v6786_v18 = vor.u32 1.1754944e-38, %v6785_v2  ;;  %v6722_v1 = vsel %vm18645_vm1, %v18552_v60, %v6718_v9  ;;  %10923 = vrcp.f32 %v18661_v46 }
 0x678   :  { %v18598_v31 = vpop.f32.mrf.mxu0  ;;  %v9588_v44 = vmul.f32 -1.442695, %v18453_v8  ;;  %vm7019_vm13 = vweird.f32 %v18661_v46 }
 0x679   :  { %v18600_v38 = vpop.f32.mrf.mxu1  ;;  %v18603_v5 = vadd.f32 %v5412_v26, %v5324_v53  ;;  %8354 = vmatmul.bf16.gmra.mxu0 %v20331_v48  ;;  %v10922_v53 = vpop.eup %10921  ;;  %v6787_v50 = vsel %vm6784_vm3, %v6786_v18, %v6782_v10  ;;  %v20343_v18 = vpack.c.bf16 %v17663_v42, %v17666_v22  ;;  %v6903_v42 = vand.u32 2147483647, %v18586_v33 }
 0x67a   :  { %8532 = vmatmul.bf16.gmra.mxu2 %v20332_v7  ;;  %8621 = vmatmul.bf16.gmra.mxu3 %v8020_v13  ;;  %v6896_v13 = vsub.f32 1.0, %v6895_v52  ;;  %v6727_v7 = vsel %vm6724_vm4, %v6726_v36, %v6722_v1  ;;  %v18663_v60 = vadd.f32 1.0, %v10922_v53  ;;  %v7924_v17 = vmul.f32 %v6787_v50, %v18431_v37 }
 0x67b   :  { %v7920_v24 = vmul.f32 %v6727_v7, %v18228_v40  ;;  %v6837_v52 = vmul.f32 %v18627_v62, %v6836_v21  ;;  %v20341_v40 = vld [vmem:[#allocation18_spill] sm:$0xff]  ;;  %v6905_v1 = vand.u32 2147483648, %v18586_v33  ;;  %v6843_v33 = vand.u32 2147483647, %v18588_v59 }
 0x67c   :  { %v6897_v19 = vmul.f32 %v18615_v29, %v6896_v13  ;;  %10925 = vrcp.f32 %v18663_v60  ;;  %vm6904_vm0 = vcmp.eq.f32.partialorder %v6903_v42, 8.507059e+37  ;;  %vm6959_vm15 = vweird.f32 %v18663_v60 }
 0x67d   :  { %10927 = vpow2.f32 %v9592_v32  ;;  %v8024_v30 = vpack.c.bf16 %v7924_v17, %v7920_v24  ;;  %v18690_v53 = vpop.eup %10923  ;;  %v6838_v34 = vadd.f32 %v18627_v62, %v6837_v52  ;;  %v6906_v21 = vor.u32 1.1754944e-38, %v6905_v1  ;;  %v20349_v24 = vld [vmem:[#allocation89_spill] sm:$0xff] }
 0x67e   :  { %v18623_v0 = vpop.f32.mrf.mxu2  ;;  %v6898_v39 = vadd.f32 %v18615_v29, %v6897_v19  ;;  %10929 = vpow2.f32 %v9588_v44  ;;  %vm6844_vm2 = vcmp.eq.f32.partialorder %v6843_v33, 8.507059e+37  ;;  %vm7020_vm11 = vweird.f32 %v18690_v53 }
 0x67f   :  { %v18625_v61 = vpop.f32.mrf.mxu3  ;;  %vm18782_vm14 = vmor %vm7019_vm13, %vm7020_vm11 }
 0x680   :  { %v5150_v35 = vpop.f32.mrf.mxu0 }
 0x681   :  { %v5239_v41 = vpop.f32.mrf.mxu1  ;;  %v5151_v26 = vadd.f32 %v5150_v35, %v17985_v55  ;;  %8443 = vmatmul.bf16.gmra.mxu1 %v20339_v28  ;;  %v20340_v35 = vld [vmem:[#allocation17_spill] sm:$0xff]  ;;  %v6845_v28 = vand.u32 2147483648, %v18588_v59  ;;  %v6842_v59 = vsel %vm18720_vm10, %v18627_v62, %v6838_v34 }
 0x683   :  { %v5240_v48 = vadd.f32 %v5239_v41, %v5151_v26  ;;  %v20342_v41 = vpack.c.bf16 %v20340_v35, %v20341_v40  ;;  %v5232_v26 = vadd.f32 %v18525_v47, %v5143_v63  ;;  %v18702_v47 = vpop.eup %10925  ;;  %v6846_v44 = vor.u32 1.1754944e-38, %v6845_v28 }
 0x684   :  { %v10928_v50 = vpop.eup %10927  ;;  %v5148_v28 = vadd.f32 %v18598_v31, %v17985_v55  ;;  %vm6960_vm12 = vweird.f32 %v18702_v47 }
 0x685   :  { %v5321_v22 = vadd.f32 %v18548_v54, %v5232_v26  ;;  %v6902_v54 = vsel %vm18707_vm8, %v18615_v29, %v6898_v39  ;;  %v6955_v29 = vmul.f32 %v18702_v47, %v18663_v60  ;;  %v18736_v52 = vadd.f32 1.0, %v10928_v50  ;;  %vm18795_vm1 = vmor %vm6959_vm15, %vm6960_vm12 }
 0x686   :  { %v5328_v2 = vpop.f32.mrf.mxu2  ;;  %v6907_v63 = vsel %vm6904_vm0, %v6906_v21, %v6902_v54  ;;  %v20351_v54 = vld [vmem:[#allocation16_spill] sm:$0xff]  ;;  %v5237_v17 = vadd.f32 %v18600_v38, %v5148_v28 }
 0x687   :  { %v5417_v9 = vpop.f32.mrf.mxu3  ;;  %v5329_v15 = vadd.f32 %v5328_v2, %v5240_v48  ;;  %v7015_v48 = vmul.f32 %v18690_v53, %v18661_v46  ;;  %v10930_v2 = vpop.eup %10929  ;;  %10931 = vrcp.f32 %v18736_v52  ;;  %vm7139_vm7 = vweird.f32 %v18736_v52 }
 0x688   :  { %v18673_v27 = vpop.f32.mrf.mxu0  ;;  %v18738_v62 = vadd.f32 1.0, %v10930_v2 }
 0x689   :  { %v18675_v37 = vpop.f32.mrf.mxu1  ;;  %v18678_v10 = vadd.f32 %v5417_v9, %v5329_v15  ;;  %8359 = vmatmul.bf16.gmra.mxu0 %v20342_v41  ;;  %v18731_v9 = vadd.f32 %v18550_v14, %v5321_v22  ;;  %v20348_v15 = vld [vmem:[#allocation88_spill] sm:$0xff]  ;;  %v7016_v40 = vsub.f32 1.0, %v7015_v48  ;;  %v6847_v41 = vsel %vm6844_vm2, %v6846_v44, %v6842_v59 }
 0x68a   :  { %8537 = vmatmul.bf16.gmra.mxu2 %v20343_v18  ;;  %8626 = vmatmul.bf16.gmra.mxu3 %v8024_v30  ;;  %v20350_v19 = vpack.c.bf16 %v20348_v15, %v20349_v24  ;;  %v7932_v30 = vmul.f32 %v6907_v63, %v18506_v51  ;;  %v6956_v18 = vsub.f32 1.0, %v6955_v29  ;;  %v7928_v34 = vmul.f32 %v6847_v41, %v18303_v23  ;;  %v20352_v23 = vld [vmem:[#allocation19_spill] sm:$0xff] }
 0x68b   :  { %v9600_v14 = vmul.f32 -1.442695, %v18731_v9  ;;  %v7017_v42 = vmul.f32 %v18690_v53, %v7016_v40  ;;  %v9596_v22 = vmul.f32 -1.442695, %v18528_v16  ;;  %10933 = vrcp.f32 %v18738_v62 }
 0x68c   :  { %v6957_v33 = vmul.f32 %v18702_v47, %v6956_v18  ;;  %v20353_v48 = vpack.c.bf16 %v20351_v54, %v20352_v23  ;;  %v6965_v15 = vand.u32 2147483648, %v18663_v60  ;;  %v7145_v40 = vand.u32 2147483648, %v18736_v52 }
 0x68d   :  { %10935 = vpow2.f32 %v9600_v14  ;;  %v7018_v31 = vadd.f32 %v18690_v53, %v7017_v42  ;;  %v18765_v21 = vpop.eup %10931  ;;  %vm7079_vm9 = vweird.f32 %v18738_v62 }
 0x68e   :  { %v18698_v45 = vpop.f32.mrf.mxu2  ;;  %10937 = vpow2.f32 %v9596_v22  ;;  %v6958_v2 = vadd.f32 %v18702_v47, %v6957_v33  ;;  %v7135_v44 = vmul.f32 %v18765_v21, %v18736_v52  ;;  %vm7140_vm5 = vweird.f32 %v18765_v21 }
 0x68f   :  { %v18700_v6 = vpop.f32.mrf.mxu3  ;;  %vm18857_vm8 = vmor %vm7139_vm7, %vm7140_vm5 }
 0x690   :  { %v5155_v13 = vpop.f32.mrf.mxu0  ;;  %v7136_v33 = vsub.f32 1.0, %v7135_v44  ;;  %v20365_v44 = vpack.c.bf16 %v17751_v20, %v17754_v4  ;;  %v7143_v20 = vand.u32 2147483647, %v18736_v52  ;;  %v7083_v52 = vand.u32 2147483647, %v18738_v62 }
 0x691   :  { %v5244_v7 = vpop.f32.mrf.mxu1  ;;  %v5156_v32 = vadd.f32 %v5155_v13, %v17985_v55  ;;  %8448 = vmatmul.bf16.gmra.mxu1 %v20350_v19  ;;  %v8028_v13 = vpack.c.bf16 %v7932_v30, %v7928_v34  ;;  %v18777_v38 = vpop.eup %10933  ;;  %v6966_v34 = vor.u32 1.1754944e-38, %v6965_v15 }
 0x692   :  { %vm7080_vm6 = vweird.f32 %v18777_v38  ;;  %vm7144_vm0 = vcmp.eq.f32.partialorder %v7143_v20, 8.507059e+37  ;;  %vm7084_vm2 = vcmp.eq.f32.partialorder %v7083_v52, 8.507059e+37  ;;  %v20376_v52 = vpack.c.bf16 %v17794_v58, %v17797_v57 }
 0x693   :  { %v5245_v35 = vadd.f32 %v5244_v7, %v5156_v32  ;;  %v20354_v7 = vpack.c.bf16 %v17706_v11, %v17709_v56  ;;  %v7025_v32 = vand.u32 2147483648, %v18661_v46  ;;  %v7023_v11 = vand.u32 2147483647, %v18661_v46  ;;  %v10936_v19 = vpop.eup %10935  ;;  %vm18870_vm10 = vmor %vm7079_vm9, %vm7080_vm6 }
 0x694   :  { %v5326_v56 = vadd.f32 %v18623_v0, %v5237_v17  ;;  %v6963_v46 = vand.u32 2147483647, %v18663_v60  ;;  %v7022_v0 = vsel %vm18782_vm14, %v18690_v53, %v7018_v31  ;;  %v10938_v18 = vpop.eup %10937  ;;  %v6962_v60 = vsel %vm18795_vm1, %v18702_v47, %v6958_v2 }
 0x695   :  { %v7026_v41 = vor.u32 1.1754944e-38, %v7025_v32  ;;  %vm7024_vm3 = vcmp.eq.f32.partialorder %v7023_v11, 8.507059e+37  ;;  %v7075_v53 = vmul.f32 %v18777_v38, %v18738_v62  ;;  %v18811_v22 = vadd.f32 1.0, %v10936_v19  ;;  %v20362_v19 = vld [vmem:[#allocation21_spill] sm:$0xff] }
 0x696   :  { %v5333_v39 = vpop.f32.mrf.mxu2  ;;  %v18806_v14 = vadd.f32 %v18625_v61, %v5326_v56  ;;  %vm6964_vm4 = vcmp.eq.f32.partialorder %v6963_v46, 8.507059e+37  ;;  %v18813_v47 = vadd.f32 1.0, %v10938_v18  ;;  %v7137_v32 = vmul.f32 %v18765_v21, %v7136_v33 }
 0x697   :  { %v5422_v26 = vpop.f32.mrf.mxu3  ;;  %v5334_v1 = vadd.f32 %v5333_v39, %v5245_v35  ;;  %v20359_v39 = vld [vmem:[#allocation90_spill] sm:$0xff]  ;;  %v7027_v42 = vsel %vm7024_vm3, %v7026_v41, %v7022_v0  ;;  %v6967_v54 = vsel %vm6964_vm4, %v6966_v34, %v6962_v60  ;;  %10939 = vrcp.f32 %v18811_v22 }
 0x698   :  { %v18748_v36 = vpop.f32.mrf.mxu0  ;;  %v7940_v23 = vmul.f32 %v7027_v42, %v18581_v49  ;;  %v9608_v61 = vmul.f32 -1.442695, %v18806_v14  ;;  %v7936_v17 = vmul.f32 %v6967_v54, %v18378_v12  ;;  %v9604_v2 = vmul.f32 -1.442695, %v18603_v5  ;;  %v20363_v12 = vld [vmem:[#allocation22_spill] sm:$0xff] }
 0x699   :  { %v18750_v51 = vpop.f32.mrf.mxu1  ;;  %v18753_v50 = vadd.f32 %v5422_v26, %v5334_v1  ;;  %8364 = vmatmul.bf16.gmra.mxu0 %v20353_v48  ;;  %v20360_v26 = vld [vmem:[#allocation91_spill] sm:$0xff]  ;;  %v7076_v48 = vsub.f32 1.0, %v7075_v53  ;;  %v5153_v11 = vadd.f32 %v18673_v27, %v17985_v55  ;;  %10941 = vrcp.f32 %v18813_v47 }
 0x69a   :  { %8542 = vmatmul.bf16.gmra.mxu2 %v20354_v7  ;;  %8631 = vmatmul.bf16.gmra.mxu3 %v8028_v13  ;;  %v20361_v1 = vpack.c.bf16 %v20359_v39, %v20360_v26  ;;  %10943 = vpow2.f32 %v9608_v61  ;;  %v20364_v46 = vpack.c.bf16 %v20362_v19, %v20363_v12  ;;  %v8032_v0 = vpack.c.bf16 %v7940_v23, %v7936_v17  ;;  %v20371_v61 = vld [vmem:[#allocation93_spill] sm:$0xff] }
 0x69b   :  { %v7077_v24 = vmul.f32 %v18777_v38, %v7076_v48  ;;  %v7138_v27 = vadd.f32 %v18765_v21, %v7137_v32  ;;  %10945 = vpow2.f32 %v9604_v2  ;;  %v7085_v60 = vand.u32 2147483648, %v18738_v62  ;;  %v20370_v48 = vld [vmem:[#allocation92_spill] sm:$0xff] }
 0x69c   :  { %vm7259_vm13 = vweird.f32 %v18811_v22  ;;  %v7263_v58 = vand.u32 2147483647, %v18811_v22  ;;  %vm7199_vm15 = vweird.f32 %v18813_v47 }
 0x69d   :  { %v7078_v41 = vadd.f32 %v18777_v38, %v7077_v24 }
 0x69e   :  { %v18773_v59 = vpop.f32.mrf.mxu2  ;;  %vm7264_vm3 = vcmp.eq.f32.partialorder %v7263_v58, 8.507059e+37 }
 0x69f   :  { %v18775_v29 = vpop.f32.mrf.mxu3  ;;  %v7082_v62 = vsel %vm18870_vm10, %v18777_v38, %v7078_v41 }
 0x6a0   :  { %v5160_v63 = vpop.f32.mrf.mxu0 }
 0x6a1   :  { %v5249_v35 = vpop.f32.mrf.mxu1  ;;  %v5161_v30 = vadd.f32 %v5160_v63, %v17985_v55  ;;  %8453 = vmatmul.bf16.gmra.mxu1 %v20361_v1  ;;  %v5242_v63 = vadd.f32 %v18675_v37, %v5153_v11 }
 0x6a3   :  { %v5250_v28 = vadd.f32 %v5249_v35, %v5161_v30  ;;  %v18840_v35 = vpop.eup %10939  ;;  %v5331_v4 = vadd.f32 %v18698_v45, %v5242_v63  ;;  %v7142_v45 = vsel %vm18857_vm8, %v18765_v21, %v7138_v27  ;;  %v9612_v63 = vmul.f32 -1.442695, %v18678_v10 }
 0x6a4   :  { %v18852_v37 = vpop.eup %10941  ;;  %v7255_v26 = vmul.f32 %v18840_v35, %v18811_v22  ;;  %vm7260_vm11 = vweird.f32 %v18840_v35 }
 0x6a5   :  { %v10944_v39 = vpop.eup %10943  ;;  %v7195_v21 = vmul.f32 %v18852_v37, %v18813_v47  ;;  %v18881_v23 = vadd.f32 %v18700_v6, %v5331_v4  ;;  %vm7200_vm12 = vweird.f32 %v18852_v37  ;;  %vm18932_vm14 = vmor %vm7259_vm13, %vm7260_vm11 }
 0x6a6   :  { %v5338_v13 = vpop.f32.mrf.mxu2  ;;  %v10946_v54 = vpop.eup %10945  ;;  %v18886_v17 = vadd.f32 1.0, %v10944_v39  ;;  %v7256_v2 = vsub.f32 1.0, %v7255_v26  ;;  %vm7201_vm1 = vmor %vm7199_vm15, %vm7200_vm12 }
 0x6a7   :  { %v5427_v7 = vpop.f32.mrf.mxu3  ;;  %v5339_v31 = vadd.f32 %v5338_v13, %v5250_v28  ;;  %v7146_v28 = vor.u32 1.1754944e-38, %v7145_v40  ;;  %v20372_v13 = vpack.c.bf16 %v20370_v48, %v20371_v61  ;;  %v18888_v38 = vadd.f32 1.0, %v10946_v54 }
 0x6a8   :  { %v18823_v56 = vpop.f32.mrf.mxu0  ;;  %v7196_v19 = vsub.f32 1.0, %v7195_v21  ;;  %v9616_v6 = vmul.f32 -1.442695, %v18881_v23  ;;  %10947 = vrcp.f32 %v18886_v17  ;;  %v7257_v27 = vmul.f32 %v18840_v35, %v7256_v2 }
 0x6a9   :  { %v18825_v49 = vpop.f32.mrf.mxu1  ;;  %v18828_v15 = vadd.f32 %v5427_v7, %v5339_v31  ;;  %8369 = vmatmul.bf16.gmra.mxu0 %v20364_v46  ;;  %v7086_v7 = vor.u32 1.1754944e-38, %v7085_v60  ;;  %v7147_v31 = vsel %vm7144_vm0, %v7146_v28, %v7142_v45  ;;  %v5158_v40 = vadd.f32 %v18748_v36, %v17985_v55  ;;  %v20373_v60 = vld [vmem:[#allocation20_spill] sm:$0xff] }
 0x6aa   :  { %8547 = vmatmul.bf16.gmra.mxu2 %v20365_v44  ;;  %8636 = vmatmul.bf16.gmra.mxu3 %v8032_v0  ;;  %v7948_v24 = vmul.f32 %v7147_v31, %v18656_v43  ;;  %10949 = vrcp.f32 %v18888_v38  ;;  %v7197_v4 = vmul.f32 %v18852_v37, %v7196_v19  ;;  %v7258_v36 = vadd.f32 %v18840_v35, %v7257_v27 }
 0x6ab   :  { %v7087_v11 = vsel %vm7084_vm2, %v7086_v7, %v7082_v62  ;;  %10951 = vpow2.f32 %v9616_v6  ;;  %v5247_v45 = vadd.f32 %v18750_v51, %v5158_v40  ;;  %v7203_v62 = vand.u32 2147483647, %v18813_v47 }
 0x6ac   :  { %v7944_v44 = vmul.f32 %v7087_v11, %v18453_v8  ;;  %v20374_v8 = vld [vmem:[#allocation23_spill] sm:$0xff]  ;;  %10953 = vpow2.f32 %v9612_v63  ;;  %v7262_v21 = vsel %vm18932_vm14, %v18840_v35, %v7258_v36  ;;  %v20379_v11 = vld [vmem:[#allocation94_spill] sm:$0xff]  ;;  %v5163_v36 = vadd.f32 %v18823_v56, %v17985_v55 }
 0x6ad   :  { %v20375_v53 = vpack.c.bf16 %v20373_v60, %v20374_v8  ;;  %v5336_v57 = vadd.f32 %v18773_v59, %v5247_v45  ;;  %vm7204_vm4 = vcmp.eq.f32.partialorder %v7203_v62, 8.507059e+37  ;;  %vm7379_vm7 = vweird.f32 %v18886_v17 }
 0x6ae   :  { %v18848_v30 = vpop.f32.mrf.mxu2  ;;  %v8036_v39 = vpack.c.bf16 %v7948_v24, %v7944_v44  ;;  %v18915_v26 = vpop.eup %10947  ;;  %v20380_v24 = vld [vmem:[#allocation95_spill] sm:$0xff]  ;;  %v5252_v62 = vadd.f32 %v18825_v49, %v5163_v36  ;;  %v7325_v49 = vand.u32 2147483648, %v18888_v38  ;;  %vm7319_vm9 = vweird.f32 %v18888_v38 }
 0x6af   :  { %v18850_v18 = vpop.f32.mrf.mxu3  ;;  %v7375_v48 = vmul.f32 %v18915_v26, %v18886_v17  ;;  %v18955_v35 = vadd.f32 %v18775_v29, %v5336_v57  ;;  %v20381_v19 = vpack.c.bf16 %v20379_v11, %v20380_v24  ;;  %v20382_v57 = vld [vmem:[#allocation25_spill] sm:$0xff]  ;;  %vm7380_vm5 = vweird.f32 %v18915_v26 }
 0x6b0   :  { %v5165_v1 = vpop.f32.mrf.mxu0  ;;  %v18927_v51 = vpop.eup %10949  ;;  %vm18997_vm8 = vmor %vm7379_vm7, %vm7380_vm5 }
 0x6b1   :  { %v5254_v34 = vpop.f32.mrf.mxu1  ;;  %v5166_v33 = vadd.f32 %v5165_v1, %v17985_v55  ;;  %8458 = vmatmul.bf16.gmra.mxu1 %v20372_v13  ;;  %v7265_v1 = vand.u32 2147483648, %v18811_v22  ;;  %v18939_v22 = vld [vmem:[%s19274_s6] ss:$0 sm:$0xff]  ;;  %v10952_v59 = vpop.eup %10951  ;;  %v9624_v29 = vmul.f32 -1.442695, %v18955_v35  ;;  %vm7320_vm6 = vweird.f32 %v18927_v51 }
 0x6b2   :  { %vm19010_vm10 = vmor %vm7319_vm9, %vm7320_vm6 }
 0x6b3   :  { %v5255_v32 = vadd.f32 %v5254_v34, %v5166_v33  ;;  %v7198_v34 = vadd.f32 %v18852_v37, %v7197_v4  ;;  %v7205_v33 = vand.u32 2147483648, %v18813_v47  ;;  %v7266_v7 = vor.u32 1.1754944e-38, %v7265_v1 }
 0x6b4   :  { %v7315_v47 = vmul.f32 %v18927_v51, %v18888_v38 }
 0x6b5   :  { %v7202_v2 = vsel %vm7201_vm1, %v18852_v37, %v7198_v34  ;;  %v7206_v6 = vor.u32 1.1754944e-38, %v7205_v33  ;;  %v20383_v33 = vld [vmem:[#allocation26_spill] sm:$0xff] }
 0x6b6   :  { %v5343_v12 = vpop.f32.mrf.mxu2  ;;  %v7316_v40 = vsub.f32 1.0, %v7315_v47 }
 0x6b7   :  { %v5432_v46 = vpop.f32.mrf.mxu3  ;;  %v5344_v0 = vadd.f32 %v5343_v12, %v5255_v32  ;;  %v10954_v32 = vpop.eup %10953  ;;  %v7267_v12 = vsel %vm7264_vm3, %v7266_v7, %v7262_v21  ;;  %v7207_v44 = vsel %vm7204_vm4, %v7206_v6, %v7202_v2 }
 0x6b8   :  { %v18898_v41 = vpop.f32.mrf.mxu0  ;;  %v18962_v27 = vadd.f32 1.0, %v10954_v32  ;;  %v7956_v63 = vmul.f32 %v7267_v12, %v18731_v9  ;;  %v7317_v58 = vmul.f32 %v18927_v51, %v7316_v40 }
 0x6b9   :  { %v18900_v43 = vpop.f32.mrf.mxu1  ;;  %v18903_v20 = vadd.f32 %v5432_v46, %v5344_v0  ;;  %8374 = vmatmul.bf16.gmra.mxu0 %v20375_v53  ;;  %v18960_v46 = vadd.f32 1.0, %v10952_v59  ;;  %v7376_v0 = vsub.f32 1.0, %v7375_v48  ;;  %v7952_v53 = vmul.f32 %v7207_v44, %v18528_v16 }
 0x6ba   :  { %8552 = vmatmul.bf16.gmra.mxu2 %v20376_v52  ;;  %8641 = vmatmul.bf16.gmra.mxu3 %v8036_v39  ;;  %v9620_v52 = vmul.f32 -1.442695, %v18753_v50  ;;  %v20384_v16 = vpack.c.bf16 %v20382_v57, %v20383_v33  ;;  %v20385_v59 = vpack.c.bf16 %v17839_v25, %v17842_v3  ;;  %v7385_v48 = vand.u32 2147483648, %v18886_v17 }
 0x6bb   :  { %10955 = vrcp.f32 %v18960_v46  ;;  %v7377_v39 = vmul.f32 %v18915_v26, %v7376_v0  ;;  %v8040_v54 = vpack.c.bf16 %v7956_v63, %v7952_v53  ;;  %v7383_v25 = vand.u32 2147483647, %v18886_v17 }
 0x6bc   :  { %10957 = vrcp.f32 %v18962_v27  ;;  %v5341_v3 = vadd.f32 %v18848_v30, %v5252_v62  ;;  %v7323_v17 = vand.u32 2147483647, %v18888_v38  ;;  %v7386_v0 = vor.u32 1.1754944e-38, %v7385_v48 }
 0x6bd   :  { %10959 = vpow2.f32 %v9624_v29  ;;  %v7378_v56 = vadd.f32 %v18915_v26, %v7377_v39  ;;  %vm7384_vm0 = vcmp.eq.f32.partialorder %v7383_v25, 8.507059e+37  ;;  %v20390_v29 = vld [vmem:[#allocation96_spill] sm:$0xff]  ;;  %v20394_v25 = vld [vmem:[#allocation27_spill] sm:$0xff]  ;;  %vm7499_vm13 = vweird.f32 %v18960_v46 }
 0x6be   :  { %v18923_v42 = vpop.f32.mrf.mxu2  ;;  %10961 = vpow2.f32 %v9620_v52  ;;  %v19021_v40 = vadd.f32 %v18850_v18, %v5341_v3  ;;  %vm7324_vm2 = vcmp.eq.f32.partialorder %v7323_v17, 8.507059e+37  ;;  %vm7439_vm15 = vweird.f32 %v18962_v27 }
 0x6bf   :  { %v18925_v28 = vpop.f32.mrf.mxu3  ;;  %v7382_v30 = vsel %vm18997_vm8, %v18915_v26, %v7378_v56 }
 0x6c0   :  { %v8330_v61 = vpop.f32.mrf.mxu0  ;;  %v7387_v53 = vsel %vm7384_vm0, %v7386_v0, %v7382_v30  ;;  %v9632_v18 = vmul.f32 -1.442695, %v19021_v40  ;;  %v7503_v30 = vand.u32 2147483647, %v18960_v46 }
 0x6c1   :  { %v8419_v13 = vpop.f32.mrf.mxu1  ;;  %v8331_v31 = vadd.f32 %v18939_v22, %v8330_v61  ;;  %8463 = vmatmul.bf16.gmra.mxu1 %v20381_v19  ;;  %v18984_v21 = vpop.eup %10955 }
 0x6c2   :  { %v18992_v32 = vpop.eup %10957  ;;  %v7495_v24 = vmul.f32 %v18984_v21, %v18960_v46  ;;  %vm7500_vm11 = vweird.f32 %v18984_v21  ;;  %vm7504_vm3 = vcmp.eq.f32.partialorder %v7503_v30, 8.507059e+37 }
 0x6c3   :  { %v8420_v37 = vadd.f32 %v8419_v13, %v8331_v31  ;;  %v7318_v13 = vadd.f32 %v18927_v51, %v7317_v58  ;;  %v10960_v11 = vpop.eup %10959  ;;  %v7435_v63 = vmul.f32 %v18992_v32, %v18962_v27  ;;  %vm7440_vm12 = vweird.f32 %v18992_v32  ;;  %vm19063_vm14 = vmor %vm7499_vm13, %vm7500_vm11 }
 0x6c4   :  { %v10962_v38 = vpop.eup %10961  ;;  %v19026_v39 = vadd.f32 1.0, %v10960_v11  ;;  %v7496_v52 = vsub.f32 1.0, %v7495_v24  ;;  %vm19076_vm1 = vmor %vm7439_vm15, %vm7440_vm12 }
 0x6c5   :  { %v7322_v26 = vsel %vm19010_vm10, %v18927_v51, %v7318_v13  ;;  %v19028_v51 = vadd.f32 1.0, %v10962_v38  ;;  %v20393_v13 = vld [vmem:[#allocation24_spill] sm:$0xff] }
 0x6c6   :  { %v8508_v4 = vpop.f32.mrf.mxu2  ;;  %10963 = vrcp.f32 %v19026_v39  ;;  %v7625_v30 = vand.u32 2147483648, %v19026_v39  ;;  %vm7619_vm7 = vweird.f32 %v19026_v39 }
 0x6c7   :  { %v8597_v60 = vpop.f32.mrf.mxu3  ;;  %v8509_v8 = vadd.f32 %v8508_v4, %v8420_v37  ;;  %v20391_v4 = vld [vmem:[#allocation97_spill] sm:$0xff]  ;;  %10965 = vrcp.f32 %v19028_v51  ;;  %vm7559_vm9 = vweird.f32 %v19028_v51 }
 0x6c8   :  { %v8332_v45 = vpop.f32.mrf.mxu0  ;;  %10967 = vpow2.f32 %v9632_v18 }
 0x6c9   :  { %v8421_v1 = vpop.f32.mrf.mxu1  ;;  %v8598_v9 = vadd.f32 %v8597_v60, %v8509_v8  ;;  %v8333_v34 = vadd.f32 %v18939_v22, %v8332_v45  ;;  %8379 = vmatmul.bf16.gmra.mxu0 %v20384_v16  ;;  %v20392_v60 = vpack.c.bf16 %v20390_v29, %v20391_v4  ;;  %v7326_v8 = vor.u32 1.1754944e-38, %v7325_v49 }
 0x6ca   :  { %8557 = vmatmul.bf16.gmra.mxu2 %v20385_v59  ;;  %8646 = vmatmul.bf16.gmra.mxu3 %v8040_v54  ;;  %v7497_v16 = vmul.f32 %v18984_v21, %v7496_v52  ;;  %v9628_v54 = vmul.f32 -1.442695, %v18828_v15  ;;  %v5168_v59 = vadd.f32 %v18898_v41, %v17985_v55 }
 0x6cb   :  { %8677 = vst [vmem:[#allocation7] sm:$0xff] %v8598_v9  ;;  %v8422_v61 = vadd.f32 %v8421_v1, %v8333_v34  ;;  %v7327_v36 = vsel %vm7324_vm2, %v7326_v8, %v7322_v26  ;;  %v7964_v1 = vmul.f32 %v7387_v53, %v18806_v14  ;;  %v7436_v9 = vsub.f32 1.0, %v7435_v63 }
 0x6cc   :  { %v7960_v33 = vmul.f32 %v7327_v36, %v18603_v5  ;;  %v20395_v5 = vpack.c.bf16 %v20393_v13, %v20394_v25  ;;  %v7498_v55 = vadd.f32 %v18984_v21, %v7497_v16  ;;  %10969 = vpow2.f32 %v9628_v54  ;;  %v19050_v2 = vpop.eup %10963  ;;  %v20403_v36 = vld [vmem:[#allocation98_spill] sm:$0xff] }
 0x6cd   :  { %v5257_v41 = vadd.f32 %v18900_v43, %v5168_v59  ;;  %v19058_v12 = vpop.eup %10965  ;;  %v7445_v43 = vand.u32 2147483648, %v18962_v27  ;;  %v7615_v38 = vmul.f32 %v19050_v2, %v19026_v39  ;;  %vm7620_vm5 = vweird.f32 %v19050_v2 }
 0x6ce   :  { %v8510_v7 = vpop.f32.mrf.mxu2  ;;  %v8044_v3 = vpack.c.bf16 %v7964_v1, %v7960_v33  ;;  %v7555_v53 = vmul.f32 %v19058_v12, %v19028_v51  ;;  %vm7560_vm6 = vweird.f32 %v19058_v12  ;;  %vm19123_vm8 = vmor %vm7619_vm7, %vm7620_vm5 }
 0x6cf   :  { %v8599_v31 = vpop.f32.mrf.mxu3  ;;  %v8511_v47 = vadd.f32 %v8510_v7, %v8422_v61  ;;  %v7437_v61 = vmul.f32 %v18992_v32, %v7436_v9  ;;  %v20396_v7 = vld [vmem:[#allocation35_spill] sm:$0xff]  ;;  %v5346_v24 = vadd.f32 %v18923_v42, %v5257_v41  ;;  %v7502_v42 = vsel %vm19063_vm14, %v18984_v21, %v7498_v55  ;;  %v20410_v41 = vld [vmem:[#allocation37_spill] sm:$0xff]  ;;  %vm19136_vm10 = vmor %vm7559_vm9, %vm7560_vm6 }
 0x6d0   :  { %v8335_v19 = vpop.f32.mrf.mxu0  ;;  %v7446_v9 = vor.u32 1.1754944e-38, %v7445_v43  ;;  %v7556_v54 = vsub.f32 1.0, %v7555_v53 }
 0x6d1   :  { %v8424_v6 = vpop.f32.mrf.mxu1  ;;  %v8600_v44 = vadd.f32 %v8599_v31, %v8511_v47  ;;  %v8336_v37 = vadd.f32 %v18939_v22, %v8335_v19  ;;  %8468 = vmatmul.bf16.gmra.mxu1 %v20392_v60  ;;  %v20397_v31 = vld [vmem:[#allocation33_spill] sm:$0xff]  ;;  %v7505_v47 = vand.u32 2147483648, %v18960_v46  ;;  %v7438_v17 = vadd.f32 %v18992_v32, %v7437_v61 }
 0x6d2   :  { %v20398_v49 = vpack.c.bf16 %v20396_v7, %v20397_v31  ;;  %v7443_v46 = vand.u32 2147483647, %v18962_v27  ;;  %v19087_v52 = vadd.f32 %v18925_v28, %v5346_v24  ;;  %v9636_v61 = vmul.f32 -1.442695, %v18903_v20  ;;  %v20406_v7 = vld [vmem:[#allocation29_spill] sm:$0xff]  ;;  %v20407_v31 = vld [vmem:[#allocation30_spill] sm:$0xff] }
 0x6d3   :  { %8678 = vst [vmem:[#allocation7 + $0x8] sm:$0xff] %v8600_v44  ;;  %v8425_v45 = vadd.f32 %v8424_v6, %v8336_v37  ;;  %v10968_v37 = vpop.eup %10967  ;;  %v7506_v4 = vor.u32 1.1754944e-38, %v7505_v47  ;;  %v7442_v21 = vsel %vm19076_vm1, %v18992_v32, %v7438_v17 }
 0x6d4   :  { %v10970_v27 = vpop.eup %10969  ;;  %vm7444_vm4 = vcmp.eq.f32.partialorder %v7443_v46, 8.507059e+37  ;;  %v9640_v28 = vmul.f32 -1.442695, %v19087_v52 }
 0x6d5   :  { %v7507_v18 = vsel %vm7504_vm3, %v7506_v4, %v7502_v42  ;;  %v19094_v32 = vadd.f32 1.0, %v10970_v27 }
 0x6d6   :  { %v8513_v34 = vpop.f32.mrf.mxu2  ;;  %v7972_v16 = vmul.f32 %v7507_v18, %v18881_v23 }
 0x6d7   :  { %v8602_v58 = vpop.f32.mrf.mxu3  ;;  %v8514_v57 = vadd.f32 %v8513_v34, %v8425_v45  ;;  %v20404_v45 = vld [vmem:[#allocation99_spill] sm:$0xff]  ;;  %v19092_v34 = vadd.f32 1.0, %v10968_v37  ;;  %v7565_v37 = vand.u32 2147483648, %v19028_v51  ;;  %vm7679_vm15 = vweird.f32 %v19094_v32 }
 0x6d8   :  { %v8337_v56 = vpop.f32.mrf.mxu0  ;;  %v20405_v1 = vpack.c.bf16 %v20403_v36, %v20404_v45  ;;  %v20416_v36 = vld [vmem:[#allocation45_spill] sm:$0xff]  ;;  %v20417_v45 = vld [vmem:[#allocation47_spill] sm:$0xff] }
 0x6d9   :  { %v8426_v62 = vpop.f32.mrf.mxu1  ;;  %v8603_v14 = vadd.f32 %v8602_v58, %v8514_v57  ;;  %v8338_v48 = vadd.f32 %v18939_v22, %v8337_v56  ;;  %8384 = vmatmul.bf16.gmra.mxu0 %v20395_v5  ;;  %v7616_v58 = vsub.f32 1.0, %v7615_v38  ;;  %v7447_v57 = vsel %vm7444_vm4, %v7446_v9, %v7442_v21 }
 0x6da   :  { %8562 = vmatmul.bf16.gmra.mxu2 %v20398_v49  ;;  %8651 = vmatmul.bf16.gmra.mxu3 %v8044_v3  ;;  %10971 = vrcp.f32 %v19092_v34  ;;  %v7557_v3 = vmul.f32 %v19058_v12, %v7556_v54  ;;  %v20408_v49 = vpack.c.bf16 %v20406_v7, %v20407_v31  ;;  %v7566_v9 = vor.u32 1.1754944e-38, %v7565_v37  ;;  %v20439_v37 = vld [vmem:[#allocation103_spill] sm:$0xff] }
 0x6db   :  { %8679 = vst [vmem:[#allocation7 + $0x10] sm:$0xff] %v8603_v14  ;;  %v8427_v11 = vadd.f32 %v8426_v62, %v8338_v48  ;;  %v7968_v14 = vmul.f32 %v7447_v57, %v18678_v10  ;;  %v7617_v48 = vmul.f32 %v19050_v2, %v7616_v58  ;;  %10973 = vrcp.f32 %v19094_v32  ;;  %v20409_v10 = vld [vmem:[#allocation39_spill] sm:$0xff] }
 0x6dc   :  { %10975 = vpow2.f32 %v9640_v28  ;;  %v20411_v47 = vpack.c.bf16 %v20409_v10, %v20410_v41  ;;  %vm7739_vm13 = vweird.f32 %v19092_v34 }
 0x6dd   :  { %v8048_v55 = vpack.c.bf16 %v7972_v16, %v7968_v14  ;;  %10977 = vpow2.f32 %v9636_v61 }
 0x6de   :  { %v8515_v19 = vpop.f32.mrf.mxu2 }
 0x6df   :  { %v8604_v6 = vpop.f32.mrf.mxu3  ;;  %v8516_v44 = vadd.f32 %v8515_v19, %v8427_v11  ;;  %v7618_v11 = vadd.f32 %v19050_v2, %v7617_v48  ;;  %v7558_v19 = vadd.f32 %v19058_v12, %v7557_v3  ;;  %v20420_v3 = vld [vmem:[#allocation32_spill] sm:$0xff] }
 0x6e0   :  { %v8340_v26 = vpop.f32.mrf.mxu0  ;;  %v19113_v17 = vpop.eup %10971 }
 0x6e1   :  { %v8429_v63 = vpop.f32.mrf.mxu1  ;;  %v8605_v60 = vadd.f32 %v8604_v6, %v8516_v44  ;;  %v8341_v8 = vadd.f32 %v18939_v22, %v8340_v26  ;;  %8473 = vmatmul.bf16.gmra.mxu1 %v20405_v1  ;;  %v7623_v6 = vand.u32 2147483647, %v19026_v39  ;;  %v19120_v44 = vpop.eup %10973  ;;  %v7563_v26 = vand.u32 2147483647, %v19028_v51 }
 0x6e2   :  { %v10976_v38 = vpop.eup %10975  ;;  %v7622_v39 = vsel %vm19123_vm8, %v19050_v2, %v7618_v11  ;;  %v7562_v2 = vsel %vm19136_vm10, %v19058_v12, %v7558_v19  ;;  %v7675_v53 = vmul.f32 %v19120_v44, %v19094_v32  ;;  %v20418_v1 = vpack.c.bf16 %v20416_v36, %v20417_v45 }
 0x6e3   :  { %8680 = vst [vmem:[#allocation7 + $0x18] sm:$0xff] %v8605_v60  ;;  %v8430_v33 = vadd.f32 %v8429_v63, %v8341_v8  ;;  %v7735_v63 = vmul.f32 %v19113_v17, %v19092_v34  ;;  %v7626_v8 = vor.u32 1.1754944e-38, %v7625_v30  ;;  %v10978_v51 = vpop.eup %10977  ;;  %vm7624_vm0 = vcmp.eq.f32.partialorder %v7623_v6, 8.507059e+37 }
 0x6e4   :  { %v19149_v58 = vadd.f32 1.0, %v10976_v38  ;;  %vm7564_vm2 = vcmp.eq.f32.partialorder %v7563_v26, 8.507059e+37  ;;  %v19151_v16 = vadd.f32 1.0, %v10978_v51  ;;  %v7676_v28 = vsub.f32 1.0, %v7675_v53 }
 0x6e5   :  { %v7627_v18 = vsel %vm7624_vm0, %v7626_v8, %v7622_v39  ;;  %v7736_v57 = vsub.f32 1.0, %v7735_v63  ;;  %vm7740_vm11 = vweird.f32 %v19113_v17  ;;  %vm7680_vm12 = vweird.f32 %v19120_v44  ;;  %v20427_v8 = vld [vmem:[#allocation100_spill] sm:$0xff] }
 0x6e6   :  { %v8518_v59 = vpop.f32.mrf.mxu2  ;;  %v7980_v12 = vmul.f32 %v7627_v18, %v18955_v35  ;;  %10979 = vrcp.f32 %v19149_v58  ;;  %v20419_v35 = vld [vmem:[#allocation28_spill] sm:$0xff]  ;;  %vm19178_vm14 = vmor %vm7739_vm13, %vm7740_vm11  ;;  %vm7859_vm7 = vweird.f32 %v19149_v58  ;;  %vm7799_vm9 = vweird.f32 %v19151_v16 }
 0x6e7   :  { %v8607_v56 = vpop.f32.mrf.mxu3  ;;  %v8519_v62 = vadd.f32 %v8518_v59, %v8430_v33  ;;  %v7567_v33 = vsel %vm7564_vm2, %v7566_v9, %v7562_v2  ;;  %v7737_v48 = vmul.f32 %v19113_v17, %v7736_v57  ;;  %10981 = vrcp.f32 %v19151_v16  ;;  %vm7681_vm1 = vmor %vm7679_vm15, %vm7680_vm12 }
 0x6e8   :  { %v8342_v13 = vpop.f32.mrf.mxu0  ;;  %v7976_v14 = vmul.f32 %v7567_v33, %v18753_v50  ;;  %v20421_v7 = vpack.c.bf16 %v20419_v35, %v20420_v3  ;;  %v7863_v3 = vand.u32 2147483647, %v19149_v58 }
 0x6e9   :  { %v8431_v25 = vpop.f32.mrf.mxu1  ;;  %v8608_v5 = vadd.f32 %v8607_v56, %v8519_v62  ;;  %v8343_v23 = vadd.f32 %v18939_v22, %v8342_v13  ;;  %8389 = vmatmul.bf16.gmra.mxu0 %v20408_v49  ;;  %v20422_v49 = vld [vmem:[#allocation40_spill] sm:$0xff]  ;;  %v7738_v10 = vadd.f32 %v19113_v17, %v7737_v48 }
 0x6ea   :  { %8567 = vmatmul.bf16.gmra.mxu2 %v20411_v47  ;;  %8656 = vmatmul.bf16.gmra.mxu3 %v8048_v55  ;;  %v8052_v31 = vpack.c.bf16 %v7980_v12, %v7976_v14  ;;  %v20423_v55 = vld [vmem:[#allocation36_spill] sm:$0xff]  ;;  %v7745_v47 = vand.u32 2147483648, %v19092_v34  ;;  %v20431_v14 = vld [vmem:[#allocation75_spill] sm:$0xff]  ;;  %vm7864_vm0 = vcmp.eq.f32.partialorder %v7863_v3, 8.507059e+37 }
 0x6eb   :  { %8681 = vst [vmem:[#allocation7 + $0x20] sm:$0xff] %v8608_v5  ;;  %v8432_v24 = vadd.f32 %v8431_v25, %v8343_v23  ;;  %v7677_v23 = vmul.f32 %v19120_v44, %v7676_v28  ;;  %v20424_v50 = vpack.c.bf16 %v20422_v49, %v20423_v55  ;;  %v7742_v38 = vsel %vm19178_vm14, %v19113_v17, %v7738_v10  ;;  %v20428_v17 = vld [vmem:[#allocation101_spill] sm:$0xff] }
 0x6ec   :  { %v19168_v41 = vpop.eup %10979  ;;  %v7746_v63 = vor.u32 1.1754944e-38, %v7745_v47  ;;  %v7805_v49 = vand.u32 2147483648, %v19151_v16  ;;  %v7803_v10 = vand.u32 2147483647, %v19151_v16 }
 0x6ed   :  { %v7678_v30 = vadd.f32 %v19120_v44, %v7677_v23  ;;  %vm7860_vm5 = vweird.f32 %v19168_v41 }
 0x6ee   :  { %v8520_v43 = vpop.f32.mrf.mxu2  ;;  %vm19217_vm8 = vmor %vm7859_vm7, %vm7860_vm5  ;;  %vm7804_vm2 = vcmp.eq.f32.partialorder %v7803_v10, 8.507059e+37 }
 0x6ef   :  { %v8609_v0 = vpop.f32.mrf.mxu3  ;;  %v8521_v42 = vadd.f32 %v8520_v43, %v8432_v24  ;;  %v7743_v24 = vand.u32 2147483647, %v19092_v34  ;;  %v19175_v43 = vpop.eup %10981  ;;  %v7855_v34 = vmul.f32 %v19168_v41, %v19149_v58  ;;  %v7682_v60 = vsel %vm7681_vm1, %v19120_v44, %v7678_v30 }
 0x6f0   :  { %v8345_v29 = vpop.f32.mrf.mxu0  ;;  %vm7800_vm6 = vweird.f32 %v19175_v43 }
 0x6f1   :  { %v8434_v4 = vpop.f32.mrf.mxu1  ;;  %v8610_v27 = vadd.f32 %v8609_v0, %v8521_v42  ;;  %v8346_v21 = vadd.f32 %v18939_v22, %v8345_v29  ;;  %8478 = vmatmul.bf16.gmra.mxu1 %v20418_v1  ;;  %v7685_v0 = vand.u32 2147483648, %v19094_v32  ;;  %v7683_v42 = vand.u32 2147483647, %v19094_v32  ;;  %vm7801_vm10 = vmor %vm7799_vm9, %vm7800_vm6 }
 0x6f2   :  { %vm7744_vm3 = vcmp.eq.f32.partialorder %v7743_v24, 8.507059e+37  ;;  %v7795_v32 = vmul.f32 %v19175_v43, %v19151_v16  ;;  %v7856_v2 = vsub.f32 1.0, %v7855_v34 }
 0x6f3   :  { %8682 = vst [vmem:[#allocation7 + $0x28] sm:$0xff] %v8610_v27  ;;  %v8435_v54 = vadd.f32 %v8434_v4, %v8346_v21  ;;  %v20429_v27 = vpack.c.bf16 %v20427_v8, %v20428_v17  ;;  %v7686_v21 = vor.u32 1.1754944e-38, %v7685_v0  ;;  %v7747_v51 = vsel %vm7744_vm3, %v7746_v63, %v7742_v38  ;;  %v20438_v0 = vld [vmem:[#allocation102_spill] sm:$0xff]  ;;  %v20441_v8 = vld [vmem:[#allocation76_spill] sm:$0xff]  ;;  %v20442_v17 = vld [vmem:[#allocation77_spill] sm:$0xff] }
 0x6f4   :  { %vm7684_vm4 = vcmp.eq.f32.partialorder %v7683_v42, 8.507059e+37  ;;  %v7988_v45 = vmul.f32 %v7747_v51, %v19021_v40  ;;  %v7796_v1 = vsub.f32 1.0, %v7795_v32  ;;  %v7857_v33 = vmul.f32 %v19168_v41, %v7856_v2  ;;  %v20444_v51 = vld [vmem:[#allocation44_spill] sm:$0xff]  ;;  %v20445_v2 = vld [vmem:[#allocation42_spill] sm:$0xff] }
 0x6f5   :  { %v7687_v53 = vsel %vm7684_vm4, %v7686_v21, %v7682_v60  ;;  %v7806_v42 = vor.u32 1.1754944e-38, %v7805_v49 }
 0x6f6   :  { %v8523_v59 = vpop.f32.mrf.mxu2  ;;  %v7984_v57 = vmul.f32 %v7687_v53, %v18828_v15  ;;  %v7858_v15 = vadd.f32 %v19168_v41, %v7857_v33  ;;  %v20446_v53 = vpack.c.bf16 %v20444_v51, %v20445_v2  ;;  %v20448_v33 = vld [vmem:[#allocation104_spill] sm:$0xff] }
 0x6f7   :  { %v8612_v56 = vpop.f32.mrf.mxu3  ;;  %v8524_v62 = vadd.f32 %v8523_v59, %v8435_v54 }
 0x6f8   :  { %v8347_v61 = vpop.f32.mrf.mxu0  ;;  %v8056_v40 = vpack.c.bf16 %v7988_v45, %v7984_v57  ;;  %v7862_v47 = vsel %vm19217_vm8, %v19168_v41, %v7858_v15  ;;  %v20447_v57 = vld [vmem:[#allocation55_spill] sm:$0xff] }
 0x6f9   :  { %v8436_v13 = vpop.f32.mrf.mxu1  ;;  %v8613_v25 = vadd.f32 %v8612_v56, %v8524_v62  ;;  %v8348_v5 = vadd.f32 %v18939_v22, %v8347_v61  ;;  %8394 = vmatmul.bf16.gmra.mxu0 %v20421_v7  ;;  %v7797_v56 = vmul.f32 %v19175_v43, %v7796_v1  ;;  %v20430_v62 = vld [vmem:[#allocation34_spill] sm:$0xff]  ;;  %v20433_v61 = vld [vmem:[#allocation31_spill] sm:$0xff] }
 0x6fa   :  { %8572 = vmatmul.bf16.gmra.mxu2 %v20424_v50  ;;  %8661 = vmatmul.bf16.gmra.mxu3 %v8052_v31  ;;  %v20432_v48 = vpack.c.bf16 %v20430_v62, %v20431_v14 }
 0x6fb   :  { %8683 = vst [vmem:[#allocation7 + $0x30] sm:$0xff] %v8613_v25  ;;  %v8437_v11 = vadd.f32 %v8436_v13, %v8348_v5  ;;  %v20434_v13 = vld [vmem:[#allocation43_spill] sm:$0xff]  ;;  %v7865_v5 = vand.u32 2147483648, %v19149_v58  ;;  %v7798_v35 = vadd.f32 %v19175_v43, %v7797_v56 }
 0x6fc   :  { %v20435_v25 = vpack.c.bf16 %v20433_v61, %v20434_v13 }
 0x6fd   :  { %v7866_v58 = vor.u32 1.1754944e-38, %v7865_v5 }
 0x6fe   :  { %v8525_v19 = vpop.f32.mrf.mxu2 }
 0x6ff   :  { %v8614_v6 = vpop.f32.mrf.mxu3  ;;  %v8526_v46 = vadd.f32 %v8525_v19, %v8437_v11  ;;  %v7867_v16 = vsel %vm7864_vm0, %v7866_v58, %v7862_v47 }
 0x700   :  { %v8350_v26 = vpop.f32.mrf.mxu0  ;;  %v7996_v34 = vmul.f32 %v7867_v16, %v19087_v52 }
 0x701   :  { %v8439_v39 = vpop.f32.mrf.mxu1  ;;  %v8615_v29 = vadd.f32 %v8614_v6, %v8526_v46  ;;  %v8351_v4 = vadd.f32 %v18939_v22, %v8350_v26  ;;  %8483 = vmatmul.bf16.gmra.mxu1 %v20429_v27  ;;  %v7802_v6 = vsel %vm7801_vm10, %v19175_v43, %v7798_v35  ;;  %v20440_v46 = vpack.c.bf16 %v20438_v0, %v20439_v37 }
 0x702   :  { %v7807_v38 = vsel %vm7804_vm2, %v7806_v42, %v7802_v6  ;;  %v20443_v27 = vpack.c.bf16 %v20441_v8, %v20442_v17 }
 0x703   :  { %8684 = vst [vmem:[#allocation7 + $0x38] sm:$0xff] %v8615_v29  ;;  %v8440_v36 = vadd.f32 %v8439_v39, %v8351_v4  ;;  %v7992_v29 = vmul.f32 %v7807_v38, %v18903_v20 }
 0x705   :  { %v8060_v21 = vpack.c.bf16 %v7996_v34, %v7992_v29 }
 0x706   :  { %v8528_v9 = vpop.f32.mrf.mxu2 }
 0x707   :  { %v8617_v44 = vpop.f32.mrf.mxu3  ;;  %v8529_v18 = vadd.f32 %v8528_v9, %v8440_v36 }
 0x708   :  { %v8352_v54 = vpop.f32.mrf.mxu0 }
 0x709   :  { %v8441_v12 = vpop.f32.mrf.mxu1  ;;  %v8618_v28 = vadd.f32 %v8617_v44, %v8529_v18  ;;  %v8353_v59 = vadd.f32 %v18939_v22, %v8352_v54  ;;  %8399 = vmatmul.bf16.gmra.mxu0 %v20432_v48  ;;  %v20449_v54 = vpack.c.bf16 %v20447_v57, %v20448_v33 }
 0x70a   :  { %8577 = vmatmul.bf16.gmra.mxu2 %v20435_v25  ;;  %8666 = vmatmul.bf16.gmra.mxu3 %v8056_v40 }
 0x70b   :  { %8685 = vst [vmem:[#allocation7 + $0x40] sm:$0xff] %v8618_v28  ;;  %v8442_v23 = vadd.f32 %v8441_v12, %v8353_v59 }
 0x70e   :  { %v8530_v7 = vpop.f32.mrf.mxu2 }
 0x70f   :  { %v8619_v31 = vpop.f32.mrf.mxu3  ;;  %v8531_v50 = vadd.f32 %v8530_v7, %v8442_v23 }
 0x710   :  { %v8355_v11 = vpop.f32.mrf.mxu0 }
 0x711   :  { %v8444_v30 = vpop.f32.mrf.mxu1  ;;  %v8620_v24 = vadd.f32 %v8619_v31, %v8531_v50  ;;  %v8356_v19 = vadd.f32 %v18939_v22, %v8355_v11  ;;  %8488 = vmatmul.bf16.gmra.mxu1 %v20440_v46 }
 0x713   :  { %8686 = vst [vmem:[#allocation7 + $0x48] sm:$0xff] %v8620_v24  ;;  %v8445_v41 = vadd.f32 %v8444_v30, %v8356_v19 }
 0x716   :  { %v8533_v26 = vpop.f32.mrf.mxu2 }
 0x717   :  { %v8622_v39 = vpop.f32.mrf.mxu3  ;;  %v8534_v63 = vadd.f32 %v8533_v26, %v8445_v41 }
 0x718   :  { %v8357_v4 = vpop.f32.mrf.mxu0 }
 0x719   :  { %v8446_v43 = vpop.f32.mrf.mxu1  ;;  %v8623_v60 = vadd.f32 %v8622_v39, %v8534_v63  ;;  %v8358_v32 = vadd.f32 %v18939_v22, %v8357_v4  ;;  %8404 = vmatmul.bf16.gmra.mxu0 %v20443_v27 }
 0x71a   :  { %8582 = vmatmul.bf16.gmra.mxu2 %v20446_v53  ;;  %8671 = vmatmul.bf16.gmra.mxu3 %v8060_v21 }
 0x71b   :  { %8687 = vst [vmem:[#allocation7 + $0x50] sm:$0xff] %v8623_v60  ;;  %v8447_v52 = vadd.f32 %v8446_v43, %v8358_v32 }
 0x71e   :  { %v8535_v36 = vpop.f32.mrf.mxu2 }
 0x71f   :  { %v8624_v45 = vpop.f32.mrf.mxu3  ;;  %v8536_v20 = vadd.f32 %v8535_v36, %v8447_v52 }
 0x720   :  { %v8360_v1 = vpop.f32.mrf.mxu0 }
 0x721   :  { %v8449_v9 = vpop.f32.mrf.mxu1  ;;  %v8625_v44 = vadd.f32 %v8624_v45, %v8536_v20  ;;  %v8361_v18 = vadd.f32 %v18939_v22, %v8360_v1  ;;  %8493 = vmatmul.bf16.gmra.mxu1 %v20449_v54 }
 0x723   :  { %8688 = vst [vmem:[#allocation7 + $0x58] sm:$0xff] %v8625_v44  ;;  %v8450_v12 = vadd.f32 %v8449_v9, %v8361_v18 }
 0x726   :  { %v8538_v28 = vpop.f32.mrf.mxu2 }
 0x727   :  { %v8627_v59 = vpop.f32.mrf.mxu3  ;;  %v8539_v56 = vadd.f32 %v8538_v28, %v8450_v12 }
 0x728   :  { %v8362_v62 = vpop.f32.mrf.mxu0 }
 0x729   :  { %v8451_v14 = vpop.f32.mrf.mxu1  ;;  %v8628_v48 = vadd.f32 %v8627_v59, %v8539_v56  ;;  %v8363_v40 = vadd.f32 %v18939_v22, %v8362_v62 }
 0x72b   :  { %8689 = vst [vmem:[#allocation7 + $0x60] sm:$0xff] %v8628_v48  ;;  %v8452_v61 = vadd.f32 %v8451_v14, %v8363_v40 }
 0x72e   :  { %v8540_v13 = vpop.f32.mrf.mxu2 }
 0x72f   :  { %v8629_v25 = vpop.f32.mrf.mxu3  ;;  %v8541_v15 = vadd.f32 %v8540_v13, %v8452_v61 }
 0x730   :  { %v8365_v5 = vpop.f32.mrf.mxu0 }
 0x731   :  { %v8454_v23 = vpop.f32.mrf.mxu1  ;;  %v8630_v35 = vadd.f32 %v8629_v25, %v8541_v15  ;;  %v8366_v3 = vadd.f32 %v18939_v22, %v8365_v5 }
 0x733   :  { %8690 = vst [vmem:[#allocation7 + $0x68] sm:$0xff] %v8630_v35  ;;  %v8455_v7 = vadd.f32 %v8454_v23, %v8366_v3 }
 0x736   :  { %v8543_v31 = vpop.f32.mrf.mxu2 }
 0x737   :  { %v8632_v49 = vpop.f32.mrf.mxu3  ;;  %v8544_v55 = vadd.f32 %v8543_v31, %v8455_v7 }
 0x738   :  { %v8367_v50 = vpop.f32.mrf.mxu0 }
 0x739   :  { %v8456_v10 = vpop.f32.mrf.mxu1  ;;  %v8633_v47 = vadd.f32 %v8632_v49, %v8544_v55  ;;  %v8368_v11 = vadd.f32 %v18939_v22, %v8367_v50 }
 0x73b   :  { %8691 = vst [vmem:[#allocation7 + $0x70] sm:$0xff] %v8633_v47  ;;  %v8457_v30 = vadd.f32 %v8456_v10, %v8368_v11 }
 0x73e   :  { %v8545_v58 = vpop.f32.mrf.mxu2 }
 0x73f   :  { %v8634_v24 = vpop.f32.mrf.mxu3  ;;  %v8546_v19 = vadd.f32 %v8545_v58, %v8457_v30 }
 0x740   :  { %v8370_v6 = vpop.f32.mrf.mxu0 }
 0x741   :  { %v8459_v0 = vpop.f32.mrf.mxu1  ;;  %v8635_v37 = vadd.f32 %v8634_v24, %v8546_v19  ;;  %v8371_v46 = vadd.f32 %v18939_v22, %v8370_v6 }
 0x743   :  { %8692 = vst [vmem:[#allocation7 + $0x78] sm:$0xff] %v8635_v37  ;;  %v8460_v42 = vadd.f32 %v8459_v0, %v8371_v46 }
 0x746   :  { %v8548_v16 = vpop.f32.mrf.mxu2 }
 0x747   :  { %v8637_v38 = vpop.f32.mrf.mxu3  ;;  %v8549_v41 = vadd.f32 %v8548_v16, %v8460_v42 }
 0x748   :  { %v8372_v34 = vpop.f32.mrf.mxu0 }
 0x749   :  { %v8461_v26 = vpop.f32.mrf.mxu1  ;;  %v8638_v39 = vadd.f32 %v8637_v38, %v8549_v41  ;;  %v8373_v63 = vadd.f32 %v18939_v22, %v8372_v34 }
 0x74b   :  { %8693 = vst [vmem:[#allocation7 + $0x80] sm:$0xff] %v8638_v39  ;;  %v8462_v29 = vadd.f32 %v8461_v26, %v8373_v63 }
 0x74e   :  { %v8550_v4 = vpop.f32.mrf.mxu2 }
 0x74f   :  { %v8639_v43 = vpop.f32.mrf.mxu3  ;;  %v8551_v60 = vadd.f32 %v8550_v4, %v8462_v29 }
 0x750   :  { %v8375_v32 = vpop.f32.mrf.mxu0 }
 0x751   :  { %v8464_v8 = vpop.f32.mrf.mxu1  ;;  %v8640_v17 = vadd.f32 %v8639_v43, %v8551_v60  ;;  %v8376_v27 = vadd.f32 %v18939_v22, %v8375_v32 }
 0x753   :  { %8694 = vst [vmem:[#allocation7 + $0x88] sm:$0xff] %v8640_v17  ;;  %v8465_v21 = vadd.f32 %v8464_v8, %v8376_v27 }
 0x756   :  { %v8553_v51 = vpop.f32.mrf.mxu2 }
 0x757   :  { %v8642_v2 = vpop.f32.mrf.mxu3  ;;  %v8554_v53 = vadd.f32 %v8553_v51, %v8465_v21 }
 0x758   :  { %v8377_v52 = vpop.f32.mrf.mxu0 }
 0x759   :  { %v8466_v36 = vpop.f32.mrf.mxu1  ;;  %v8643_v45 = vadd.f32 %v8642_v2, %v8554_v53  ;;  %v8378_v20 = vadd.f32 %v18939_v22, %v8377_v52 }
 0x75b   :  { %8695 = vst [vmem:[#allocation7 + $0x90] sm:$0xff] %v8643_v45  ;;  %v8467_v1 = vadd.f32 %v8466_v36, %v8378_v20 }
 0x75e   :  { %v8555_v9 = vpop.f32.mrf.mxu2 }
 0x75f   :  { %v8644_v44 = vpop.f32.mrf.mxu3  ;;  %v8556_v18 = vadd.f32 %v8555_v9, %v8467_v1 }
 0x760   :  { %v8380_v57 = vpop.f32.mrf.mxu0 }
 0x761   :  { %v8469_v33 = vpop.f32.mrf.mxu1  ;;  %v8645_v54 = vadd.f32 %v8644_v44, %v8556_v18  ;;  %v8381_v12 = vadd.f32 %v18939_v22, %v8380_v57 }
 0x763   :  { %8696 = vst [vmem:[#allocation7 + $0x98] sm:$0xff] %v8645_v54  ;;  %v8470_v28 = vadd.f32 %v8469_v33, %v8381_v12 }
 0x766   :  { %v8558_v59 = vpop.f32.mrf.mxu2 }
 0x767   :  { %v8647_v56 = vpop.f32.mrf.mxu3  ;;  %v8559_v62 = vadd.f32 %v8558_v59, %v8470_v28 }
 0x768   :  { %v8382_v14 = vpop.f32.mrf.mxu0 }
 0x769   :  { %v8471_v48 = vpop.f32.mrf.mxu1  ;;  %v8648_v40 = vadd.f32 %v8647_v56, %v8559_v62  ;;  %v8383_v61 = vadd.f32 %v18939_v22, %v8382_v14 }
 0x76b   :  { %8697 = vst [vmem:[#allocation7 + $0xa0] sm:$0xff] %v8648_v40  ;;  %v8472_v13 = vadd.f32 %v8471_v48, %v8383_v61 }
 0x76e   :  { %v8560_v25 = vpop.f32.mrf.mxu2 }
 0x76f   :  { %v8649_v15 = vpop.f32.mrf.mxu3  ;;  %v8561_v5 = vadd.f32 %v8560_v25, %v8472_v13 }
 0x770   :  { %v8385_v23 = vpop.f32.mrf.mxu0 }
 0x771   :  { %v8474_v35 = vpop.f32.mrf.mxu1  ;;  %v8650_v3 = vadd.f32 %v8649_v15, %v8561_v5  ;;  %v8386_v7 = vadd.f32 %v18939_v22, %v8385_v23 }
 0x773   :  { %8698 = vst [vmem:[#allocation7 + $0xa8] sm:$0xff] %v8650_v3  ;;  %v8475_v31 = vadd.f32 %v8474_v35, %v8386_v7 }
 0x776   :  { %v8563_v49 = vpop.f32.mrf.mxu2 }
 0x777   :  { %v8652_v55 = vpop.f32.mrf.mxu3  ;;  %v8564_v50 = vadd.f32 %v8563_v49, %v8475_v31 }
 0x778   :  { %v8387_v10 = vpop.f32.mrf.mxu0 }
 0x779   :  { %v8476_v47 = vpop.f32.mrf.mxu1  ;;  %v8653_v11 = vadd.f32 %v8652_v55, %v8564_v50  ;;  %v8388_v30 = vadd.f32 %v18939_v22, %v8387_v10 }
 0x77b   :  { %8699 = vst [vmem:[#allocation7 + $0xb0] sm:$0xff] %v8653_v11  ;;  %v8477_v58 = vadd.f32 %v8476_v47, %v8388_v30  ;;  %v10986_v30 = vld [vmem:[%s19274_s6] ss:$0 sm:$0xff] }
 0x77e   :  { %v8565_v24 = vpop.f32.mrf.mxu2 }
 0x77f   :  { %v8654_v19 = vpop.f32.mrf.mxu3  ;;  %v8566_v6 = vadd.f32 %v8565_v24, %v8477_v58 }
 0x780   :  { %v8390_v0 = vpop.f32.mrf.mxu0 }
 0x781   :  { %v8479_v37 = vpop.f32.mrf.mxu1  ;;  %v8655_v46 = vadd.f32 %v8654_v19, %v8566_v6  ;;  %v8391_v42 = vadd.f32 %v18939_v22, %v8390_v0 }
 0x783   :  { %8700 = vst [vmem:[#allocation7 + $0xb8] sm:$0xff] %v8655_v46  ;;  %v8480_v16 = vadd.f32 %v8479_v37, %v8391_v42 }
 0x786   :  { %v8568_v38 = vpop.f32.mrf.mxu2 }
 0x787   :  { %v8657_v41 = vpop.f32.mrf.mxu3  ;;  %v8569_v34 = vadd.f32 %v8568_v38, %v8480_v16 }
 0x788   :  { %v8392_v26 = vpop.f32.mrf.mxu0 }
 0x789   :  { %v8481_v39 = vpop.f32.mrf.mxu1  ;;  %v8658_v63 = vadd.f32 %v8657_v41, %v8569_v34  ;;  %v8393_v29 = vadd.f32 %v18939_v22, %v8392_v26 }
 0x78b   :  { %8701 = vst [vmem:[#allocation7 + $0xc0] sm:$0xff] %v8658_v63  ;;  %v8482_v4 = vadd.f32 %v8481_v39, %v8393_v29 }
 0x78e   :  { %v8570_v43 = vpop.f32.mrf.mxu2 }
 0x78f   :  { %v8659_v60 = vpop.f32.mrf.mxu3  ;;  %v8571_v32 = vadd.f32 %v8570_v43, %v8482_v4 }
 0x790   :  { %v8395_v8 = vpop.f32.mrf.mxu0 }
 0x791   :  { %v8484_v17 = vpop.f32.mrf.mxu1  ;;  %v8660_v27 = vadd.f32 %v8659_v60, %v8571_v32  ;;  %v8396_v21 = vadd.f32 %v18939_v22, %v8395_v8 }
 0x793   :  { %8702 = vst [vmem:[#allocation7 + $0xc8] sm:$0xff] %v8660_v27  ;;  %v8485_v51 = vadd.f32 %v8484_v17, %v8396_v21 }
 0x796   :  { %v8573_v2 = vpop.f32.mrf.mxu2 }
 0x797   :  { %v8662_v53 = vpop.f32.mrf.mxu3  ;;  %v8574_v52 = vadd.f32 %v8573_v2, %v8485_v51 }
 0x798   :  { %v8397_v36 = vpop.f32.mrf.mxu0 }
 0x799   :  { %v8486_v45 = vpop.f32.mrf.mxu1  ;;  %v8663_v20 = vadd.f32 %v8662_v53, %v8574_v52  ;;  %v8398_v1 = vadd.f32 %v18939_v22, %v8397_v36 }
 0x79b   :  { %8703 = vst [vmem:[#allocation7 + $0xd0] sm:$0xff] %v8663_v20  ;;  %v8487_v9 = vadd.f32 %v8486_v45, %v8398_v1 }
 0x79e   :  { %v8575_v44 = vpop.f32.mrf.mxu2 }
 0x79f   :  { %v8664_v18 = vpop.f32.mrf.mxu3  ;;  %v8576_v57 = vadd.f32 %v8575_v44, %v8487_v9 }
 0x7a0   :  { %v8400_v33 = vpop.f32.mrf.mxu0 }
 0x7a1   :  { %v8489_v54 = vpop.f32.mrf.mxu1  ;;  %v8665_v12 = vadd.f32 %v8664_v18, %v8576_v57  ;;  %v8401_v28 = vadd.f32 %v18939_v22, %v8400_v33 }
 0x7a3   :  { %8704 = vst [vmem:[#allocation7 + $0xd8] sm:$0xff] %v8665_v12  ;;  %v8490_v59 = vadd.f32 %v8489_v54, %v8401_v28 }
 0x7a6   :  { %v8578_v56 = vpop.f32.mrf.mxu2 }
 0x7a7   :  { %v8667_v62 = vpop.f32.mrf.mxu3  ;;  %v8579_v14 = vadd.f32 %v8578_v56, %v8490_v59 }
 0x7a8   :  { %v8402_v48 = vpop.f32.mrf.mxu0 }
 0x7a9   :  { %v8491_v40 = vpop.f32.mrf.mxu1  ;;  %v8668_v61 = vadd.f32 %v8667_v62, %v8579_v14  ;;  %v8403_v13 = vadd.f32 %v18939_v22, %v8402_v48 }
 0x7ab   :  { %8705 = vst [vmem:[#allocation7 + $0xe0] sm:$0xff] %v8668_v61  ;;  %v8492_v25 = vadd.f32 %v8491_v40, %v8403_v13 }
 0x7ae   :  { %v8580_v15 = vpop.f32.mrf.mxu2 }
 0x7af   :  { %v8669_v5 = vpop.f32.mrf.mxu3  ;;  %v8581_v23 = vadd.f32 %v8580_v15, %v8492_v25 }
 0x7b0   :  { %v8405_v35 = vpop.f32.mrf.mxu0 }
 0x7b1   :  { %v8670_v3 = vadd.f32 %v8669_v5, %v8581_v23  ;;  %v8406_v7 = vadd.f32 %v18939_v22, %v8405_v35  ;;  %v8494_v31 = vpop.f32.mrf.mxu1 }
 0x7b3   :  { %8706 = vst [vmem:[#allocation7 + $0xe8] sm:$0xff] %v8670_v3  ;;  %v8495_v49 = vadd.f32 %v8494_v31, %v8406_v7 }
 0x7b6   :  { %v8583_v55 = vpop.f32.mrf.mxu2 }
 0x7b7   :  { %v8672_v50 = vpop.f32.mrf.mxu3  ;;  %v8584_v10 = vadd.f32 %v8583_v55, %v8495_v49 }
 0x7b8   :  { %v8407_v47 = vpop.f32.mrf.mxu0 }
 0x7b9   :  { %v8673_v11 = vadd.f32 %v8672_v50, %v8584_v10  ;;  %v8408_v58 = vadd.f32 %v10986_v30, %v8407_v47  ;;  %v8496_v24 = vpop.f32.mrf.mxu1 }
 0x7bb   :  { %8707 = vst [vmem:[#allocation7 + $0xf0] sm:$0xff] %v8673_v11  ;;  %v8497_v19 = vadd.f32 %v8496_v24, %v8408_v58 }
 0x7be   :  { %v8585_v22 = vpop.f32.mrf.mxu2 }
 0x7bf   :  { %v8586_v6 = vadd.f32 %v8585_v22, %v8497_v19  ;;  %v8674_v0 = vpop.f32.mrf.mxu3 }
 0x7c1   :  { %v8675_v37 = vadd.f32 %v8674_v0, %v8586_v6 }
 0x7c3   :  { %8708 = vst [vmem:[#allocation7 + $0xf8] sm:$0xff] %v8675_v37 }
 0x7c4   :  { %8721 = dma.vmem_to_hbm [thread:$0]  %s8714_s21, 4096, %s8716_s23, [#allocation4], %s11072_s24, %s11072_s24, %s11073_s25  }
 0x7c5   :  { %11063 = dma.done.wait [#allocation4], 4096  }
 0x7c6   :  { %11064 = vsyncadd [#allocation4], 4294963200 }
 0x7c7   :  { %8726 = vsyncpa [#allocation3], 1 }
 0x7c8   :  { %8727 = vsyncpa [#allocation6], 1 }
 0x7c9   :  { %8728 = vsyncpa [#allocation4], 1 }

</bundles_post_ra>
